<compile_context>
chip_gen: v5e
topology: v5e:2x2
jax: 0.10.0
libtpu: 0.0.40
codegen_flags: <defaults>
</compile_context>

<pallas_src>
import functools

import jax
import jax.numpy as jnp
from jax.experimental import pallas as pl
from jax.experimental.pallas import tpu as pltpu


def _block_kernel(has_shortcut, B, H, W, Cin, Cout, *refs):
    if has_shortcut:
        (x_ref, bn0s_ref, bn0b_ref, w0_ref, bn1s_ref, bn1b_ref, w1_ref,
         ws_ref, o_ref, pad0_ref, pad1_ref) = refs
    else:
        (x_ref, bn0s_ref, bn0b_ref, w0_ref, bn1s_ref, bn1b_ref, w1_ref,
         o_ref, pad0_ref, pad1_ref) = refs
        ws_ref = None

    M = B * H * W
    f32, bf16 = jnp.float32, jnp.bfloat16
    Hp, Wp = H + 2, W + 2

    def zero_border(pad_ref, C):
        # Thin 1-pixel border; interior + border together cover the whole
        # scratch every grid step, so it never carries state across steps
        # (safe with a megacore-"parallel" batch axis).
        pad_ref[:, 0:1, :, :] = jnp.zeros((B, 1, Wp, C), bf16)
        pad_ref[:, Hp - 1:Hp, :, :] = jnp.zeros((B, 1, Wp, C), bf16)
        pad_ref[:, 1:Hp - 1, 0:1, :] = jnp.zeros((B, H, 1, C), bf16)
        pad_ref[:, 1:Hp - 1, Wp - 1:Wp, :] = jnp.zeros((B, H, 1, C), bf16)

    def conv3x3(pad_ref, w_ref, Cin_, Cout_):
        # 9 accumulated (M, Cin_) x (Cin_, Cout_) MXU matmuls over shifted
        # full (B,H,W,Cin_) windows of the padded activation scratch.
        acc = jnp.zeros((M, Cout_), f32)
        for dy in range(3):
            for dx in range(3):
                win = pad_ref[:, dy:dy + H, dx:dx + W, :]     # (B,H,W,Cin_) bf16
                acc = acc + jnp.dot(win.reshape(M, Cin_),
                                    w_ref[3 * dy + dx],        # (Cin_, Cout_)
                                    preferred_element_type=f32)
        return acc                                             # (M, Cout_) f32

    # --- BN0 (folded scale/shift) + ReLU in f32; bf16 into conv_0 scratch ---
    a0 = jnp.maximum(x_ref[...].astype(f32) * bn0s_ref[...] + bn0b_ref[...],
                     0.0)
    zero_border(pad0_ref, Cin)
    pad0_ref[:, 1:H + 1, 1:W + 1, :] = a0.astype(bf16)

    # --- conv_0 ---
    h0 = conv3x3(pad0_ref, w0_ref, Cin, Cout)                  # (M, Cout) f32

    # --- BN1 + ReLU fused straight into conv_1's padded scratch ---
    a1 = jnp.maximum(h0.reshape(B, H, W, Cout) * bn1s_ref[...] + bn1b_ref[...],
                     0.0)
    zero_border(pad1_ref, Cout)
    pad1_ref[:, 1:H + 1, 1:W + 1, :] = a1.astype(bf16)

    # --- conv_1 ---
    h1 = conv3x3(pad1_ref, w1_ref, Cout, Cout)                 # (M, Cout) f32

    # --- residual: 1x1 shortcut on relu(bn0(x)) (re-read from scratch), or
    #     identity (re-read x block; not kept live across the convs) ---
    if has_shortcut:
        a0b = pad0_ref[:, 1:H + 1, 1:W + 1, :]                 # (B,H,W,Cin) bf16
        res = jnp.dot(a0b.reshape(M, Cin), ws_ref[...],
                      preferred_element_type=f32)
    else:
        res = x_ref[...].astype(f32).reshape(M, Cin)           # Cin == Cout

    o_ref[...] = (res + h1).reshape(B, H, W, Cout).astype(o_ref.dtype)


def _vmem_budget_and_limit():
    """Generation-aware VMEM numbers (v5e/v6e: 128 MiB, v7x: 64 MiB)."""
    cap = None
    try:
        cap = getattr(pltpu.get_tpu_info(), "vmem_capacity_bytes", None)
    except Exception:
        cap = None
    if not cap:
        cap = 64 * 1024 * 1024            # conservative fallback (v7x per-TC)
    budget = int(0.70 * cap)              # for batch-tile selection
    limit = min(int(0.85 * cap), cap - (8 << 20))   # Mosaic scratch headroom
    limit = max(limit, 32 << 20)
    return budget, int(limit)


def _pick_batch_tile(N, H, W, Cin, Cout, budget_bytes):
    """Largest divisor of N fitting the VMEM budget, with >= 2 grid steps."""
    Hp, Wp = H + 2, W + 2
    wts = (9 * Cin * Cout + 9 * Cout * Cout + Cin * Cout) * 2  # bf16, 1-buffered

    def vmem_bytes(b):
        m = b * H * W
        x_in = 2 * m * Cin * 2                      # bf16 input block, 2-buf
        out = 2 * m * Cout * 2                      # bf16 output block, 2-buf
        pads = b * Hp * Wp * (Cin + Cout) * 2       # padded bf16 scratches
        live = m * (2 * Cin + 4 * Cout) * 4         # generous f32 live bound
        return x_in + out + pads + wts + live

    max_b = N if N < 2 else N // 2                  # keep >= 2 grid steps
    for b in range(max_b, 0, -1):
        if N % b == 0 and vmem_bytes(b) <= budget_bytes:
            return b
    return 1


def wide_resnet_block_nhwc(x_nhwc, params, *, stride, has_shortcut,
                           batch_tile=None):
    """Fused _Block forward on NHWC input; bf16 activation I/O, bf16 output."""
    if stride != 1:
        # TODO(synk): stride=2 path (asymmetric (0,1,0,1) pad, strided window
        # reads and strided 1x1 shortcut) is not implemented in-kernel.
        raise NotImplementedError("only stride=1 is implemented in-kernel")

    x = x_nhwc.astype(jnp.bfloat16)
    N, H, W, Cin = x.shape
    Cout = params["w1"].shape[-1]
    if not has_shortcut:
        assert Cin == Cout, "identity residual requires Cin == Cout"

    budget, vmem_limit = _vmem_budget_and_limit()
    B = batch_tile if batch_tile is not None else _pick_batch_tile(
        N, H, W, Cin, Cout, budget)
    assert N % B == 0, "batch_tile must divide the batch size"

    # HWIO weights -> (9, C, Cout) bf16 (tap index t = 3*dy + dx).
    w0 = params["w0"].reshape(9, Cin, Cout).astype(jnp.bfloat16)
    w1 = params["w1"].reshape(9, Cout, Cout).astype(jnp.bfloat16)

    kernel = functools.partial(_block_kernel, has_shortcut, B, H, W, Cin, Cout)

    def const_spec(shape):
        nd = len(shape)
        return pl.BlockSpec(shape, lambda n, _nd=nd: (0,) * _nd,
                            pipeline_mode=pl.Buffered(1))

    in_specs = [
        pl.BlockSpec((B, H, W, Cin), lambda n: (n, 0, 0, 0)),
        const_spec((1, Cin)),
        const_spec((1, Cin)),
        const_spec((9, Cin, Cout)),
        const_spec((1, Cout)),
        const_spec((1, Cout)),
        const_spec((9, Cout, Cout)),
    ]
    args = [x, params["bn0_scale"], params["bn0_shift"], w0,
            params["bn1_scale"], params["bn1_shift"], w1]
    if has_shortcut:
        in_specs.append(const_spec((Cin, Cout)))
        args.append(params["ws"].astype(jnp.bfloat16))

    return pl.pallas_call(
        kernel,
        out_shape=jax.ShapeDtypeStruct((N, H, W, Cout), jnp.bfloat16),
        grid=(N // B,),
        in_specs=in_specs,
        out_specs=pl.BlockSpec((B, H, W, Cout), lambda n: (n, 0, 0, 0)),
        scratch_shapes=[
            pltpu.VMEM((B, H + 2, W + 2, Cin), jnp.bfloat16),   # conv_0 input
            pltpu.VMEM((B, H + 2, W + 2, Cout), jnp.bfloat16),  # conv_1 input
        ],
        compiler_params=pltpu.CompilerParams(
            dimension_semantics=("parallel",),
            vmem_limit_bytes=vmem_limit),
    )(*args)


def wide_resnet_block(x_nchw, params, *, stride, has_shortcut, batch_tile=None):
    """PyTorch-parity wrapper: accepts/returns NCHW f32. In a full network keep
    activations NHWC/bf16 and call wide_resnet_block_nhwc directly instead."""
    x = jnp.transpose(x_nchw, (0, 2, 3, 1))                    # NCHW -> NHWC
    out = wide_resnet_block_nhwc(x, params, stride=stride,
                                 has_shortcut=has_shortcut,
                                 batch_tile=batch_tile)
    return jnp.transpose(out.astype(jnp.float32), (0, 3, 1, 2))  # NHWC -> NCHW


# ------------------------- plain-JAX reference ------------------------------
def block_reference(x_nchw, params, *, stride, has_shortcut):
    x = jnp.transpose(x_nchw, (0, 2, 3, 1))
    dn = ("NHWC", "HWIO", "NHWC")
    s0 = params["bn0_scale"].reshape(1, 1, 1, -1)
    b0 = params["bn0_shift"].reshape(1, 1, 1, -1)
    s1 = params["bn1_scale"].reshape(1, 1, 1, -1)
    b1 = params["bn1_shift"].reshape(1, 1, 1, -1)

    a0 = jnp.maximum(x * s0 + b0, 0.0)
    if stride == 1:
        v = jnp.pad(a0, ((0, 0), (1, 1), (1, 1), (0, 0)))
    else:
        v = jnp.pad(a0, ((0, 0), (0, 1), (0, 1), (0, 0)))
    out = jax.lax.conv_general_dilated(v, params["w0"], (stride, stride),
                                       "VALID", dimension_numbers=dn)
    out = jnp.maximum(out * s1 + b1, 0.0)
    out = jax.lax.conv_general_dilated(out, params["w1"], (1, 1),
                                       [(1, 1), (1, 1)], dimension_numbers=dn)
    if has_shortcut:
        sc = jax.lax.conv_general_dilated(a0, params["ws"][None, None],
                                          (stride, stride), "VALID",
                                          dimension_numbers=dn)
    else:
        sc = x
    return jnp.transpose(sc + out, (0, 3, 1, 2))


# ------------------------- parameter construction ---------------------------
def make_params(key, cin, cout, has_shortcut, eps=1e-5):
    ks = jax.random.split(key, 12)

    def bn(kg, kb, km, kv, c):
        gamma = jax.random.uniform(kg, (c,), minval=0.5, maxval=1.5)
        beta = 0.1 * jax.random.normal(kb, (c,))
        mean = 0.1 * jax.random.normal(km, (c,))
        var = jax.random.uniform(kv, (c,), minval=0.5, maxval=1.5)
        scale = gamma / jnp.sqrt(var + eps)
        shift = beta - mean * scale
        return scale.reshape(1, c).astype(jnp.float32), \
               shift.reshape(1, c).astype(jnp.float32)

    bn0_scale, bn0_shift = bn(ks[0], ks[1], ks[2], ks[3], cin)
    bn1_scale, bn1_shift = bn(ks[4], ks[5], ks[6], ks[7], cout)

    # PyTorch OIHW weights -> HWIO for the NHWC kernel.
    w0_oihw = jax.random.normal(ks[8], (cout, cin, 3, 3)) / jnp.sqrt(9.0 * cin)
    w1_oihw = jax.random.normal(ks[9], (cout, cout, 3, 3)) / jnp.sqrt(9.0 * cout)
    params = {
        "bn0_scale": bn0_scale, "bn0_shift": bn0_shift,
        "bn1_scale": bn1_scale, "bn1_shift": bn1_shift,
        "w0": jnp.transpose(w0_oihw, (2, 3, 1, 0)).astype(jnp.float32),
        "w1": jnp.transpose(w1_oihw, (2, 3, 1, 0)).astype(jnp.float32),
    }
    if has_shortcut:
        ws_oihw = jax.random.normal(ks[10], (cout, cin, 1, 1)) / jnp.sqrt(float(cin))
        params["ws"] = jnp.transpose(ws_oihw[:, :, 0, 0], (1, 0)).astype(jnp.float32)
    return params


if __name__ == "__main__":
    key = jax.random.PRNGKey(0)
    k1, k2, k3, k4 = jax.random.split(key, 4)

    # bf16 activation I/O + bf16 MXU inputs (f32 accumulate) vs. f32 reference
    # -> loose tolerance.
    ATOL = RTOL = 5e-2

    # Config 1: in_planes != out_planes -> has_shortcut, stride=1.
    N, Cin, Cout, H, W = 2, 4, 8, 16, 16
    x = jax.random.normal(k1, (N, Cin, H, W), dtype=jnp.float32)  # NCHW
    params = make_params(k2, Cin, Cout, has_shortcut=True)
    out = wide_resnet_block(x, params, stride=1, has_shortcut=True)
    jax.block_until_ready(out)
    ref = block_reference(x, params, stride=1, has_shortcut=True)
    assert out.shape == (N, Cout, H, W)
    assert bool(jnp.allclose(out, ref, atol=ATOL, rtol=RTOL)), \
        float(jnp.max(jnp.abs(out - ref)))

    # Config 2: in_planes == out_planes -> identity residual, stride=1.
    x2 = jax.random.normal(k3, (N, Cout, H, W), dtype=jnp.float32)
    params2 = make_params(k4, Cout, Cout, has_shortcut=False)
    out2 = wide_resnet_block(x2, params2, stride=1, has_shortcut=False)
    jax.block_until_ready(out2)
    ref2 = block_reference(x2, params2, stride=1, has_shortcut=False)
    assert out2.shape == (N, Cout, H, W)
    assert bool(jnp.allclose(out2, ref2, atol=ATOL, rtol=RTOL)), \
        float(jnp.max(jnp.abs(out2 - ref2)))

    print("KERNEL_OK")
</pallas_src>

<mosaic_0001>
module attributes {stable_mosaic.version = 11 : i64} {
  func.func @_block_kernel(%arg0: i32, %arg1: memref<1x16x16x4xbf16, #tpu.memory_space<vmem>>, %arg2: memref<1x4xf32, #tpu.memory_space<vmem>>, %arg3: memref<1x4xf32, #tpu.memory_space<vmem>>, %arg4: memref<9x4x8xbf16, #tpu.memory_space<vmem>>, %arg5: memref<1x8xf32, #tpu.memory_space<vmem>>, %arg6: memref<1x8xf32, #tpu.memory_space<vmem>>, %arg7: memref<9x8x8xbf16, #tpu.memory_space<vmem>>, %arg8: memref<4x8xbf16, #tpu.memory_space<vmem>>, %arg9: memref<1x16x16x8xbf16, #tpu.memory_space<vmem>>, %arg10: memref<1x18x18x4xbf16, #tpu.memory_space<vmem>>, %arg11: memref<1x18x18x8xbf16, #tpu.memory_space<vmem>>) attributes {dimension_semantics = [#tpu.dimension_semantics<parallel>], iteration_bounds = array<i64: 2>, scalar_prefetch = 0 : i64, scratch_operands = 2 : i64, tpu.core_type = #tpu.core_type<tc>, window_params = [{transform_indices = @transform_0, window_bounds = array<i64: 1, 16, 16, 4>}, {pipeline_mode = #tpu.pipeline_mode<synchronous>, transform_indices = @transform_1, window_bounds = array<i64: 1, 4>}, {pipeline_mode = #tpu.pipeline_mode<synchronous>, transform_indices = @transform_2, window_bounds = array<i64: 1, 4>}, {pipeline_mode = #tpu.pipeline_mode<synchronous>, transform_indices = @transform_3, window_bounds = array<i64: 9, 4, 8>}, {pipeline_mode = #tpu.pipeline_mode<synchronous>, transform_indices = @transform_4, window_bounds = array<i64: 1, 8>}, {pipeline_mode = #tpu.pipeline_mode<synchronous>, transform_indices = @transform_5, window_bounds = array<i64: 1, 8>}, {pipeline_mode = #tpu.pipeline_mode<synchronous>, transform_indices = @transform_6, window_bounds = array<i64: 9, 8, 8>}, {pipeline_mode = #tpu.pipeline_mode<synchronous>, transform_indices = @transform_7, window_bounds = array<i64: 4, 8>}, {transform_indices = @transform_8, window_bounds = array<i64: 1, 16, 16, 8>}]} {
    %c0 = arith.constant 0 : index
    %c0_0 = arith.constant 0 : index
    %c0_1 = arith.constant 0 : index
    %c0_2 = arith.constant 0 : index
    %0 = vector.load %arg1[%c0, %c0_0, %c0_1, %c0_2] : memref<1x16x16x4xbf16, #tpu.memory_space<vmem>>, vector<1x16x16x4xbf16>
    %1 = arith.extf %0 : vector<1x16x16x4xbf16> to vector<1x16x16x4xf32>
    %c0_3 = arith.constant 0 : index
    %c0_4 = arith.constant 0 : index
    %2 = vector.load %arg2[%c0_3, %c0_4] : memref<1x4xf32, #tpu.memory_space<vmem>>, vector<1x4xf32>
    %3 = vector.shape_cast %2 : vector<1x4xf32> to vector<1x1x1x4xf32>
    %4 = vector.broadcast %3 : vector<1x1x1x4xf32> to vector<1x16x16x4xf32>
    %5 = arith.mulf %1, %4 : vector<1x16x16x4xf32>
    %c0_5 = arith.constant 0 : index
    %c0_6 = arith.constant 0 : index
    %6 = vector.load %arg3[%c0_5, %c0_6] : memref<1x4xf32, #tpu.memory_space<vmem>>, vector<1x4xf32>
    %7 = vector.shape_cast %6 : vector<1x4xf32> to vector<1x1x1x4xf32>
    %8 = vector.broadcast %7 : vector<1x1x1x4xf32> to vector<1x16x16x4xf32>
    %9 = arith.addf %5, %8 : vector<1x16x16x4xf32>
    %cst = arith.constant 0.000000e+00 : f32
    %10 = vector.broadcast %cst : f32 to vector<1x16x16x4xf32>
    %11 = arith.maximumf %9, %10 : vector<1x16x16x4xf32>
    %cst_7 = arith.constant 0.000000e+00 : bf16
    %12 = vector.broadcast %cst_7 : bf16 to vector<1x1x18x4xbf16>
    %c0_8 = arith.constant 0 : index
    %c0_9 = arith.constant 0 : index
    %c0_10 = arith.constant 0 : index
    %c0_11 = arith.constant 0 : index
    %13 = vector.load %arg10[%c0_8, %c0_9, %c0_10, %c0_11] : memref<1x18x18x4xbf16, #tpu.memory_space<vmem>>, vector<1x1x18x4xbf16>
    tpu.vector_store %arg10[%c0_8, %c0_9, %c0_10, %c0_11], %12 {strides = array<i32>} : memref<1x18x18x4xbf16, #tpu.memory_space<vmem>>, vector<1x1x18x4xbf16>,
    %cst_12 = arith.constant 0.000000e+00 : bf16
    %14 = vector.broadcast %cst_12 : bf16 to vector<1x1x18x4xbf16>
    %c0_13 = arith.constant 0 : index
    %c17 = arith.constant 17 : index
    %c0_14 = arith.constant 0 : index
    %c0_15 = arith.constant 0 : index
    %15 = vector.load %arg10[%c0_13, %c17, %c0_14, %c0_15] : memref<1x18x18x4xbf16, #tpu.memory_space<vmem>>, vector<1x1x18x4xbf16>
    tpu.vector_store %arg10[%c0_13, %c17, %c0_14, %c0_15], %14 {strides = array<i32>} : memref<1x18x18x4xbf16, #tpu.memory_space<vmem>>, vector<1x1x18x4xbf16>,
    %cst_16 = arith.constant 0.000000e+00 : bf16
    %16 = vector.broadcast %cst_16 : bf16 to vector<1x16x1x4xbf16>
    %c0_17 = arith.constant 0 : index
    %c1 = arith.constant 1 : index
    %c0_18 = arith.constant 0 : index
    %c0_19 = arith.constant 0 : index
    %17 = vector.load %arg10[%c0_17, %c1, %c0_18, %c0_19] : memref<1x18x18x4xbf16, #tpu.memory_space<vmem>>, vector<1x16x1x4xbf16>
    tpu.vector_store %arg10[%c0_17, %c1, %c0_18, %c0_19], %16 {strides = array<i32>} : memref<1x18x18x4xbf16, #tpu.memory_space<vmem>>, vector<1x16x1x4xbf16>,
    %cst_20 = arith.constant 0.000000e+00 : bf16
    %18 = vector.broadcast %cst_20 : bf16 to vector<1x16x1x4xbf16>
    %c0_21 = arith.constant 0 : index
    %c1_22 = arith.constant 1 : index
    %c17_23 = arith.constant 17 : index
    %c0_24 = arith.constant 0 : index
    %19 = vector.load %arg10[%c0_21, %c1_22, %c17_23, %c0_24] : memref<1x18x18x4xbf16, #tpu.memory_space<vmem>>, vector<1x16x1x4xbf16>
    tpu.vector_store %arg10[%c0_21, %c1_22, %c17_23, %c0_24], %18 {strides = array<i32>} : memref<1x18x18x4xbf16, #tpu.memory_space<vmem>>, vector<1x16x1x4xbf16>,
    %20 = arith.truncf %11 : vector<1x16x16x4xf32> to vector<1x16x16x4xbf16>
    %c0_25 = arith.constant 0 : index
    %c1_26 = arith.constant 1 : index
    %c1_27 = arith.constant 1 : index
    %c0_28 = arith.constant 0 : index
    %21 = vector.load %arg10[%c0_25, %c1_26, %c1_27, %c0_28] : memref<1x18x18x4xbf16, #tpu.memory_space<vmem>>, vector<1x16x16x4xbf16>
    tpu.vector_store %arg10[%c0_25, %c1_26, %c1_27, %c0_28], %20 {strides = array<i32>} : memref<1x18x18x4xbf16, #tpu.memory_space<vmem>>, vector<1x16x16x4xbf16>,
    %cst_29 = arith.constant 0.000000e+00 : f32
    %22 = vector.broadcast %cst_29 : f32 to vector<256x8xf32>
    %c0_30 = arith.constant 0 : index
    %c0_31 = arith.constant 0 : index
    %c0_32 = arith.constant 0 : index
    %c0_33 = arith.constant 0 : index
    %23 = vector.load %arg10[%c0_30, %c0_31, %c0_32, %c0_33] : memref<1x18x18x4xbf16, #tpu.memory_space<vmem>>, vector<1x16x16x4xbf16>
    %24 = vector.shape_cast %23 : vector<1x16x16x4xbf16> to vector<256x4xbf16>
    %c0_34 = arith.constant 0 : index
    %c0_35 = arith.constant 0 : index
    %c0_36 = arith.constant 0 : index
    %25 = vector.load %arg4[%c0_34, %c0_35, %c0_36] : memref<9x4x8xbf16, #tpu.memory_space<vmem>>, vector<1x4x8xbf16>
    %26 = vector.shape_cast %25 : vector<1x4x8xbf16> to vector<4x8xbf16>
    %cst_37 = arith.constant dense<0.000000e+00> : vector<256x8xf32>
    %27 = tpu.matmul %24, %26, %cst_37 {dimension_numbers = #tpu.dot_dimension_numbers<[1], [0], [0], [1], [0, 0, 1, 1], [], []>} : vector<256x4xbf16>, vector<4x8xbf16>, vector<256x8xf32> -> vector<256x8xf32>
    %28 = arith.addf %22, %27 : vector<256x8xf32>
    %c0_38 = arith.constant 0 : index
    %c0_39 = arith.constant 0 : index
    %c1_40 = arith.constant 1 : index
    %c0_41 = arith.constant 0 : index
    %29 = vector.load %arg10[%c0_38, %c0_39, %c1_40, %c0_41] : memref<1x18x18x4xbf16, #tpu.memory_space<vmem>>, vector<1x16x16x4xbf16>
    %30 = vector.shape_cast %29 : vector<1x16x16x4xbf16> to vector<256x4xbf16>
    %c1_42 = arith.constant 1 : index
    %c0_43 = arith.constant 0 : index
    %c0_44 = arith.constant 0 : index
    %31 = vector.load %arg4[%c1_42, %c0_43, %c0_44] : memref<9x4x8xbf16, #tpu.memory_space<vmem>>, vector<1x4x8xbf16>
    %32 = vector.shape_cast %31 : vector<1x4x8xbf16> to vector<4x8xbf16>
    %cst_45 = arith.constant dense<0.000000e+00> : vector<256x8xf32>
    %33 = tpu.matmul %30, %32, %cst_45 {dimension_numbers = #tpu.dot_dimension_numbers<[1], [0], [0], [1], [0, 0, 1, 1], [], []>} : vector<256x4xbf16>, vector<4x8xbf16>, vector<256x8xf32> -> vector<256x8xf32>
    %34 = arith.addf %28, %33 : vector<256x8xf32>
    %c0_46 = arith.constant 0 : index
    %c0_47 = arith.constant 0 : index
    %c2 = arith.constant 2 : index
    %c0_48 = arith.constant 0 : index
    %35 = vector.load %arg10[%c0_46, %c0_47, %c2, %c0_48] : memref<1x18x18x4xbf16, #tpu.memory_space<vmem>>, vector<1x16x16x4xbf16>
    %36 = vector.shape_cast %35 : vector<1x16x16x4xbf16> to vector<256x4xbf16>
    %c2_49 = arith.constant 2 : index
    %c0_50 = arith.constant 0 : index
    %c0_51 = arith.constant 0 : index
    %37 = vector.load %arg4[%c2_49, %c0_50, %c0_51] : memref<9x4x8xbf16, #tpu.memory_space<vmem>>, vector<1x4x8xbf16>
    %38 = vector.shape_cast %37 : vector<1x4x8xbf16> to vector<4x8xbf16>
    %cst_52 = arith.constant dense<0.000000e+00> : vector<256x8xf32>
    %39 = tpu.matmul %36, %38, %cst_52 {dimension_numbers = #tpu.dot_dimension_numbers<[1], [0], [0], [1], [0, 0, 1, 1], [], []>} : vector<256x4xbf16>, vector<4x8xbf16>, vector<256x8xf32> -> vector<256x8xf32>
    %40 = arith.addf %34, %39 : vector<256x8xf32>
    %c0_53 = arith.constant 0 : index
    %c1_54 = arith.constant 1 : index
    %c0_55 = arith.constant 0 : index
    %c0_56 = arith.constant 0 : index
    %41 = vector.load %arg10[%c0_53, %c1_54, %c0_55, %c0_56] : memref<1x18x18x4xbf16, #tpu.memory_space<vmem>>, vector<1x16x16x4xbf16>
    %42 = vector.shape_cast %41 : vector<1x16x16x4xbf16> to vector<256x4xbf16>
    %c3 = arith.constant 3 : index
    %c0_57 = arith.constant 0 : index
    %c0_58 = arith.constant 0 : index
    %43 = vector.load %arg4[%c3, %c0_57, %c0_58] : memref<9x4x8xbf16, #tpu.memory_space<vmem>>, vector<1x4x8xbf16>
    %44 = vector.shape_cast %43 : vector<1x4x8xbf16> to vector<4x8xbf16>
    %cst_59 = arith.constant dense<0.000000e+00> : vector<256x8xf32>
    %45 = tpu.matmul %42, %44, %cst_59 {dimension_numbers = #tpu.dot_dimension_numbers<[1], [0], [0], [1], [0, 0, 1, 1], [], []>} : vector<256x4xbf16>, vector<4x8xbf16>, vector<256x8xf32> -> vector<256x8xf32>
    %46 = arith.addf %40, %45 : vector<256x8xf32>
    %c0_60 = arith.constant 0 : index
    %c1_61 = arith.constant 1 : index
    %c1_62 = arith.constant 1 : index
    %c0_63 = arith.constant 0 : index
    %47 = vector.load %arg10[%c0_60, %c1_61, %c1_62, %c0_63] : memref<1x18x18x4xbf16, #tpu.memory_space<vmem>>, vector<1x16x16x4xbf16>
    %48 = vector.shape_cast %47 : vector<1x16x16x4xbf16> to vector<256x4xbf16>
    %c4 = arith.constant 4 : index
    %c0_64 = arith.constant 0 : index
    %c0_65 = arith.constant 0 : index
    %49 = vector.load %arg4[%c4, %c0_64, %c0_65] : memref<9x4x8xbf16, #tpu.memory_space<vmem>>, vector<1x4x8xbf16>
    %50 = vector.shape_cast %49 : vector<1x4x8xbf16> to vector<4x8xbf16>
    %cst_66 = arith.constant dense<0.000000e+00> : vector<256x8xf32>
    %51 = tpu.matmul %48, %50, %cst_66 {dimension_numbers = #tpu.dot_dimension_numbers<[1], [0], [0], [1], [0, 0, 1, 1], [], []>} : vector<256x4xbf16>, vector<4x8xbf16>, vector<256x8xf32> -> vector<256x8xf32>
    %52 = arith.addf %46, %51 : vector<256x8xf32>
    %c0_67 = arith.constant 0 : index
    %c1_68 = arith.constant 1 : index
    %c2_69 = arith.constant 2 : index
    %c0_70 = arith.constant 0 : index
    %53 = vector.load %arg10[%c0_67, %c1_68, %c2_69, %c0_70] : memref<1x18x18x4xbf16, #tpu.memory_space<vmem>>, vector<1x16x16x4xbf16>
    %54 = vector.shape_cast %53 : vector<1x16x16x4xbf16> to vector<256x4xbf16>
    %c5 = arith.constant 5 : index
    %c0_71 = arith.constant 0 : index
    %c0_72 = arith.constant 0 : index
    %55 = vector.load %arg4[%c5, %c0_71, %c0_72] : memref<9x4x8xbf16, #tpu.memory_space<vmem>>, vector<1x4x8xbf16>
    %56 = vector.shape_cast %55 : vector<1x4x8xbf16> to vector<4x8xbf16>
    %cst_73 = arith.constant dense<0.000000e+00> : vector<256x8xf32>
    %57 = tpu.matmul %54, %56, %cst_73 {dimension_numbers = #tpu.dot_dimension_numbers<[1], [0], [0], [1], [0, 0, 1, 1], [], []>} : vector<256x4xbf16>, vector<4x8xbf16>, vector<256x8xf32> -> vector<256x8xf32>
    %58 = arith.addf %52, %57 : vector<256x8xf32>
    %c0_74 = arith.constant 0 : index
    %c2_75 = arith.constant 2 : index
    %c0_76 = arith.constant 0 : index
    %c0_77 = arith.constant 0 : index
    %59 = vector.load %arg10[%c0_74, %c2_75, %c0_76, %c0_77] : memref<1x18x18x4xbf16, #tpu.memory_space<vmem>>, vector<1x16x16x4xbf16>
    %60 = vector.shape_cast %59 : vector<1x16x16x4xbf16> to vector<256x4xbf16>
    %c6 = arith.constant 6 : index
    %c0_78 = arith.constant 0 : index
    %c0_79 = arith.constant 0 : index
    %61 = vector.load %arg4[%c6, %c0_78, %c0_79] : memref<9x4x8xbf16, #tpu.memory_space<vmem>>, vector<1x4x8xbf16>
    %62 = vector.shape_cast %61 : vector<1x4x8xbf16> to vector<4x8xbf16>
    %cst_80 = arith.constant dense<0.000000e+00> : vector<256x8xf32>
    %63 = tpu.matmul %60, %62, %cst_80 {dimension_numbers = #tpu.dot_dimension_numbers<[1], [0], [0], [1], [0, 0, 1, 1], [], []>} : vector<256x4xbf16>, vector<4x8xbf16>, vector<256x8xf32> -> vector<256x8xf32>
    %64 = arith.addf %58, %63 : vector<256x8xf32>
    %c0_81 = arith.constant 0 : index
    %c2_82 = arith.constant 2 : index
    %c1_83 = arith.constant 1 : index
    %c0_84 = arith.constant 0 : index
    %65 = vector.load %arg10[%c0_81, %c2_82, %c1_83, %c0_84] : memref<1x18x18x4xbf16, #tpu.memory_space<vmem>>, vector<1x16x16x4xbf16>
    %66 = vector.shape_cast %65 : vector<1x16x16x4xbf16> to vector<256x4xbf16>
    %c7 = arith.constant 7 : index
    %c0_85 = arith.constant 0 : index
    %c0_86 = arith.constant 0 : index
    %67 = vector.load %arg4[%c7, %c0_85, %c0_86] : memref<9x4x8xbf16, #tpu.memory_space<vmem>>, vector<1x4x8xbf16>
    %68 = vector.shape_cast %67 : vector<1x4x8xbf16> to vector<4x8xbf16>
    %cst_87 = arith.constant dense<0.000000e+00> : vector<256x8xf32>
    %69 = tpu.matmul %66, %68, %cst_87 {dimension_numbers = #tpu.dot_dimension_numbers<[1], [0], [0], [1], [0, 0, 1, 1], [], []>} : vector<256x4xbf16>, vector<4x8xbf16>, vector<256x8xf32> -> vector<256x8xf32>
    %70 = arith.addf %64, %69 : vector<256x8xf32>
    %c0_88 = arith.constant 0 : index
    %c2_89 = arith.constant 2 : index
    %c2_90 = arith.constant 2 : index
    %c0_91 = arith.constant 0 : index
    %71 = vector.load %arg10[%c0_88, %c2_89, %c2_90, %c0_91] : memref<1x18x18x4xbf16, #tpu.memory_space<vmem>>, vector<1x16x16x4xbf16>
    %72 = vector.shape_cast %71 : vector<1x16x16x4xbf16> to vector<256x4xbf16>
    %c8 = arith.constant 8 : index
    %c0_92 = arith.constant 0 : index
    %c0_93 = arith.constant 0 : index
    %73 = vector.load %arg4[%c8, %c0_92, %c0_93] : memref<9x4x8xbf16, #tpu.memory_space<vmem>>, vector<1x4x8xbf16>
    %74 = vector.shape_cast %73 : vector<1x4x8xbf16> to vector<4x8xbf16>
    %cst_94 = arith.constant dense<0.000000e+00> : vector<256x8xf32>
    %75 = tpu.matmul %72, %74, %cst_94 {dimension_numbers = #tpu.dot_dimension_numbers<[1], [0], [0], [1], [0, 0, 1, 1], [], []>} : vector<256x4xbf16>, vector<4x8xbf16>, vector<256x8xf32> -> vector<256x8xf32>
    %76 = arith.addf %70, %75 : vector<256x8xf32>
    %77 = vector.shape_cast %76 : vector<256x8xf32> to vector<1x16x16x8xf32>
    %c0_95 = arith.constant 0 : index
    %c0_96 = arith.constant 0 : index
    %78 = vector.load %arg5[%c0_95, %c0_96] : memref<1x8xf32, #tpu.memory_space<vmem>>, vector<1x8xf32>
    %79 = vector.shape_cast %78 : vector<1x8xf32> to vector<1x1x1x8xf32>
    %80 = vector.broadcast %79 : vector<1x1x1x8xf32> to vector<1x16x16x8xf32>
    %81 = arith.mulf %77, %80 : vector<1x16x16x8xf32>
    %c0_97 = arith.constant 0 : index
    %c0_98 = arith.constant 0 : index
    %82 = vector.load %arg6[%c0_97, %c0_98] : memref<1x8xf32, #tpu.memory_space<vmem>>, vector<1x8xf32>
    %83 = vector.shape_cast %82 : vector<1x8xf32> to vector<1x1x1x8xf32>
    %84 = vector.broadcast %83 : vector<1x1x1x8xf32> to vector<1x16x16x8xf32>
    %85 = arith.addf %81, %84 : vector<1x16x16x8xf32>
    %cst_99 = arith.constant 0.000000e+00 : f32
    %86 = vector.broadcast %cst_99 : f32 to vector<1x16x16x8xf32>
    %87 = arith.maximumf %85, %86 : vector<1x16x16x8xf32>
    %cst_100 = arith.constant 0.000000e+00 : bf16
    %88 = vector.broadcast %cst_100 : bf16 to vector<1x1x18x8xbf16>
    %c0_101 = arith.constant 0 : index
    %c0_102 = arith.constant 0 : index
    %c0_103 = arith.constant 0 : index
    %c0_104 = arith.constant 0 : index
    %89 = vector.load %arg11[%c0_101, %c0_102, %c0_103, %c0_104] : memref<1x18x18x8xbf16, #tpu.memory_space<vmem>>, vector<1x1x18x8xbf16>
    tpu.vector_store %arg11[%c0_101, %c0_102, %c0_103, %c0_104], %88 {strides = array<i32>} : memref<1x18x18x8xbf16, #tpu.memory_space<vmem>>, vector<1x1x18x8xbf16>,
    %cst_105 = arith.constant 0.000000e+00 : bf16
    %90 = vector.broadcast %cst_105 : bf16 to vector<1x1x18x8xbf16>
    %c0_106 = arith.constant 0 : index
    %c17_107 = arith.constant 17 : index
    %c0_108 = arith.constant 0 : index
    %c0_109 = arith.constant 0 : index
    %91 = vector.load %arg11[%c0_106, %c17_107, %c0_108, %c0_109] : memref<1x18x18x8xbf16, #tpu.memory_space<vmem>>, vector<1x1x18x8xbf16>
    tpu.vector_store %arg11[%c0_106, %c17_107, %c0_108, %c0_109], %90 {strides = array<i32>} : memref<1x18x18x8xbf16, #tpu.memory_space<vmem>>, vector<1x1x18x8xbf16>,
    %cst_110 = arith.constant 0.000000e+00 : bf16
    %92 = vector.broadcast %cst_110 : bf16 to vector<1x16x1x8xbf16>
    %c0_111 = arith.constant 0 : index
    %c1_112 = arith.constant 1 : index
    %c0_113 = arith.constant 0 : index
    %c0_114 = arith.constant 0 : index
    %93 = vector.load %arg11[%c0_111, %c1_112, %c0_113, %c0_114] : memref<1x18x18x8xbf16, #tpu.memory_space<vmem>>, vector<1x16x1x8xbf16>
    tpu.vector_store %arg11[%c0_111, %c1_112, %c0_113, %c0_114], %92 {strides = array<i32>} : memref<1x18x18x8xbf16, #tpu.memory_space<vmem>>, vector<1x16x1x8xbf16>,
    %cst_115 = arith.constant 0.000000e+00 : bf16
    %94 = vector.broadcast %cst_115 : bf16 to vector<1x16x1x8xbf16>
    %c0_116 = arith.constant 0 : index
    %c1_117 = arith.constant 1 : index
    %c17_118 = arith.constant 17 : index
    %c0_119 = arith.constant 0 : index
    %95 = vector.load %arg11[%c0_116, %c1_117, %c17_118, %c0_119] : memref<1x18x18x8xbf16, #tpu.memory_space<vmem>>, vector<1x16x1x8xbf16>
    tpu.vector_store %arg11[%c0_116, %c1_117, %c17_118, %c0_119], %94 {strides = array<i32>} : memref<1x18x18x8xbf16, #tpu.memory_space<vmem>>, vector<1x16x1x8xbf16>,
    %96 = arith.truncf %87 : vector<1x16x16x8xf32> to vector<1x16x16x8xbf16>
    %c0_120 = arith.constant 0 : index
    %c1_121 = arith.constant 1 : index
    %c1_122 = arith.constant 1 : index
    %c0_123 = arith.constant 0 : index
    %97 = vector.load %arg11[%c0_120, %c1_121, %c1_122, %c0_123] : memref<1x18x18x8xbf16, #tpu.memory_space<vmem>>, vector<1x16x16x8xbf16>
    tpu.vector_store %arg11[%c0_120, %c1_121, %c1_122, %c0_123], %96 {strides = array<i32>} : memref<1x18x18x8xbf16, #tpu.memory_space<vmem>>, vector<1x16x16x8xbf16>,
    %cst_124 = arith.constant 0.000000e+00 : f32
    %98 = vector.broadcast %cst_124 : f32 to vector<256x8xf32>
    %c0_125 = arith.constant 0 : index
    %c0_126 = arith.constant 0 : index
    %c0_127 = arith.constant 0 : index
    %c0_128 = arith.constant 0 : index
    %99 = vector.load %arg11[%c0_125, %c0_126, %c0_127, %c0_128] : memref<1x18x18x8xbf16, #tpu.memory_space<vmem>>, vector<1x16x16x8xbf16>
    %100 = vector.shape_cast %99 : vector<1x16x16x8xbf16> to vector<256x8xbf16>
    %c0_129 = arith.constant 0 : index
    %c0_130 = arith.constant 0 : index
    %c0_131 = arith.constant 0 : index
    %101 = vector.load %arg7[%c0_129, %c0_130, %c0_131] : memref<9x8x8xbf16, #tpu.memory_space<vmem>>, vector<1x8x8xbf16>
    %102 = vector.shape_cast %101 : vector<1x8x8xbf16> to vector<8x8xbf16>
    %cst_132 = arith.constant dense<0.000000e+00> : vector<256x8xf32>
    %103 = tpu.matmul %100, %102, %cst_132 {dimension_numbers = #tpu.dot_dimension_numbers<[1], [0], [0], [1], [0, 0, 1, 1], [], []>} : vector<256x8xbf16>, vector<8x8xbf16>, vector<256x8xf32> -> vector<256x8xf32>
    %104 = arith.addf %98, %103 : vector<256x8xf32>
    %c0_133 = arith.constant 0 : index
    %c0_134 = arith.constant 0 : index
    %c1_135 = arith.constant 1 : index
    %c0_136 = arith.constant 0 : index
    %105 = vector.load %arg11[%c0_133, %c0_134, %c1_135, %c0_136] : memref<1x18x18x8xbf16, #tpu.memory_space<vmem>>, vector<1x16x16x8xbf16>
    %106 = vector.shape_cast %105 : vector<1x16x16x8xbf16> to vector<256x8xbf16>
    %c1_137 = arith.constant 1 : index
    %c0_138 = arith.constant 0 : index
    %c0_139 = arith.constant 0 : index
    %107 = vector.load %arg7[%c1_137, %c0_138, %c0_139] : memref<9x8x8xbf16, #tpu.memory_space<vmem>>, vector<1x8x8xbf16>
    %108 = vector.shape_cast %107 : vector<1x8x8xbf16> to vector<8x8xbf16>
    %cst_140 = arith.constant dense<0.000000e+00> : vector<256x8xf32>
    %109 = tpu.matmul %106, %108, %cst_140 {dimension_numbers = #tpu.dot_dimension_numbers<[1], [0], [0], [1], [0, 0, 1, 1], [], []>} : vector<256x8xbf16>, vector<8x8xbf16>, vector<256x8xf32> -> vector<256x8xf32>
    %110 = arith.addf %104, %109 : vector<256x8xf32>
    %c0_141 = arith.constant 0 : index
    %c0_142 = arith.constant 0 : index
    %c2_143 = arith.constant 2 : index
    %c0_144 = arith.constant 0 : index
    %111 = vector.load %arg11[%c0_141, %c0_142, %c2_143, %c0_144] : memref<1x18x18x8xbf16, #tpu.memory_space<vmem>>, vector<1x16x16x8xbf16>
    %112 = vector.shape_cast %111 : vector<1x16x16x8xbf16> to vector<256x8xbf16>
    %c2_145 = arith.constant 2 : index
    %c0_146 = arith.constant 0 : index
    %c0_147 = arith.constant 0 : index
    %113 = vector.load %arg7[%c2_145, %c0_146, %c0_147] : memref<9x8x8xbf16, #tpu.memory_space<vmem>>, vector<1x8x8xbf16>
    %114 = vector.shape_cast %113 : vector<1x8x8xbf16> to vector<8x8xbf16>
    %cst_148 = arith.constant dense<0.000000e+00> : vector<256x8xf32>
    %115 = tpu.matmul %112, %114, %cst_148 {dimension_numbers = #tpu.dot_dimension_numbers<[1], [0], [0], [1], [0, 0, 1, 1], [], []>} : vector<256x8xbf16>, vector<8x8xbf16>, vector<256x8xf32> -> vector<256x8xf32>
    %116 = arith.addf %110, %115 : vector<256x8xf32>
    %c0_149 = arith.constant 0 : index
    %c1_150 = arith.constant 1 : index
    %c0_151 = arith.constant 0 : index
    %c0_152 = arith.constant 0 : index
    %117 = vector.load %arg11[%c0_149, %c1_150, %c0_151, %c0_152] : memref<1x18x18x8xbf16, #tpu.memory_space<vmem>>, vector<1x16x16x8xbf16>
    %118 = vector.shape_cast %117 : vector<1x16x16x8xbf16> to vector<256x8xbf16>
    %c3_153 = arith.constant 3 : index
    %c0_154 = arith.constant 0 : index
    %c0_155 = arith.constant 0 : index
    %119 = vector.load %arg7[%c3_153, %c0_154, %c0_155] : memref<9x8x8xbf16, #tpu.memory_space<vmem>>, vector<1x8x8xbf16>
    %120 = vector.shape_cast %119 : vector<1x8x8xbf16> to vector<8x8xbf16>
    %cst_156 = arith.constant dense<0.000000e+00> : vector<256x8xf32>
    %121 = tpu.matmul %118, %120, %cst_156 {dimension_numbers = #tpu.dot_dimension_numbers<[1], [0], [0], [1], [0, 0, 1, 1], [], []>} : vector<256x8xbf16>, vector<8x8xbf16>, vector<256x8xf32> -> vector<256x8xf32>
    %122 = arith.addf %116, %121 : vector<256x8xf32>
    %c0_157 = arith.constant 0 : index
    %c1_158 = arith.constant 1 : index
    %c1_159 = arith.constant 1 : index
    %c0_160 = arith.constant 0 : index
    %123 = vector.load %arg11[%c0_157, %c1_158, %c1_159, %c0_160] : memref<1x18x18x8xbf16, #tpu.memory_space<vmem>>, vector<1x16x16x8xbf16>
    %124 = vector.shape_cast %123 : vector<1x16x16x8xbf16> to vector<256x8xbf16>
    %c4_161 = arith.constant 4 : index
    %c0_162 = arith.constant 0 : index
    %c0_163 = arith.constant 0 : index
    %125 = vector.load %arg7[%c4_161, %c0_162, %c0_163] : memref<9x8x8xbf16, #tpu.memory_space<vmem>>, vector<1x8x8xbf16>
    %126 = vector.shape_cast %125 : vector<1x8x8xbf16> to vector<8x8xbf16>
    %cst_164 = arith.constant dense<0.000000e+00> : vector<256x8xf32>
    %127 = tpu.matmul %124, %126, %cst_164 {dimension_numbers = #tpu.dot_dimension_numbers<[1], [0], [0], [1], [0, 0, 1, 1], [], []>} : vector<256x8xbf16>, vector<8x8xbf16>, vector<256x8xf32> -> vector<256x8xf32>
    %128 = arith.addf %122, %127 : vector<256x8xf32>
    %c0_165 = arith.constant 0 : index
    %c1_166 = arith.constant 1 : index
    %c2_167 = arith.constant 2 : index
    %c0_168 = arith.constant 0 : index
    %129 = vector.load %arg11[%c0_165, %c1_166, %c2_167, %c0_168] : memref<1x18x18x8xbf16, #tpu.memory_space<vmem>>, vector<1x16x16x8xbf16>
    %130 = vector.shape_cast %129 : vector<1x16x16x8xbf16> to vector<256x8xbf16>
    %c5_169 = arith.constant 5 : index
    %c0_170 = arith.constant 0 : index
    %c0_171 = arith.constant 0 : index
    %131 = vector.load %arg7[%c5_169, %c0_170, %c0_171] : memref<9x8x8xbf16, #tpu.memory_space<vmem>>, vector<1x8x8xbf16>
    %132 = vector.shape_cast %131 : vector<1x8x8xbf16> to vector<8x8xbf16>
    %cst_172 = arith.constant dense<0.000000e+00> : vector<256x8xf32>
    %133 = tpu.matmul %130, %132, %cst_172 {dimension_numbers = #tpu.dot_dimension_numbers<[1], [0], [0], [1], [0, 0, 1, 1], [], []>} : vector<256x8xbf16>, vector<8x8xbf16>, vector<256x8xf32> -> vector<256x8xf32>
    %134 = arith.addf %128, %133 : vector<256x8xf32>
    %c0_173 = arith.constant 0 : index
    %c2_174 = arith.constant 2 : index
    %c0_175 = arith.constant 0 : index
    %c0_176 = arith.constant 0 : index
    %135 = vector.load %arg11[%c0_173, %c2_174, %c0_175, %c0_176] : memref<1x18x18x8xbf16, #tpu.memory_space<vmem>>, vector<1x16x16x8xbf16>
    %136 = vector.shape_cast %135 : vector<1x16x16x8xbf16> to vector<256x8xbf16>
    %c6_177 = arith.constant 6 : index
    %c0_178 = arith.constant 0 : index
    %c0_179 = arith.constant 0 : index
    %137 = vector.load %arg7[%c6_177, %c0_178, %c0_179] : memref<9x8x8xbf16, #tpu.memory_space<vmem>>, vector<1x8x8xbf16>
    %138 = vector.shape_cast %137 : vector<1x8x8xbf16> to vector<8x8xbf16>
    %cst_180 = arith.constant dense<0.000000e+00> : vector<256x8xf32>
    %139 = tpu.matmul %136, %138, %cst_180 {dimension_numbers = #tpu.dot_dimension_numbers<[1], [0], [0], [1], [0, 0, 1, 1], [], []>} : vector<256x8xbf16>, vector<8x8xbf16>, vector<256x8xf32> -> vector<256x8xf32>
    %140 = arith.addf %134, %139 : vector<256x8xf32>
    %c0_181 = arith.constant 0 : index
    %c2_182 = arith.constant 2 : index
    %c1_183 = arith.constant 1 : index
    %c0_184 = arith.constant 0 : index
    %141 = vector.load %arg11[%c0_181, %c2_182, %c1_183, %c0_184] : memref<1x18x18x8xbf16, #tpu.memory_space<vmem>>, vector<1x16x16x8xbf16>
    %142 = vector.shape_cast %141 : vector<1x16x16x8xbf16> to vector<256x8xbf16>
    %c7_185 = arith.constant 7 : index
    %c0_186 = arith.constant 0 : index
    %c0_187 = arith.constant 0 : index
    %143 = vector.load %arg7[%c7_185, %c0_186, %c0_187] : memref<9x8x8xbf16, #tpu.memory_space<vmem>>, vector<1x8x8xbf16>
    %144 = vector.shape_cast %143 : vector<1x8x8xbf16> to vector<8x8xbf16>
    %cst_188 = arith.constant dense<0.000000e+00> : vector<256x8xf32>
    %145 = tpu.matmul %142, %144, %cst_188 {dimension_numbers = #tpu.dot_dimension_numbers<[1], [0], [0], [1], [0, 0, 1, 1], [], []>} : vector<256x8xbf16>, vector<8x8xbf16>, vector<256x8xf32> -> vector<256x8xf32>
    %146 = arith.addf %140, %145 : vector<256x8xf32>
    %c0_189 = arith.constant 0 : index
    %c2_190 = arith.constant 2 : index
    %c2_191 = arith.constant 2 : index
    %c0_192 = arith.constant 0 : index
    %147 = vector.load %arg11[%c0_189, %c2_190, %c2_191, %c0_192] : memref<1x18x18x8xbf16, #tpu.memory_space<vmem>>, vector<1x16x16x8xbf16>
    %148 = vector.shape_cast %147 : vector<1x16x16x8xbf16> to vector<256x8xbf16>
    %c8_193 = arith.constant 8 : index
    %c0_194 = arith.constant 0 : index
    %c0_195 = arith.constant 0 : index
    %149 = vector.load %arg7[%c8_193, %c0_194, %c0_195] : memref<9x8x8xbf16, #tpu.memory_space<vmem>>, vector<1x8x8xbf16>
    %150 = vector.shape_cast %149 : vector<1x8x8xbf16> to vector<8x8xbf16>
    %cst_196 = arith.constant dense<0.000000e+00> : vector<256x8xf32>
    %151 = tpu.matmul %148, %150, %cst_196 {dimension_numbers = #tpu.dot_dimension_numbers<[1], [0], [0], [1], [0, 0, 1, 1], [], []>} : vector<256x8xbf16>, vector<8x8xbf16>, vector<256x8xf32> -> vector<256x8xf32>
    %152 = arith.addf %146, %151 : vector<256x8xf32>
    %c0_197 = arith.constant 0 : index
    %c1_198 = arith.constant 1 : index
    %c1_199 = arith.constant 1 : index
    %c0_200 = arith.constant 0 : index
    %153 = vector.load %arg10[%c0_197, %c1_198, %c1_199, %c0_200] : memref<1x18x18x4xbf16, #tpu.memory_space<vmem>>, vector<1x16x16x4xbf16>
    %154 = vector.shape_cast %153 : vector<1x16x16x4xbf16> to vector<256x4xbf16>
    %c0_201 = arith.constant 0 : index
    %c0_202 = arith.constant 0 : index
    %155 = vector.load %arg8[%c0_201, %c0_202] : memref<4x8xbf16, #tpu.memory_space<vmem>>, vector<4x8xbf16>
    %cst_203 = arith.constant dense<0.000000e+00> : vector<256x8xf32>
    %156 = tpu.matmul %154, %155, %cst_203 {dimension_numbers = #tpu.dot_dimension_numbers<[1], [0], [0], [1], [0, 0, 1, 1], [], []>} : vector<256x4xbf16>, vector<4x8xbf16>, vector<256x8xf32> -> vector<256x8xf32>
    %157 = arith.addf %156, %152 : vector<256x8xf32>
    %158 = vector.shape_cast %157 : vector<256x8xf32> to vector<1x16x16x8xf32>
    %159 = arith.truncf %158 : vector<1x16x16x8xf32> to vector<1x16x16x8xbf16>
    %c0_204 = arith.constant 0 : index
    %c0_205 = arith.constant 0 : index
    %c0_206 = arith.constant 0 : index
    %c0_207 = arith.constant 0 : index
    %160 = vector.load %arg9[%c0_204, %c0_205, %c0_206, %c0_207] : memref<1x16x16x8xbf16, #tpu.memory_space<vmem>>, vector<1x16x16x8xbf16>
    tpu.vector_store %arg9[%c0_204, %c0_205, %c0_206, %c0_207], %159 {strides = array<i32>} : memref<1x16x16x8xbf16, #tpu.memory_space<vmem>>, vector<1x16x16x8xbf16>,
    return
  }
  func.func @transform_0(%arg0: i32) -> (i32, i32, i32, i32) {
    %c0_i32 = arith.constant 0 : i32
    %c0_i32_0 = arith.constant 0 : i32
    %c0_i32_1 = arith.constant 0 : i32
    %c0_i32_2 = arith.constant 0 : i32
    return %arg0, %c0_i32, %c0_i32_0, %c0_i32_1 : i32, i32, i32, i32
  }
  func.func @transform_1(%arg0: i32) -> (i32, i32) {
    %c0_i32 = arith.constant 0 : i32
    %c0_i32_0 = arith.constant 0 : i32
    %c0_i32_1 = arith.constant 0 : i32
    return %c0_i32, %c0_i32_0 : i32, i32
  }
  func.func @transform_2(%arg0: i32) -> (i32, i32) {
    %c0_i32 = arith.constant 0 : i32
    %c0_i32_0 = arith.constant 0 : i32
    %c0_i32_1 = arith.constant 0 : i32
    return %c0_i32, %c0_i32_0 : i32, i32
  }
  func.func @transform_3(%arg0: i32) -> (i32, i32, i32) {
    %c0_i32 = arith.constant 0 : i32
    %c0_i32_0 = arith.constant 0 : i32
    %c0_i32_1 = arith.constant 0 : i32
    %c0_i32_2 = arith.constant 0 : i32
    return %c0_i32, %c0_i32_0, %c0_i32_1 : i32, i32, i32
  }
  func.func @transform_4(%arg0: i32) -> (i32, i32) {
    %c0_i32 = arith.constant 0 : i32
    %c0_i32_0 = arith.constant 0 : i32
    %c0_i32_1 = arith.constant 0 : i32
    return %c0_i32, %c0_i32_0 : i32, i32
  }
  func.func @transform_5(%arg0: i32) -> (i32, i32) {
    %c0_i32 = arith.constant 0 : i32
    %c0_i32_0 = arith.constant 0 : i32
    %c0_i32_1 = arith.constant 0 : i32
    return %c0_i32, %c0_i32_0 : i32, i32
  }
  func.func @transform_6(%arg0: i32) -> (i32, i32, i32) {
    %c0_i32 = arith.constant 0 : i32
    %c0_i32_0 = arith.constant 0 : i32
    %c0_i32_1 = arith.constant 0 : i32
    %c0_i32_2 = arith.constant 0 : i32
    return %c0_i32, %c0_i32_0, %c0_i32_1 : i32, i32, i32
  }
  func.func @transform_7(%arg0: i32) -> (i32, i32) {
    %c0_i32 = arith.constant 0 : i32
    %c0_i32_0 = arith.constant 0 : i32
    %c0_i32_1 = arith.constant 0 : i32
    return %c0_i32, %c0_i32_0 : i32, i32
  }
  func.func @transform_8(%arg0: i32) -> (i32, i32, i32, i32) {
    %c0_i32 = arith.constant 0 : i32
    %c0_i32_0 = arith.constant 0 : i32
    %c0_i32_1 = arith.constant 0 : i32
    %c0_i32_2 = arith.constant 0 : i32
    return %arg0, %c0_i32, %c0_i32_0, %c0_i32_1 : i32, i32, i32, i32
  }
}

</mosaic_0001>

<bundles_post_ra>
// kernel: tpu_custom_call.1
= control target key start
LH: loop header
LB: loop body
LE: loop exit
PB: predicated region body
PF: predicated region fallthrough
CT: control target
= control target key end

     0   :  { %s11362_s27 = smov 0   ;;  %s15783_s0 = inlined_call_operand.vmem [shape: bf16[2,16,16,4], index: 0, kind: input, shape index: {}]   ;;  %s15784_s1 = inlined_call_operand.vmem [shape: f32[1,4], index: 1, kind: input, shape index: {}]   ;;  %s15785_s2 = inlined_call_operand.vmem [shape: f32[1,4], index: 2, kind: input, shape index: {}]   ;;  %s15786_s3 = inlined_call_operand.vmem [shape: bf16[9,4,8], index: 3, kind: input, shape index: {}]   ;;  %s15787_s4 = inlined_call_operand.vmem [shape: f32[1,8], index: 4, kind: input, shape index: {}]   ;;  %s15788_s5 = inlined_call_operand.vmem [shape: f32[1,8], index: 5, kind: input, shape index: {}]   ;;  %s15789_s6 = inlined_call_operand.vmem [shape: bf16[9,8,8], index: 6, kind: input, shape index: {}]   ;;  %s15790_s7 = inlined_call_operand.vmem [shape: bf16[4,8], index: 7, kind: input, shape index: {}]   ;;  %s15791_s8 = inlined_call_operand.vmem [shape: bf16[2,16,16,8], index: 8, kind: output, shape index: {}]  }
   0x1 LB: > { %s10287_s28 = sadd.s32 4294967295, %s11314_s27   ;;  %p10291_p0 = scmp.ge.s32.totalorder %s11314_s27, 1  ;;  %s11314_s27 = sphi %s11362_s27, %s18_s27  }
   0x2   : > { %p262_p1 = scmp.lt.s32.totalorder %s11314_s27, 3 }
   0x4   : > { %p263_p2 = pnand %p10291_p0, %p262_p1 }
   0x6   : > { %266 = sbr.rel (%p263_p2) target bundleno = 1604 (0x644), region = 52 }
   0xb   : > { %v10296_v0 = vld [vmem:[%s15786_s3 + $0x2] sm:$0x3]  ;;  %vm1589_vm0 = vcmask 1041408   ;;  %vm475_vm1 = vcmask 27648   ;;  %vm478_vm2 = vcmask 24576   ;;  %v11316_v2 = vmov 0  }
   0xc   : > { %v1591_v1 = vsel %vm1589_vm0, %v10296_v0, 0  ;;  %476 = vst.msk [vmem:[#allocation2] sm:$0xf] %vm475_vm1, %v11316_v2  ;;  %vm486_vm3 = vsmask.f32 256  ;;  %vm5068_vm7 = vcmask 60416  }
   0xd   : > { %1600 = vmatpush.bf16.msra.mxu0 %v1591_v1  ;;  %477 = vst.msk [vmem:[#allocation2 + $0x4] sm:$0xf] %vm475_vm1, %v11316_v2  ;;  %vm536_vm4 = vsmask.f32 7938  ;;  %11275 = vmatpush.bf16.msra.mxu3 %v1591_v1  ;;  %vm1103_vm5 = vsmask.f32 3328  ;;  %vm11402_vm11 = vmand %vm478_vm2, %vm486_vm3 }
   0xe   : > { %479 = vst.msk [vmem:[#allocation2 + $0x8] sm:$0x1] %vm478_vm2, %v11316_v2  ;;  %vm1104_vm6 = vsmask.f32 7440  ;;  %v10409_v3 = vld [vmem:[%s15786_s3 + $0x4] sm:$0x3]  ;;  %vm11416_vm13 = vmand %vm478_vm2, %vm536_vm4 }
   0xf   : > { %481 = vst.msk [vmem:[#allocation2 + $0xcc] sm:$0xf] %vm475_vm1, %v11316_v2  ;;  %v11383_v4 = vsel %vm1589_vm0, %v10409_v3, 0  ;;  %v1086_v5 = vld [vmem:[%s15786_s3] sm:$0x3]  ;;  %p296_p3 = scmp.lt.s32.totalorder %s10287_s28, 1  ;;  %vm11429_vm15 = vmor %vm1103_vm5, %vm1104_vm6 }
  0x10   : > { %482 = vst.msk [vmem:[#allocation2 + $0xd0] sm:$0xf] %vm475_vm1, %v11316_v2  ;;  %vm5071_vm8 = vcmask 57344   ;;  %2173 = vmatpush.bf16.msra.mxu2 %v11383_v4  ;;  %v1811_v6 = vsel %vm1589_vm0, %v1086_v5, 0  ;;  %vm1950_vm9 = vcmask 1042432   ;;  %vm1951_vm10 = vcmask 1046532   ;;  %vm11493_vm5 = vmand %vm475_vm1, %vm536_vm4 }
  0x11   : > { %483 = vst.msk [vmem:[#allocation2 + $0xd4] sm:$0x1] %vm478_vm2, %v11316_v2  ;;  %1820 = vmatpush.bf16.msra.mxu1 %v1811_v6  ;;  %s16110_s28 = smov (!%p296_p3, %s10287_s28), 1  ;;  %11276 = vmatpush.bf16.msrb.mxu3 %v1811_v6  ;;  %vm11410_vm12 = vmor %vm1950_vm9, %vm1951_vm10  ;;  %vm1540_vm14 = vcmask 31744   ;;  %v11425_v27 = vld [vmem:[%s15784_s1] ss:$0 sm:$0xff] }
  0x12   : > { %5069 = vst.msk [vmem:[#allocation3] sm:$0xf] %vm5068_vm7, %v11316_v2  ;;  %s11098_s13 = sshll.u32 %s16110_s28, 7  ;;  %v488_v33 = vld [vmem:[#allocation2 + $0xc] sm:$0x1]  ;;  %vm6175_vm9 = vcmask 1043456   ;;  %vm13076_vm10 = vmand %vm5068_vm7, %vm536_vm4 }
  0x13   : > { %v1054_v7 = vld [vmem:[#allocation2] sm:$0xf]  ;;  %5070 = vst.msk [vmem:[#allocation3 + $0x4] sm:$0xf] %vm5068_vm7, %v11316_v2  ;;  %s11440_s18 = scalar_lea.vmem %s15783_s0, %s11098_s13  ;;  %v538_v34 = vld [vmem:[#allocation2 + $0x14] sm:$0x1]  ;;  %s15555_s19 = scalar_lea.vmem %s15791_s8, %s11098_s13 }
  0x14   : > { %v1902_v8 = vld [vmem:[#allocation2] sm:$0xe]  ;;  %v1055_v9 = vld [vmem:[#allocation2 + $0x4] sm:$0xf]  ;;  %v1107_v10 = vshrl.u32 %v1054_v7, 16  ;;  %v1110_v11 = vshll.u32 %v1054_v7, 16 }
  0x15   : > { %5072 = vst.msk [vmem:[#allocation3 + $0x8] sm:$0x1] %vm5071_vm8, %v11316_v2  ;;  %v1087_v13 = vld [vmem:[#allocation2 + $0x8] sm:$0x1]  ;;  %v1116_v14 = vshll.u32 %v1055_v9, 16  ;;  %v1120_v15 = vshrl.u32 %v1055_v9, 16 }
  0x16   : > { %5074 = vst.msk [vmem:[#allocation3 + $0xcc] sm:$0xf] %vm5068_vm7, %v11316_v2  ;;  %v1109_v16 = vrot.slane %v1107_v10, 4  ;;  %v1112_v17 = vrot.slane %v1110_v11, 5  ;;  %v1126_v18 = vshll.u32 %v1087_v13, 16  ;;  %v10393_v20 = vrot.slane %v1902_v8, 9 }
  0x17   : > { %5075 = vst.msk [vmem:[#allocation3 + $0xd0] sm:$0xf] %vm5068_vm7, %v11316_v2  ;;  %v1118_v22 = vrot.slane %v1116_v14, 5  ;;  %v1122_v23 = vrot.slane %v1120_v15, 4  ;;  %v1955_v24 = vrot.slane %v1055_v9, 5  ;;  %v1958_v25 = vrot.slane %v1087_v13, 5 }
  0x18   : > { %5076 = vst.msk [vmem:[#allocation3 + $0xd4] sm:$0x1] %vm5071_vm8, %v11316_v2  ;;  %v1113_v26 = vor.u32 %v1112_v17, %v1109_v16  ;;  %v1128_v30 = vrot.slane %v1126_v18, 5  ;;  %v11197_v37 = vld [vmem:[%s11440_s18] sm:$0xff]   ;;  %v489_v38 = vsel %vm11402_vm11, 0, %v488_v33  ;;  %v539_v39 = vsel %vm11416_vm13, 0, %v538_v34 }
  0x19   : > { %v1123_v29 = vor.u32 %v1122_v23, %v1118_v22  ;;  %v1956_v31 = vsel %vm11410_vm12, %v10393_v20, %v1955_v24  ;;  %v1957_v32 = vrot.slane %v1955_v24, 4  ;;  %v11270_v40 = vld [vmem:[%s11440_s18 + $0x58] sm:$0xff]   ;;  %v11198_v43 = vunpack.c.l.bf16 %v11197_v37  ;;  %v11453_v45 = vld [vmem:[%s15785_s2] ss:$0 sm:$0xff]  ;;  %490 = vst [vmem:[#allocation2 + $0xc] sm:$0x1] %v489_v38 }
  0x1a   : > { %v1114_v35 = vrot.slane %v1113_v26, 4  ;;  %v2067_v36 = vunpack.c.l.b16 %v1956_v31  ;;  %v11199_v44 = vunpack.c.h.bf16 %v11197_v37  ;;  %540 = vst [vmem:[#allocation2 + $0x14] sm:$0x1] %v539_v39  ;;  %v11242_v48 = vunpack.c.l.bf16 %v11270_v40  ;;  %v521_v49 = vld [vmem:[#allocation2 + $0x90] sm:$0x1]  ;;  %v11260_v55 = vld [vmem:[%s11440_s18 + $0x8] sm:$0xff]  }
  0x1b   : > { %v1124_v41 = vrot.slane %v1123_v29, 4  ;;  %v1959_v42 = vsel %vm11410_vm12, %v1957_v32, %v1958_v25  ;;  %v571_v50 = vld [vmem:[#allocation2 + $0x98] sm:$0x1]  ;;  %v375_v53 = vmul.f32 %v11425_v27, %v11198_v43  ;;  %vm618_vm2 = vsmask.f32 4368  ;;  %v11473_v7 = vld [vmem:[%s11440_s18 + $0x60] sm:$0xff]  }
  0x1c   : > { %v1119_v46 = vsel %vm11429_vm15, %v1114_v35, %v1118_v22  ;;  %v2068_v47 = vunpack.c.l.b16 %v1959_v42  ;;  %v376_v54 = vmul.f32 %v11425_v27, %v11199_v44  ;;  %v11243_v58 = vunpack.c.h.bf16 %v11270_v40  ;;  %v491_v60 = vld [vmem:[#allocation2 + $0x18] sm:$0x1]  ;;  %v541_v1 = vld [vmem:[#allocation2 + $0x20] sm:$0x1]  ;;  %v10507_v34 = vld [vmem:[%s15786_s3 + $0x8] sm:$0x3] }
  0x1d   : > { %v1129_v51 = vsel %vm11429_vm15, %v1124_v41, %v1128_v30  ;;  %v1492_v52 = vunpack.c.l.b16 %v1119_v46  ;;  %v397_v59 = vmul.f32 %v11425_v27, %v11242_v48  ;;  %v411_v61 = vadd.f32 %v11453_v45, %v375_v53  ;;  %v11100_v20 = vld [vmem:[#allocation2] sm:$0xff]  ;;  %vm11500_vm6 = vmor %vm486_vm3, %vm618_vm2 }
  0x1e   : > { %v1493_v56 = vunpack.c.l.b16 %v1129_v51  ;;  %v2099_v57 = vpack.c.b16 %v2068_v47, %v2067_v36  ;;  %v412_v62 = vadd.f32 %v11453_v45, %v376_v54  ;;  %v522_v63 = vsel %vm11402_vm11, 0, %v521_v49  ;;  %10377 = vmatmul.msk.bf16.vlgmr.msra.gmra.mxu1 %vm1540_vm14, %v11100_v20 }
  0x1f   : > { %v572_v0 = vsel %vm11416_vm13, 0, %v571_v50  ;;  %v398_v3 = vmul.f32 %v11425_v27, %v11243_v58  ;;  %v433_v5 = vadd.f32 %v11453_v45, %v397_v59  ;;  %523 = vst [vmem:[#allocation2 + $0x90] sm:$0x1] %v522_v63  ;;  %v11202_v6 = vunpack.c.l.bf16 %v11260_v55 }
  0x20   : > { %v1524_v2 = vpack.c.b16 %v1493_v56, %v1492_v52  ;;  %10410 = vmatmul.msk.bf16.vlgmr.msra.gmra.mxu2 %vm1540_vm14, %v2099_v57  ;;  %v443_v8 = vmax.f32 %v411_v61, 0.0  ;;  %v444_v9 = vmax.f32 %v412_v62, 0.0  ;;  %573 = vst [vmem:[#allocation2 + $0x98] sm:$0x1] %v572_v0  ;;  %v11203_v10 = vunpack.c.h.bf16 %v11260_v55  ;;  %v942_v42 = vld [vmem:[#allocation2 + $0xc] sm:$0xf] }
  0x21   : > { %v492_v11 = vsel %vm11402_vm11, 0, %v491_v60  ;;  %v434_v13 = vadd.f32 %v11453_v45, %v398_v3  ;;  %v465_v14 = vmax.f32 %v433_v5, 0.0  ;;  %v377_v15 = vmul.f32 %v11425_v27, %v11202_v6  ;;  %v946_v47 = vld [vmem:[#allocation2 + $0x14] sm:$0x1] }
  0x22   : > { %10297 = vmatmul.msk.bf16.vlgmr.msra.gmra.mxu0 %vm1540_vm14, %v1524_v2  ;;  %493 = vst [vmem:[#allocation2 + $0x18] sm:$0x1] %v492_v11  ;;  %v542_v16 = vsel %vm11416_vm13, 0, %v541_v1  ;;  %v586_v17 = vpack.c.bf16 %v443_v8, %v443_v8  ;;  %v587_v18 = vpack.c.bf16 %v444_v9, %v444_v9  ;;  %v378_v22 = vmul.f32 %v11425_v27, %v11203_v10  ;;  %v524_v2 = vld [vmem:[#allocation2 + $0x9c] sm:$0x1] }
  0x23   : > { %543 = vst [vmem:[#allocation2 + $0x20] sm:$0x1] %v542_v16  ;;  %v11246_v23 = vunpack.c.l.bf16 %v11473_v7  ;;  %v466_v24 = vmax.f32 %v434_v13, 0.0  ;;  %v608_v25 = vpack.c.bf16 %v465_v14, %v465_v14  ;;  %v413_v26 = vadd.f32 %v11453_v45, %v377_v15  ;;  %v574_v8 = vld [vmem:[#allocation2 + $0xa4] sm:$0x1]  ;;  %v11261_v14 = vld [vmem:[%s11440_s18 + $0x10] sm:$0xff]  }
  0x24   : > { %v11247_v29 = vunpack.c.h.bf16 %v11473_v7  ;;  %v621_v30 = vshrl.u32 %v586_v17, 16  ;;  %v624_v31 = vshll.u32 %v586_v17, 16  ;;  %v629_v32 = vshrl.u32 %v587_v18, 16 }
  0x25   : > { %v632_v33 = vshll.u32 %v587_v18, 16  ;;  %v609_v35 = vpack.c.bf16 %v466_v24, %v466_v24  ;;  %v808_v36 = vshrl.u32 %v608_v25, 16  ;;  %v811_v37 = vshll.u32 %v608_v25, 16 }
  0x26   : > { %v3104_v38 = vsel %vm1589_vm0, %v10507_v34, 0  ;;  %v623_v40 = vrot.slane %v621_v30, 7  ;;  %v631_v41 = vrot.slane %v629_v32, 7  ;;  %v414_v43 = vadd.f32 %v11453_v45, %v378_v22  ;;  %v1019_v56 = vld [vmem:[#allocation2 + $0x90] sm:$0xf] }
  0x27   : > { %3113 = vmatpush.bf16.msrb.mxu0 %v3104_v38  ;;  %v445_v44 = vmax.f32 %v413_v26, 0.0  ;;  %v810_v48 = vrot.slane %v808_v36, 7  ;;  %v816_v49 = vshrl.u32 %v609_v35, 16  ;;  %v819_v50 = vshll.u32 %v609_v35, 16  ;;  %v1023_v0 = vld [vmem:[#allocation2 + $0x98] sm:$0x1] }
  0x28   : > { %v399_v51 = vmul.f32 %v11425_v27, %v11246_v23  ;;  %v626_v52 = vor.u32 %v624_v31, %v623_v40  ;;  %v627_v53 = vrot.slane %v623_v40, 4  ;;  %v634_v54 = vor.u32 %v632_v33, %v631_v41 }
  0x29   : > { %v636_v55 = vrot.slane %v631_v41, 4  ;;  %v813_v57 = vor.u32 %v811_v37, %v810_v48  ;;  %v814_v58 = vrot.slane %v810_v48, 4  ;;  %v818_v59 = vrot.slane %v816_v49, 7  ;;  %v949_v26 = vld [vmem:[#allocation2 + $0x18] sm:$0xf] }
  0x2a   : > { %v446_v60 = vmax.f32 %v414_v43, 0.0  ;;  %v635_v61 = vsel %vm11500_vm6, %v627_v53, %v634_v54  ;;  %v943_v62 = vsel %vm11493_vm5, %v626_v52, %v942_v42  ;;  %v588_v1 = vpack.c.bf16 %v445_v44, %v445_v44  ;;  %v953_v37 = vld [vmem:[#allocation2 + $0x20] sm:$0x1] }
  0x2b   : > { %v947_v63 = vsel %vm11402_vm11, %v636_v55, %v946_v47  ;;  %944 = vst [vmem:[#allocation2 + $0xc] sm:$0xf] %v943_v62  ;;  %v821_v3 = vor.u32 %v819_v50, %v818_v59  ;;  %v823_v5 = vrot.slane %v818_v59, 4  ;;  %v1020_v6 = vsel %vm11493_vm5, %v813_v57, %v1019_v56  ;;  %v11544_v62 = vld [vmem:[%s11440_s18 + $0x68] sm:$0xff]  }
  0x2c   : > { %v589_v7 = vpack.c.bf16 %v446_v60, %v446_v60  ;;  %945 = vst.msk [vmem:[#allocation2 + $0x10] sm:$0xf] %vm475_vm1, %v635_v61  ;;  %v638_v9 = vshrl.u32 %v588_v1, 16  ;;  %v641_v10 = vshll.u32 %v588_v1, 16  ;;  %v400_v11 = vmul.f32 %v11425_v27, %v11247_v29 }
  0x2d   : > { %v435_v13 = vadd.f32 %v11453_v45, %v399_v51  ;;  %948 = vst [vmem:[#allocation2 + $0x14] sm:$0x1] %v947_v63  ;;  %v822_v15 = vsel %vm11500_vm6, %v814_v58, %v821_v3  ;;  %v1024_v16 = vsel %vm11402_vm11, %v823_v5, %v1023_v0  ;;  %v525_v24 = vsel %vm11402_vm11, 0, %v524_v2 }
  0x2e   : > { %v646_v17 = vshrl.u32 %v589_v7, 16  ;;  %v649_v18 = vshll.u32 %v589_v7, 16  ;;  %1021 = vst [vmem:[#allocation2 + $0x90] sm:$0xf] %v1020_v6  ;;  %v640_v20 = vrot.slane %v638_v9, 7  ;;  %v436_v22 = vadd.f32 %v11453_v45, %v400_v11 }
  0x2f   : > { %v467_v23 = vmax.f32 %v435_v13, 0.0  ;;  %1022 = vst.msk [vmem:[#allocation2 + $0x94] sm:$0xf] %vm475_vm1, %v822_v15  ;;  %v575_v29 = vsel %vm11416_vm13, 0, %v574_v8  ;;  %v11206_v30 = vunpack.c.l.bf16 %v11261_v14  ;;  %v11207_v31 = vunpack.c.h.bf16 %v11261_v14 }
  0x30   : > { %v648_v25 = vrot.slane %v646_v17, 7  ;;  %1025 = vst [vmem:[#allocation2 + $0x98] sm:$0x1] %v1024_v16  ;;  %v643_v32 = vor.u32 %v641_v10, %v640_v20  ;;  %v644_v33 = vrot.slane %v640_v20, 4  ;;  %v468_v34 = vmax.f32 %v436_v22, 0.0 }
  0x31   : > { %526 = vst [vmem:[#allocation2 + $0x9c] sm:$0x1] %v525_v24  ;;  %v11529_v42 = vpack.c.bf16 %v467_v23, %v467_v23  ;;  %v11532_v43 = vmul.f32 %v11425_v27, %v11206_v30  ;;  %v11535_v44 = vmul.f32 %v11425_v27, %v11207_v31  ;;  %v11251_v24 = vunpack.c.h.bf16 %v11544_v62 }
  0x32   : > { %v651_v35 = vor.u32 %v649_v18, %v648_v25  ;;  %v653_v36 = vrot.slane %v648_v25, 4  ;;  %v1056_v38 = vld [vmem:[#allocation2 + $0xc] sm:$0xf]  ;;  %v950_v41 = vsel %vm11493_vm5, %v643_v32, %v949_v26  ;;  %576 = vst [vmem:[#allocation2 + $0xa4] sm:$0x1] %v575_v29  ;;  %v11537_v51 = vpack.c.bf16 %v468_v34, %v468_v34 }
  0x33   : > { %v1903_v40 = vld [vmem:[#allocation2 + $0xc] sm:$0xe]  ;;  %v1057_v47 = vld [vmem:[#allocation2 + $0x10] sm:$0xf]  ;;  %v1131_v48 = vshrl.u32 %v1056_v38, 16  ;;  %v1134_v49 = vshll.u32 %v1056_v38, 16  ;;  %v11250_v18 = vunpack.c.l.bf16 %v11544_v62 }
  0x34   : > { %v10394_v50 = vrot.slane %v1903_v40, 9  ;;  %v1088_v52 = vld [vmem:[#allocation2 + $0x14] sm:$0x1]  ;;  %v1140_v53 = vshll.u32 %v1057_v47, 16  ;;  %v1144_v54 = vshrl.u32 %v1057_v47, 16  ;;  %v1962_v55 = vrot.slane %v1057_v47, 5 }
  0x35   : > { %v652_v56 = vsel %vm11500_vm6, %v644_v33, %v651_v35  ;;  %v1133_v57 = vrot.slane %v1131_v48, 4  ;;  %v1136_v58 = vrot.slane %v1134_v49, 5  ;;  %v1150_v59 = vshll.u32 %v1088_v52, 16  ;;  %v1078_v60 = vld [vmem:[#allocation2 + $0x90] sm:$0xf] }
  0x36   : > { %v954_v61 = vsel %vm11402_vm11, %v653_v36, %v953_v37  ;;  %v1142_v63 = vrot.slane %v1140_v53, 5  ;;  %v1146_v0 = vrot.slane %v1144_v54, 4  ;;  %v11546_v1 = vld [vmem:[#allocation2 + $0x94] sm:$0xf]  ;;  %v1395_v2 = vshrl.u32 %v1078_v60, 16  ;;  %v11101_v35 = vld [vmem:[#allocation2 + $0xc] sm:$0xff] }
  0x37   : > { %v1398_v3 = vshll.u32 %v1078_v60, 16  ;;  %v1137_v5 = vor.u32 %v1136_v58, %v1133_v57  ;;  %v1152_v6 = vrot.slane %v1150_v59, 5  ;;  %v1099_v7 = vld [vmem:[#allocation2 + $0x98] sm:$0x1]  ;;  %v1404_v8 = vshll.u32 %v11546_v1, 16  ;;  %10378 = vmatmul.msk.bf16.gmra.mxu1 %vm1540_vm14, %v11101_v35 }
  0x38   : > { %v1408_v9 = vshrl.u32 %v11546_v1, 16  ;;  %v1147_v10 = vor.u32 %v1146_v0, %v1142_v63  ;;  %v1397_v11 = vrot.slane %v1395_v2, 4  ;;  %v1414_v14 = vshll.u32 %v1099_v7, 16  ;;  %951 = vst [vmem:[#allocation2 + $0x18] sm:$0xf] %v950_v41 }
  0x39   : > { %v1400_v13 = vrot.slane %v1398_v3, 5  ;;  %v1138_v15 = vrot.slane %v1137_v5, 4  ;;  %v1406_v16 = vrot.slane %v1404_v8, 5  ;;  %952 = vst.msk [vmem:[#allocation2 + $0x1c] sm:$0xf] %vm475_vm1, %v652_v56  ;;  %v1965_v23 = vrot.slane %v1088_v52, 5 }
  0x3a   : > { %v1410_v17 = vrot.slane %v1408_v9, 4  ;;  %v1148_v20 = vrot.slane %v1147_v10, 4  ;;  %955 = vst [vmem:[#allocation2 + $0x20] sm:$0x1] %v954_v61  ;;  %v1416_v29 = vrot.slane %v1414_v14, 5  ;;  %v1963_v30 = vsel %vm11410_vm12, %v10394_v50, %v1962_v55 }
  0x3b   : > { %v1401_v22 = vor.u32 %v1400_v13, %v1397_v11  ;;  %v1143_v25 = vsel %vm11429_vm15, %v1138_v15, %v1142_v63  ;;  %v1964_v34 = vrot.slane %v1962_v55, 4  ;;  %v2069_v38 = vunpack.c.l.b16 %v1963_v30  ;;  %v1026_v61 = vld [vmem:[#allocation2 + $0x9c] sm:$0xf]  ;;  %v1030_v15 = vld [vmem:[#allocation2 + $0xa4] sm:$0x1] }
  0x3c   : > { %v1411_v26 = vor.u32 %v1410_v17, %v1406_v16  ;;  %v1153_v31 = vsel %vm11429_vm15, %v1148_v20, %v1152_v6  ;;  %v1494_v32 = vunpack.c.l.b16 %v1143_v25  ;;  %v825_v40 = vshrl.u32 %v11529_v42, 16 }
  0x3d   : > { %v1402_v33 = vrot.slane %v1401_v22, 4  ;;  %v1495_v36 = vunpack.c.l.b16 %v1153_v31  ;;  %v1966_v47 = vsel %vm11410_vm12, %v1964_v34, %v1965_v23  ;;  %v828_v48 = vshll.u32 %v11529_v42, 16 }
  0x3e   : > { %v1412_v37 = vrot.slane %v1411_v26, 4  ;;  %v833_v49 = vshrl.u32 %v11537_v51, 16  ;;  %v2070_v54 = vunpack.c.l.b16 %v1966_v47  ;;  %v827_v60 = vrot.slane %v825_v40, 7  ;;  %v544_v47 = vld [vmem:[#allocation2 + $0x2c] sm:$0x1] }
  0x3f   : > { %v1407_v41 = vsel %vm11429_vm15, %v1402_v33, %v1406_v16  ;;  %v1525_v50 = vpack.c.b16 %v1495_v36, %v1494_v32  ;;  %v1058_v55 = vld [vmem:[#allocation2 + $0x18] sm:$0xf]  ;;  %v836_v20 = vshll.u32 %v11537_v51, 16  ;;  %v415_v36 = vadd.f32 %v11453_v45, %v11532_v43 }
  0x40   : > { %v1417_v52 = vsel %vm11429_vm15, %v1412_v37, %v1416_v29  ;;  %v1516_v53 = vunpack.c.l.b16 %v1407_v41  ;;  %v1059_v57 = vld [vmem:[#allocation2 + $0x1c] sm:$0xf]  ;;  %v1155_v58 = vshrl.u32 %v1058_v55, 16  ;;  %v1158_v59 = vshll.u32 %v1058_v55, 16  ;;  %v1904_v9 = vld [vmem:[#allocation2 + $0x18] sm:$0xe] }
  0x41   : > { %v1517_v56 = vunpack.c.l.b16 %v1417_v52  ;;  %10298 = vmatmul.msk.bf16.gmra.mxu0 %vm1540_vm14, %v1525_v50  ;;  %v2100_v42 = vpack.c.b16 %v2070_v54, %v2069_v38  ;;  %v1089_v63 = vld [vmem:[#allocation2 + $0x20] sm:$0x1]  ;;  %v1164_v0 = vshll.u32 %v1059_v57, 16  ;;  %v1168_v2 = vshrl.u32 %v1059_v57, 16  ;;  %v494_v37 = vld [vmem:[#allocation2 + $0x24] sm:$0x1] }
  0x42   : > { %v835_v3 = vrot.slane %v833_v49, 7  ;;  %v1157_v6 = vrot.slane %v1155_v58, 4  ;;  %v1160_v7 = vrot.slane %v1158_v59, 5  ;;  %v1174_v8 = vshll.u32 %v1089_v63, 16  ;;  %v527_v52 = vld [vmem:[#allocation2 + $0xa8] sm:$0x1] }
  0x43   : > { %v1536_v5 = vpack.c.b16 %v1517_v56, %v1516_v53  ;;  %10411 = vmatmul.msk.bf16.gmra.mxu2 %vm1540_vm14, %v2100_v42  ;;  %v1166_v10 = vrot.slane %v1164_v0, 5  ;;  %v1170_v11 = vrot.slane %v1168_v2, 4  ;;  %v830_v13 = vor.u32 %v828_v48, %v827_v60  ;;  %v577_v0 = vld [vmem:[#allocation2 + $0xb0] sm:$0x1] }
  0x44   : > { %v831_v14 = vrot.slane %v827_v60, 4  ;;  %v1161_v16 = vor.u32 %v1160_v7, %v1157_v6  ;;  %v1176_v17 = vrot.slane %v1174_v8, 5  ;;  %v840_v22 = vrot.slane %v835_v3, 4 }
  0x45   : > { %10309 = vmatmul.msk.bf16.vlgmr.msra.gmra.mxu3 %vm1540_vm14, %v1536_v5  ;;  %v1171_v23 = vor.u32 %v1170_v11, %v1166_v10  ;;  %v1027_v25 = vsel %vm11493_vm5, %v830_v13, %v1026_v61  ;;  %v10395_v26 = vrot.slane %v1904_v9, 9  ;;  %v1969_v29 = vrot.slane %v1059_v57, 5 }
  0x46   : > { %11277 = vmatpush.bf16.msra.mxu3 %v11383_v4  ;;  %v1162_v30 = vrot.slane %v1161_v16, 4  ;;  %v838_v31 = vor.u32 %v836_v20, %v835_v3  ;;  %1028 = vst [vmem:[#allocation2 + $0x9c] sm:$0xf] %v1027_v25  ;;  %v1031_v32 = vsel %vm11402_vm11, %v840_v22, %v1030_v15  ;;  %v1972_v33 = vrot.slane %v1089_v63, 5 }
  0x47   : > { %v1172_v34 = vrot.slane %v1171_v23, 4  ;;  %1032 = vst [vmem:[#allocation2 + $0xa4] sm:$0x1] %v1031_v32  ;;  %v1970_v51 = vsel %vm11410_vm12, %v10395_v26, %v1969_v29  ;;  %v1971_v35 = vrot.slane %v1969_v29, 4  ;;  %v416_v41 = vadd.f32 %v11453_v45, %v11535_v44 }
  0x48   : > { %v1167_v4 = vsel %vm11429_vm15, %v1162_v30, %v1166_v10  ;;  %v839_v38 = vsel %vm11500_vm6, %v831_v14, %v838_v31  ;;  %v2071_v40 = vunpack.c.l.b16 %v1970_v51  ;;  %v447_v50 = vmax.f32 %v415_v36, 0.0  ;;  %v11102_v30 = vld [vmem:[#allocation2 + $0x18] sm:$0xff] }
  0x49   : > { %v1177_v48 = vsel %vm11429_vm15, %v1172_v34, %v1176_v17  ;;  %v1496_v49 = vunpack.c.l.b16 %v1167_v4  ;;  %1029 = vst.msk [vmem:[#allocation2 + $0xa0] sm:$0xf] %vm475_vm1, %v839_v38  ;;  %v1973_v43 = vsel %vm11410_vm12, %v1971_v35, %v1972_v33  ;;  %v448_v55 = vmax.f32 %v416_v41, 0.0  ;;  %v11262_v35 = vld [vmem:[%s11440_s18 + $0x18] sm:$0xff]   ;;  %10379 = vmatmul.msk.bf16.gmra.mxu1 %vm1540_vm14, %v11102_v30 }
  0x4a   : > { %v1497_v53 = vunpack.c.l.b16 %v1177_v48  ;;  %v2072_v54 = vunpack.c.l.b16 %v1973_v43  ;;  %v495_v56 = vsel %vm11402_vm11, 0, %v494_v37  ;;  %v545_v44 = vsel %vm11416_vm13, 0, %v544_v47  ;;  %v497_v43 = vld [vmem:[#allocation2 + $0x30] sm:$0x1] }
  0x4b   : > { %496 = vst [vmem:[#allocation2 + $0x24] sm:$0x1] %v495_v56  ;;  %v590_v57 = vpack.c.bf16 %v447_v50, %v447_v50  ;;  %v401_v58 = vmul.f32 %v11425_v27, %v11250_v18  ;;  %v402_v59 = vmul.f32 %v11425_v27, %v11251_v24  ;;  %v591_v42 = vpack.c.bf16 %v448_v55, %v448_v55  ;;  %v547_v55 = vld [vmem:[#allocation2 + $0x38] sm:$0x1] }
  0x4c   : > { %v1526_v60 = vpack.c.b16 %v1497_v53, %v1496_v49  ;;  %v2101_v61 = vpack.c.b16 %v2072_v54, %v2071_v40  ;;  %546 = vst [vmem:[#allocation2 + $0x2c] sm:$0x1] %v545_v44  ;;  %v528_v63 = vsel %vm11402_vm11, 0, %v527_v52  ;;  %v578_v22 = vsel %vm11416_vm13, 0, %v577_v0 }
  0x4d   : > { %v1080_v2 = vld [vmem:[#allocation2 + $0x9c] sm:$0xf]  ;;  %v655_v3 = vshrl.u32 %v590_v57, 16  ;;  %v658_v5 = vshll.u32 %v590_v57, 16  ;;  %v437_v6 = vadd.f32 %v11453_v45, %v401_v58  ;;  %v438_v7 = vadd.f32 %v11453_v45, %v402_v59  ;;  %529 = vst [vmem:[#allocation2 + $0xa8] sm:$0x1] %v528_v63 }
  0x4e   : > { %v1100_v18 = vld [vmem:[#allocation2 + $0xa4] sm:$0x1]  ;;  %v1419_v62 = vshrl.u32 %v1080_v2, 16  ;;  %v1422_v8 = vshll.u32 %v1080_v2, 16  ;;  %v663_v24 = vshrl.u32 %v591_v42, 16  ;;  %v666_v9 = vshll.u32 %v591_v42, 16 }
  0x4f   : > { %v1438_v10 = vshll.u32 %v1100_v18, 16  ;;  %v657_v11 = vrot.slane %v655_v3, 7  ;;  %v469_v13 = vmax.f32 %v437_v6, 0.0  ;;  %v470_v14 = vmax.f32 %v438_v7, 0.0  ;;  %579 = vst [vmem:[#allocation2 + $0xb0] sm:$0x1] %v578_v22 }
  0x50   : > { %v1081_v15 = vld [vmem:[#allocation2 + $0xa0] sm:$0xf]  ;;  %v1421_v16 = vrot.slane %v1419_v62, 4  ;;  %v1424_v17 = vrot.slane %v1422_v8, 5  ;;  %v665_v20 = vrot.slane %v663_v24, 7  ;;  %v11210_v54 = vunpack.c.l.bf16 %v11262_v35  ;;  %v11273_v6 = vld [vmem:[%s11440_s18 + $0x70] sm:$0xff]  }
  0x51   : > { %10299 = vmatmul.msk.bf16.gmra.mxu0 %vm1540_vm14, %v1526_v60  ;;  %v1428_v23 = vshll.u32 %v1081_v15, 16  ;;  %v1432_v25 = vshrl.u32 %v1081_v15, 16  ;;  %v1440_v26 = vrot.slane %v1438_v10, 5  ;;  %v660_v29 = vor.u32 %v658_v5, %v657_v11 }
  0x52   : > { %v1425_v31 = vor.u32 %v1424_v17, %v1421_v16  ;;  %v661_v32 = vrot.slane %v657_v11, 4  ;;  %v668_v33 = vor.u32 %v666_v9, %v665_v20  ;;  %v670_v34 = vrot.slane %v665_v20, 4  ;;  %v956_v51 = vld [vmem:[#allocation2 + $0x24] sm:$0xf] }
  0x53   : > { %v1430_v36 = vrot.slane %v1428_v23, 5  ;;  %v1434_v37 = vrot.slane %v1432_v25, 4  ;;  %10412 = vmatmul.msk.bf16.gmra.mxu2 %vm1540_vm14, %v2101_v61  ;;  %v957_v4 = vsel %vm11493_vm5, %v660_v29, %v956_v51  ;;  %v960_v38 = vld [vmem:[#allocation2 + $0x2c] sm:$0x1]  ;;  %v612_v40 = vpack.c.bf16 %v469_v13, %v469_v13 }
  0x54   : > { %v1426_v41 = vrot.slane %v1425_v31, 4  ;;  %v669_v47 = vsel %vm11500_vm6, %v661_v32, %v668_v33  ;;  %958 = vst [vmem:[#allocation2 + $0x24] sm:$0xf] %v957_v4  ;;  %v961_v48 = vsel %vm11402_vm11, %v670_v34, %v960_v38  ;;  %v613_v49 = vpack.c.bf16 %v470_v14, %v470_v14  ;;  %v1033_v0 = vld [vmem:[#allocation2 + $0xa8] sm:$0xf] }
  0x55   : > { %v1435_v50 = vor.u32 %v1434_v37, %v1430_v36  ;;  %959 = vst.msk [vmem:[#allocation2 + $0x28] sm:$0xf] %vm475_vm1, %v669_v47  ;;  %v842_v52 = vshrl.u32 %v612_v40, 16  ;;  %v845_v53 = vshll.u32 %v612_v40, 16  ;;  %v11211_v58 = vunpack.c.h.bf16 %v11262_v35 }
  0x56   : > { %v1431_v56 = vsel %vm11429_vm15, %v1426_v41, %v1430_v36  ;;  %962 = vst [vmem:[#allocation2 + $0x2c] sm:$0x1] %v961_v48  ;;  %v850_v44 = vshrl.u32 %v613_v49, 16  ;;  %v853_v57 = vshll.u32 %v613_v49, 16  ;;  %v381_v42 = vmul.f32 %v11425_v27, %v11210_v54  ;;  %v1037_v11 = vld [vmem:[#allocation2 + $0xb0] sm:$0x1] }
  0x57   : > { %v1436_v59 = vrot.slane %v1435_v50, 4  ;;  %v1518_v60 = vunpack.c.l.b16 %v1431_v56  ;;  %v844_v61 = vrot.slane %v842_v52, 7  ;;  %v382_v2 = vmul.f32 %v11425_v27, %v11211_v58 }
  0x58   : > { %v852_v63 = vrot.slane %v850_v44, 7  ;;  %v498_v3 = vsel %vm11402_vm11, 0, %v497_v43  ;;  %v548_v5 = vsel %vm11416_vm13, 0, %v547_v55  ;;  %v417_v8 = vadd.f32 %v11453_v45, %v381_v42 }
  0x59   : > { %v1441_v7 = vsel %vm11429_vm15, %v1436_v59, %v1440_v26  ;;  %v847_v18 = vor.u32 %v845_v53, %v844_v61  ;;  %v848_v62 = vrot.slane %v844_v61, 4  ;;  %499 = vst [vmem:[#allocation2 + $0x30] sm:$0x1] %v498_v3  ;;  %v418_v13 = vadd.f32 %v11453_v45, %v382_v2 }
  0x5a   : > { %v1519_v24 = vunpack.c.l.b16 %v1441_v7  ;;  %v855_v9 = vor.u32 %v853_v57, %v852_v63  ;;  %v857_v10 = vrot.slane %v852_v63, 4  ;;  %549 = vst [vmem:[#allocation2 + $0x38] sm:$0x1] %v548_v5  ;;  %v449_v17 = vmax.f32 %v417_v8, 0.0 }
  0x5b   : > { %v1060_v14 = vld [vmem:[#allocation2 + $0x24] sm:$0xf]  ;;  %v1034_v15 = vsel %vm11493_vm5, %v847_v18, %v1033_v0  ;;  %v11254_v20 = vunpack.c.l.bf16 %v11273_v6  ;;  %v11255_v22 = vunpack.c.h.bf16 %v11273_v6  ;;  %v450_v43 = vmax.f32 %v418_v13, 0.0 }
  0x5c   : > { %v1905_v16 = vld [vmem:[#allocation2 + $0x24] sm:$0xe]  ;;  %v1537_v23 = vpack.c.b16 %v1519_v24, %v1518_v60  ;;  %v1061_v25 = vld [vmem:[#allocation2 + $0x28] sm:$0xf]  ;;  %v1179_v26 = vshrl.u32 %v1060_v14, 16  ;;  %v1182_v29 = vshll.u32 %v1060_v14, 16  ;;  %v856_v30 = vsel %vm11500_vm6, %v848_v62, %v855_v9 }
  0x5d   : > { %1035 = vst [vmem:[#allocation2 + $0xa8] sm:$0xf] %v1034_v15  ;;  %v1090_v31 = vld [vmem:[#allocation2 + $0x2c] sm:$0x1]  ;;  %v1188_v32 = vshll.u32 %v1061_v25, 16  ;;  %v1192_v33 = vshrl.u32 %v1061_v25, 16  ;;  %v1038_v34 = vsel %vm11402_vm11, %v857_v10, %v1037_v11  ;;  %v592_v51 = vpack.c.bf16 %v449_v17, %v449_v17 }
  0x5e   : > { %1036 = vst.msk [vmem:[#allocation2 + $0xac] sm:$0xf] %vm475_vm1, %v856_v30  ;;  %10310 = vmatmul.msk.bf16.gmra.mxu3 %vm1540_vm14, %v1537_v23  ;;  %v1181_v35 = vrot.slane %v1179_v26, 4  ;;  %v1184_v36 = vrot.slane %v1182_v29, 5  ;;  %v1198_v37 = vshll.u32 %v1090_v31, 16  ;;  %v10396_v4 = vrot.slane %v1905_v16, 9 }
  0x5f   : > { %1039 = vst [vmem:[#allocation2 + $0xb0] sm:$0x1] %v1038_v34  ;;  %v1190_v38 = vrot.slane %v1188_v32, 5  ;;  %v1194_v40 = vrot.slane %v1192_v33, 4  ;;  %v1976_v41 = vrot.slane %v1061_v25, 5  ;;  %v1979_v47 = vrot.slane %v1090_v31, 5 }
  0x60   : > { %v1185_v48 = vor.u32 %v1184_v36, %v1181_v35  ;;  %v1200_v49 = vrot.slane %v1198_v37, 5  ;;  %v672_v50 = vshrl.u32 %v592_v51, 16  ;;  %v675_v55 = vshll.u32 %v592_v51, 16  ;;  %v963_v14 = vld [vmem:[#allocation2 + $0x30] sm:$0xf]  ;;  %v11263_v31 = vld [vmem:[%s11440_s18 + $0x20] sm:$0xff]  }
  0x61   : > { %v1195_v52 = vor.u32 %v1194_v40, %v1190_v38  ;;  %v1977_v53 = vsel %vm11410_vm12, %v10396_v4, %v1976_v41  ;;  %v1978_v54 = vrot.slane %v1976_v41, 4  ;;  %v593_v57 = vpack.c.bf16 %v450_v43, %v450_v43  ;;  %v580_v30 = vld [vmem:[#allocation2 + $0xbc] sm:$0x1]  ;;  %v967_v43 = vld [vmem:[#allocation2 + $0x38] sm:$0x1] }
  0x62   : > { %v1186_v56 = vrot.slane %v1185_v48, 4  ;;  %v2073_v44 = vunpack.c.l.b16 %v1977_v53  ;;  %v11643_v58 = vrot.slane %v672_v50, 7  ;;  %v403_v42 = vmul.f32 %v11425_v27, %v11254_v20 }
  0x63   : > { %v1196_v59 = vrot.slane %v1195_v52, 4  ;;  %v1980_v61 = vsel %vm11410_vm12, %v1978_v54, %v1979_v47  ;;  %v404_v63 = vmul.f32 %v11425_v27, %v11255_v22  ;;  %v530_v22 = vld [vmem:[#allocation2 + $0xb4] sm:$0x1]  ;;  %v680_v33 = vshrl.u32 %v593_v57, 16 }
  0x64   : > { %v1082_v60 = vld [vmem:[#allocation2 + $0xa8] sm:$0xf]  ;;  %v1191_v0 = vsel %vm11429_vm15, %v1186_v56, %v1190_v38  ;;  %v2074_v6 = vunpack.c.l.b16 %v1980_v61  ;;  %v677_v20 = vor.u32 %v675_v55, %v11643_v58  ;;  %v678_v29 = vrot.slane %v11643_v58, 4  ;;  %v500_v38 = vld [vmem:[#allocation2 + $0x3c] sm:$0x1] }
  0x65   : > { %v1083_v2 = vld [vmem:[#allocation2 + $0xac] sm:$0xf]  ;;  %v1443_v3 = vshrl.u32 %v1082_v60, 16  ;;  %v1446_v5 = vshll.u32 %v1082_v60, 16  ;;  %v1201_v7 = vsel %vm11429_vm15, %v1196_v59, %v1200_v49  ;;  %v1498_v18 = vunpack.c.l.b16 %v1191_v0 }
  0x66   : > { %v1101_v62 = vld [vmem:[#allocation2 + $0xb0] sm:$0x1]  ;;  %v1452_v8 = vshll.u32 %v1083_v2, 16  ;;  %v1456_v24 = vshrl.u32 %v1083_v2, 16  ;;  %v1499_v9 = vunpack.c.l.b16 %v1201_v7  ;;  %v2102_v17 = vpack.c.b16 %v2074_v6, %v2073_v44 }
  0x67   : > { %v1445_v10 = vrot.slane %v1443_v3, 4  ;;  %v1448_v11 = vrot.slane %v1446_v5, 5  ;;  %v1462_v13 = vshll.u32 %v1101_v62, 16  ;;  %v683_v34 = vshll.u32 %v593_v57, 16  ;;  %v11103_v57 = vld [vmem:[#allocation2 + $0x24] sm:$0xff] }
  0x68   : > { %v1454_v15 = vrot.slane %v1452_v8, 5  ;;  %v1458_v16 = vrot.slane %v1456_v24, 4  ;;  %v1527_v23 = vpack.c.b16 %v1499_v9, %v1498_v18  ;;  %10413 = vmatmul.msk.bf16.gmra.mxu2 %vm1540_vm14, %v2102_v17  ;;  %v964_v51 = vsel %vm11493_vm5, %v677_v20, %v963_v14  ;;  %10380 = vmatmul.msk.bf16.gmra.mxu1 %vm1540_vm14, %v11103_v57  ;;  %v11681_v62 = vld [vmem:[%s11440_s18 + $0x28] sm:$0xff]  }
  0x69   : > { %v1449_v25 = vor.u32 %v1448_v11, %v1445_v10  ;;  %v1464_v26 = vrot.slane %v1462_v13, 5  ;;  %965 = vst [vmem:[#allocation2 + $0x30] sm:$0xf] %v964_v51  ;;  %v439_v36 = vadd.f32 %v11453_v45, %v403_v42  ;;  %v440_v37 = vadd.f32 %v11453_v45, %v404_v63  ;;  %v550_v42 = vld [vmem:[#allocation2 + $0x44] sm:$0x1] }
  0x6a   : > { %v1459_v32 = vor.u32 %v1458_v16, %v1454_v15  ;;  %10300 = vmatmul.msk.bf16.gmra.mxu0 %vm1540_vm14, %v1527_v23  ;;  %v531_v4 = vsel %vm11402_vm11, 0, %v530_v22  ;;  %v682_v41 = vrot.slane %v680_v33, 7  ;;  %v581_v47 = vsel %vm11416_vm13, 0, %v580_v30 }
  0x6b   : > { %v1450_v35 = vrot.slane %v1449_v25, 4  ;;  %532 = vst [vmem:[#allocation2 + $0xb4] sm:$0x1] %v531_v4  ;;  %v11214_v48 = vunpack.c.l.bf16 %v11263_v31  ;;  %v471_v50 = vmax.f32 %v439_v36, 0.0  ;;  %v472_v52 = vmax.f32 %v440_v37, 0.0 }
  0x6c   : > { %v1460_v40 = vrot.slane %v1459_v32, 4  ;;  %582 = vst [vmem:[#allocation2 + $0xbc] sm:$0x1] %v581_v47  ;;  %v11215_v53 = vunpack.c.h.bf16 %v11263_v31  ;;  %v685_v56 = vor.u32 %v683_v34, %v682_v41  ;;  %v687_v44 = vrot.slane %v682_v41, 4  ;;  %v11695_v4 = vld [vmem:[%s15784_s1] ss:$0 sm:$0xff] }
  0x6d   : > { %v1455_v49 = vsel %vm11429_vm15, %v1450_v35, %v1454_v15  ;;  %v614_v59 = vpack.c.bf16 %v471_v50, %v471_v50  ;;  %v615_v60 = vpack.c.bf16 %v472_v52, %v472_v52  ;;  %v383_v61 = vmul.f32 %v11425_v27, %v11214_v48 }
  0x6e   : > { %v1465_v54 = vsel %vm11429_vm15, %v1460_v40, %v1464_v26  ;;  %v1520_v55 = vunpack.c.l.b16 %v1455_v49  ;;  %v686_v63 = vsel %vm11500_vm6, %v678_v29, %v685_v56  ;;  %v968_v0 = vsel %vm11402_vm11, %v687_v44, %v967_v43 }
  0x6f   : > { %v1521_v58 = vunpack.c.l.b16 %v1465_v54  ;;  %v384_v2 = vmul.f32 %v11425_v27, %v11215_v53  ;;  %v501_v3 = vsel %vm11402_vm11, 0, %v500_v38  ;;  %966 = vst.msk [vmem:[#allocation2 + $0x34] sm:$0xf] %vm475_vm1, %v686_v63  ;;  %v859_v6 = vshrl.u32 %v614_v59, 16 }
  0x70   : > { %v862_v7 = vshll.u32 %v614_v59, 16  ;;  %v867_v18 = vshrl.u32 %v615_v60, 16  ;;  %969 = vst [vmem:[#allocation2 + $0x38] sm:$0x1] %v968_v0  ;;  %v1062_v8 = vld [vmem:[#allocation2 + $0x30] sm:$0xf]  ;;  %v419_v9 = vadd.f32 %v11453_v45, %v383_v61  ;;  %v11218_v25 = vunpack.c.l.bf16 %v11681_v62 }
  0x71   : > { %v1538_v5 = vpack.c.b16 %v1521_v58, %v1520_v55  ;;  %v870_v24 = vshll.u32 %v615_v60, 16  ;;  %v420_v10 = vadd.f32 %v11453_v45, %v384_v2  ;;  %v551_v27 = vsel %vm11416_vm13, 0, %v550_v42  ;;  %v1906_v20 = vld [vmem:[#allocation2 + $0x30] sm:$0xe]  ;;  %502 = vst [vmem:[#allocation2 + $0x3c] sm:$0x1] %v501_v3 }
  0x72   : > { %v1203_v11 = vshrl.u32 %v1062_v8, 16  ;;  %v1206_v13 = vshll.u32 %v1062_v8, 16  ;;  %v861_v14 = vrot.slane %v859_v6, 7  ;;  %v869_v15 = vrot.slane %v867_v18, 7  ;;  %v1040_v16 = vld [vmem:[#allocation2 + $0xb4] sm:$0xf] }
  0x73   : > { %10311 = vmatmul.msk.bf16.gmra.mxu3 %vm1540_vm14, %v1538_v5  ;;  %v1044_v17 = vld [vmem:[#allocation2 + $0xbc] sm:$0x1]  ;;  %v451_v22 = vmax.f32 %v419_v9, 0.0  ;;  %v452_v23 = vmax.f32 %v420_v10, 0.0  ;;  %v11219_v26 = vunpack.c.h.bf16 %v11681_v62  ;;  %v10397_v34 = vrot.slane %v1906_v20, 9 }
  0x74   : > { %v1205_v29 = vrot.slane %v1203_v11, 4  ;;  %v1208_v45 = vrot.slane %v1206_v13, 5  ;;  %v864_v30 = vor.u32 %v862_v7, %v861_v14  ;;  %v865_v31 = vrot.slane %v861_v14, 4  ;;  %552 = vst [vmem:[#allocation2 + $0x44] sm:$0x1] %v551_v27 }
  0x75   : > { %v872_v32 = vor.u32 %v870_v24, %v869_v15  ;;  %v874_v33 = vrot.slane %v869_v15, 4  ;;  %v594_v51 = vpack.c.bf16 %v451_v22, %v451_v22  ;;  %v595_v37 = vpack.c.bf16 %v452_v23, %v452_v23 }
  0x76   : > { %v1209_v35 = vor.u32 %v1208_v45, %v1205_v29  ;;  %v1041_v36 = vsel %vm11493_vm5, %v864_v30, %v1040_v16  ;;  %v385_v38 = vmul.f32 %v11695_v4, %v11218_v25  ;;  %v1063_v40 = vld [vmem:[#allocation2 + $0x34] sm:$0xf]  ;;  %v386_v15 = vmul.f32 %v11695_v4, %v11219_v26  ;;  %v11715_v16 = vld [vmem:[%s15785_s2] ss:$0 sm:$0xff]  ;;  %v503_v29 = vld [vmem:[#allocation2 + $0x48] sm:$0x1] }
  0x77   : > { %v873_v41 = vsel %vm11500_vm6, %v865_v31, %v872_v32  ;;  %1042 = vst [vmem:[#allocation2 + $0xb4] sm:$0xf] %v1041_v36  ;;  %v1045_v47 = vsel %vm11402_vm11, %v874_v33, %v1044_v17  ;;  %v689_v48 = vshrl.u32 %v594_v51, 16  ;;  %v692_v49 = vshll.u32 %v594_v51, 16  ;;  %v1091_v43 = vld [vmem:[#allocation2 + $0x38] sm:$0x1] }
  0x78   : > { %v1210_v50 = vrot.slane %v1209_v35, 4  ;;  %v1212_v52 = vshll.u32 %v1063_v40, 16  ;;  %v1216_v53 = vshrl.u32 %v1063_v40, 16  ;;  %v1983_v54 = vrot.slane %v1063_v40, 5  ;;  %1043 = vst.msk [vmem:[#allocation2 + $0xb8] sm:$0xf] %vm475_vm1, %v873_v41 }
  0x79   : > { %v1222_v55 = vshll.u32 %v1091_v43, 16  ;;  %v1986_v56 = vrot.slane %v1091_v43, 5  ;;  %v691_v44 = vrot.slane %v689_v48, 7  ;;  %v697_v57 = vshrl.u32 %v595_v37, 16  ;;  %1046 = vst [vmem:[#allocation2 + $0xbc] sm:$0x1] %v1045_v47 }
  0x7a   : > { %v1214_v58 = vrot.slane %v1212_v52, 5  ;;  %v1218_v59 = vrot.slane %v1216_v53, 4  ;;  %v1984_v60 = vsel %vm11410_vm12, %v10397_v34, %v1983_v54  ;;  %v1985_v61 = vrot.slane %v1983_v54, 4  ;;  %v970_v3 = vld [vmem:[#allocation2 + $0x3c] sm:$0xf]  ;;  %v11104_v5 = vld [vmem:[#allocation2 + $0x30] sm:$0xff] }
  0x7b   : > { %v1224_v42 = vrot.slane %v1222_v55, 5  ;;  %v2075_v63 = vunpack.c.l.b16 %v1984_v60  ;;  %v694_v0 = vor.u32 %v692_v49, %v691_v44  ;;  %v695_v2 = vrot.slane %v691_v44, 4  ;;  %v974_v27 = vld [vmem:[#allocation2 + $0x44] sm:$0x1]  ;;  %10381 = vmatmul.msk.bf16.gmra.mxu1 %vm1540_vm14, %v11104_v5  ;;  %v553_v33 = vld [vmem:[#allocation2 + $0x50] sm:$0x1] }
  0x7c   : > { %v1215_v6 = vsel %vm11429_vm15, %v1210_v50, %v1214_v58  ;;  %v1219_v7 = vor.u32 %v1218_v59, %v1214_v58  ;;  %v1987_v18 = vsel %vm11410_vm12, %v1985_v61, %v1986_v56  ;;  %v699_v62 = vrot.slane %v697_v57, 7  ;;  %v11728_v48 = vld [vmem:[%s11440_s18 + $0x30] sm:$0xff]  }
  0x7d   : > { %v1500_v8 = vunpack.c.l.b16 %v1215_v6  ;;  %v2076_v24 = vunpack.c.l.b16 %v1987_v18  ;;  %v700_v9 = vshll.u32 %v595_v37, 16  ;;  %v971_v10 = vsel %vm11493_vm5, %v694_v0, %v970_v3 }
  0x7e   : > { %v1220_v11 = vrot.slane %v1219_v7, 4  ;;  %v1084_v13 = vld [vmem:[#allocation2 + $0xb4] sm:$0xf]  ;;  %v704_v14 = vrot.slane %v699_v62, 4  ;;  %972 = vst [vmem:[#allocation2 + $0x3c] sm:$0xf] %v971_v10  ;;  %v421_v17 = vadd.f32 %v11715_v16, %v385_v38  ;;  %v422_v31 = vadd.f32 %v11715_v16, %v386_v15 }
  0x7f   : > { %v1467_v20 = vshrl.u32 %v1084_v13, 16  ;;  %v1470_v22 = vshll.u32 %v1084_v13, 16  ;;  %v2103_v23 = vpack.c.b16 %v2076_v24, %v2075_v63  ;;  %v702_v25 = vor.u32 %v700_v9, %v699_v62  ;;  %v1085_v30 = vld [vmem:[#allocation2 + $0xb8] sm:$0xf] }
  0x80   : > { %v1225_v45 = vsel %vm11429_vm15, %v1220_v11, %v1224_v42  ;;  %v975_v26 = vsel %vm11402_vm11, %v704_v14, %v974_v27  ;;  %v453_v32 = vmax.f32 %v421_v17, 0.0  ;;  %v1102_v51 = vld [vmem:[#allocation2 + $0xbc] sm:$0x1]  ;;  %v1476_v37 = vshll.u32 %v1085_v30, 16 }
  0x81   : > { %v1501_v34 = vunpack.c.l.b16 %v1225_v45  ;;  %v1469_v35 = vrot.slane %v1467_v20, 4  ;;  %v1472_v36 = vrot.slane %v1470_v22, 5  ;;  %10414 = vmatmul.msk.bf16.gmra.mxu2 %vm1540_vm14, %v2103_v23  ;;  %v1480_v38 = vshrl.u32 %v1085_v30, 16  ;;  %976 = vst [vmem:[#allocation2 + $0x44] sm:$0x1] %v975_v26 }
  0x82   : > { %v1486_v40 = vshll.u32 %v1102_v51, 16  ;;  %v703_v41 = vsel %vm11500_vm6, %v695_v2, %v702_v25  ;;  %v454_v47 = vmax.f32 %v422_v31, 0.0  ;;  %v1478_v50 = vrot.slane %v1476_v37, 5  ;;  %v506_v26 = vld [vmem:[#allocation2 + $0x54] sm:$0x1] }
  0x83   : > { %v1528_v49 = vpack.c.b16 %v1501_v34, %v1500_v8  ;;  %v1473_v43 = vor.u32 %v1472_v36, %v1469_v35  ;;  %973 = vst.msk [vmem:[#allocation2 + $0x40] sm:$0xf] %vm475_vm1, %v703_v41  ;;  %v504_v52 = vsel %vm11402_vm11, 0, %v503_v29  ;;  %v1482_v53 = vrot.slane %v1480_v38, 4 }
  0x84   : > { %v1488_v54 = vrot.slane %v1486_v40, 5  ;;  %505 = vst [vmem:[#allocation2 + $0x48] sm:$0x1] %v504_v52  ;;  %v554_v55 = vsel %vm11416_vm13, 0, %v553_v33  ;;  %v596_v56 = vpack.c.bf16 %v453_v32, %v453_v32  ;;  %v597_v59 = vpack.c.bf16 %v454_v47, %v454_v47 }
  0x85   : > { %10301 = vmatmul.msk.bf16.gmra.mxu0 %vm1540_vm14, %v1528_v49  ;;  %v1474_v44 = vrot.slane %v1473_v43, 4  ;;  %v1064_v57 = vld [vmem:[#allocation2 + $0x3c] sm:$0xf]  ;;  %v11222_v60 = vunpack.c.l.bf16 %v11728_v48  ;;  %v11223_v61 = vunpack.c.h.bf16 %v11728_v48  ;;  %v1483_v42 = vor.u32 %v1482_v53, %v1478_v50  ;;  %555 = vst [vmem:[#allocation2 + $0x50] sm:$0x1] %v554_v55 }
  0x86   : > { %v1907_v58 = vld [vmem:[#allocation2 + $0x3c] sm:$0xe]  ;;  %v1227_v63 = vshrl.u32 %v1064_v57, 16  ;;  %v1230_v0 = vshll.u32 %v1064_v57, 16  ;;  %v706_v5 = vshrl.u32 %v596_v56, 16  ;;  %v709_v6 = vshll.u32 %v596_v56, 16 }
  0x87   : > { %v10398_v2 = vrot.slane %v1907_v58, 9  ;;  %v1479_v3 = vsel %vm11429_vm15, %v1474_v44, %v1478_v50  ;;  %v714_v7 = vshrl.u32 %v597_v59, 16  ;;  %v1484_v18 = vrot.slane %v1483_v42, 4  ;;  %v11266_v55 = vld [vmem:[%s11440_s18 + $0x38] sm:$0xff]   ;;  %v509_v56 = vld [vmem:[#allocation2 + $0x60] sm:$0x1] }
  0x88   : > { %v1522_v62 = vunpack.c.l.b16 %v1479_v3  ;;  %v1229_v8 = vrot.slane %v1227_v63, 4  ;;  %v1232_v24 = vrot.slane %v1230_v0, 5  ;;  %v1092_v9 = vld [vmem:[#allocation2 + $0x44] sm:$0x1]  ;;  %v708_v10 = vrot.slane %v706_v5, 7 }
  0x89   : > { %v716_v27 = vrot.slane %v714_v7, 7  ;;  %v717_v11 = vshll.u32 %v597_v59, 16  ;;  %v387_v13 = vmul.f32 %v11695_v4, %v11222_v60  ;;  %v1489_v14 = vsel %vm11429_vm15, %v1484_v18, %v1488_v54  ;;  %v556_v54 = vld [vmem:[#allocation2 + $0x5c] sm:$0x1] }
  0x8a   : > { %v1065_v15 = vld [vmem:[#allocation2 + $0x40] sm:$0xf]  ;;  %v1233_v17 = vor.u32 %v1232_v24, %v1229_v8  ;;  %v1246_v20 = vshll.u32 %v1092_v9, 16  ;;  %v1993_v22 = vrot.slane %v1092_v9, 5  ;;  %v1523_v23 = vunpack.c.l.b16 %v1489_v14 }
  0x8b   : > { %v1236_v25 = vshll.u32 %v1065_v15, 16  ;;  %v1240_v29 = vshrl.u32 %v1065_v15, 16  ;;  %v1990_v45 = vrot.slane %v1065_v15, 5  ;;  %v11105_v30 = vld [vmem:[#allocation2 + $0x3c] sm:$0xff]  ;;  %v711_v33 = vor.u32 %v709_v6, %v708_v10  ;;  %v977_v51 = vld [vmem:[#allocation2 + $0x48] sm:$0xf] }
  0x8c   : > { %v1234_v31 = vrot.slane %v1233_v17, 4  ;;  %v1248_v32 = vrot.slane %v1246_v20, 5  ;;  %v712_v34 = vrot.slane %v708_v10, 4  ;;  %v1539_v35 = vpack.c.b16 %v1523_v23, %v1522_v62  ;;  %v981_v40 = vld [vmem:[#allocation2 + $0x50] sm:$0x1]  ;;  %10382 = vmatmul.msk.bf16.gmra.mxu1 %vm1540_vm14, %v11105_v30 }
  0x8d   : > { %v1238_v36 = vrot.slane %v1236_v25, 5  ;;  %v1242_v37 = vrot.slane %v1240_v29, 4  ;;  %v1991_v38 = vsel %vm11410_vm12, %v10398_v2, %v1990_v45  ;;  %v1992_v41 = vrot.slane %v1990_v45, 4 }
  0x8e   : > { %v2077_v47 = vunpack.c.l.b16 %v1991_v38  ;;  %v719_v48 = vor.u32 %v717_v11, %v716_v27  ;;  %v721_v49 = vrot.slane %v716_v27, 4  ;;  %10312 = vmatmul.msk.bf16.gmra.mxu3 %vm1540_vm14, %v1539_v35  ;;  %v978_v52 = vsel %vm11493_vm5, %v711_v33, %v977_v51  ;;  %v11112_v38 = vld [vmem:[#allocation2 + $0x90] sm:$0xff] }
  0x8f   : > { %v1239_v43 = vsel %vm11429_vm15, %v1234_v31, %v1238_v36  ;;  %v1243_v50 = vor.u32 %v1242_v37, %v1238_v36  ;;  %v507_v53 = vsel %vm11402_vm11, 0, %v506_v26  ;;  %v1994_v57 = vsel %vm11410_vm12, %v1992_v41, %v1993_v22  ;;  %979 = vst [vmem:[#allocation2 + $0x48] sm:$0xf] %v978_v52 }
  0x90   : > { %v1502_v44 = vunpack.c.l.b16 %v1239_v43  ;;  %v720_v58 = vsel %vm11500_vm6, %v712_v34, %v719_v48  ;;  %v982_v59 = vsel %vm11402_vm11, %v721_v49, %v981_v40  ;;  %v2078_v42 = vunpack.c.l.b16 %v1994_v57  ;;  %508 = vst [vmem:[#allocation2 + $0x54] sm:$0x1] %v507_v53 }
  0x91   : > { %v1244_v60 = vrot.slane %v1243_v50, 4  ;;  %980 = vst.msk [vmem:[#allocation2 + $0x4c] sm:$0xf] %vm475_vm1, %v720_v58  ;;  %v388_v63 = vmul.f32 %v11695_v4, %v11223_v61  ;;  %v423_v0 = vadd.f32 %v11715_v16, %v387_v13  ;;  %v557_v2 = vsel %vm11416_vm13, 0, %v556_v54  ;;  %v559_v61 = vld [vmem:[#allocation2 + $0x68] sm:$0x1] }
  0x92   : > { %983 = vst [vmem:[#allocation2 + $0x50] sm:$0x1] %v982_v59  ;;  %v11226_v3 = vunpack.c.l.bf16 %v11266_v55  ;;  %v11227_v5 = vunpack.c.h.bf16 %v11266_v55  ;;  %v510_v6 = vsel %vm11402_vm11, 0, %v509_v56  ;;  %v2104_v18 = vpack.c.b16 %v2078_v42, %v2077_v47 }
  0x93   : > { %v1249_v7 = vsel %vm11429_vm15, %v1244_v60, %v1248_v32  ;;  %v424_v62 = vadd.f32 %v11715_v16, %v388_v63  ;;  %v455_v8 = vmax.f32 %v423_v0, 0.0  ;;  %558 = vst [vmem:[#allocation2 + $0x5c] sm:$0x1] %v557_v2  ;;  %v560_v27 = vsel %vm11416_vm13, 0, %v559_v61  ;;  %v11267_v63 = vld [vmem:[%s11440_s18 + $0x40] sm:$0xff]  }
  0x94   : > { %v1503_v24 = vunpack.c.l.b16 %v1249_v7  ;;  %v389_v9 = vmul.f32 %v11695_v4, %v11226_v3  ;;  %v390_v10 = vmul.f32 %v11695_v4, %v11227_v5  ;;  %10415 = vmatmul.msk.bf16.gmra.mxu2 %vm1540_vm14, %v2104_v18  ;;  %511 = vst [vmem:[#allocation2 + $0x60] sm:$0x1] %v510_v6  ;;  %v2039_v14 = vrot.slane %v11546_v1, 5 }
  0x95   : > { %v456_v11 = vmax.f32 %v424_v62, 0.0  ;;  %v598_v13 = vpack.c.bf16 %v455_v8, %v455_v8  ;;  %561 = vst [vmem:[#allocation2 + $0x68] sm:$0x1] %v560_v27 }
  0x96   : > { %v1529_v15 = vpack.c.b16 %v1503_v24, %v1502_v44  ;;  %v425_v17 = vadd.f32 %v11715_v16, %v389_v9  ;;  %v1066_v20 = vld [vmem:[#allocation2 + $0x48] sm:$0xf]  ;;  %v426_v45 = vadd.f32 %v11715_v16, %v390_v10  ;;  %v11230_v9 = vunpack.c.l.bf16 %v11267_v63 }
  0x97   : > { %v1908_v22 = vld [vmem:[#allocation2 + $0x48] sm:$0xe]  ;;  %v599_v23 = vpack.c.bf16 %v456_v11, %v456_v11  ;;  %v723_v25 = vshrl.u32 %v598_v13, 16  ;;  %v726_v29 = vshll.u32 %v598_v13, 16  ;;  %v1251_v26 = vshrl.u32 %v1066_v20, 16 }
  0x98   : > { %10302 = vmatmul.msk.bf16.gmra.mxu0 %vm1540_vm14, %v1529_v15  ;;  %v1067_v30 = vld [vmem:[#allocation2 + $0x4c] sm:$0xf]  ;;  %v1254_v31 = vshll.u32 %v1066_v20, 16  ;;  %v10399_v32 = vrot.slane %v1908_v22, 9  ;;  %v457_v33 = vmax.f32 %v425_v17, 0.0  ;;  %v458_v18 = vmax.f32 %v426_v45, 0.0 }
  0x99   : > { %v1093_v34 = vld [vmem:[#allocation2 + $0x50] sm:$0x1]  ;;  %v1260_v51 = vshll.u32 %v1067_v30, 16  ;;  %v1264_v35 = vshrl.u32 %v1067_v30, 16  ;;  %v1997_v36 = vrot.slane %v1067_v30, 5  ;;  %v725_v37 = vrot.slane %v723_v25, 7 }
  0x9a   : > { %v1253_v40 = vrot.slane %v1251_v26, 4  ;;  %v1256_v41 = vrot.slane %v1254_v31, 5  ;;  %v1270_v47 = vshll.u32 %v1093_v34, 16  ;;  %v2000_v48 = vrot.slane %v1093_v34, 5  ;;  %v984_v53 = vld [vmem:[#allocation2 + $0x54] sm:$0xf] }
  0x9b   : > { %v1262_v49 = vrot.slane %v1260_v51, 5  ;;  %v1266_v43 = vrot.slane %v1264_v35, 4  ;;  %v1998_v50 = vsel %vm11410_vm12, %v10399_v32, %v1997_v36  ;;  %v1999_v52 = vrot.slane %v1997_v36, 4  ;;  %v11106_v54 = vld [vmem:[#allocation2 + $0x48] sm:$0xff]  ;;  %v988_v24 = vld [vmem:[#allocation2 + $0x5c] sm:$0x1] }
  0x9c   : > { %v1257_v55 = vor.u32 %v1256_v41, %v1253_v40  ;;  %v1272_v56 = vrot.slane %v1270_v47, 5  ;;  %v2079_v44 = vunpack.c.l.b16 %v1998_v50  ;;  %v728_v57 = vor.u32 %v726_v29, %v725_v37  ;;  %10383 = vmatmul.msk.bf16.gmra.mxu1 %vm1540_vm14, %v11106_v54  ;;  %v512_v25 = vld [vmem:[#allocation2 + $0x6c] sm:$0x1]  ;;  %v991_v30 = vld [vmem:[#allocation2 + $0x60] sm:$0xf] }
  0x9d   : > { %v1267_v58 = vor.u32 %v1266_v43, %v1262_v49  ;;  %v2001_v59 = vsel %vm11410_vm12, %v1999_v52, %v2000_v48  ;;  %v729_v60 = vrot.slane %v725_v37, 4  ;;  %v731_v42 = vshrl.u32 %v599_v23, 16  ;;  %v562_v32 = vld [vmem:[#allocation2 + $0x74] sm:$0x1]  ;;  %v995_v36 = vld [vmem:[#allocation2 + $0x68] sm:$0x1] }
  0x9e   : > { %v1258_v0 = vrot.slane %v1257_v55, 4  ;;  %v2080_v2 = vunpack.c.l.b16 %v2001_v59  ;;  %v734_v3 = vshll.u32 %v599_v23, 16  ;;  %v985_v5 = vsel %vm11493_vm5, %v728_v57, %v984_v53  ;;  %10389 = vmatmul.msk.bf16.vlgmr.msrb.gmra.mxu3 %vm1540_vm14, %v11112_v38 }
  0x9f   : > { %v1268_v6 = vrot.slane %v1267_v58, 4  ;;  %v733_v7 = vrot.slane %v731_v42, 7  ;;  %986 = vst [vmem:[#allocation2 + $0x54] sm:$0xf] %v985_v5  ;;  %v600_v62 = vpack.c.bf16 %v457_v33, %v457_v33  ;;  %v11231_v10 = vunpack.c.h.bf16 %v11267_v63  ;;  %v11809_v58 = vld [vmem:[#allocation2 + $0x98] sm:$0x1] }
  0xa0   : > { %v1263_v8 = vsel %vm11429_vm15, %v1258_v0, %v1262_v49  ;;  %v2105_v61 = vpack.c.b16 %v2080_v2, %v2079_v44  ;;  %v601_v20 = vpack.c.bf16 %v458_v18, %v458_v18  ;;  %v391_v26 = vmul.f32 %v11695_v4, %v11230_v9  ;;  %v11113_v2 = vld [vmem:[#allocation2 + $0x9c] sm:$0xff] }
  0xa1   : > { %v1273_v27 = vsel %vm11429_vm15, %v1268_v6, %v1272_v56  ;;  %v1504_v11 = vunpack.c.l.b16 %v1263_v8  ;;  %v736_v13 = vor.u32 %v734_v3, %v733_v7  ;;  %v738_v15 = vrot.slane %v733_v7, 4  ;;  %v11821_v7 = vld [vmem:[%s11440_s18 + $0x48] sm:$0xff]  }
  0xa2   : > { %v1505_v17 = vunpack.c.l.b16 %v1273_v27  ;;  %v740_v22 = vshrl.u32 %v600_v62, 16  ;;  %v743_v23 = vshll.u32 %v600_v62, 16  ;;  %v392_v31 = vmul.f32 %v11695_v4, %v11231_v10 }
  0xa3   : > { %v737_v29 = vsel %vm11500_vm6, %v729_v60, %v736_v13  ;;  %v989_v45 = vsel %vm11402_vm11, %v738_v15, %v988_v24  ;;  %v748_v51 = vshrl.u32 %v601_v20, 16  ;;  %v751_v35 = vshll.u32 %v601_v20, 16 }
  0xa4   : > { %v1530_v33 = vpack.c.b16 %v1505_v17, %v1504_v11  ;;  %987 = vst.msk [vmem:[#allocation2 + $0x58] sm:$0xf] %vm475_vm1, %v737_v29  ;;  %v742_v34 = vrot.slane %v740_v22, 7  ;;  %10416 = vmatmul.msk.bf16.gmra.mxu2 %vm1540_vm14, %v2105_v61  ;;  %v427_v37 = vadd.f32 %v11715_v16, %v391_v26  ;;  %v428_v38 = vadd.f32 %v11715_v16, %v392_v31  ;;  %v1602_v31 = vpop.f32.mrf.mxu0 }
  0xa5   : > { %990 = vst [vmem:[#allocation2 + $0x5c] sm:$0x1] %v989_v45  ;;  %v513_v40 = vsel %vm11402_vm11, 0, %v512_v25  ;;  %v563_v41 = vsel %vm11416_vm13, 0, %v562_v32  ;;  %v750_v50 = vrot.slane %v748_v51, 7  ;;  %v2042_v59 = vrot.slane %v11809_v58, 5  ;;  %v1822_v32 = vpop.f32.mrf.mxu1 }
  0xa6   : > { %v1068_v47 = vld [vmem:[#allocation2 + $0x54] sm:$0xf]  ;;  %v745_v49 = vor.u32 %v743_v23, %v742_v34  ;;  %v746_v43 = vrot.slane %v742_v34, 4  ;;  %v459_v54 = vmax.f32 %v427_v37, 0.0  ;;  %514 = vst [vmem:[#allocation2 + $0x6c] sm:$0x1] %v513_v40  ;;  %v11234_v34 = vunpack.c.l.bf16 %v11821_v7 }
  0xa7   : > { %v1909_v48 = vld [vmem:[#allocation2 + $0x54] sm:$0xe]  ;;  %v1275_v52 = vshrl.u32 %v1068_v47, 16  ;;  %v1278_v53 = vshll.u32 %v1068_v47, 16  ;;  %v753_v55 = vor.u32 %v751_v35, %v750_v50  ;;  %v755_v56 = vrot.slane %v750_v50, 4 }
  0xa8   : > { %10303 = vmatmul.msk.bf16.gmra.mxu0 %vm1540_vm14, %v1530_v33  ;;  %v992_v44 = vsel %vm11493_vm5, %v745_v49, %v991_v30  ;;  %v460_v57 = vmax.f32 %v428_v38, 0.0  ;;  %564 = vst [vmem:[#allocation2 + $0x74] sm:$0x1] %v563_v41  ;;  %v602_v63 = vpack.c.bf16 %v459_v54, %v459_v54  ;;  %v11814_v0 = vrot.slane %v2039_v14, 4 }
  0xa9   : > { %v1277_v60 = vrot.slane %v1275_v52, 4  ;;  %v1280_v42 = vrot.slane %v1278_v53, 5  ;;  %993 = vst [vmem:[#allocation2 + $0x60] sm:$0xf] %v992_v44  ;;  %v10400_v3 = vrot.slane %v1909_v48, 9  ;;  %v754_v5 = vsel %vm11500_vm6, %v746_v43, %v753_v55  ;;  %v2175_v43 = vpop.f32.mrf.mxu2 }
  0xaa   : > { %v996_v6 = vsel %vm11402_vm11, %v755_v56, %v995_v36  ;;  %994 = vst.msk [vmem:[#allocation2 + $0x64] sm:$0xf] %vm475_vm1, %v754_v5  ;;  %v11824_v61 = vpack.c.bf16 %v460_v57, %v460_v57  ;;  %v757_v24 = vshrl.u32 %v602_v63, 16  ;;  %v760_v13 = vshll.u32 %v602_v63, 16 }
  0xab   : > { %v1069_v18 = vld [vmem:[#allocation2 + $0x58] sm:$0xf]  ;;  %v1281_v62 = vor.u32 %v1280_v42, %v1277_v60  ;;  %997 = vst [vmem:[#allocation2 + $0x68] sm:$0x1] %v996_v6  ;;  %v1823_v40 = vadd.f32 %v1822_v32, %v1602_v31 }
  0xac   : > { %v11107_v8 = vld [vmem:[#allocation2 + $0x54] sm:$0xff]  ;;  %v1094_v9 = vld [vmem:[#allocation2 + $0x5c] sm:$0x1]  ;;  %v1284_v10 = vshll.u32 %v1069_v18, 16  ;;  %v1288_v27 = vshrl.u32 %v1069_v18, 16  ;;  %v2004_v11 = vrot.slane %v1069_v18, 5  ;;  %v11850_v31 = vpop.f32.mrf.mxu0 }
  0xad   : > { %v1282_v15 = vrot.slane %v1281_v62, 4  ;;  %v1294_v17 = vshll.u32 %v1094_v9, 16  ;;  %v2007_v20 = vrot.slane %v1094_v9, 5  ;;  %v11826_v22 = vrot.slane %v757_v24, 7  ;;  %10384 = vmatmul.msk.bf16.gmra.mxu1 %vm1540_vm14, %v11107_v8 }
  0xae   : > { %v1286_v23 = vrot.slane %v1284_v10, 5  ;;  %v1290_v25 = vrot.slane %v1288_v27, 4  ;;  %v2005_v29 = vsel %vm11410_vm12, %v10400_v3, %v2004_v11  ;;  %v2006_v45 = vrot.slane %v2004_v11, 4  ;;  %10390 = vmatmul.msk.bf16.gmra.mxu3 %vm1540_vm14, %v11113_v2  ;;  %v998_v11 = vld [vmem:[#allocation2 + $0x6c] sm:$0xf] }
  0xaf   : > { %v1296_v30 = vrot.slane %v1294_v17, 5  ;;  %v2081_v26 = vunpack.c.l.b16 %v2005_v29  ;;  %v762_v33 = vor.u32 %v760_v13, %v11826_v22  ;;  %v11838_v54 = vadd.f32 %v2175_v43, %v1823_v40  ;;  %v11114_v40 = vld [vmem:[#allocation2 + $0xa8] sm:$0xff] }
  0xb0   : > { %v1287_v51 = vsel %vm11429_vm15, %v1282_v15, %v1286_v23  ;;  %v1291_v35 = vor.u32 %v1290_v25, %v1286_v23  ;;  %v2008_v36 = vsel %vm11410_vm12, %v2006_v45, %v2007_v20  ;;  %v1070_v37 = vld [vmem:[#allocation2 + $0x60] sm:$0xf]  ;;  %v765_v55 = vshrl.u32 %v11824_v61, 16  ;;  %v1002_v20 = vld [vmem:[#allocation2 + $0x74] sm:$0x1] }
  0xb1   : > { %v1910_v38 = vld [vmem:[#allocation2 + $0x60] sm:$0xe]  ;;  %v1506_v41 = vunpack.c.l.b16 %v1287_v51  ;;  %v2082_v47 = vunpack.c.l.b16 %v2008_v36  ;;  %v1299_v48 = vshrl.u32 %v1070_v37, 16  ;;  %v1302_v49 = vshll.u32 %v1070_v37, 16  ;;  %v1071_v52 = vld [vmem:[#allocation2 + $0x64] sm:$0xf] }
  0xb2   : > { %v1292_v50 = vrot.slane %v1291_v35, 4  ;;  %v10401_v53 = vrot.slane %v1910_v38, 9  ;;  %v1308_v60 = vshll.u32 %v1071_v52, 16  ;;  %v1095_v63 = vld [vmem:[#allocation2 + $0x68] sm:$0x1]  ;;  %v1312_v2 = vshrl.u32 %v1071_v52, 16 }
  0xb3   : > { %v2106_v56 = vpack.c.b16 %v2082_v47, %v2081_v26  ;;  %v1301_v44 = vrot.slane %v1299_v48, 4  ;;  %v1304_v57 = vrot.slane %v1302_v49, 5  ;;  %v2011_v3 = vrot.slane %v1071_v52, 5  ;;  %v1914_v23 = vld [vmem:[#allocation2 + $0x90] sm:$0xe] }
  0xb4   : > { %v1297_v42 = vsel %vm11429_vm15, %v1292_v50, %v1296_v30  ;;  %v767_v5 = vrot.slane %v765_v55, 7  ;;  %v1310_v62 = vrot.slane %v1308_v60, 5  ;;  %v1318_v8 = vshll.u32 %v1095_v63, 16  ;;  %v515_v38 = vld [vmem:[#allocation2 + $0x78] sm:$0x1] }
  0xb5   : > { %v1507_v6 = vunpack.c.l.b16 %v1297_v42  ;;  %10417 = vmatmul.msk.bf16.gmra.mxu2 %vm1540_vm14, %v2106_v56  ;;  %v1305_v18 = vor.u32 %v1304_v57, %v1301_v44  ;;  %v1314_v24 = vrot.slane %v1312_v2, 4  ;;  %v2012_v9 = vsel %vm11410_vm12, %v10401_v53, %v2011_v3  ;;  %v565_v49 = vld [vmem:[#allocation2 + $0x80] sm:$0x1]  ;;  %v11269_v53 = vld [vmem:[%s11440_s18 + $0x50] sm:$0xff]   ;;  %v10426_v60 = vld [vmem:[%s15786_s3 + $0x6] sm:$0x3]  ;;  %v11890_v42 = vpop.f32.mrf.mxu1 }
  0xb6   : > { %v2013_v10 = vrot.slane %v2011_v3, 4  ;;  %v2014_v27 = vrot.slane %v1095_v63, 5  ;;  %v763_v17 = vrot.slane %v11826_v22, 4  ;;  %v11235_v25 = vunpack.c.h.bf16 %v11821_v7  ;;  %v11892_v63 = vpop.f32.mrf.mxu2 }
  0xb7   : > { %v1531_v13 = vpack.c.b16 %v1507_v6, %v1506_v41  ;;  %v1306_v15 = vrot.slane %v1305_v18, 4  ;;  %v1315_v29 = vor.u32 %v1314_v24, %v1310_v62  ;;  %v1320_v45 = vrot.slane %v1318_v8, 5  ;;  %v518_v18 = vld [vmem:[#allocation2 + $0x84] sm:$0x1] }
  0xb8   : > { %v768_v30 = vshll.u32 %v11824_v61, 16  ;;  %v772_v26 = vrot.slane %v767_v5, 4  ;;  %v2083_v32 = vunpack.c.l.b16 %v2012_v9  ;;  %v999_v51 = vsel %vm11493_vm5, %v762_v33, %v998_v11  ;;  %v11108_v33 = vld [vmem:[#allocation2 + $0x60] sm:$0xff] }
  0xb9   : > { %10304 = vmatmul.msk.bf16.gmra.mxu0 %vm1540_vm14, %v1531_v13  ;;  %v10405_v35 = vrot.slane %v1914_v23, 9  ;;  %v393_v22 = vmul.f32 %v11695_v4, %v11234_v34  ;;  %v1316_v36 = vrot.slane %v1315_v29, 4  ;;  %v2015_v7 = vsel %vm11410_vm12, %v2013_v10, %v2014_v27  ;;  %1000 = vst [vmem:[#allocation2 + $0x6c] sm:$0xf] %v999_v51 }
  0xba   : > { %v770_v37 = vor.u32 %v768_v30, %v767_v5  ;;  %v1003_v61 = vsel %vm11402_vm11, %v772_v26, %v1002_v20  ;;  %v1311_v41 = vsel %vm11429_vm15, %v1306_v15, %v1310_v62  ;;  %v2043_v47 = vsel %vm11410_vm12, %v11814_v0, %v2042_v59 }
  0xbb   : > { %1004 = vst [vmem:[#allocation2 + $0x74] sm:$0x1] %v1003_v61  ;;  %v2040_v34 = vsel %vm11410_vm12, %v10405_v35, %v2039_v14  ;;  %v394_v48 = vmul.f32 %v11695_v4, %v11235_v25  ;;  %v1321_v43 = vsel %vm11429_vm15, %v1316_v36, %v1320_v45  ;;  %v2092_v1 = vunpack.c.l.b16 %v2043_v47 }
  0xbc   : > { %v771_v50 = vsel %vm11500_vm6, %v763_v17, %v770_v37  ;;  %v2091_v52 = vunpack.c.l.b16 %v2040_v34  ;;  %v2084_v55 = vunpack.c.l.b16 %v2015_v7  ;;  %v429_v14 = vadd.f32 %v11715_v16, %v393_v22 }
  0xbd   : > { %1001 = vst.msk [vmem:[#allocation2 + $0x70] sm:$0xf] %vm475_vm1, %v771_v50  ;;  %v430_v58 = vadd.f32 %v11715_v16, %v394_v48  ;;  %v516_v59 = vsel %vm11402_vm11, 0, %v515_v38  ;;  %v1508_v0 = vunpack.c.l.b16 %v1311_v41  ;;  %v1509_v56 = vunpack.c.l.b16 %v1321_v43  ;;  %10385 = vmatmul.msk.bf16.gmra.mxu1 %vm1540_vm14, %v11108_v33 }
  0xbe   : > { %v11881_v44 = vpack.c.b16 %v2092_v1, %v2091_v52  ;;  %517 = vst [vmem:[#allocation2 + $0x78] sm:$0x1] %v516_v59  ;;  %v566_v57 = vsel %vm11416_vm13, 0, %v565_v49  ;;  %10391 = vmatmul.msk.bf16.gmra.mxu3 %vm1540_vm14, %v11114_v40  ;;  %v461_v2 = vmax.f32 %v429_v14, 0.0  ;;  %v11238_v5 = vunpack.c.l.bf16 %v11269_v53  ;;  %v1607_v23 = vpop.f32.mrf.mxu0  ;;  %v1827_v49 = vpop.f32.mrf.mxu1 }
  0xbf   : > { %v462_v3 = vmax.f32 %v430_v58, 0.0  ;;  %567 = vst [vmem:[#allocation2 + $0x80] sm:$0x1] %v566_v57  ;;  %v2450_v6 = vsel %vm1589_vm0, %v10426_v60, 0  ;;  %v2107_v62 = vpack.c.b16 %v2084_v55, %v2083_v32  ;;  %v519_v27 = vsel %vm11402_vm11, 0, %v518_v18 }
  0xc0   : > { %v1072_v8 = vld [vmem:[#allocation2 + $0x6c] sm:$0xf]  ;;  %2459 = vmatpush.bf16.msrb.mxu3 %v2450_v6  ;;  %v604_v9 = vpack.c.bf16 %v461_v2, %v461_v2  ;;  %v1532_v11 = vpack.c.b16 %v1509_v56, %v1508_v0  ;;  %v11239_v20 = vunpack.c.h.bf16 %v11269_v53  ;;  %v395_v30 = vmul.f32 %v11695_v4, %v11238_v5  ;;  %520 = vst [vmem:[#allocation2 + $0x84] sm:$0x1] %v519_v27 }
  0xc1   : > { %v1911_v24 = vld [vmem:[#allocation2 + $0x6c] sm:$0xe]  ;;  %v605_v10 = vpack.c.bf16 %v462_v3, %v462_v3  ;;  %v1323_v15 = vshrl.u32 %v1072_v8, 16  ;;  %v1326_v17 = vshll.u32 %v1072_v8, 16  ;;  %v1828_v1 = vadd.f32 %v1827_v49, %v1607_v23  ;;  %v11115_v3 = vld [vmem:[#allocation2 + $0xb4] sm:$0xff] }
  0xc2   : > { %v1096_v13 = vld [vmem:[#allocation2 + $0x74] sm:$0x1]  ;;  %v10402_v29 = vrot.slane %v1911_v24, 9  ;;  %v774_v45 = vshrl.u32 %v604_v9, 16  ;;  %v777_v35 = vshll.u32 %v604_v9, 16  ;;  %v396_v43 = vmul.f32 %v11695_v4, %v11239_v20 }
  0xc3   : > { %v1342_v25 = vshll.u32 %v1096_v13, 16  ;;  %v1325_v32 = vrot.slane %v1323_v15, 4  ;;  %v1328_v51 = vrot.slane %v1326_v17, 5  ;;  %v782_v22 = vshrl.u32 %v605_v10, 16  ;;  %v568_v8 = vld [vmem:[#allocation2 + $0x8c] sm:$0x1] }
  0xc4   : > { %v1073_v26 = vld [vmem:[#allocation2 + $0x70] sm:$0xf]  ;;  %v785_v61 = vshll.u32 %v605_v10, 16  ;;  %v2021_v40 = vrot.slane %v1096_v13, 5  ;;  %v776_v41 = vrot.slane %v774_v45, 7  ;;  %v431_v15 = vadd.f32 %v11715_v16, %v395_v30 }
  0xc5   : > { %10418 = vmatmul.msk.bf16.gmra.mxu2 %vm1540_vm14, %v2107_v62  ;;  %v1332_v36 = vshll.u32 %v1073_v26, 16  ;;  %v1336_v7 = vshrl.u32 %v1073_v26, 16  ;;  %v2018_v37 = vrot.slane %v1073_v26, 5  ;;  %v1329_v38 = vor.u32 %v1328_v51, %v1325_v32  ;;  %v1005_v14 = vld [vmem:[#allocation2 + $0x78] sm:$0xf]  ;;  %v11109_v62 = vld [vmem:[#allocation2 + $0x6c] sm:$0xff] }
  0xc6   : > { %v784_v33 = vrot.slane %v782_v22, 7  ;;  %v1344_v52 = vrot.slane %v1342_v25, 5  ;;  %v2180_v53 = vpop.f32.mrf.mxu2  ;;  %v779_v55 = vor.u32 %v777_v35, %v776_v41  ;;  %v780_v0 = vrot.slane %v776_v41, 4  ;;  %v1009_v57 = vld [vmem:[#allocation2 + $0x80] sm:$0x1] }
  0xc7   : > { %v1334_v34 = vrot.slane %v1332_v36, 5  ;;  %v1338_v47 = vrot.slane %v1336_v7, 4  ;;  %v2020_v48 = vrot.slane %v2018_v37, 4  ;;  %v1330_v50 = vrot.slane %v1329_v38, 4 }
  0xc8   : > { %v2019_v59 = vsel %vm11410_vm12, %v10402_v29, %v2018_v37  ;;  %v787_v56 = vor.u32 %v785_v61, %v784_v33  ;;  %v11905_v2 = vadd.f32 %v2180_v53, %v1828_v1  ;;  %v789_v4 = vrot.slane %v784_v33, 4  ;;  %v11926_v29 = vpop.f32.mrf.mxu1 }
  0xc9   : > { %10305 = vmatmul.msk.bf16.gmra.mxu0 %vm1540_vm14, %v1532_v11  ;;  %v1339_v58 = vor.u32 %v1338_v47, %v1334_v34  ;;  %v2022_v60 = vsel %vm11410_vm12, %v2020_v48, %v2021_v40  ;;  %v1006_v18 = vsel %vm11493_vm5, %v779_v55, %v1005_v14  ;;  %v1335_v24 = vsel %vm11429_vm15, %v1330_v50, %v1334_v34  ;;  %v11917_v11 = vpop.f32.mrf.mxu0  ;;  %v11931_v50 = vpop.f32.mrf.mxu3 }
  0xca   : > { %v788_v6 = vsel %vm11500_vm6, %v780_v0, %v787_v56  ;;  %v2085_v9 = vunpack.c.l.b16 %v2019_v59  ;;  %1007 = vst [vmem:[#allocation2 + $0x78] sm:$0xf] %v1006_v18  ;;  %v1010_v10 = vsel %vm11402_vm11, %v789_v4, %v1009_v57  ;;  %v2086_v13 = vunpack.c.l.b16 %v2022_v60  ;;  %v11294_v60 = vld [vmem:[#allocation2 + $0xa0] sm:$0xf] }
  0xcb   : > { %v1340_v5 = vrot.slane %v1339_v58, 4  ;;  %1008 = vst.msk [vmem:[#allocation2 + $0x7c] sm:$0xf] %vm475_vm1, %v788_v6  ;;  %v432_v17 = vadd.f32 %v11715_v16, %v396_v43  ;;  %v569_v20 = vsel %vm11416_vm13, 0, %v568_v8  ;;  %v1510_v23 = vunpack.c.l.b16 %v1335_v24 }
  0xcc   : > { %1011 = vst [vmem:[#allocation2 + $0x80] sm:$0x1] %v1010_v10  ;;  %v463_v45 = vmax.f32 %v431_v15, 0.0  ;;  %v2108_v30 = vpack.c.b16 %v2086_v13, %v2085_v9  ;;  %v2046_v4 = vrot.slane %v11294_v60, 5 }
  0xcd   : > { %v1345_v27 = vsel %vm11429_vm15, %v1340_v5, %v1344_v52  ;;  %10386 = vmatmul.msk.bf16.gmra.mxu1 %vm1540_vm14, %v11109_v62  ;;  %v464_v26 = vmax.f32 %v432_v17, 0.0  ;;  %570 = vst [vmem:[#allocation2 + $0x8c] sm:$0x1] %v569_v20  ;;  %v1012_v5 = vld [vmem:[#allocation2 + $0x84] sm:$0xf] }
  0xce   : > { %10392 = vmatmul.msk.bf16.gmra.mxu3 %vm1540_vm14, %v11115_v3  ;;  %v1511_v25 = vunpack.c.l.b16 %v1345_v27  ;;  %v11928_v32 = vpop.f32.mrf.mxu2  ;;  %v606_v51 = vpack.c.bf16 %v463_v45, %v463_v45  ;;  %v1915_v62 = vld [vmem:[#allocation2 + $0x9c] sm:$0xe] }
  0xcf   : > { %v607_v16 = vpack.c.bf16 %v464_v26, %v464_v26 }
  0xd0   : > { %v1533_v35 = vpack.c.b16 %v1511_v25, %v1510_v23  ;;  %v791_v7 = vshrl.u32 %v606_v51, 16  ;;  %v794_v37 = vshll.u32 %v606_v51, 16  ;;  %v1832_v56 = vpop.f32.mrf.mxu1 }
  0xd1   : > { %v1074_v22 = vld [vmem:[#allocation2 + $0x78] sm:$0xf]  ;;  %v799_v33 = vshrl.u32 %v607_v16, 16  ;;  %v1612_v14 = vpop.f32.mrf.mxu0  ;;  %v802_v23 = vshll.u32 %v607_v16, 16 }
  0xd2   : > { %v1912_v36 = vld [vmem:[#allocation2 + $0x78] sm:$0xe]  ;;  %v1075_v61 = vld [vmem:[#allocation2 + $0x7c] sm:$0xf]  ;;  %v1347_v38 = vshrl.u32 %v1074_v22, 16  ;;  %v1350_v40 = vshll.u32 %v1074_v22, 16  ;;  %v1833_v3 = vadd.f32 %v1832_v56, %v1612_v14 }
  0xd3   : > { %v10403_v41 = vrot.slane %v1912_v36, 9  ;;  %v1097_v34 = vld [vmem:[#allocation2 + $0x80] sm:$0x1]  ;;  %v1356_v47 = vshll.u32 %v1075_v61, 16  ;;  %v1360_v48 = vshrl.u32 %v1075_v61, 16  ;;  %v2025_v49 = vrot.slane %v1075_v61, 5 }
  0xd4   : > { %v793_v43 = vrot.slane %v791_v7, 7  ;;  %v1349_v52 = vrot.slane %v1347_v38, 4  ;;  %v1352_v1 = vrot.slane %v1350_v40, 5  ;;  %v1366_v53 = vshll.u32 %v1097_v34, 16  ;;  %v1016_v45 = vld [vmem:[#allocation2 + $0x8c] sm:$0x1] }
  0xd5   : > { %10419 = vmatmul.msk.bf16.gmra.mxu2 %vm1540_vm14, %v2108_v30  ;;  %v2028_v55 = vrot.slane %v1097_v34, 5  ;;  %v1358_v58 = vrot.slane %v1356_v47, 5  ;;  %v1362_v59 = vrot.slane %v1360_v48, 4  ;;  %v2027_v0 = vrot.slane %v2025_v49, 4  ;;  %v11110_v26 = vld [vmem:[#allocation2 + $0x78] sm:$0xff]  ;;  %v11959_v47 = vpop.f32.mrf.mxu3 }
  0xd6   : > { %v1353_v57 = vor.u32 %v1352_v1, %v1349_v52  ;;  %v1368_v18 = vrot.slane %v1366_v53, 5  ;;  %v2026_v8 = vsel %vm11410_vm12, %v10403_v41, %v2025_v49  ;;  %v2185_v24 = vpop.f32.mrf.mxu2  ;;  %v796_v9 = vor.u32 %v794_v37, %v793_v43  ;;  %v11295_v38 = vld [vmem:[#allocation2 + $0xa4] sm:$0x1]  ;;  %v10540_v34 = vld [vmem:[%s15786_s3 + $0xa] sm:$0x3] }
  0xd7   : > { %v1363_v6 = vor.u32 %v1362_v59, %v1358_v58  ;;  %v2029_v27 = vsel %vm11410_vm12, %v2027_v0, %v2028_v55  ;;  %v11938_v13 = vadd.f32 %v2185_v24, %v1833_v3  ;;  %v801_v15 = vrot.slane %v799_v33, 7  ;;  %v10557_v33 = vld [vmem:[%s15786_s3 + $0xc] sm:$0x3] }
  0xd8   : > { %v1354_v10 = vrot.slane %v1353_v57, 4  ;;  %v797_v20 = vrot.slane %v793_v43, 4  ;;  %v1013_v25 = vsel %vm11493_vm5, %v796_v9, %v1012_v5  ;;  %v10406_v30 = vrot.slane %v1915_v62, 9  ;;  %v11970_v14 = vpop.f32.mrf.mxu1 }
  0xd9   : > { %10306 = vmatmul.msk.bf16.gmra.mxu0 %vm1540_vm14, %v1533_v35  ;;  %v1364_v17 = vrot.slane %v1363_v6, 4  ;;  %v806_v51 = vrot.slane %v801_v15, 4  ;;  %1014 = vst [vmem:[#allocation2 + $0x84] sm:$0xf] %v1013_v25  ;;  %v2048_v35 = vrot.slane %v2046_v4, 4  ;;  %v2087_v22 = vunpack.c.l.b16 %v2026_v8  ;;  %v11968_v55 = vpop.f32.mrf.mxu0 }
  0xda   : > { %v2088_v36 = vunpack.c.l.b16 %v2029_v27  ;;  %v804_v7 = vor.u32 %v802_v23, %v801_v15  ;;  %v1359_v37 = vsel %vm11429_vm15, %v1354_v10, %v1358_v58  ;;  %v2049_v16 = vrot.slane %v11295_v38, 5  ;;  %v11976_v25 = vld [vmem:[#allocation2 + $0x10] sm:$0xf] }
  0xdb   : > { %v1369_v61 = vsel %vm11429_vm15, %v1364_v17, %v1368_v18  ;;  %v1017_v40 = vsel %vm11402_vm11, %v806_v51, %v1016_v45  ;;  %v3502_v48 = vsel %vm1589_vm0, %v10540_v34, 0  ;;  %v1512_v49 = vunpack.c.l.b16 %v1359_v37  ;;  %v2573_v17 = vld [vmem:[#allocation2 + $0xc] sm:$0xf] }
  0xdc   : > { %v805_v41 = vsel %vm11500_vm6, %v797_v20, %v804_v7  ;;  %1018 = vst [vmem:[#allocation2 + $0x8c] sm:$0x1] %v1017_v40  ;;  %v1513_v43 = vunpack.c.l.b16 %v1369_v61  ;;  %v2109_v52 = vpack.c.b16 %v2088_v36, %v2087_v22  ;;  %3511 = vmatpush.bf16.msrb.mxu1 %v3502_v48  ;;  %v2047_v1 = vsel %vm11410_vm12, %v10406_v30, %v2046_v4  ;;  %v11296_v36 = vld [vmem:[#allocation2 + $0xac] sm:$0xf] }
  0xdd   : > { %10387 = vmatmul.msk.bf16.gmra.mxu1 %vm1540_vm14, %v11110_v26  ;;  %1015 = vst.msk [vmem:[#allocation2 + $0x88] sm:$0xf] %vm475_vm1, %v805_v41  ;;  %v2050_v53 = vsel %vm11410_vm12, %v2048_v35, %v2049_v16  ;;  %v2093_v3 = vunpack.c.l.b16 %v2047_v1  ;;  %v1916_v35 = vld [vmem:[#allocation2 + $0xa8] sm:$0xe]  ;;  %v2053_v7 = vrot.slane %v11296_v36, 5  ;;  %v2622_v38 = vshrl.u32 %v2573_v17, 16 }
  0xde   : > { %10422 = vmatmul.msk.bf16.vlgmr.msra.gmra.mxu3 %vm1540_vm14, %v11881_v44  ;;  %v3789_v44 = vsel %vm1589_vm0, %v10557_v33, 0  ;;  %v11972_v57 = vpop.f32.mrf.mxu2  ;;  %v1534_v60 = vpack.c.b16 %v1513_v43, %v1512_v49  ;;  %v2094_v5 = vunpack.c.l.b16 %v2050_v53  ;;  %v2625_v16 = vshll.u32 %v2573_v17, 16 }
  0xdf   : > { %3798 = vmatpush.bf16.msrb.mxu2 %v3789_v44  ;;  %v2631_v44 = vshll.u32 %v11976_v25, 16  ;;  %v2635_v48 = vshrl.u32 %v11976_v25, 16 }
  0xe0   : > { %v1076_v58 = vld [vmem:[#allocation2 + $0x84] sm:$0xf]  ;;  %v2112_v20 = vpack.c.b16 %v2094_v5, %v2093_v3 }
  0xe1   : > { %v1913_v59 = vld [vmem:[#allocation2 + $0x84] sm:$0xe]  ;;  %v1371_v0 = vshrl.u32 %v1076_v58, 16  ;;  %v1374_v56 = vshll.u32 %v1076_v58, 16  ;;  %v11978_v45 = vpop.f32.mrf.mxu3  ;;  %v10407_v58 = vrot.slane %v1916_v35, 9 }
  0xe2   : > { %v10404_v62 = vrot.slane %v1913_v59, 9 }
  0xe3   : > { %v1098_v6 = vld [vmem:[#allocation2 + $0x8c] sm:$0x1]  ;;  %v1373_v4 = vrot.slane %v1371_v0, 4  ;;  %v1376_v18 = vrot.slane %v1374_v56, 5  ;;  %v2055_v56 = vrot.slane %v2053_v7, 4 }
  0xe4   : > { %v1077_v8 = vld [vmem:[#allocation2 + $0x88] sm:$0xf]  ;;  %v1390_v24 = vshll.u32 %v1098_v6, 16  ;;  %v2035_v23 = vrot.slane %v1098_v6, 5  ;;  %v2624_v6 = vrot.slane %v2622_v38, 4 }
  0xe5   : > { %10420 = vmatmul.msk.bf16.gmra.mxu2 %vm1540_vm14, %v2109_v52  ;;  %v1377_v9 = vor.u32 %v1376_v18, %v1373_v4  ;;  %v1380_v10 = vshll.u32 %v1077_v8, 16  ;;  %v1384_v27 = vshrl.u32 %v1077_v8, 16  ;;  %v2032_v15 = vrot.slane %v1077_v8, 5  ;;  %v11111_v61 = vld [vmem:[#allocation2 + $0x84] sm:$0xff]  ;;  %v1837_v34 = vpop.f32.mrf.mxu1 }
  0xe6   : > { %v1392_v33 = vrot.slane %v1390_v24, 5  ;;  %v2627_v18 = vrot.slane %v2625_v16, 5  ;;  %v2637_v8 = vrot.slane %v2635_v48, 4  ;;  %v2576_v16 = vld [vmem:[#allocation2 + $0x18] sm:$0xf] }
  0xe7   : > { %v1378_v26 = vrot.slane %v1377_v9, 4  ;;  %v1382_v30 = vrot.slane %v1380_v10, 5  ;;  %v1386_v51 = vrot.slane %v1384_v27, 4  ;;  %v2033_v22 = vsel %vm11410_vm12, %v10404_v62, %v2032_v15  ;;  %v1617_v40 = vpop.f32.mrf.mxu0  ;;  %v11994_v27 = vld [vmem:[#allocation2 + $0x14] sm:$0x1] }
  0xe8   : > { %v2034_v37 = vrot.slane %v2032_v15, 4  ;;  %v2089_v43 = vunpack.c.l.b16 %v2033_v22  ;;  %v1838_v52 = vadd.f32 %v1837_v34, %v1617_v40  ;;  %v2633_v62 = vrot.slane %v2631_v44, 5  ;;  %v11298_v40 = vld [vmem:[#allocation2 + $0xb8] sm:$0xf]  ;;  %v12011_v34 = vld [vmem:[#allocation2 + $0x1c] sm:$0xf] }
  0xe9   : > { %10307 = vmatmul.msk.bf16.gmra.mxu0 %vm1540_vm14, %v1534_v60  ;;  %v1387_v41 = vor.u32 %v1386_v51, %v1382_v30  ;;  %v1383_v1 = vsel %vm11429_vm15, %v1378_v26, %v1382_v30  ;;  %v11297_v60 = vld [vmem:[#allocation2 + $0xb0] sm:$0x1]  ;;  %v2054_v15 = vsel %vm11410_vm12, %v10407_v58, %v2053_v7  ;;  %v11998_v17 = vpop.f32.mrf.mxu3  ;;  %v2641_v30 = vshll.u32 %v11994_v27, 16  ;;  %v1917_v48 = vld [vmem:[#allocation2 + $0xb4] sm:$0xe] }
  0xea   : > { %v2036_v49 = vsel %vm11410_vm12, %v2034_v37, %v2035_v23  ;;  %v2056_v3 = vrot.slane %v11297_v60, 5  ;;  %v1514_v24 = vunpack.c.l.b16 %v1383_v1  ;;  %v2628_v23 = vor.u32 %v2627_v18, %v2624_v6 }
  0xeb   : > { %v1388_v53 = vrot.slane %v1387_v41, 4  ;;  %v2090_v59 = vunpack.c.l.b16 %v2036_v49  ;;  %v2190_v0 = vpop.f32.mrf.mxu2  ;;  %v2638_v26 = vor.u32 %v2637_v8, %v2633_v62  ;;  %v2095_v22 = vunpack.c.l.b16 %v2054_v15  ;;  %v12027_v15 = vld [vmem:[#allocation2 + $0x20] sm:$0x1] }
  0xec   : > { %v11989_v5 = vadd.f32 %v2190_v0, %v1838_v52  ;;  %v2643_v38 = vrot.slane %v2641_v30, 5  ;;  %v2060_v41 = vrot.slane %v11298_v40, 5  ;;  %v2646_v49 = vshrl.u32 %v2576_v16, 16  ;;  %v11132_v40 = vld [vmem:[#allocation2 + $0x18] sm:$0xff] }
  0xed   : > { %10388 = vmatmul.msk.bf16.gmra.mxu1 %vm1540_vm14, %v11111_v61  ;;  %v1393_v4 = vsel %vm11429_vm15, %v1388_v53, %v1392_v33  ;;  %v2110_v10 = vpack.c.b16 %v2090_v59, %v2089_v43  ;;  %v12003_v51 = vpop.f32.mrf.mxu1  ;;  %v2629_v61 = vrot.slane %v2628_v23, 4  ;;  %v2639_v7 = vrot.slane %v2638_v26, 4  ;;  %v3227_v26 = vld [vmem:[#allocation2 + $0xc] sm:$0xe] }
  0xee   : > { %10423 = vmatmul.msk.bf16.gmra.mxu3 %vm1540_vm14, %v2112_v20  ;;  %v1515_v9 = vunpack.c.l.b16 %v1393_v4  ;;  %v2057_v20 = vsel %vm11410_vm12, %v2055_v56, %v2056_v3  ;;  %v2649_v43 = vshll.u32 %v2576_v16, 16  ;;  %v2655_v58 = vshll.u32 %v12011_v34, 16  ;;  %v11299_v3 = vld [vmem:[#allocation2 + $0xbc] sm:$0x1] }
  0xef   : > { %v2096_v36 = vunpack.c.l.b16 %v2057_v20  ;;  %v12006_v37 = vpop.f32.mrf.mxu0  ;;  %v2634_v52 = vsel %vm11429_vm15, %v2629_v61, %v2633_v62  ;;  %v2644_v1 = vsel %vm11429_vm15, %v2639_v7, %v2643_v38  ;;  %v2659_v59 = vshrl.u32 %v12011_v34, 16 }
  0xf0   : > { %v1535_v35 = vpack.c.b16 %v1515_v9, %v1514_v24  ;;  %v10408_v56 = vrot.slane %v1917_v48, 9  ;;  %v2062_v60 = vrot.slane %v2060_v41, 4  ;;  %v2063_v6 = vrot.slane %v11299_v3, 5  ;;  %v10638_v24 = vld [vmem:[%s15786_s3 + $0xe] sm:$0x3] }
  0xf1   : > { %v2113_v44 = vpack.c.b16 %v2096_v36, %v2095_v22  ;;  %v3007_v4 = vunpack.c.l.b16 %v2634_v52  ;;  %v3008_v18 = vunpack.c.l.b16 %v2644_v1  ;;  %v2648_v8 = vrot.slane %v2646_v49, 4 }
  0xf2   : > { %v2651_v62 = vrot.slane %v2649_v43, 5  ;;  %v4443_v9 = vsel %vm1589_vm0, %v10638_v24, 0  ;;  %v2657_v20 = vrot.slane %v2655_v58, 5  ;;  %v2661_v23 = vrot.slane %v2659_v59, 4 }
  0xf3   : > { %v12009_v33 = vpop.f32.mrf.mxu2  ;;  %4452 = vmatpush.bf16.msra.mxu3 %v4443_v9  ;;  %v10524_v22 = vrot.slane %v3227_v26, 9  ;;  %v3296_v61 = vrot.slane %v11994_v27, 5  ;;  %v2064_v7 = vsel %vm11410_vm12, %v2062_v60, %v2063_v6  ;;  %v3039_v38 = vpack.c.b16 %v3008_v18, %v3007_v4  ;;  %v12050_v9 = vld [vmem:[#allocation2 + $0x28] sm:$0xf] }
  0xf4   : > { %v2665_v49 = vshll.u32 %v12027_v15, 16  ;;  %v2098_v60 = vunpack.c.l.b16 %v2064_v7 }
  0xf5   : > { %10421 = vmatmul.msk.bf16.gmra.mxu2 %vm1540_vm14, %v2110_v10  ;;  %v3293_v10 = vrot.slane %v11976_v25, 5  ;;  %v2652_v25 = vor.u32 %v2651_v62, %v2648_v8  ;;  %v2579_v62 = vld [vmem:[#allocation2 + $0x24] sm:$0xf] }
  0xf6   : > { %v12019_v0 = vpop.f32.mrf.mxu3  ;;  %v2667_v8 = vrot.slane %v2665_v49, 5 }
  0xf7   : > { %v3295_v36 = vrot.slane %v3293_v10, 4  ;;  %v3294_v27 = vsel %vm11410_vm12, %v10524_v22, %v3293_v10  ;;  %v2653_v4 = vrot.slane %v2652_v25, 4  ;;  %v2670_v22 = vshrl.u32 %v2579_v62, 16 }
  0xf8   : > { %v1842_v53 = vpop.f32.mrf.mxu1  ;;  %v3405_v58 = vunpack.c.l.b16 %v3294_v27 }
  0xf9   : > { %10308 = vmatmul.msk.bf16.gmra.mxu0 %vm1540_vm14, %v1535_v35  ;;  %v2061_v35 = vsel %vm11410_vm12, %v10408_v56, %v2060_v41  ;;  %v3297_v52 = vsel %vm11410_vm12, %v3295_v36, %v3296_v61  ;;  %v2658_v26 = vsel %vm11429_vm15, %v2653_v4, %v2657_v20  ;;  %v2673_v36 = vshll.u32 %v2579_v62, 16 }
  0xfa   : > { %v3406_v59 = vunpack.c.l.b16 %v3297_v52  ;;  %v2097_v56 = vunpack.c.l.b16 %v2061_v35  ;;  %v3009_v25 = vunpack.c.l.b16 %v2658_v26  ;;  %v2581_v52 = vld [vmem:[#allocation2 + $0x2c] sm:$0x1] }
  0xfc   : > { %v3437_v3 = vpack.c.b16 %v3406_v59, %v3405_v58  ;;  %v2114_v10 = vpack.c.b16 %v2098_v60, %v2097_v56  ;;  %v3303_v59 = vrot.slane %v12027_v15, 5  ;;  %v11133_v56 = vld [vmem:[#allocation2 + $0x24] sm:$0xff] }
  0xfe   : > { %10424 = vmatmul.msk.bf16.gmra.mxu3 %vm1540_vm14, %v2113_v44  ;;  %v10671_v44 = vld [vmem:[%s15786_s3 + $0x10] sm:$0x3]  ;;  %v12046_v6 = vpop.f32.mrf.mxu3  ;;  %10541 = vmatmul.msk.bf16.vlgmr.msrb.gmra.mxu1 %vm1540_vm14, %v3437_v3 }
  0xff   : > { %v4841_v41 = vsel %vm1589_vm0, %v10671_v44, 0  ;;  %v2672_v44 = vrot.slane %v2670_v22, 4 }
 0x100   : > { %v1844_v43 = vpop.f32.mrf.mxu1  ;;  %4850 = vmatpush.bf16.msra.mxu0 %v4841_v41  ;;  %v3228_v41 = vld [vmem:[#allocation2 + $0x18] sm:$0xe] }
 0x102   : > { %v1622_v30 = vpop.f32.mrf.mxu0 }
 0x103   : > { %v1843_v16 = vadd.f32 %v1842_v53, %v1622_v30  ;;  %v2662_v53 = vor.u32 %v2661_v23, %v2657_v20  ;;  %v3300_v20 = vrot.slane %v12011_v34, 5 }
 0x104   : > { %v2195_v48 = vpop.f32.mrf.mxu2 }
 0x105   : > { %v12043_v1 = vadd.f32 %v2195_v48, %v1843_v16  ;;  %10622 = vmatmul.msk.bf16.vlgmr.msrb.gmra.mxu2 %vm1540_vm14, %v11132_v40  ;;  %v2663_v18 = vrot.slane %v2662_v53, 4  ;;  %v2683_v16 = vshrl.u32 %v12050_v9, 16  ;;  %v2675_v48 = vrot.slane %v2673_v36, 5 }
 0x106   : > { %v10525_v53 = vrot.slane %v3228_v41, 9  ;;  %v3302_v58 = vrot.slane %v3300_v20, 4 }
 0x107   : > { %v2668_v61 = vsel %vm11429_vm15, %v2663_v18, %v2667_v8  ;;  %v2676_v3 = vor.u32 %v2675_v48, %v2672_v44  ;;  %v11116_v44 = vld [vmem:[#allocation2 + $0xc] sm:$0xff] }
 0x108   : > { %v3010_v40 = vunpack.c.l.b16 %v2668_v61  ;;  %v3301_v18 = vsel %vm11410_vm12, %v10525_v53, %v3300_v20  ;;  %v3304_v34 = vsel %vm11410_vm12, %v3302_v58, %v3303_v59 }
 0x109   : > { %10508 = vmatmul.msk.bf16.vlgmr.msrb.gmra.mxu0 %vm1540_vm14, %v3039_v38  ;;  %v1847_v35 = vpop.f32.mrf.mxu1  ;;  %v2679_v38 = vshll.u32 %v12050_v9, 16  ;;  %v2677_v22 = vrot.slane %v2676_v3, 4 }
 0x10a   : > { %v1624_v24 = vpop.f32.mrf.mxu0  ;;  %v3040_v60 = vpack.c.b16 %v3010_v40, %v3009_v25  ;;  %v12076_v40 = vld [vmem:[#allocation2 + $0x34] sm:$0xf] }
 0x10b   : > { %v1845_v23 = vadd.f32 %v1844_v43, %v1624_v24  ;;  %v2681_v49 = vrot.slane %v2679_v38, 5  ;;  %v2685_v43 = vrot.slane %v2683_v16, 4  ;;  %v2689_v24 = vshll.u32 %v2581_v52, 16  ;;  %v2582_v16 = vld [vmem:[#allocation2 + $0x30] sm:$0xf] }
 0x10c   : > { %v2197_v30 = vpop.f32.mrf.mxu2  ;;  %v2694_v20 = vshrl.u32 %v2582_v16, 16  ;;  %v2703_v58 = vshll.u32 %v12076_v40, 16  ;;  %v2707_v59 = vshrl.u32 %v12076_v40, 16 }
 0x10d   : > { %v12056_v7 = vadd.f32 %v2197_v30, %v1845_v23  ;;  %v2686_v62 = vor.u32 %v2685_v43, %v2681_v49  ;;  %v3408_v23 = vunpack.c.l.b16 %v3304_v34  ;;  %v2691_v38 = vrot.slane %v2689_v24, 5 }
 0x10e   : > { %10425 = vmatmul.msk.bf16.gmra.mxu3 %vm1540_vm14, %v2114_v10  ;;  %v3407_v10 = vunpack.c.l.b16 %v3301_v18  ;;  %v2697_v43 = vshll.u32 %v2582_v16, 16  ;;  %v2696_v34 = vrot.slane %v2694_v20, 4  ;;  %v2705_v24 = vrot.slane %v2703_v58, 5 }
 0x10f   : > { %15805 = vst [vmem:[#allocation4_spill] sm:$0xff] %v12056_v7  ;;  %v2687_v61 = vrot.slane %v2686_v62, 4 }
 0x110   : > { %v3438_v30 = vpack.c.b16 %v3408_v23, %v3407_v10  ;;  %v2709_v10 = vrot.slane %v2707_v59, 4  ;;  %v3229_v23 = vld [vmem:[#allocation2 + $0x24] sm:$0xe] }
 0x111   : > { %v12062_v27 = vpop.f32.mrf.mxu3  ;;  %v1849_v4 = vpop.f32.mrf.mxu1  ;;  %v2692_v53 = vsel %vm11429_vm15, %v2687_v61, %v2691_v38  ;;  %v11134_v61 = vld [vmem:[#allocation2 + $0x30] sm:$0xff] }
 0x112   : > { %10542 = vmatmul.msk.bf16.gmra.mxu1 %vm1540_vm14, %v3438_v30  ;;  %v3012_v3 = vunpack.c.l.b16 %v2692_v53  ;;  %v2584_v30 = vld [vmem:[#allocation2 + $0x38] sm:$0x1] }
 0x115   : > { %v1627_v8 = vpop.f32.mrf.mxu0  ;;  %10623 = vmatmul.msk.bf16.gmra.mxu2 %vm1540_vm14, %v11133_v56 }
 0x116   : > { %v1848_v26 = vadd.f32 %v1847_v35, %v1627_v8  ;;  %v2682_v35 = vsel %vm11429_vm15, %v2677_v22, %v2681_v49  ;;  %v2699_v8 = vrot.slane %v2697_v43, 5  ;;  %v3307_v49 = vrot.slane %v12050_v9, 5 }
 0x117   : > { %v2200_v15 = vpop.f32.mrf.mxu2  ;;  %v2710_v43 = vor.u32 %v2709_v10, %v2705_v24  ;;  %v12101_v10 = vld [vmem:[#allocation2 + $0x40] sm:$0xf] }
 0x118   : > { %v12071_v36 = vadd.f32 %v2200_v15, %v1848_v26  ;;  %v10526_v15 = vrot.slane %v3229_v23, 9  ;;  %v3309_v22 = vrot.slane %v3307_v49, 4  ;;  %v2700_v16 = vor.u32 %v2699_v8, %v2696_v34  ;;  %v2585_v8 = vld [vmem:[#allocation2 + $0x3c] sm:$0xf] }
 0x119   : > { %10509 = vmatmul.msk.bf16.gmra.mxu0 %vm1540_vm14, %v3040_v60  ;;  %v12074_v25 = vpop.f32.mrf.mxu3  ;;  %v1852_v48 = vpop.f32.mrf.mxu1  ;;  %v3011_v60 = vunpack.c.l.b16 %v2682_v35  ;;  %v11117_v23 = vld [vmem:[#allocation2 + $0x18] sm:$0xff] }
 0x11a   : > { %15806 = vst [vmem:[#allocation5_spill] sm:$0xff] %v12071_v36  ;;  %v3308_v35 = vsel %vm11410_vm12, %v10526_v15, %v3307_v49 }
 0x11b   : > { %v3041_v38 = vpack.c.b16 %v3012_v3, %v3011_v60  ;;  %v3409_v53 = vunpack.c.l.b16 %v3308_v35  ;;  %v2711_v3 = vrot.slane %v2710_v43, 4  ;;  %v2731_v35 = vshrl.u32 %v12101_v10, 16 }
 0x11d   : > { %v1629_v41 = vpop.f32.mrf.mxu0 }
 0x11e   : > { %v1850_v56 = vadd.f32 %v1849_v4, %v1629_v41  ;;  %10491 = vmatmul.msk.bf16.vlgmr.msrb.gmra.mxu3 %vm1540_vm14, %v11116_v44  ;;  %v3310_v4 = vrot.slane %v2581_v52, 5  ;;  %v2713_v41 = vshll.u32 %v2584_v30, 16 }
 0x11f   : > { %v2202_v18 = vpop.f32.mrf.mxu2 }
 0x120   : > { %v12086_v62 = vadd.f32 %v2202_v18, %v1850_v56  ;;  %v3311_v9 = vsel %vm11410_vm12, %v3309_v22, %v3310_v4  ;;  %v2701_v18 = vrot.slane %v2700_v16, 4  ;;  %v2715_v34 = vrot.slane %v2713_v41, 5 }
 0x121   : > { %v12088_v26 = vpop.f32.mrf.mxu3  ;;  %v1854_v44 = vpop.f32.mrf.mxu1  ;;  %v3410_v58 = vunpack.c.l.b16 %v3311_v9  ;;  %v2718_v22 = vshrl.u32 %v2585_v8, 16  ;;  %v2721_v4 = vshll.u32 %v2585_v8, 16  ;;  %v2727_v16 = vshll.u32 %v12101_v10, 16 }
 0x122   : > { %15807 = vst [vmem:[#allocation6_spill] sm:$0xff] %v12086_v62 }
 0x123   : > { %v3439_v56 = vpack.c.b16 %v3410_v58, %v3409_v53  ;;  %v2720_v53 = vrot.slane %v2718_v22, 4  ;;  %v2723_v58 = vrot.slane %v2721_v4, 5 }
 0x125   : > { %v1632_v20 = vpop.f32.mrf.mxu0  ;;  %10624 = vmatmul.msk.bf16.gmra.mxu2 %vm1540_vm14, %v11134_v61  ;;  %10543 = vmatmul.msk.bf16.gmra.mxu1 %vm1540_vm14, %v3439_v56  ;;  %v2729_v56 = vrot.slane %v2727_v16, 5 }
 0x126   : > { %v1853_v59 = vadd.f32 %v1852_v48, %v1632_v20  ;;  %v2706_v48 = vsel %vm11429_vm15, %v2701_v18, %v2705_v24  ;;  %v3314_v24 = vrot.slane %v12076_v40, 5  ;;  %v3230_v18 = vld [vmem:[#allocation2 + $0x30] sm:$0xe] }
 0x127   : > { %v2205_v52 = vpop.f32.mrf.mxu2  ;;  %v3013_v20 = vunpack.c.l.b16 %v2706_v48  ;;  %v10527_v8 = vrot.slane %v3230_v18, 9  ;;  %v2724_v48 = vor.u32 %v2723_v58, %v2720_v53 }
 0x128   : > { %v12096_v60 = vadd.f32 %v2205_v52, %v1853_v59  ;;  %v2733_v52 = vrot.slane %v2731_v35, 4 }
 0x129   : > { %10510 = vmatmul.msk.bf16.gmra.mxu0 %vm1540_vm14, %v3041_v38  ;;  %v12099_v49 = vpop.f32.mrf.mxu3  ;;  %v2716_v38 = vsel %vm11429_vm15, %v2711_v3, %v2715_v34  ;;  %v2587_v34 = vld [vmem:[#allocation2 + $0x44] sm:$0x1]  ;;  %v3315_v22 = vsel %vm11410_vm12, %v10527_v8, %v3314_v24  ;;  %v2725_v62 = vrot.slane %v2724_v48, 4 }
 0x12a   : > { %15808 = vst [vmem:[#allocation7_spill] sm:$0xff] %v12096_v60  ;;  %v1857_v15 = vpop.f32.mrf.mxu1  ;;  %v3014_v43 = vunpack.c.l.b16 %v2716_v38  ;;  %v3316_v60 = vrot.slane %v3314_v24, 4  ;;  %v2734_v4 = vor.u32 %v2733_v52, %v2729_v56  ;;  %v2737_v16 = vshll.u32 %v2587_v34, 16  ;;  %v12126_v24 = vld [vmem:[#allocation2 + $0x4c] sm:$0xf]  ;;  %v11118_v52 = vld [vmem:[#allocation2 + $0x24] sm:$0xff] }
 0x12b   : > { %v3411_v35 = vunpack.c.l.b16 %v3315_v22  ;;  %v2751_v48 = vshll.u32 %v12126_v24, 16  ;;  %v2755_v22 = vshrl.u32 %v12126_v24, 16 }
 0x12c   : > { %v2739_v53 = vrot.slane %v2737_v16, 5 }
 0x12d   : > { %v1634_v61 = vpop.f32.mrf.mxu0 }
 0x12e   : > { %v1855_v9 = vadd.f32 %v1854_v44, %v1634_v61  ;;  %10492 = vmatmul.msk.bf16.gmra.mxu3 %vm1540_vm14, %v11117_v23  ;;  %v3317_v44 = vrot.slane %v2584_v30, 5  ;;  %v11135_v61 = vld [vmem:[#allocation2 + $0x3c] sm:$0xff]  ;;  %v3042_v23 = vpack.c.b16 %v3014_v43, %v3013_v20  ;;  %v2735_v43 = vrot.slane %v2734_v4, 4 }
 0x12f   : > { %v2207_v41 = vpop.f32.mrf.mxu2 }
 0x130   : > { %v12111_v59 = vadd.f32 %v2207_v41, %v1855_v9  ;;  %v3318_v40 = vsel %vm11410_vm12, %v3316_v60, %v3317_v44  ;;  %v2588_v60 = vld [vmem:[#allocation2 + $0x48] sm:$0xf] }
 0x131   : > { %v12113_v3 = vpop.f32.mrf.mxu3  ;;  %v3412_v9 = vunpack.c.l.b16 %v3318_v40  ;;  %v2742_v44 = vshrl.u32 %v2588_v60, 16 }
 0x132   : > { %15809 = vst [vmem:[#allocation8_spill] sm:$0xff] %v12111_v59  ;;  %v1859_v38 = vpop.f32.mrf.mxu1 }
 0x133   : > { %v3440_v59 = vpack.c.b16 %v3412_v9, %v3411_v35  ;;  %v2744_v9 = vrot.slane %v2742_v44, 4 }
 0x135   : > { %10625 = vmatmul.msk.bf16.gmra.mxu2 %vm1540_vm14, %v11135_v61  ;;  %10544 = vmatmul.msk.bf16.gmra.mxu1 %vm1540_vm14, %v3440_v59  ;;  %v2745_v61 = vshll.u32 %v2588_v60, 16  ;;  %v12140_v60 = vld [vmem:[#allocation2 + $0x50] sm:$0x1] }
 0x136   : > { %v1637_v41 = vpop.f32.mrf.mxu0 }
 0x137   : > { %v1858_v18 = vadd.f32 %v1857_v15, %v1637_v41  ;;  %v2730_v15 = vsel %vm11429_vm15, %v2725_v62, %v2729_v56  ;;  %v2747_v41 = vrot.slane %v2745_v61, 5  ;;  %v3321_v62 = vrot.slane %v12101_v10, 5 }
 0x138   : > { %v2210_v30 = vpop.f32.mrf.mxu2  ;;  %v3015_v40 = vunpack.c.l.b16 %v2730_v15  ;;  %v11136_v15 = vld [vmem:[#allocation2 + $0x48] sm:$0xff] }
 0x139   : > { %10511 = vmatmul.msk.bf16.gmra.mxu0 %vm1540_vm14, %v3042_v23  ;;  %v12121_v20 = vadd.f32 %v2210_v30, %v1858_v18  ;;  %v12124_v58 = vpop.f32.mrf.mxu3  ;;  %v2740_v23 = vsel %vm11429_vm15, %v2735_v43, %v2739_v53  ;;  %v2753_v18 = vrot.slane %v2751_v48, 5  ;;  %v2757_v30 = vrot.slane %v2755_v22, 4  ;;  %v3231_v43 = vld [vmem:[#allocation2 + $0x3c] sm:$0xe] }
 0x13a   : > { %v1862_v8 = vpop.f32.mrf.mxu1  ;;  %v3016_v16 = vunpack.c.l.b16 %v2740_v23  ;;  %v3323_v36 = vrot.slane %v3321_v62, 4  ;;  %v2748_v23 = vor.u32 %v2747_v41, %v2744_v9  ;;  %v2761_v48 = vshll.u32 %v12140_v60, 16 }
 0x13b   : > { %15810 = vst [vmem:[#allocation9_spill] sm:$0xff] %v12121_v20  ;;  %v10528_v20 = vrot.slane %v3231_v43, 9  ;;  %v2758_v61 = vor.u32 %v2757_v30, %v2753_v18 }
 0x13c   : > { %v2763_v9 = vrot.slane %v2761_v48, 5 }
 0x13d   : > { %v3322_v44 = vsel %vm11410_vm12, %v10528_v20, %v3321_v62  ;;  %v2759_v20 = vrot.slane %v2758_v61, 4  ;;  %v12152_v62 = vld [vmem:[#allocation2 + $0x58] sm:$0xf] }
 0x13e   : > { %v1639_v59 = vpop.f32.mrf.mxu0  ;;  %10493 = vmatmul.msk.bf16.gmra.mxu3 %vm1540_vm14, %v11118_v52  ;;  %v3324_v52 = vrot.slane %v2587_v34, 5  ;;  %v3413_v22 = vunpack.c.l.b16 %v3322_v44  ;;  %v2775_v44 = vshll.u32 %v12152_v62, 16 }
 0x13f   : > { %v1860_v4 = vadd.f32 %v1859_v38, %v1639_v59  ;;  %v3043_v38 = vpack.c.b16 %v3016_v16, %v3015_v40  ;;  %v2749_v40 = vrot.slane %v2748_v23, 4 }
 0x140   : > { %v2212_v35 = vpop.f32.mrf.mxu2  ;;  %v3325_v10 = vsel %vm11410_vm12, %v3323_v36, %v3324_v52  ;;  %v2591_v36 = vld [vmem:[#allocation2 + $0x54] sm:$0xf] }
 0x141   : > { %v12136_v56 = vadd.f32 %v2212_v35, %v1860_v4  ;;  %v12138_v53 = vpop.f32.mrf.mxu3  ;;  %v3414_v4 = vunpack.c.l.b16 %v3325_v10  ;;  %v11119_v52 = vld [vmem:[#allocation2 + $0x30] sm:$0xff]  ;;  %v2766_v23 = vshrl.u32 %v2591_v36, 16  ;;  %v2779_v10 = vshrl.u32 %v12152_v62, 16 }
 0x142   : > { %v1864_v59 = vpop.f32.mrf.mxu1 }
 0x143   : > { %15811 = vst [vmem:[#allocation10_spill] sm:$0xff] %v12136_v56  ;;  %v3441_v34 = vpack.c.b16 %v3414_v4, %v3413_v22 }
 0x145   : > { %10626 = vmatmul.msk.bf16.gmra.mxu2 %vm1540_vm14, %v11136_v15  ;;  %10545 = vmatmul.msk.bf16.gmra.mxu1 %vm1540_vm14, %v3441_v34 }
 0x146   : > { %v1642_v35 = vpop.f32.mrf.mxu0 }
 0x147   : > { %v1863_v43 = vadd.f32 %v1862_v8, %v1642_v35  ;;  %v2754_v8 = vsel %vm11429_vm15, %v2749_v40, %v2753_v18  ;;  %v2768_v35 = vrot.slane %v2766_v23, 4  ;;  %v3328_v18 = vrot.slane %v12126_v24, 5 }
 0x148   : > { %v2215_v56 = vpop.f32.mrf.mxu2  ;;  %v3017_v48 = vunpack.c.l.b16 %v2754_v8  ;;  %v2777_v40 = vrot.slane %v2775_v44, 5  ;;  %v11137_v8 = vld [vmem:[#allocation2 + $0x54] sm:$0xff] }
 0x149   : > { %10512 = vmatmul.msk.bf16.gmra.mxu0 %vm1540_vm14, %v3043_v38  ;;  %v12149_v16 = vadd.f32 %v2215_v56, %v1863_v43  ;;  %v1894_v41 = vpop.f32.mrf.mxu3  ;;  %v2769_v38 = vshll.u32 %v2591_v36, 16  ;;  %v2764_v56 = vsel %vm11429_vm15, %v2759_v20, %v2763_v9  ;;  %v2781_v36 = vrot.slane %v2779_v10, 4  ;;  %v3232_v20 = vld [vmem:[#allocation2 + $0x48] sm:$0xe] }
 0x14a   : > { %v12155_v30 = vadd.f32 %v1894_v41, %v12046_v6  ;;  %v1867_v15 = vpop.f32.mrf.mxu1  ;;  %v3018_v22 = vunpack.c.l.b16 %v2764_v56  ;;  %v12167_v41 = vld [vmem:[#allocation2 + $0x5c] sm:$0x1]  ;;  %v3330_v7 = vrot.slane %v3328_v18, 4 }
 0x14b   : > { %15812 = vst [vmem:[#allocation11_spill] sm:$0xff] %v12149_v16  ;;  %v2771_v43 = vrot.slane %v2769_v38, 5  ;;  %v10529_v16 = vrot.slane %v3232_v20, 9  ;;  %v2782_v10 = vor.u32 %v2781_v36, %v2777_v40 }
 0x14c   : > { %v3044_v23 = vpack.c.b16 %v3018_v22, %v3017_v48 }
 0x14d   : > { %v2772_v38 = vor.u32 %v2771_v43, %v2768_v35  ;;  %v3329_v24 = vsel %vm11410_vm12, %v10529_v16, %v3328_v18  ;;  %v2783_v16 = vrot.slane %v2782_v10, 4  ;;  %v12183_v18 = vld [vmem:[#allocation2 + $0x64] sm:$0xf] }
 0x14e   : > { %v1644_v61 = vpop.f32.mrf.mxu0  ;;  %10494 = vmatmul.msk.bf16.gmra.mxu3 %vm1540_vm14, %v11119_v52  ;;  %v3331_v52 = vrot.slane %v12140_v60, 5 }
 0x14f   : > { %v1865_v6 = vadd.f32 %v1864_v59, %v1644_v61  ;;  %v2785_v61 = vshll.u32 %v12167_v41, 16  ;;  %v2773_v48 = vrot.slane %v2772_v38, 4 }
 0x150   : > { %v2217_v4 = vpop.f32.mrf.mxu2  ;;  %v3332_v44 = vsel %vm11410_vm12, %v3330_v7, %v3331_v52  ;;  %v2594_v7 = vld [vmem:[#allocation2 + $0x60] sm:$0xf] }
 0x151   : > { %v12165_v34 = vadd.f32 %v2217_v4, %v1865_v6  ;;  %v1897_v9 = vpop.f32.mrf.mxu3  ;;  %v3415_v6 = vunpack.c.l.b16 %v3329_v24  ;;  %v3416_v60 = vunpack.c.l.b16 %v3332_v44  ;;  %v2787_v35 = vrot.slane %v2785_v61, 5  ;;  %v11120_v52 = vld [vmem:[#allocation2 + $0x3c] sm:$0xff] }
 0x152   : > { %v12171_v59 = vadd.f32 %v1897_v9, %v12062_v27  ;;  %v1869_v56 = vpop.f32.mrf.mxu1  ;;  %v2793_v38 = vshll.u32 %v2594_v7, 16  ;;  %v2799_v24 = vshll.u32 %v12183_v18, 16  ;;  %v2803_v44 = vshrl.u32 %v12183_v18, 16 }
 0x153   : > { %v3442_v20 = vpack.c.b16 %v3416_v60, %v3415_v6 }
 0x155   : > { %10627 = vmatmul.msk.bf16.gmra.mxu2 %vm1540_vm14, %v11137_v8  ;;  %10546 = vmatmul.msk.bf16.gmra.mxu1 %vm1540_vm14, %v3442_v20  ;;  %v2790_v8 = vshrl.u32 %v2594_v7, 16  ;;  %v2795_v20 = vrot.slane %v2793_v38, 5  ;;  %v3233_v7 = vld [vmem:[#allocation2 + $0x54] sm:$0xe] }
 0x156   : > { %v1647_v4 = vpop.f32.mrf.mxu0 }
 0x157   : > { %v1868_v27 = vadd.f32 %v1867_v15, %v1647_v4  ;;  %v2778_v15 = vsel %vm11429_vm15, %v2773_v48, %v2777_v40  ;;  %v3335_v40 = vrot.slane %v12152_v62, 5 }
 0x158   : > { %v2220_v9 = vpop.f32.mrf.mxu2  ;;  %v3019_v6 = vunpack.c.l.b16 %v2778_v15 }
 0x159   : > { %10513 = vmatmul.msk.bf16.gmra.mxu0 %vm1540_vm14, %v3044_v23  ;;  %v12180_v22 = vadd.f32 %v2220_v9, %v1868_v27  ;;  %v1899_v43 = vpop.f32.mrf.mxu3  ;;  %v2788_v23 = vsel %vm11429_vm15, %v2783_v16, %v2787_v35  ;;  %v2792_v27 = vrot.slane %v2790_v8, 4  ;;  %v1883_v9 = vadd.f32 %v12088_v26, %v11931_v50  ;;  %v11138_v8 = vld [vmem:[#allocation2 + $0x60] sm:$0xff] }
 0x15a   : > { %v12186_v36 = vadd.f32 %v1899_v43, %v12074_v25  ;;  %v1872_v61 = vpop.f32.mrf.mxu1  ;;  %v3020_v60 = vunpack.c.l.b16 %v2788_v23  ;;  %v2801_v16 = vrot.slane %v2799_v24, 5  ;;  %v2805_v35 = vrot.slane %v2803_v44, 4 }
 0x15b   : > { %15813 = vst [vmem:[#allocation12_spill] sm:$0xff] %v12180_v22  ;;  %v12200_v22 = vld [vmem:[#allocation2 + $0x68] sm:$0x1]  ;;  %v3337_v15 = vrot.slane %v3335_v40, 4  ;;  %v2796_v62 = vor.u32 %v2795_v20, %v2792_v27 }
 0x15c   : > { %v3045_v38 = vpack.c.b16 %v3020_v60, %v3019_v6  ;;  %v2806_v24 = vor.u32 %v2805_v35, %v2801_v16  ;;  %v2809_v44 = vshll.u32 %v12200_v22, 16  ;;  %v1885_v60 = vadd.f32 %v12099_v49, %v11959_v47  ;;  %v2597_v35 = vld [vmem:[#allocation2 + $0x6c] sm:$0xf] }
 0x15d   : > { %v2817_v47 = vshll.u32 %v2597_v35, 16 }
 0x15e   : > { %v1649_v10 = vpop.f32.mrf.mxu0  ;;  %10495 = vmatmul.msk.bf16.gmra.mxu3 %vm1540_vm14, %v11120_v52  ;;  %v10530_v52 = vrot.slane %v3233_v7, 9  ;;  %v2807_v20 = vrot.slane %v2806_v24, 4 }
 0x15f   : > { %v1870_v25 = vadd.f32 %v1869_v56, %v1649_v10  ;;  %v3338_v56 = vrot.slane %v12167_v41, 5 }
 0x160   : > { %v2222_v4 = vpop.f32.mrf.mxu2  ;;  %v3336_v50 = vsel %vm11410_vm12, %v10530_v52, %v3335_v40  ;;  %v2811_v40 = vrot.slane %v2809_v44, 5 }
 0x161   : > { %v12198_v48 = vadd.f32 %v2222_v4, %v1870_v25  ;;  %v2235_v43 = vpop.f32.mrf.mxu3  ;;  %v3339_v26 = vsel %vm11410_vm12, %v3337_v15, %v3338_v56  ;;  %v3417_v10 = vunpack.c.l.b16 %v3336_v50  ;;  %v12217_v15 = vld [vmem:[#allocation2 + $0x70] sm:$0xf]  ;;  %v11121_v56 = vld [vmem:[#allocation2 + $0x48] sm:$0xff] }
 0x162   : > { %v12203_v23 = vadd.f32 %v2235_v43, %v1883_v9  ;;  %v3418_v25 = vunpack.c.l.b16 %v3339_v26  ;;  %v2797_v43 = vrot.slane %v2796_v62, 4  ;;  %v1874_v6 = vpop.f32.mrf.mxu1  ;;  %v2814_v62 = vshrl.u32 %v2597_v35, 16 }
 0x163   : > { %v2812_v49 = vsel %vm11429_vm15, %v2807_v20, %v2811_v40  ;;  %v2827_v50 = vshrl.u32 %v12217_v15, 16  ;;  %v3234_v20 = vld [vmem:[#allocation2 + $0x60] sm:$0xe] }
 0x164   : > { %15814 = vst [vmem:[#allocation13_spill] sm:$0xff] %v12203_v23  ;;  %v3443_v9 = vpack.c.b16 %v3418_v25, %v3417_v10  ;;  %v3022_v10 = vunpack.c.l.b16 %v2812_v49 }
 0x165   : > { %10628 = vmatmul.msk.bf16.gmra.mxu2 %vm1540_vm14, %v11138_v8  ;;  %v2802_v8 = vsel %vm11429_vm15, %v2797_v43, %v2801_v16  ;;  %v3342_v16 = vrot.slane %v12183_v18, 5 }
 0x166   : > { %v1652_v4 = vpop.f32.mrf.mxu0  ;;  %10547 = vmatmul.msk.bf16.gmra.mxu1 %vm1540_vm14, %v3443_v9  ;;  %v3021_v24 = vunpack.c.l.b16 %v2802_v8  ;;  %v1888_v9 = vadd.f32 %v12113_v3, %v11978_v45 }
 0x167   : > { %v1873_v41 = vadd.f32 %v1872_v61, %v1652_v4  ;;  %v2816_v4 = vrot.slane %v2814_v62, 4  ;;  %v3344_v8 = vrot.slane %v3342_v16, 4  ;;  %v11139_v62 = vld [vmem:[#allocation2 + $0x6c] sm:$0xff] }
 0x168   : > { %v2225_v7 = vpop.f32.mrf.mxu2 }
 0x169   : > { %10514 = vmatmul.msk.bf16.gmra.mxu0 %vm1540_vm14, %v3045_v38  ;;  %v12214_v27 = vadd.f32 %v2225_v7, %v1873_v41  ;;  %v2237_v52 = vpop.f32.mrf.mxu3  ;;  %v2823_v38 = vshll.u32 %v12217_v15, 16  ;;  %v2819_v41 = vrot.slane %v2817_v47, 5  ;;  %v3046_v47 = vpack.c.b16 %v3022_v10, %v3021_v24 }
 0x16a   : > { %v12219_v61 = vadd.f32 %v2237_v52, %v1885_v60  ;;  %v2829_v60 = vrot.slane %v2827_v50, 4  ;;  %v1877_v35 = vpop.f32.mrf.mxu1  ;;  %v2599_v52 = vld [vmem:[#allocation2 + $0x74] sm:$0x1]  ;;  %v1890_v24 = vadd.f32 %v12124_v58, %v11998_v17 }
 0x16b   : > { %v2825_v43 = vrot.slane %v2823_v38, 5  ;;  %v2820_v18 = vor.u32 %v2819_v41, %v2816_v4  ;;  %v2833_v50 = vshll.u32 %v2599_v52, 16 }
 0x16c   : > { %15815 = vst [vmem:[#allocation14_spill] sm:$0xff] %v12219_v61 }
 0x16d   : > { %v2830_v38 = vor.u32 %v2829_v60, %v2825_v43  ;;  %v2835_v41 = vrot.slane %v2833_v50, 5  ;;  %v2600_v60 = vld [vmem:[#allocation2 + $0x78] sm:$0xf]  ;;  %v1893_v50 = vadd.f32 %v12138_v53, %v12019_v0 }
 0x16e   : > { %v1654_v26 = vpop.f32.mrf.mxu0  ;;  %10496 = vmatmul.msk.bf16.gmra.mxu3 %vm1540_vm14, %v11121_v56  ;;  %v10531_v56 = vrot.slane %v3234_v20, 9  ;;  %v2838_v58 = vshrl.u32 %v2600_v60, 16  ;;  %v11140_v0 = vld [vmem:[#allocation2 + $0x78] sm:$0xff] }
 0x16f   : > { %v1875_v44 = vadd.f32 %v1874_v6, %v1654_v26  ;;  %v3345_v6 = vrot.slane %v12200_v22, 5  ;;  %v2831_v4 = vrot.slane %v2830_v38, 4 }
 0x170   : > { %v2227_v25 = vpop.f32.mrf.mxu2  ;;  %v3343_v45 = vsel %vm11410_vm12, %v10531_v56, %v3342_v16  ;;  %v12247_v56 = vld [vmem:[#allocation2 + $0x7c] sm:$0xf] }
 0x171   : > { %v12231_v7 = vadd.f32 %v2227_v25, %v1875_v44  ;;  %v2240_v40 = vpop.f32.mrf.mxu3  ;;  %v3346_v3 = vsel %vm11410_vm12, %v3344_v8, %v3345_v6  ;;  %v3419_v26 = vunpack.c.l.b16 %v3343_v45  ;;  %v2836_v17 = vsel %vm11429_vm15, %v2831_v4, %v2835_v41 }
 0x172   : > { %v12234_v49 = vadd.f32 %v2240_v40, %v1888_v9  ;;  %v3420_v44 = vunpack.c.l.b16 %v3346_v3  ;;  %v2821_v40 = vrot.slane %v2820_v18, 4  ;;  %v2847_v18 = vshll.u32 %v12247_v56, 16 }
 0x173   : > { %v2851_v3 = vshrl.u32 %v12247_v56, 16 }
 0x174   : > { %15816 = vst [vmem:[#allocation15_spill] sm:$0xff] %v12234_v49  ;;  %v3444_v22 = vpack.c.b16 %v3420_v44, %v3419_v26  ;;  %v2826_v6 = vsel %vm11429_vm15, %v2821_v40, %v2825_v43  ;;  %v3024_v44 = vunpack.c.l.b16 %v2836_v17  ;;  %v2849_v40 = vrot.slane %v2847_v18, 5 }
 0x175   : > { %10629 = vmatmul.msk.bf16.gmra.mxu2 %vm1540_vm14, %v11139_v62  ;;  %v1879_v62 = vpop.f32.mrf.mxu1  ;;  %v3023_v26 = vunpack.c.l.b16 %v2826_v6  ;;  %v2853_v41 = vrot.slane %v2851_v3, 4 }
 0x176   : > { %v1657_v25 = vpop.f32.mrf.mxu0  ;;  %10548 = vmatmul.msk.bf16.gmra.mxu1 %vm1540_vm14, %v3444_v22  ;;  %v2840_v22 = vrot.slane %v2838_v58, 4 }
 0x177   : > { %v1878_v20 = vadd.f32 %v1877_v35, %v1657_v25  ;;  %v11122_v35 = vld [vmem:[#allocation2 + $0x54] sm:$0xff]  ;;  %v3349_v25 = vrot.slane %v12217_v15, 5  ;;  %v3047_v6 = vpack.c.b16 %v3024_v44, %v3023_v26  ;;  %v2854_v3 = vor.u32 %v2853_v41, %v2849_v40  ;;  %v11123_v41 = vld [vmem:[#allocation2 + $0x60] sm:$0xff] }
 0x178   : > { %v2230_v9 = vpop.f32.mrf.mxu2 }
 0x179   : > { %10515 = vmatmul.msk.bf16.gmra.mxu0 %vm1540_vm14, %v3046_v47  ;;  %v12244_v10 = vadd.f32 %v2230_v9, %v1878_v20  ;;  %v2242_v16 = vpop.f32.mrf.mxu3  ;;  %v2841_v47 = vshll.u32 %v2600_v60, 16  ;;  %v3351_v60 = vrot.slane %v3349_v25, 4  ;;  %v2855_v44 = vrot.slane %v2854_v3, 4 }
 0x17a   : > { %v12249_v8 = vadd.f32 %v2242_v16, %v1890_v24  ;;  %v3235_v24 = vld [vmem:[#allocation2 + $0x6c] sm:$0xe] }
 0x17b   : > { %v2843_v9 = vrot.slane %v2841_v47, 5  ;;  %v10532_v16 = vrot.slane %v3235_v24, 9  ;;  %v12278_v24 = vld [vmem:[#allocation2 + $0x88] sm:$0xf] }
 0x17c   : > { %15817 = vst [vmem:[#allocation16_spill] sm:$0xff] %v12249_v8  ;;  %v2605_v8 = vld [vmem:[#allocation2 + $0x8c] sm:$0x1] }
 0x17d   : > { %v3350_v53 = vsel %vm11410_vm12, %v10532_v16, %v3349_v25  ;;  %v2844_v17 = vor.u32 %v2843_v9, %v2840_v22  ;;  %v2603_v9 = vld [vmem:[#allocation2 + $0x84] sm:$0xf]  ;;  %v3366_v23 = vrot.slane %v2605_v8, 5 }
 0x17e   : > { %v1659_v45 = vpop.f32.mrf.mxu0  ;;  %10497 = vmatmul.msk.bf16.gmra.mxu3 %vm1540_vm14, %v11122_v35  ;;  %v3352_v35 = vrot.slane %v2599_v52, 5  ;;  %v3421_v58 = vunpack.c.l.b16 %v3350_v53 }
 0x17f   : > { %v1880_v38 = vadd.f32 %v1879_v62, %v1659_v45  ;;  %v2602_v45 = vld [vmem:[#allocation2 + $0x80] sm:$0x1]  ;;  %v2845_v25 = vrot.slane %v2844_v17, 4  ;;  %v2875_v17 = vshrl.u32 %v12278_v24, 16 }
 0x180   : > { %v2232_v43 = vpop.f32.mrf.mxu2  ;;  %v3353_v15 = vsel %vm11410_vm12, %v3351_v60, %v3352_v35  ;;  %v2857_v52 = vshll.u32 %v2602_v45, 16  ;;  %v2862_v60 = vshrl.u32 %v2603_v9, 16  ;;  %v2865_v35 = vshll.u32 %v2603_v9, 16 }
 0x181   : > { %v12261_v20 = vadd.f32 %v2232_v43, %v1880_v38  ;;  %v2245_v4 = vpop.f32.mrf.mxu3  ;;  %v3422_v47 = vunpack.c.l.b16 %v3353_v15  ;;  %v12272_v38 = vpop.f32.mrf.mxu1  ;;  %v2850_v16 = vsel %vm11429_vm15, %v2845_v25, %v2849_v40  ;;  %v3356_v40 = vrot.slane %v12247_v56, 5  ;;  %v3236_v25 = vld [vmem:[#allocation2 + $0x78] sm:$0xe] }
 0x182   : > { %v12263_v62 = vadd.f32 %v2245_v4, %v1893_v50  ;;  %v2859_v22 = vrot.slane %v2857_v52, 5  ;;  %v2864_v3 = vrot.slane %v2862_v60, 4  ;;  %v2867_v52 = vrot.slane %v2865_v35, 5 }
 0x183   : > { %15818 = vst [vmem:[#allocation17_spill] sm:$0xff] %v12261_v20  ;;  %v3445_v50 = vpack.c.b16 %v3422_v47, %v3421_v58  ;;  %v2877_v9 = vrot.slane %v2875_v17, 4 }
 0x184   : > { %15819 = vst [vmem:[#allocation18_spill] sm:$0xff] %v12263_v62  ;;  %v2860_v15 = vsel %vm11429_vm15, %v2855_v44, %v2859_v22  ;;  %v3358_v44 = vrot.slane %v3356_v40, 4  ;;  %v3359_v22 = vrot.slane %v2602_v45, 5  ;;  %v2868_v35 = vor.u32 %v2867_v52, %v2864_v3  ;;  %v2606_v3 = vld [vmem:[#allocation2 + $0x90] sm:$0xf] }
 0x185   : > { %10630 = vmatmul.msk.bf16.gmra.mxu2 %vm1540_vm14, %v11140_v0  ;;  %v2871_v0 = vshll.u32 %v12278_v24, 16  ;;  %v3026_v47 = vunpack.c.l.b16 %v2860_v15  ;;  %v12313_v52 = vld [vmem:[#allocation2 + $0x94] sm:$0xf] }
 0x186   : > { %v12270_v18 = vpop.f32.mrf.mxu0  ;;  %10549 = vmatmul.msk.bf16.gmra.mxu1 %vm1540_vm14, %v3445_v50  ;;  %v3360_v56 = vsel %vm11410_vm12, %v3358_v44, %v3359_v22 }
 0x187   : > { %v2873_v50 = vrot.slane %v2871_v0, 5  ;;  %v3424_v15 = vunpack.c.l.b16 %v3360_v56  ;;  %v2895_v56 = vshll.u32 %v12313_v52, 16 }
 0x188   : > { %v12274_v43 = vpop.f32.mrf.mxu2 }
 0x189   : > { %10516 = vmatmul.msk.bf16.gmra.mxu0 %vm1540_vm14, %v3047_v6  ;;  %v2247_v26 = vpop.f32.mrf.mxu3  ;;  %v12290_v6 = vpop.f32.mrf.mxu1  ;;  %v2878_v45 = vor.u32 %v2877_v9, %v2873_v50  ;;  %v11124_v9 = vld [vmem:[#allocation2 + $0x6c] sm:$0xff] }
 0x18a   : > { %v12281_v4 = vadd.f32 %v2247_v26, %v12155_v30  ;;  %v3025_v30 = vunpack.c.l.b16 %v2850_v16 }
 0x18c   : > { %15820 = vst [vmem:[#allocation19_spill] sm:$0xff] %v12281_v4  ;;  %v10533_v4 = vrot.slane %v3236_v25, 9  ;;  %v3048_v60 = vpack.c.b16 %v3026_v47, %v3025_v30  ;;  %v2881_v25 = vshll.u32 %v2605_v8, 16 }
 0x18e   : > { %v12286_v53 = vpop.f32.mrf.mxu0  ;;  %10498 = vmatmul.msk.bf16.gmra.mxu3 %vm1540_vm14, %v11123_v41  ;;  %v11141_v41 = vld [vmem:[#allocation2 + $0x84] sm:$0xff]  ;;  %v3357_v16 = vsel %vm11410_vm12, %v10533_v4, %v3356_v40  ;;  %v2869_v4 = vrot.slane %v2868_v35, 4  ;;  %v2879_v40 = vrot.slane %v2878_v45, 4  ;;  %v2883_v47 = vrot.slane %v2881_v25, 5 }
 0x18f   : > { %v3423_v0 = vunpack.c.l.b16 %v3357_v16  ;;  %v2889_v16 = vshll.u32 %v2606_v3, 16 }
 0x190   : > { %v12294_v58 = vpop.f32.mrf.mxu2  ;;  %v2874_v22 = vsel %vm11429_vm15, %v2869_v4, %v2873_v50  ;;  %v2884_v35 = vsel %vm11429_vm15, %v2879_v40, %v2883_v47  ;;  %v2897_v47 = vrot.slane %v2895_v56, 5 }
 0x191   : > { %v2250_v26 = vpop.f32.mrf.mxu3  ;;  %v3027_v50 = vunpack.c.l.b16 %v2874_v22  ;;  %v3028_v4 = vunpack.c.l.b16 %v2884_v35  ;;  %v2891_v40 = vrot.slane %v2889_v16, 5  ;;  %v12337_v22 = vld [vmem:[#allocation2 + $0x98] sm:$0x1] }
 0x192   : > { %v12298_v62 = vadd.f32 %v2250_v26, %v12171_v59  ;;  %v12307_v59 = vpop.f32.mrf.mxu1  ;;  %v3446_v26 = vpack.c.b16 %v3424_v15, %v3423_v0  ;;  %v2899_v15 = vshrl.u32 %v12313_v52, 16 }
 0x194   : > { %15821 = vst [vmem:[#allocation20_spill] sm:$0xff] %v12298_v62 }
 0x195   : > { %10631 = vmatmul.msk.bf16.gmra.mxu2 %vm1540_vm14, %v11141_v41  ;;  %v2886_v41 = vshrl.u32 %v2606_v3, 16  ;;  %v3237_v3 = vld [vmem:[#allocation2 + $0x84] sm:$0xe] }
 0x196   : > { %v12305_v17 = vpop.f32.mrf.mxu0  ;;  %10550 = vmatmul.msk.bf16.gmra.mxu1 %vm1540_vm14, %v3446_v26  ;;  %v3363_v26 = vrot.slane %v12278_v24, 5  ;;  %v10534_v49 = vrot.slane %v3237_v3, 9  ;;  %v11142_v24 = vld [vmem:[#allocation2 + $0x90] sm:$0xff] }
 0x198   : > { %v12309_v62 = vpop.f32.mrf.mxu2  ;;  %v3365_v61 = vrot.slane %v3363_v26, 4  ;;  %v3364_v56 = vsel %vm11410_vm12, %v10534_v49, %v3363_v26 }
 0x199   : > { %10517 = vmatmul.msk.bf16.gmra.mxu0 %vm1540_vm14, %v3048_v60  ;;  %v2252_v30 = vpop.f32.mrf.mxu3  ;;  %v3425_v35 = vunpack.c.l.b16 %v3364_v56 }
 0x19a   : > { %v12316_v44 = vadd.f32 %v2252_v30, %v12186_v36  ;;  %v12325_v0 = vpop.f32.mrf.mxu1  ;;  %v5675_v36 = vld [vmem:[%s15789_s6] sm:$0xf]  ;;  %v2888_v30 = vrot.slane %v2886_v41, 4  ;;  %v1825_v41 = vadd.f32 %v11890_v42, %v11850_v31  ;;  %v3367_v8 = vsel %vm11410_vm12, %v3365_v61, %v3366_v23  ;;  %v2609_v61 = vld [vmem:[#allocation2 + $0x9c] sm:$0xf] }
 0x19b   : > { %v6397_v45 = vsel %vm6175_vm9, %v5675_v36, 0  ;;  %v10688_v36 = vld [vmem:[%s15789_s6 + $0x4] sm:$0xf]  ;;  %v2905_v42 = vshll.u32 %v12337_v22, 16  ;;  %v2913_v56 = vshll.u32 %v2609_v61, 16 }
 0x19c   : > { %15822 = vst [vmem:[#allocation21_spill] sm:$0xff] %v12316_v44  ;;  %6406 = vmatpush.bf16.msra.mxu2 %v6397_v45  ;;  %v6177_v16 = vsel %vm6175_vm9, %v10688_v36, 0  ;;  %v2892_v3 = vor.u32 %v2891_v40, %v2888_v30 }
 0x19d   : > { %6186 = vmatpush.bf16.msra.mxu1 %v6177_v16  ;;  %v2910_v16 = vshrl.u32 %v2609_v61, 16 }
 0x19e   : > { %v12321_v60 = vpop.f32.mrf.mxu0  ;;  %10499 = vmatmul.msk.bf16.gmra.mxu3 %vm1540_vm14, %v11124_v9  ;;  %v2901_v9 = vrot.slane %v2899_v15, 4  ;;  %v3426_v15 = vunpack.c.l.b16 %v3367_v8  ;;  %v2893_v30 = vrot.slane %v2892_v3, 4 }
 0x19f   : > { %v2912_v3 = vrot.slane %v2910_v16, 4 }
 0x1a0   : > { %v12333_v25 = vpop.f32.mrf.mxu2  ;;  %v2902_v31 = vor.u32 %v2901_v9, %v2897_v47  ;;  %v3447_v26 = vpack.c.b16 %v3426_v15, %v3425_v35  ;;  %v2907_v9 = vrot.slane %v2905_v42, 5 }
 0x1a1   : > { %v2461_v44 = vpop.f32.mrf.mxu3 }
 0x1a2   : > { %v2541_v20 = vadd.f32 %v2461_v44, %v11838_v54  ;;  %v3049_v44 = vpack.c.b16 %v3028_v4, %v3027_v50  ;;  %v12354_v36 = vpop.f32.mrf.mxu1  ;;  %v12365_v50 = vld [vmem:[#allocation2 + $0xa0] sm:$0xf]  ;;  %v2903_v40 = vrot.slane %v2902_v31, 4  ;;  %v2915_v31 = vrot.slane %v2913_v56, 5 }
 0x1a3   : > { %v2919_v8 = vshll.u32 %v12365_v50, 16 }
 0x1a4   : > { %v3195_v54 = vadd.f32 %v12270_v18, %v2541_v20  ;;  %v2256_v20 = vadd.f32 %v11892_v63, %v1825_v41  ;;  %v2923_v63 = vshrl.u32 %v12365_v50, 16  ;;  %v2916_v56 = vor.u32 %v2915_v31, %v2912_v3 }
 0x1a5   : > { %10632 = vmatmul.msk.bf16.gmra.mxu2 %vm1540_vm14, %v11142_v24  ;;  %v11125_v24 = vld [vmem:[#allocation2 + $0x78] sm:$0xff]  ;;  %v12380_v42 = vrot.slane %v2919_v8, 5 }
 0x1a6   : > { %v12351_v45 = vpop.f32.mrf.mxu0  ;;  %v3593_v49 = vadd.f32 %v12272_v38, %v3195_v54  ;;  %10551 = vmatmul.msk.bf16.gmra.mxu1 %vm1540_vm14, %v3447_v26  ;;  %v2898_v54 = vsel %vm11429_vm15, %v2893_v30, %v2897_v47  ;;  %v3370_v26 = vrot.slane %v12313_v52, 5  ;;  %v3238_v30 = vld [vmem:[#allocation2 + $0x90] sm:$0xe]  ;;  %v11143_v52 = vld [vmem:[#allocation2 + $0x9c] sm:$0xff]  ;;  %v2917_v3 = vrot.slane %v2916_v56, 4  ;;  %v11126_v56 = vld [vmem:[#allocation2 + $0x84] sm:$0xff] }
 0x1a7   : > { %v3029_v61 = vunpack.c.l.b16 %v2898_v54 }
 0x1a8   : > { %v12357_v23 = vpop.f32.mrf.mxu2  ;;  %v12361_v18 = vadd.f32 %v12274_v43, %v3593_v49  ;;  %v2925_v49 = vrot.slane %v2923_v63, 4 }
 0x1a9   : > { %10518 = vmatmul.msk.bf16.gmra.mxu0 %vm1540_vm14, %v3049_v44  ;;  %v2463_v4 = vpop.f32.mrf.mxu3  ;;  %v2908_v44 = vsel %vm11429_vm15, %v2903_v40, %v2907_v9  ;;  %v10535_v40 = vrot.slane %v3238_v30, 9  ;;  %v3372_v9 = vrot.slane %v3370_v26, 4 }
 0x1aa   : > { %v2542_v38 = vadd.f32 %v2463_v4, %v2256_v20  ;;  %v12376_v35 = vpop.f32.mrf.mxu1  ;;  %v3030_v20 = vunpack.c.l.b16 %v2908_v44  ;;  %v12388_v4 = vld [vmem:[#allocation2 + $0xa4] sm:$0x1] }
 0x1ab   : > { %v2929_v8 = vshll.u32 %v12388_v4, 16  ;;  %v3371_v63 = vsel %vm11410_vm12, %v10535_v40, %v3370_v26  ;;  %v12416_v40 = vld [vmem:[#allocation2 + $0xac] sm:$0xf] }
 0x1ac   : > { %v3196_v43 = vadd.f32 %v12286_v53, %v2542_v38  ;;  %v3373_v38 = vrot.slane %v12337_v22, 5  ;;  %v3050_v54 = vpack.c.b16 %v3030_v20, %v3029_v61  ;;  %v2612_v20 = vld [vmem:[#allocation2 + $0xa8] sm:$0xf] }
 0x1ad   : > { %v2931_v26 = vrot.slane %v2929_v8, 5  ;;  %v2934_v8 = vshrl.u32 %v2612_v20, 16 }
 0x1ae   : > { %v12370_v41 = vpop.f32.mrf.mxu0  ;;  %v3594_v15 = vadd.f32 %v12290_v6, %v3196_v43  ;;  %10500 = vmatmul.msk.bf16.gmra.mxu3 %vm1540_vm14, %v11125_v24  ;;  %v1830_v24 = vadd.f32 %v11926_v29, %v11917_v11  ;;  %v3374_v43 = vsel %vm11410_vm12, %v3372_v9, %v3373_v38  ;;  %v3427_v11 = vunpack.c.l.b16 %v3371_v63 }
 0x1af   : > { %v2937_v63 = vshll.u32 %v2612_v20, 16  ;;  %v2936_v20 = vrot.slane %v2934_v8, 4  ;;  %v3380_v8 = vrot.slane %v12388_v4, 5 }
 0x1b0   : > { %v12382_v53 = vpop.f32.mrf.mxu2  ;;  %v12386_v47 = vadd.f32 %v12294_v58, %v3594_v15  ;;  %v2926_v58 = vor.u32 %v2925_v49, %v12380_v42 }
 0x1b1   : > { %v2466_v6 = vpop.f32.mrf.mxu3 }
 0x1b2   : > { %v2543_v16 = vadd.f32 %v2466_v6, %v11905_v2  ;;  %v3428_v2 = vunpack.c.l.b16 %v3374_v43  ;;  %v12404_v44 = vpop.f32.mrf.mxu1  ;;  %v2927_v49 = vrot.slane %v2926_v58, 4  ;;  %v11274_v6 = vld [vmem:[%s11440_s18 + $0x78] sm:$0xff]   ;;  %v2943_v43 = vshll.u32 %v12416_v40, 16 }
 0x1b3   : > { %v11259_v9 = vunpack.c.h.bf16 %v11274_v6 }
 0x1b4   : > { %v3197_v22 = vadd.f32 %v12305_v17, %v2543_v16  ;;  %v3448_v31 = vpack.c.b16 %v3428_v2, %v3427_v11  ;;  %v2258_v17 = vadd.f32 %v11928_v32, %v1830_v24  ;;  %v11300_v32 = vld [vmem:[%s15784_s1] ss:$0 sm:$0xff]  ;;  %v2932_v58 = vsel %vm11429_vm15, %v2927_v49, %v2931_v26 }
 0x1b5   : > { %10633 = vmatmul.msk.bf16.gmra.mxu2 %vm1540_vm14, %v11143_v52  ;;  %v2922_v52 = vsel %vm11429_vm15, %v2917_v3, %v12380_v42  ;;  %v406_v24 = vmul.f32 %v11300_v32, %v11259_v9  ;;  %v11301_v42 = vld [vmem:[%s15785_s2] ss:$0 sm:$0xff]  ;;  %v3032_v26 = vunpack.c.l.b16 %v2932_v58  ;;  %v3377_v9 = vrot.slane %v12365_v50, 5 }
 0x1b6   : > { %v12402_v29 = vpop.f32.mrf.mxu0  ;;  %v3595_v15 = vadd.f32 %v12307_v59, %v3197_v22  ;;  %10552 = vmatmul.msk.bf16.gmra.mxu1 %vm1540_vm14, %v3448_v31  ;;  %v11258_v59 = vunpack.c.l.bf16 %v11274_v6  ;;  %v3031_v49 = vunpack.c.l.b16 %v2922_v52  ;;  %v1835_v50 = vadd.f32 %v11970_v14, %v11968_v55 }
 0x1b7   : > { %v442_v2 = vadd.f32 %v11301_v42, %v406_v24 }
 0x1b8   : > { %v12407_v30 = vpop.f32.mrf.mxu2  ;;  %v12412_v61 = vadd.f32 %v12309_v62, %v3595_v15  ;;  %v405_v62 = vmul.f32 %v11300_v32, %v11258_v59 }
 0x1b9   : > { %10519 = vmatmul.msk.bf16.gmra.mxu0 %vm1540_vm14, %v3050_v54  ;;  %v2468_v38 = vpop.f32.mrf.mxu3  ;;  %v2947_v54 = vshrl.u32 %v12416_v40, 16 }
 0x1ba   : > { %v2544_v16 = vadd.f32 %v2468_v38, %v2258_v17  ;;  %v441_v11 = vadd.f32 %v11301_v42, %v405_v62  ;;  %v12434_v3 = vpop.f32.mrf.mxu1  ;;  %v12438_v17 = vld [vmem:[#allocation2 + $0xb0] sm:$0x1]  ;;  %v474_v38 = vmax.f32 %v442_v2, 0.0  ;;  %v3239_v62 = vld [vmem:[#allocation2 + $0x9c] sm:$0xe]  ;;  %v3051_v2 = vpack.c.b16 %v3032_v26, %v3031_v49 }
 0x1bb   : > { %v2949_v52 = vrot.slane %v2947_v54, 4  ;;  %v10536_v58 = vrot.slane %v3239_v62, 9 }
 0x1bc   : > { %v3198_v22 = vadd.f32 %v12321_v60, %v2544_v16  ;;  %v473_v6 = vmax.f32 %v441_v11, 0.0  ;;  %v533_v60 = vld [vmem:[#allocation2 + $0xc0] sm:$0x1] }
 0x1bd   : > { %v534_v16 = vsel %vm11402_vm11, 0, %v533_v60  ;;  %v3378_v54 = vsel %vm11410_vm12, %v10536_v58, %v3377_v9 }
 0x1be   : > { %v12432_v15 = vpop.f32.mrf.mxu0  ;;  %v3596_v31 = vadd.f32 %v12325_v0, %v3198_v22  ;;  %10501 = vmatmul.msk.bf16.gmra.mxu3 %vm1540_vm14, %v11126_v56  ;;  %v2939_v0 = vrot.slane %v2937_v63, 5  ;;  %v12448_v56 = vrot.slane %v2943_v43, 5  ;;  %v3379_v22 = vrot.slane %v3377_v9, 4  ;;  %535 = vst [vmem:[#allocation2 + $0xc0] sm:$0x1] %v534_v16  ;;  %v11144_v63 = vld [vmem:[#allocation2 + $0xa8] sm:$0xff] }
 0x1bf   : > { %v616_v42 = vpack.c.bf16 %v473_v6, %v473_v6  ;;  %v583_v43 = vld [vmem:[#allocation2 + $0xc8] sm:$0x1]  ;;  %v617_v6 = vpack.c.bf16 %v474_v38, %v474_v38  ;;  %v2260_v38 = vadd.f32 %v11972_v57, %v1835_v50 }
 0x1c0   : > { %v12440_v59 = vpop.f32.mrf.mxu2  ;;  %v12446_v32 = vadd.f32 %v12333_v25, %v3596_v31  ;;  %v2953_v25 = vshll.u32 %v12438_v17, 16  ;;  %v3381_v31 = vsel %vm11410_vm12, %v3379_v22, %v3380_v8  ;;  %v584_v4 = vsel %vm11416_vm13, 0, %v583_v43 }
 0x1c1   : > { %v2471_v24 = vpop.f32.mrf.mxu3  ;;  %v2940_v55 = vor.u32 %v2939_v0, %v2936_v20  ;;  %v3430_v14 = vunpack.c.l.b16 %v3381_v31  ;;  %585 = vst [vmem:[#allocation2 + $0xc8] sm:$0x1] %v584_v4  ;;  %v2950_v26 = vor.u32 %v2949_v52, %v12448_v56  ;;  %v876_v16 = vshrl.u32 %v616_v42, 16  ;;  %v2615_v20 = vld [vmem:[#allocation2 + $0xb4] sm:$0xf] }
 0x1c2   : > { %v2545_v11 = vadd.f32 %v2471_v24, %v11938_v13  ;;  %v3429_v13 = vunpack.c.l.b16 %v3378_v54  ;;  %v12466_v9 = vpop.f32.mrf.mxu1  ;;  %v879_v24 = vshll.u32 %v616_v42, 16  ;;  %v884_v58 = vshrl.u32 %v617_v6, 16  ;;  %v11127_v4 = vld [vmem:[#allocation2 + $0x90] sm:$0xff] }
 0x1c3   : > { %v878_v0 = vrot.slane %v876_v16, 7  ;;  %v2941_v52 = vrot.slane %v2940_v55, 4  ;;  %v2955_v8 = vrot.slane %v2953_v25, 5 }
 0x1c4   : > { %v3199_v60 = vadd.f32 %v12351_v45, %v2545_v11  ;;  %v3449_v21 = vpack.c.b16 %v3430_v14, %v3429_v13  ;;  %v12477_v11 = vld [vmem:[#allocation2 + $0xb8] sm:$0xf]  ;;  %v886_v43 = vrot.slane %v884_v58, 7 }
 0x1c5   : > { %10634 = vmatmul.msk.bf16.gmra.mxu2 %vm1540_vm14, %v11144_v63  ;;  %v2951_v63 = vrot.slane %v2950_v26, 4  ;;  %v881_v57 = vor.u32 %v879_v24, %v878_v0  ;;  %v882_v50 = vrot.slane %v878_v0, 4  ;;  %v1047_v54 = vld [vmem:[#allocation2 + $0xc0] sm:$0xf]  ;;  %v2967_v13 = vshll.u32 %v12477_v11, 16 }
 0x1c6   : > { %v12463_v49 = vpop.f32.mrf.mxu0  ;;  %v3597_v62 = vadd.f32 %v12354_v36, %v3199_v60  ;;  %10553 = vmatmul.msk.bf16.gmra.mxu1 %vm1540_vm14, %v3449_v21  ;;  %v887_v36 = vshll.u32 %v617_v6, 16  ;;  %v2958_v60 = vshrl.u32 %v2615_v20, 16  ;;  %v891_v55 = vrot.slane %v886_v43, 4 }
 0x1c7   : > { %v1048_v6 = vsel %vm11493_vm5, %v881_v57, %v1047_v54  ;;  %v2956_v21 = vsel %vm11429_vm15, %v2951_v63, %v2955_v8  ;;  %v2969_v58 = vrot.slane %v2967_v13, 5  ;;  %v3240_v63 = vld [vmem:[#allocation2 + $0xa8] sm:$0xe]  ;;  %v3387_v54 = vrot.slane %v12438_v17, 5 }
 0x1c8   : > { %v12470_v45 = vpop.f32.mrf.mxu2  ;;  %v12473_v22 = vadd.f32 %v12357_v23, %v3597_v62  ;;  %v2961_v23 = vshll.u32 %v2615_v20, 16  ;;  %v889_v25 = vor.u32 %v887_v36, %v886_v43  ;;  %v1051_v14 = vld [vmem:[#allocation2 + $0xc8] sm:$0x1]  ;;  %v2946_v62 = vsel %vm11429_vm15, %v2941_v52, %v12448_v56  ;;  %1049 = vst [vmem:[#allocation2 + $0xc0] sm:$0xf] %v1048_v6 }
 0x1c9   : > { %10520 = vmatmul.msk.bf16.gmra.mxu0 %vm1540_vm14, %v3051_v2  ;;  %v2473_v42 = vpop.f32.mrf.mxu3  ;;  %v2971_v2 = vshrl.u32 %v12477_v11, 16  ;;  %v12499_v20 = vld [vmem:[#allocation2 + $0xbc] sm:$0x1]  ;;  %v2960_v0 = vrot.slane %v2958_v60, 4  ;;  %v3384_v36 = vrot.slane %v12416_v40, 5  ;;  %v11145_v40 = vld [vmem:[#allocation2 + $0xb4] sm:$0xff] }
 0x1ca   : > { %v2546_v31 = vadd.f32 %v2473_v42, %v2260_v38  ;;  %v12491_v24 = vpop.f32.mrf.mxu1  ;;  %v890_v38 = vsel %vm11500_vm6, %v882_v50, %v889_v25  ;;  %v2963_v56 = vrot.slane %v2961_v23, 5  ;;  %v3033_v42 = vunpack.c.l.b16 %v2946_v62 }
 0x1cb   : > { %1050 = vst.msk [vmem:[#allocation2 + $0xc4] sm:$0xf] %vm475_vm1, %v890_v38  ;;  %v2973_v52 = vrot.slane %v2971_v2, 4  ;;  %v10537_v50 = vrot.slane %v3240_v63, 9  ;;  %v3386_v43 = vrot.slane %v3384_v36, 4  ;;  %v2977_v60 = vshll.u32 %v12499_v20, 16  ;;  %vm12921_vm1 = vmand %vm5071_vm8, %vm486_vm3 }
 0x1cc   : > { %v3200_v16 = vadd.f32 %v12370_v41, %v2546_v31  ;;  %v1052_v41 = vsel %vm11402_vm11, %v891_v55, %v1051_v14  ;;  %v1840_v31 = vadd.f32 %v12003_v51, %v12006_v37  ;;  %v2964_v23 = vor.u32 %v2963_v56, %v2960_v0  ;;  %vm12949_vm3 = vmand %vm5071_vm8, %vm536_vm4 }
 0x1cd   : > { %1053 = vst [vmem:[#allocation2 + $0xc8] sm:$0x1] %v1052_v41  ;;  %v2974_v13 = vor.u32 %v2973_v52, %v2969_v58  ;;  %v3388_v2 = vsel %vm11410_vm12, %v3386_v43, %v3387_v54  ;;  %v11128_v52 = vld [vmem:[#allocation2 + $0x9c] sm:$0xff]  ;;  %vm6126_vm8 = vcmask 64512  }
 0x1ce   : > { %v12484_v26 = vpop.f32.mrf.mxu0  ;;  %v3598_v39 = vadd.f32 %v12376_v35, %v3200_v16  ;;  %10502 = vmatmul.msk.bf16.gmra.mxu3 %vm1540_vm14, %v11127_v4  ;;  %v3034_v35 = vunpack.c.l.b16 %v2956_v21  ;;  %v3432_v51 = vunpack.c.l.b16 %v3388_v2  ;;  %v2965_v6 = vrot.slane %v2964_v23, 4 }
 0x1cf   : > { %v2975_v62 = vrot.slane %v2974_v13, 4  ;;  %v2979_v21 = vrot.slane %v2977_v60, 5  ;;  %v2262_v41 = vadd.f32 %v12009_v33, %v1840_v31  ;;  %v2618_v0 = vld [vmem:[#allocation2 + $0xc0] sm:$0xf] }
 0x1d0   : > { %v12502_v8 = vpop.f32.mrf.mxu2  ;;  %v12506_v12 = vadd.f32 %v12382_v53, %v3598_v39  ;;  %v3385_v53 = vsel %vm11410_vm12, %v10537_v50, %v3384_v36  ;;  %v3052_v55 = vpack.c.b16 %v3034_v35, %v3033_v42  ;;  %v2970_v36 = vsel %vm11429_vm15, %v2965_v6, %v2969_v58 }
 0x1d1   : > { %v2476_v57 = vpop.f32.mrf.mxu3  ;;  %v3431_v17 = vunpack.c.l.b16 %v3385_v53  ;;  %v2980_v42 = vsel %vm11429_vm15, %v2975_v62, %v2979_v21  ;;  %v2985_v35 = vshll.u32 %v2618_v0, 16  ;;  %v3035_v58 = vunpack.c.l.b16 %v2970_v36  ;;  %v3241_v53 = vld [vmem:[#allocation2 + $0xb4] sm:$0xe] }
 0x1d2   : > { %v2547_v4 = vadd.f32 %v2476_v57, %v11989_v5  ;;  %v12521_v5 = vpop.f32.mrf.mxu1  ;;  %v12532_v56 = vld [vmem:[#allocation2 + $0xc4] sm:$0xf]  ;;  %v3036_v31 = vunpack.c.l.b16 %v2980_v42 }
 0x1d3   : > { %v3450_v16 = vpack.c.b16 %v3432_v51, %v3431_v17  ;;  %v2991_v63 = vshll.u32 %v12532_v56, 16  ;;  %v2995_v43 = vshrl.u32 %v12532_v56, 16  ;;  %v2987_v23 = vrot.slane %v2985_v35, 5 }
 0x1d4   : > { %v3201_v25 = vadd.f32 %v12402_v29, %v2547_v4  ;;  %v3053_v62 = vpack.c.b16 %v3036_v31, %v3035_v58  ;;  %v11129_v58 = vld [vmem:[#allocation2 + $0xa8] sm:$0xff] }
 0x1d5   : > { %10635 = vmatmul.msk.bf16.gmra.mxu2 %vm1540_vm14, %v11145_v40  ;;  %v2993_v13 = vrot.slane %v2991_v63, 5 }
 0x1d6   : > { %v12519_v37 = vpop.f32.mrf.mxu0  ;;  %v3599_v14 = vadd.f32 %v12404_v44, %v3201_v25  ;;  %10554 = vmatmul.msk.bf16.gmra.mxu1 %vm1540_vm14, %v3450_v16  ;;  %v2997_v25 = vrot.slane %v2995_v43, 4  ;;  %v11146_v16 = vld [vmem:[#allocation2 + $0xc0] sm:$0xff]  ;;  %v15823_v43 = vld [vmem:[#allocation4_spill] sm:$0xff] }
 0x1d8   : > { %v12524_v38 = vpop.f32.mrf.mxu2  ;;  %v12528_v29 = vadd.f32 %v12407_v30, %v3599_v14  ;;  %v2982_v30 = vshrl.u32 %v2618_v0, 16  ;;  %v2620_v14 = vld [vmem:[#allocation2 + $0xc8] sm:$0x1]  ;;  %v2998_v0 = vor.u32 %v2997_v25, %v2993_v13 }
 0x1d9   : > { %10521 = vmatmul.msk.bf16.gmra.mxu0 %vm1540_vm14, %v3052_v55  ;;  %v2478_v39 = vpop.f32.mrf.mxu3  ;;  %v10538_v55 = vrot.slane %v3241_v53, 9  ;;  %v3398_v53 = vrot.slane %v12532_v56, 5 }
 0x1da   : > { %v2548_v44 = vadd.f32 %v2478_v39, %v2262_v41  ;;  %v12542_v50 = vpop.f32.mrf.mxu1  ;;  %v2984_v40 = vrot.slane %v2982_v30, 4  ;;  %v2999_v35 = vrot.slane %v2998_v0, 4 }
 0x1dc   : > { %v3202_v33 = vadd.f32 %v12432_v15, %v2548_v44  ;;  %v3391_v15 = vrot.slane %v12477_v11, 5 }
 0x1de   : > { %v12540_v57 = vpop.f32.mrf.mxu0  ;;  %v3600_v54 = vadd.f32 %v12434_v3, %v3202_v33  ;;  %10503 = vmatmul.msk.bf16.gmra.mxu3 %vm1540_vm14, %v11128_v52  ;;  %v3393_v17 = vrot.slane %v3391_v15, 4  ;;  %v3394_v3 = vrot.slane %v12499_v20, 5  ;;  %v3392_v11 = vsel %vm11410_vm12, %v10538_v55, %v3391_v15 }
 0x1df   : > { %v3433_v21 = vunpack.c.l.b16 %v3392_v11  ;;  %v2988_v20 = vor.u32 %v2987_v23, %v2984_v40  ;;  %v3913_v11 = vld [vmem:[#allocation2 + $0x1c] sm:$0xf] }
 0x1e0   : > { %v12547_v4 = vpop.f32.mrf.mxu2  ;;  %v12551_v60 = vadd.f32 %v12440_v59, %v3600_v54  ;;  %v3395_v59 = vsel %vm11410_vm12, %v3393_v17, %v3394_v3  ;;  %v3400_v3 = vrot.slane %v3398_v53, 4 }
 0x1e1   : > { %v2481_v2 = vpop.f32.mrf.mxu3  ;;  %v3434_v41 = vunpack.c.l.b16 %v3395_v59  ;;  %v2989_v30 = vrot.slane %v2988_v20, 4  ;;  %v11147_v59 = vld [vmem:[#allocation2 + $0xcc] sm:$0xff] }
 0x1e2   : > { %v2549_v51 = vadd.f32 %v2481_v2, %v12043_v1  ;;  %v3001_v1 = vshll.u32 %v2620_v14, 16 }
 0x1e3   : > { %v12563_v44 = vpop.f32.mrf.mxu1  ;;  %v3451_v36 = vpack.c.b16 %v3434_v41, %v3433_v21 }
 0x1e4   : > { %v3203_v6 = vadd.f32 %v12463_v49, %v2549_v51  ;;  %v3003_v63 = vrot.slane %v3001_v1, 5  ;;  %v3401_v51 = vrot.slane %v2620_v14, 5  ;;  %v4632_v14 = vrot.slane %v3913_v11, 5 }
 0x1e5   : > { %10636 = vmatmul.msk.bf16.gmra.mxu2 %vm1540_vm14, %v11146_v16  ;;  %v15824_v16 = vld [vmem:[#allocation5_spill] sm:$0xff] }
 0x1e6   : > { %v12561_v39 = vpop.f32.mrf.mxu0  ;;  %v3601_v52 = vadd.f32 %v12466_v9, %v3203_v6  ;;  %10555 = vmatmul.msk.bf16.gmra.mxu1 %vm1540_vm14, %v3451_v36  ;;  %v3004_v15 = vsel %vm11429_vm15, %v2999_v35, %v3003_v63  ;;  %v3914_v36 = vld [vmem:[#allocation2 + $0x20] sm:$0x1] }
 0x1e7   : > { %v3038_v25 = vunpack.c.l.b16 %v3004_v15 }
 0x1e8   : > { %v12566_v42 = vpop.f32.mrf.mxu2  ;;  %v12569_v33 = vadd.f32 %v12470_v45, %v3601_v52  ;;  %v2994_v45 = vsel %vm11429_vm15, %v2989_v30, %v2993_v13 }
 0x1e9   : > { %10522 = vmatmul.msk.bf16.gmra.mxu0 %vm1540_vm14, %v3053_v62  ;;  %v2483_v49 = vpop.f32.mrf.mxu3  ;;  %v3037_v2 = vunpack.c.l.b16 %v2994_v45  ;;  %v3402_v62 = vsel %vm11410_vm12, %v3400_v3, %v3401_v51  ;;  %v15825_v45 = vld [vmem:[#allocation6_spill] sm:$0xff] }
 0x1ea   : > { %v2550_v54 = vadd.f32 %v2483_v49, %v15823_v43  ;;  %v3436_v20 = vunpack.c.l.b16 %v3402_v62  ;;  %v4566_v49 = vld [vmem:[#allocation2 + $0x18] sm:$0xe]  ;;  %v3916_v62 = vld [vmem:[#allocation2 + $0x28] sm:$0xf] }
 0x1eb   : > { %v12583_v40 = vpop.f32.mrf.mxu1  ;;  %v3054_v56 = vpack.c.b16 %v3038_v25, %v3037_v2  ;;  %v10655_v43 = vrot.slane %v4566_v49, 9 }
 0x1ec   : > { %v12575_v31 = vadd.f32 %v12484_v26, %v2550_v54  ;;  %v3242_v26 = vld [vmem:[#allocation2 + $0xc0] sm:$0xe]  ;;  %v4634_v54 = vrot.slane %v4632_v14, 4 }
 0x1ed   : > { %v10539_v17 = vrot.slane %v3242_v26, 9 }
 0x1ee   : > { %v12577_v9 = vpop.f32.mrf.mxu0  ;;  %10504 = vmatmul.msk.bf16.gmra.mxu3 %vm1540_vm14, %v11129_v58  ;;  %v4635_v58 = vrot.slane %v3914_v36, 5 }
 0x1ef   : > { %v3399_v6 = vsel %vm11410_vm12, %v10539_v17, %v3398_v53  ;;  %v11130_v53 = vld [vmem:[#allocation2 + $0xb4] sm:$0xff] }
 0x1f0   : > { %v12586_v23 = vpop.f32.mrf.mxu2  ;;  %v3435_v41 = vunpack.c.l.b16 %v3399_v6  ;;  %v4636_v25 = vsel %vm11410_vm12, %v4634_v54, %v4635_v58  ;;  %v4567_v54 = vld [vmem:[#allocation2 + $0x24] sm:$0xe] }
 0x1f1   : > { %v2486_v55 = vpop.f32.mrf.mxu3  ;;  %v4745_v51 = vunpack.c.l.b16 %v4636_v25 }
 0x1f2   : > { %v2551_v13 = vadd.f32 %v2486_v55, %v15824_v16  ;;  %v3452_v30 = vpack.c.b16 %v3436_v20, %v3435_v41  ;;  %v3912_v55 = vld [vmem:[#allocation2 + $0x18] sm:$0xf] }
 0x1f3   : > { %v12598_v1 = vpop.f32.mrf.mxu1  ;;  %v3964_v6 = vshll.u32 %v3912_v55, 16 }
 0x1f4   : > { %v3205_v21 = vadd.f32 %v12519_v37, %v2551_v13 }
 0x1f5   : > { %10637 = vmatmul.msk.bf16.gmra.mxu2 %vm1540_vm14, %v11147_v59  ;;  %v3961_v59 = vshrl.u32 %v3912_v55, 16  ;;  %v15828_v55 = vld [vmem:[#allocation8_spill] sm:$0xff] }
 0x1f6   : > { %v12596_v0 = vpop.f32.mrf.mxu0  ;;  %v3603_v52 = vadd.f32 %v12521_v5, %v3205_v21  ;;  %10556 = vmatmul.msk.bf16.gmra.mxu1 %vm1540_vm14, %v3452_v30  ;;  %v3970_v21 = vshll.u32 %v3913_v11, 16 }
 0x1f7   : > { %v3963_v30 = vrot.slane %v3961_v59, 4 }
 0x1f8   : > { %v12601_v35 = vpop.f32.mrf.mxu2  ;;  %v12604_v63 = vadd.f32 %v12524_v38, %v3603_v52  ;;  %v4633_v38 = vsel %vm11410_vm12, %v10655_v43, %v4632_v14  ;;  %v4639_v52 = vrot.slane %v3916_v62, 5  ;;  %v12628_v43 = vld [vmem:[#allocation2 + $0x2c] sm:$0x1]  ;;  %v3972_v58 = vrot.slane %v3970_v21, 5 }
 0x1f9   : > { %10523 = vmatmul.msk.bf16.gmra.mxu0 %vm1540_vm14, %v3054_v56  ;;  %v2488_v37 = vpop.f32.mrf.mxu3  ;;  %v4744_v3 = vunpack.c.l.b16 %v4633_v38  ;;  %v3974_v56 = vshrl.u32 %v3913_v11, 16  ;;  %v10656_v11 = vrot.slane %v4567_v54, 9  ;;  %v4642_v25 = vrot.slane %v12628_v43, 5 }
 0x1fa   : > { %v2552_v15 = vadd.f32 %v2488_v37, %v15825_v45  ;;  %v3966_v37 = vrot.slane %v3964_v6, 5  ;;  %v4641_v38 = vrot.slane %v4639_v52, 4 }
 0x1fb   : > { %v12618_v26 = vpop.f32.mrf.mxu1  ;;  %v4776_v20 = vpack.c.b16 %v4745_v51, %v4744_v3  ;;  %v3976_v45 = vrot.slane %v3974_v56, 4  ;;  %v11131_v51 = vld [vmem:[#allocation2 + $0xc0] sm:$0xff]  ;;  %v4640_v6 = vsel %vm11410_vm12, %v10656_v11, %v4639_v52 }
 0x1fc   : > { %v12610_v5 = vadd.f32 %v12540_v57, %v2552_v15  ;;  %v15827_v57 = vld [vmem:[#allocation7_spill] sm:$0xff]  ;;  %v4643_v21 = vsel %vm11410_vm12, %v4641_v38, %v4642_v25  ;;  %v3994_v25 = vshll.u32 %v3916_v62, 16 }
 0x1fe   : > { %v12612_v2 = vpop.f32.mrf.mxu0  ;;  %10505 = vmatmul.msk.bf16.gmra.mxu3 %vm1540_vm14, %v11130_v53 }
 0x200   : > { %v12621_v17 = vpop.f32.mrf.mxu2 }
 0x201   : > { %15826 = vst [vmem:[#allocation4_spill] sm:$0xff] %v12621_v17  ;;  %v2491_v16 = vpop.f32.mrf.mxu3 }
 0x202   : > { %v2553_v13 = vadd.f32 %v2491_v16, %v15827_v57  ;;  %v3967_v16 = vor.u32 %v3966_v37, %v3963_v30  ;;  %v3977_v57 = vor.u32 %v3976_v45, %v3972_v58  ;;  %v4746_v30 = vunpack.c.l.b16 %v4640_v6 }
 0x203   : > { %v12630_v15 = vpop.f32.mrf.mxu1  ;;  %v4747_v37 = vunpack.c.l.b16 %v4643_v21 }
 0x204   : > { %v3207_v41 = vadd.f32 %v12561_v39, %v2553_v13  ;;  %v3980_v13 = vshll.u32 %v3914_v36, 16  ;;  %v3968_v56 = vrot.slane %v3967_v16, 4 }
 0x206   : > { %v12625_v14 = vpop.f32.mrf.mxu0  ;;  %v3605_v49 = vadd.f32 %v12563_v44, %v3207_v41  ;;  %v3978_v41 = vrot.slane %v3977_v57, 4  ;;  %v4777_v57 = vpack.c.b16 %v4747_v37, %v4746_v30 }
 0x208   : > { %v12633_v53 = vadd.f32 %v12566_v42, %v3605_v49  ;;  %v12637_v44 = vpop.f32.mrf.mxu2  ;;  %v3915_v49 = vld [vmem:[#allocation2 + $0x24] sm:$0xf] }
 0x209   : > { %10672 = vmatmul.msk.bf16.vlgmr.msra.gmra.mxu0 %vm1540_vm14, %v4776_v20  ;;  %v2493_v39 = vpop.f32.mrf.mxu3  ;;  %v3982_v20 = vrot.slane %v3980_v13, 5  ;;  %v3985_v52 = vshrl.u32 %v3915_v49, 16  ;;  %v3988_v11 = vshll.u32 %v3915_v49, 16 }
 0x20a   : > { %v2554_v3 = vadd.f32 %v2493_v39, %v15828_v55  ;;  %v3973_v39 = vsel %vm11429_vm15, %v3968_v56, %v3972_v58  ;;  %v12655_v55 = vld [vmem:[#allocation2 + $0x34] sm:$0xf] }
 0x20b   : > { %v12650_v54 = vpop.f32.mrf.mxu1  ;;  %v3983_v38 = vsel %vm11429_vm15, %v3978_v41, %v3982_v20  ;;  %v4346_v6 = vunpack.c.l.b16 %v3973_v39  ;;  %v4646_v21 = vrot.slane %v12655_v55, 5  ;;  %v3987_v49 = vrot.slane %v3985_v52, 4  ;;  %v4568_v41 = vld [vmem:[#allocation2 + $0x30] sm:$0xe]  ;;  %v15833_v39 = vld [vmem:[#allocation10_spill] sm:$0xff] }
 0x20c   : > { %v12641_v59 = vadd.f32 %v12577_v9, %v2554_v3  ;;  %15829 = vst [vmem:[#allocation5_spill] sm:$0xff] %v12650_v54  ;;  %v15830_v9 = vld [vmem:[#allocation9_spill] sm:$0xff]  ;;  %v3998_v3 = vshrl.u32 %v3916_v62, 16  ;;  %v4347_v56 = vunpack.c.l.b16 %v3983_v38  ;;  %v3996_v20 = vrot.slane %v3994_v25, 5 }
 0x20d   : > { %v10657_v30 = vrot.slane %v4568_v41, 9  ;;  %v4648_v37 = vrot.slane %v4646_v21, 4 }
 0x20e   : > { %v12643_v42 = vpop.f32.mrf.mxu0  ;;  %10506 = vmatmul.msk.bf16.gmra.mxu3 %vm1540_vm14, %v11131_v51  ;;  %v4000_v62 = vrot.slane %v3998_v3, 4  ;;  %v4378_v38 = vpack.c.b16 %v4347_v56, %v4346_v6 }
 0x20f   : > { %v4647_v3 = vsel %vm11410_vm12, %v10657_v30, %v4646_v21 }
 0x210   : > { %v12659_v51 = vpop.f32.mrf.mxu2 }
 0x211   : > { %v2496_v36 = vpop.f32.mrf.mxu3  ;;  %15831 = vst [vmem:[#allocation6_spill] sm:$0xff] %v12659_v51 }
 0x212   : > { %v2555_v45 = vadd.f32 %v2496_v36, %v15830_v9  ;;  %v3990_v36 = vrot.slane %v3988_v11, 5  ;;  %v12666_v9 = vld [vmem:[#allocation2 + $0x38] sm:$0x1]  ;;  %v4001_v11 = vor.u32 %v4000_v62, %v3996_v20  ;;  %v15834_v62 = vld [vmem:[#allocation11_spill] sm:$0xff] }
 0x213   : > { %v12675_v54 = vpop.f32.mrf.mxu1 }
 0x214   : > { %v3209_v16 = vadd.f32 %v12596_v0, %v2555_v45  ;;  %v4649_v45 = vrot.slane %v12666_v9, 5  ;;  %v3991_v52 = vor.u32 %v3990_v36, %v3987_v49  ;;  %v4002_v56 = vrot.slane %v4001_v11, 4  ;;  %v3918_v49 = vld [vmem:[#allocation2 + $0x30] sm:$0xf] }
 0x215   : > { %v4748_v36 = vunpack.c.l.b16 %v4647_v3  ;;  %v4009_v21 = vshrl.u32 %v3918_v49, 16  ;;  %v4012_v30 = vshll.u32 %v3918_v49, 16 }
 0x216   : > { %v12662_v13 = vpop.f32.mrf.mxu0  ;;  %v3607_v58 = vadd.f32 %v12598_v1, %v3209_v16  ;;  %v4004_v16 = vshll.u32 %v12628_v43, 16  ;;  %v3992_v6 = vrot.slane %v3991_v52, 4 }
 0x218   : > { %v12669_v51 = vadd.f32 %v12601_v35, %v3607_v58  ;;  %v12686_v58 = vpop.f32.mrf.mxu2  ;;  %v4006_v43 = vrot.slane %v4004_v16, 5 }
 0x219   : > { %10673 = vmatmul.msk.bf16.gmra.mxu0 %vm1540_vm14, %v4777_v57  ;;  %v2498_v0 = vpop.f32.mrf.mxu3  ;;  %v4650_v57 = vsel %vm11410_vm12, %v4648_v37, %v4649_v45  ;;  %v4018_v45 = vshll.u32 %v12655_v55, 16 }
 0x21a   : > { %15832 = vst [vmem:[#allocation7_spill] sm:$0xff] %v12669_v51  ;;  %v2556_v1 = vadd.f32 %v2498_v0, %v15833_v39  ;;  %v4749_v41 = vunpack.c.l.b16 %v4650_v57  ;;  %v3997_v39 = vsel %vm11429_vm15, %v3992_v6, %v3996_v20  ;;  %v4007_v37 = vsel %vm11429_vm15, %v4002_v56, %v4006_v43  ;;  %v12705_v56 = vld [vmem:[#allocation2 + $0x44] sm:$0x1]  ;;  %v4569_v43 = vld [vmem:[#allocation2 + $0x3c] sm:$0xe] }
 0x21b   : > { %v4348_v3 = vunpack.c.l.b16 %v3997_v39  ;;  %v12701_v57 = vpop.f32.mrf.mxu1  ;;  %v4349_v49 = vunpack.c.l.b16 %v4007_v37  ;;  %v4020_v51 = vrot.slane %v4018_v45, 5  ;;  %v4028_v45 = vshll.u32 %v12666_v9, 16 }
 0x21c   : > { %v12678_v25 = vadd.f32 %v12612_v2, %v2556_v1  ;;  %v12692_v1 = vld [vmem:[#allocation2 + $0x40] sm:$0xf]  ;;  %v4778_v11 = vpack.c.b16 %v4749_v41, %v4748_v36  ;;  %15835 = vst [vmem:[#allocation8_spill] sm:$0xff] %v12701_v57  ;;  %v10658_v41 = vrot.slane %v4569_v43, 9 }
 0x21d   : > { %v4653_v20 = vrot.slane %v12692_v1, 5 }
 0x21e   : > { %v12680_v35 = vpop.f32.mrf.mxu0  ;;  %10639 = vmatmul.msk.bf16.vlgmr.msra.gmra.mxu3 %vm1540_vm14, %v4378_v38  ;;  %v4022_v38 = vshrl.u32 %v12655_v55, 16 }
 0x220   : > { %v4024_v55 = vrot.slane %v4022_v38, 4  ;;  %v12707_v17 = vpop.f32.mrf.mxu2 }
 0x221   : > { %v2501_v2 = vpop.f32.mrf.mxu3  ;;  %15836 = vst [vmem:[#allocation9_spill] sm:$0xff] %v12707_v17  ;;  %v12744_v17 = vld [vmem:[#allocation2 + $0x50] sm:$0x1] }
 0x222   : > { %v2557_v0 = vadd.f32 %v2501_v2, %v15834_v62  ;;  %v4011_v2 = vrot.slane %v4009_v21, 4  ;;  %v4014_v62 = vrot.slane %v4012_v30, 5  ;;  %v4379_v21 = vpack.c.b16 %v4349_v49, %v4348_v3 }
 0x223   : > { %v4025_v37 = vor.u32 %v4024_v55, %v4020_v51  ;;  %v4030_v3 = vrot.slane %v4028_v45, 5  ;;  %v12726_v49 = vpop.f32.mrf.mxu1  ;;  %v15838_v55 = vld [vmem:[#allocation12_spill] sm:$0xff] }
 0x224   : > { %v3211_v52 = vadd.f32 %v12625_v14, %v2557_v0  ;;  %v4655_v0 = vrot.slane %v4653_v20, 4  ;;  %v4015_v30 = vor.u32 %v4014_v62, %v4011_v2  ;;  %v3921_v2 = vld [vmem:[#allocation2 + $0x3c] sm:$0xf] }
 0x226   : > { %v12699_v16 = vpop.f32.mrf.mxu0  ;;  %v3609_v6 = vadd.f32 %v12630_v15, %v3211_v52  ;;  %v4656_v15 = vrot.slane %v12705_v56, 5 }
 0x228   : > { %v12710_v14 = vadd.f32 %v12637_v44, %v3609_v6  ;;  %v4654_v44 = vsel %vm11410_vm12, %v10658_v41, %v4653_v20  ;;  %v4016_v6 = vrot.slane %v4015_v30, 4  ;;  %v12728_v43 = vpop.f32.mrf.mxu2  ;;  %v4033_v41 = vshrl.u32 %v3921_v2, 16 }
 0x229   : > { %10674 = vmatmul.msk.bf16.gmra.mxu0 %vm1540_vm14, %v4778_v11  ;;  %v2503_v36 = vpop.f32.mrf.mxu3  ;;  %v4657_v11 = vsel %vm11410_vm12, %v4655_v0, %v4656_v15  ;;  %v4750_v9 = vunpack.c.l.b16 %v4654_v44  ;;  %v4036_v0 = vshll.u32 %v3921_v2, 16  ;;  %v12733_v15 = vld [vmem:[#allocation2 + $0x4c] sm:$0xf]  ;;  %v4046_v30 = vshrl.u32 %v12692_v1, 16 }
 0x22a   : > { %15837 = vst [vmem:[#allocation10_spill] sm:$0xff] %v12710_v14  ;;  %v2558_v39 = vadd.f32 %v2503_v36, %v12165_v34  ;;  %v4026_v34 = vrot.slane %v4025_v37, 4  ;;  %v4751_v62 = vunpack.c.l.b16 %v4657_v11  ;;  %v4021_v20 = vsel %vm11429_vm15, %v4016_v6, %v4020_v51 }
 0x22b   : > { %v4350_v11 = vunpack.c.l.b16 %v4021_v20  ;;  %v4035_v2 = vrot.slane %v4033_v41, 4  ;;  %v4048_v14 = vrot.slane %v4046_v30, 4 }
 0x22c   : > { %v12717_v38 = vadd.f32 %v12643_v42, %v2558_v39  ;;  %v4031_v39 = vsel %vm11429_vm15, %v4026_v34, %v4030_v3  ;;  %v4779_v45 = vpack.c.b16 %v4751_v62, %v4750_v9  ;;  %v4570_v34 = vld [vmem:[#allocation2 + $0x48] sm:$0xe]  ;;  %v12750_v9 = vpop.f32.mrf.mxu1 }
 0x22d   : > { %v4351_v6 = vunpack.c.l.b16 %v4031_v39  ;;  %15840 = vst [vmem:[#allocation12_spill] sm:$0xff] %v12750_v9  ;;  %v10659_v62 = vrot.slane %v4570_v34, 9 }
 0x22e   : > { %v12719_v52 = vpop.f32.mrf.mxu0  ;;  %10640 = vmatmul.msk.bf16.gmra.mxu3 %vm1540_vm14, %v4379_v21  ;;  %v4042_v21 = vshll.u32 %v12692_v1, 16 }
 0x22f   : > { %v4380_v41 = vpack.c.b16 %v4351_v6, %v4350_v11  ;;  %v3924_v6 = vld [vmem:[#allocation2 + $0x48] sm:$0xf] }
 0x230   : > { %v4044_v3 = vrot.slane %v4042_v21, 5  ;;  %v4052_v21 = vshll.u32 %v12705_v56, 16  ;;  %v12755_v30 = vpop.f32.mrf.mxu2 }
 0x231   : > { %v2506_v42 = vpop.f32.mrf.mxu3  ;;  %15841 = vst [vmem:[#allocation22_spill] sm:$0xff] %v12755_v30 }
 0x232   : > { %v2559_v36 = vadd.f32 %v2506_v42, %v15838_v55  ;;  %v4660_v42 = vrot.slane %v12733_v15, 5  ;;  %v4038_v55 = vrot.slane %v4036_v0, 5  ;;  %v4049_v39 = vor.u32 %v4048_v14, %v4044_v3 }
 0x233   : > { %v4054_v14 = vrot.slane %v4052_v21, 5 }
 0x234   : > { %v3213_v37 = vadd.f32 %v12662_v13, %v2559_v36  ;;  %v4662_v36 = vrot.slane %v4660_v42, 4  ;;  %v4039_v0 = vor.u32 %v4038_v55, %v4035_v2  ;;  %v4050_v11 = vrot.slane %v4049_v39, 4 }
 0x236   : > { %v12740_v44 = vpop.f32.mrf.mxu0  ;;  %v3611_v51 = vadd.f32 %v12675_v54, %v3213_v37  ;;  %v4663_v54 = vrot.slane %v12744_v17, 5 }
 0x238   : > { %v12747_v1 = vadd.f32 %v12686_v58, %v3611_v51  ;;  %v4664_v51 = vsel %vm11410_vm12, %v4662_v36, %v4663_v54  ;;  %v3568_v36 = vpop.f32.mrf.mxu1  ;;  %v4066_v54 = vshll.u32 %v12733_v15, 16 }
 0x239   : > { %10675 = vmatmul.msk.bf16.gmra.mxu0 %vm1540_vm14, %v4779_v45  ;;  %v2508_v13 = vpop.f32.mrf.mxu3  ;;  %v4661_v45 = vsel %vm11410_vm12, %v10659_v62, %v4660_v42  ;;  %v4753_v2 = vunpack.c.l.b16 %v4664_v51  ;;  %v12770_v42 = vld [vmem:[#allocation2 + $0x58] sm:$0xf]  ;;  %v4055_v62 = vsel %vm11429_vm15, %v4050_v11, %v4054_v14  ;;  %v12781_v11 = vld [vmem:[#allocation2 + $0x5c] sm:$0x1]  ;;  %v4571_v14 = vld [vmem:[#allocation2 + $0x54] sm:$0xe] }
 0x23a   : > { %15839 = vst [vmem:[#allocation11_spill] sm:$0xff] %v12747_v1  ;;  %v2560_v20 = vadd.f32 %v2508_v13, %v12198_v48  ;;  %v4040_v48 = vrot.slane %v4039_v0, 4  ;;  %v4752_v56 = vunpack.c.l.b16 %v4661_v45  ;;  %v4057_v13 = vshrl.u32 %v3924_v6, 16  ;;  %v3855_v45 = vpop.f32.mrf.mxu2 }
 0x23b   : > { %v4068_v30 = vrot.slane %v4066_v54, 5 }
 0x23c   : > { %v12758_v58 = vadd.f32 %v12680_v35, %v2560_v20  ;;  %v4045_v34 = vsel %vm11429_vm15, %v4040_v48, %v4044_v3  ;;  %v4060_v20 = vshll.u32 %v3924_v6, 16  ;;  %v4780_v39 = vpack.c.b16 %v4753_v2, %v4752_v56 }
 0x23d   : > { %v4667_v3 = vrot.slane %v12770_v42, 5  ;;  %v4353_v48 = vunpack.c.l.b16 %v4055_v62  ;;  %v4059_v6 = vrot.slane %v4057_v13, 4  ;;  %v10660_v56 = vrot.slane %v4571_v14, 9 }
 0x23e   : > { %15842 = vst [vmem:[#allocation23_spill] sm:$0xff] %v12758_v58  ;;  %v12760_v37 = vpop.f32.mrf.mxu0  ;;  %10641 = vmatmul.msk.bf16.gmra.mxu3 %vm1540_vm14, %v4380_v41  ;;  %v4070_v41 = vshrl.u32 %v12733_v15, 16  ;;  %v4076_v62 = vshll.u32 %v12744_v17, 16  ;;  %v3927_v17 = vld [vmem:[#allocation2 + $0x54] sm:$0xf] }
 0x23f   : > { %v4669_v2 = vrot.slane %v4667_v3, 4 }
 0x240   : > { %v4072_v9 = vrot.slane %v4070_v41, 4 }
 0x241   : > { %v2511_v55 = vpop.f32.mrf.mxu3 }
 0x242   : > { %v2561_v35 = vadd.f32 %v2511_v55, %v12214_v27  ;;  %v4352_v27 = vunpack.c.l.b16 %v4045_v34  ;;  %v4062_v55 = vrot.slane %v4060_v20, 5  ;;  %v4073_v20 = vor.u32 %v4072_v9, %v4068_v30 }
 0x243   : > { %v4078_v9 = vrot.slane %v4076_v62, 5 }
 0x244   : > { %v3215_v0 = vadd.f32 %v12699_v16, %v2561_v35  ;;  %v4670_v35 = vrot.slane %v12781_v11, 5  ;;  %v4381_v34 = vpack.c.b16 %v4353_v48, %v4352_v27  ;;  %v4063_v13 = vor.u32 %v4062_v55, %v4059_v6 }
 0x245   : > { %v4074_v27 = vrot.slane %v4073_v20, 4 }
 0x246   : > { %v12777_v21 = vpop.f32.mrf.mxu0  ;;  %v3613_v51 = vadd.f32 %v12726_v49, %v3215_v0  ;;  %v4668_v0 = vsel %vm11410_vm12, %v10660_v56, %v4667_v3  ;;  %v4081_v3 = vshrl.u32 %v3927_v17, 16  ;;  %v12807_v56 = vld [vmem:[#allocation2 + $0x64] sm:$0xf] }
 0x247   : > { %v4674_v62 = vrot.slane %v12807_v56, 5 }
 0x248   : > { %v12784_v15 = vadd.f32 %v12728_v43, %v3613_v51  ;;  %v12795_v43 = vpop.f32.mrf.mxu1  ;;  %v12802_v51 = vpop.f32.mrf.mxu2 }
 0x249   : > { %10676 = vmatmul.msk.bf16.gmra.mxu0 %vm1540_vm14, %v4780_v39  ;;  %v2513_v16 = vpop.f32.mrf.mxu3  ;;  %15845 = vst [vmem:[#allocation26_spill] sm:$0xff] %v12795_v43  ;;  %v4671_v39 = vsel %vm11410_vm12, %v4669_v2, %v4670_v35  ;;  %v4079_v2 = vsel %vm11429_vm15, %v4074_v27, %v4078_v9  ;;  %v4090_v35 = vshll.u32 %v12770_v42, 16 }
 0x24a   : > { %15843 = vst [vmem:[#allocation24_spill] sm:$0xff] %v12784_v15  ;;  %v2562_v49 = vadd.f32 %v2513_v16, %v12231_v7  ;;  %v4064_v7 = vrot.slane %v4063_v13, 4  ;;  %v4755_v48 = vunpack.c.l.b16 %v4671_v39  ;;  %v4084_v16 = vshll.u32 %v3927_v17, 16  ;;  %v12817_v17 = vld [vmem:[#allocation2 + $0x68] sm:$0x1] }
 0x24b   : > { %15846 = vst [vmem:[#allocation27_spill] sm:$0xff] %v12802_v51  ;;  %v4083_v39 = vrot.slane %v4081_v3, 4  ;;  %v4092_v9 = vrot.slane %v4090_v35, 5 }
 0x24c   : > { %v12791_v54 = vadd.f32 %v12719_v52, %v2562_v49  ;;  %v4754_v52 = vunpack.c.l.b16 %v4668_v0  ;;  %v4069_v14 = vsel %vm11429_vm15, %v4064_v7, %v4068_v30  ;;  %v4094_v49 = vshrl.u32 %v12770_v42, 16 }
 0x24d   : > { %v4355_v0 = vunpack.c.l.b16 %v4079_v2  ;;  %v4086_v7 = vrot.slane %v4084_v16, 5 }
 0x24e   : > { %15844 = vst [vmem:[#allocation25_spill] sm:$0xff] %v12791_v54  ;;  %v12793_v41 = vpop.f32.mrf.mxu0  ;;  %10642 = vmatmul.msk.bf16.gmra.mxu3 %vm1540_vm14, %v4381_v34  ;;  %v4781_v13 = vpack.c.b16 %v4755_v48, %v4754_v52  ;;  %v4096_v51 = vrot.slane %v4094_v49, 4  ;;  %v4676_v48 = vrot.slane %v4674_v62, 4 }
 0x24f   : > { %v4087_v16 = vor.u32 %v4086_v7, %v4083_v39 }
 0x250   : > { %v3573_v27 = vpop.f32.mrf.mxu1  ;;  %v3860_v42 = vpop.f32.mrf.mxu2  ;;  %v4097_v2 = vor.u32 %v4096_v51, %v4092_v9 }
 0x251   : > { %v2516_v6 = vpop.f32.mrf.mxu3 }
 0x252   : > { %v2563_v55 = vadd.f32 %v2516_v6, %v12244_v10  ;;  %v4354_v10 = vunpack.c.l.b16 %v4069_v14  ;;  %v4572_v6 = vld [vmem:[#allocation2 + $0x60] sm:$0xe] }
 0x253   : > { %v10661_v52 = vrot.slane %v4572_v6, 9  ;;  %v4098_v6 = vrot.slane %v4097_v2, 4 }
 0x254   : > { %v3217_v34 = vadd.f32 %v12740_v44, %v2563_v55  ;;  %v4677_v55 = vrot.slane %v12817_v17, 5  ;;  %v4382_v3 = vpack.c.b16 %v4355_v0, %v4354_v10  ;;  %v3930_v0 = vld [vmem:[#allocation2 + $0x60] sm:$0xf] }
 0x255   : > { %v4675_v49 = vsel %vm11410_vm12, %v10661_v52, %v4674_v62  ;;  %v4105_v62 = vshrl.u32 %v3930_v0, 16  ;;  %v4108_v52 = vshll.u32 %v3930_v0, 16 }
 0x256   : > { %v12814_v20 = vpop.f32.mrf.mxu0  ;;  %v3615_v30 = vadd.f32 %v3568_v36, %v3217_v34  ;;  %v15848_v36 = vld [vmem:[#allocation17_spill] sm:$0xff]  ;;  %v4100_v34 = vshll.u32 %v12781_v11, 16  ;;  %v4756_v51 = vunpack.c.l.b16 %v4675_v49 }
 0x258   : > { %v12819_v43 = vadd.f32 %v3855_v45, %v3615_v30  ;;  %v4088_v30 = vrot.slane %v4087_v16, 4  ;;  %v4102_v10 = vrot.slane %v4100_v34, 5  ;;  %v12835_v7 = vpop.f32.mrf.mxu1  ;;  %v4118_v16 = vshrl.u32 %v12807_v56, 16 }
 0x259   : > { %10677 = vmatmul.msk.bf16.gmra.mxu0 %vm1540_vm14, %v4781_v13  ;;  %v2518_v44 = vpop.f32.mrf.mxu3  ;;  %v4678_v13 = vsel %vm11410_vm12, %v4676_v48, %v4677_v55  ;;  %15850 = vst [vmem:[#allocation29_spill] sm:$0xff] %v12835_v7  ;;  %v12844_v55 = vpop.f32.mrf.mxu2  ;;  %v12852_v7 = vld [vmem:[#allocation2 + $0x74] sm:$0x1] }
 0x25a   : > { %15847 = vst [vmem:[#allocation28_spill] sm:$0xff] %v12819_v43  ;;  %v2564_v14 = vadd.f32 %v2518_v44, %v15848_v36  ;;  %v4757_v39 = vunpack.c.l.b16 %v4678_v13  ;;  %v4093_v36 = vsel %vm11429_vm15, %v4088_v30, %v4092_v9  ;;  %v4103_v48 = vsel %vm11429_vm15, %v4098_v6, %v4102_v10  ;;  %v4573_v6 = vld [vmem:[#allocation2 + $0x6c] sm:$0xe] }
 0x25b   : > { %v4356_v13 = vunpack.c.l.b16 %v4093_v36  ;;  %v4357_v0 = vunpack.c.l.b16 %v4103_v48 }
 0x25c   : > { %v12826_v35 = vadd.f32 %v12760_v37, %v2564_v14  ;;  %v15851_v37 = vld [vmem:[#allocation13_spill] sm:$0xff]  ;;  %v12840_v14 = vld [vmem:[#allocation2 + $0x70] sm:$0xf]  ;;  %v4782_v34 = vpack.c.b16 %v4757_v39, %v4756_v51  ;;  %v4684_v39 = vrot.slane %v12852_v7, 5 }
 0x25d   : > { %15852 = vst [vmem:[#allocation13_spill] sm:$0xff] %v12844_v55  ;;  %v4681_v9 = vrot.slane %v12840_v14, 5  ;;  %v4120_v55 = vrot.slane %v4118_v16, 4 }
 0x25e   : > { %15849 = vst [vmem:[#allocation17_spill] sm:$0xff] %v12826_v35  ;;  %v12828_v45 = vpop.f32.mrf.mxu0  ;;  %10643 = vmatmul.msk.bf16.gmra.mxu3 %vm1540_vm14, %v4382_v3  ;;  %v4114_v3 = vshll.u32 %v12807_v56, 16  ;;  %v10662_v56 = vrot.slane %v4573_v6, 9 }
 0x25f   : > { %v4683_v51 = vrot.slane %v4681_v9, 4 }
 0x260   : > { %v4116_v10 = vrot.slane %v4114_v3, 5 }
 0x261   : > { %v2521_v11 = vpop.f32.mrf.mxu3  ;;  %v3865_v16 = vpop.f32.mrf.mxu2 }
 0x262   : > { %v2565_v44 = vadd.f32 %v2521_v11, %v15851_v37  ;;  %v4107_v11 = vrot.slane %v4105_v62, 4  ;;  %v4110_v37 = vrot.slane %v4108_v52, 5  ;;  %v3578_v62 = vpop.f32.mrf.mxu1  ;;  %v4121_v52 = vor.u32 %v4120_v55, %v4116_v10  ;;  %v3933_v55 = vld [vmem:[#allocation2 + $0x6c] sm:$0xf] }
 0x264   : > { %v3219_v2 = vadd.f32 %v12777_v21, %v2565_v44  ;;  %v15854_v44 = vld [vmem:[#allocation14_spill] sm:$0xff]  ;;  %v4111_v48 = vor.u32 %v4110_v37, %v4107_v11 }
 0x266   : > { %v12849_v49 = vpop.f32.mrf.mxu0  ;;  %v3617_v30 = vadd.f32 %v3573_v27, %v3219_v2  ;;  %v4383_v27 = vpack.c.b16 %v4357_v0, %v4356_v13  ;;  %v4124_v2 = vshll.u32 %v12817_v17, 16  ;;  %v4112_v13 = vrot.slane %v4111_v48, 4 }
 0x267   : > { %v4122_v0 = vrot.slane %v4121_v52, 4 }
 0x268   : > { %v12854_v43 = vadd.f32 %v3860_v42, %v3617_v30  ;;  %v4685_v30 = vsel %vm11410_vm12, %v4683_v51, %v4684_v39  ;;  %v4126_v11 = vrot.slane %v4124_v2, 5  ;;  %v4138_v51 = vshll.u32 %v12840_v14, 16 }
 0x269   : > { %10678 = vmatmul.msk.bf16.gmra.mxu0 %vm1540_vm14, %v4782_v34  ;;  %v2523_v21 = vpop.f32.mrf.mxu3  ;;  %v4682_v34 = vsel %vm11410_vm12, %v10662_v56, %v4681_v9  ;;  %v4759_v17 = vunpack.c.l.b16 %v4685_v30  ;;  %v3937_v9 = vld [vmem:[#allocation2 + $0x7c] sm:$0xf]  ;;  %v4142_v39 = vshrl.u32 %v12840_v14, 16 }
 0x26a   : > { %15853 = vst [vmem:[#allocation30_spill] sm:$0xff] %v12854_v43  ;;  %v2566_v36 = vadd.f32 %v2523_v21, %v15854_v44  ;;  %v4758_v37 = vunpack.c.l.b16 %v4682_v34  ;;  %v4117_v44 = vsel %vm11429_vm15, %v4112_v13, %v4116_v10  ;;  %v4132_v43 = vshll.u32 %v3933_v55, 16  ;;  %v12880_v2 = vpop.f32.mrf.mxu1 }
 0x26b   : > { %v4127_v56 = vsel %vm11429_vm15, %v4122_v0, %v4126_v11  ;;  %v4358_v34 = vunpack.c.l.b16 %v4117_v44  ;;  %v4688_v30 = vrot.slane %v3937_v9, 5  ;;  %v12882_v0 = vpop.f32.mrf.mxu2  ;;  %v4140_v11 = vrot.slane %v4138_v51, 5 }
 0x26c   : > { %v12861_v3 = vadd.f32 %v12793_v41, %v2566_v36  ;;  %v15856_v41 = vld [vmem:[#allocation15_spill] sm:$0xff]  ;;  %v4129_v36 = vshrl.u32 %v3933_v55, 16  ;;  %v4783_v48 = vpack.c.b16 %v4759_v17, %v4758_v37  ;;  %v4359_v13 = vunpack.c.l.b16 %v4127_v56  ;;  %15858 = vst [vmem:[#allocation31_spill] sm:$0xff] %v12882_v0 }
 0x26d   : > { %15857 = vst [vmem:[#allocation15_spill] sm:$0xff] %v12880_v2  ;;  %v4144_v35 = vrot.slane %v4142_v39, 4  ;;  %v15860_v2 = vld [vmem:[#allocation16_spill] sm:$0xff]  ;;  %v4166_v39 = vshrl.u32 %v3937_v9, 16 }
 0x26e   : > { %15855 = vst [vmem:[#allocation14_spill] sm:$0xff] %v12861_v3  ;;  %v12863_v42 = vpop.f32.mrf.mxu0  ;;  %10644 = vmatmul.msk.bf16.gmra.mxu3 %vm1540_vm14, %v4383_v27  ;;  %v4131_v55 = vrot.slane %v4129_v36, 4  ;;  %v4574_v3 = vld [vmem:[#allocation2 + $0x78] sm:$0xe]  ;;  %v4384_v56 = vpack.c.b16 %v4359_v13, %v4358_v34 }
 0x26f   : > { %v10663_v17 = vrot.slane %v4574_v3, 9 }
 0x271   : > { %v2526_v6 = vpop.f32.mrf.mxu3  ;;  %v4689_v3 = vsel %vm11410_vm12, %v10663_v17, %v4688_v30 }
 0x272   : > { %v2567_v21 = vadd.f32 %v2526_v6, %v15856_v41  ;;  %v4134_v6 = vrot.slane %v4132_v43, 5  ;;  %v3938_v41 = vld [vmem:[#allocation2 + $0x80] sm:$0x1]  ;;  %v4145_v43 = vor.u32 %v4144_v35, %v4140_v11  ;;  %v3583_v34 = vpop.f32.mrf.mxu1 }
 0x273   : > { %v4691_v44 = vrot.slane %v3938_v41, 5 }
 0x274   : > { %v3221_v27 = vadd.f32 %v12814_v20, %v2567_v21  ;;  %v3936_v20 = vld [vmem:[#allocation2 + $0x78] sm:$0xf]  ;;  %v4690_v21 = vrot.slane %v4688_v30, 4  ;;  %v4135_v36 = vor.u32 %v4134_v6, %v4131_v55  ;;  %v12900_v30 = vld [vmem:[#allocation2 + $0x88] sm:$0xf] }
 0x275   : > { %v4153_v15 = vshrl.u32 %v3936_v20, 16  ;;  %v4156_v0 = vshll.u32 %v3936_v20, 16 }
 0x276   : > { %v12878_v52 = vpop.f32.mrf.mxu0  ;;  %v3619_v10 = vadd.f32 %v3578_v62, %v3221_v27  ;;  %v4148_v27 = vshll.u32 %v12852_v7, 16  ;;  %v4136_v35 = vrot.slane %v4135_v36, 4  ;;  %v4146_v7 = vrot.slane %v4145_v43, 4 }
 0x277   : > { %v4155_v13 = vrot.slane %v4153_v15, 4  ;;  %v4158_v55 = vrot.slane %v4156_v0, 5  ;;  %v4172_v36 = vshll.u32 %v3938_v41, 16 }
 0x278   : > { %v12884_v14 = vadd.f32 %v3865_v16, %v3619_v10  ;;  %v4162_v16 = vshll.u32 %v3937_v9, 16  ;;  %v4150_v10 = vrot.slane %v4148_v27, 5  ;;  %v4168_v9 = vrot.slane %v4166_v39, 4 }
 0x279   : > { %10679 = vmatmul.msk.bf16.gmra.mxu0 %vm1540_vm14, %v4783_v48  ;;  %v2528_v37 = vpop.f32.mrf.mxu3  ;;  %v4141_v17 = vsel %vm11429_vm15, %v4136_v35, %v4140_v11  ;;  %v4695_v27 = vrot.slane %v12900_v30, 5 }
 0x27a   : > { %15859 = vst [vmem:[#allocation32_spill] sm:$0xff] %v12884_v14  ;;  %v2568_v62 = vadd.f32 %v2528_v37, %v15860_v2  ;;  %v4692_v2 = vsel %vm11410_vm12, %v4690_v21, %v4691_v44  ;;  %v4164_v20 = vrot.slane %v4162_v16, 5  ;;  %v15862_v14 = vld [vmem:[#allocation18_spill] sm:$0xff]  ;;  %v4151_v21 = vsel %vm11429_vm15, %v4146_v7, %v4150_v10  ;;  %v12915_v10 = vpop.f32.mrf.mxu1 }
 0x27b   : > { %v4761_v6 = vunpack.c.l.b16 %v4692_v2  ;;  %v4159_v44 = vor.u32 %v4158_v55, %v4155_v13  ;;  %v4361_v39 = vunpack.c.l.b16 %v4151_v21  ;;  %v4575_v2 = vld [vmem:[#allocation2 + $0x84] sm:$0xe]  ;;  %15864 = vst [vmem:[#allocation33_spill] sm:$0xff] %v12915_v10  ;;  %v4697_v13 = vrot.slane %v4695_v27, 4 }
 0x27c   : > { %v12890_v51 = vadd.f32 %v12828_v45, %v2568_v62  ;;  %v4760_v45 = vunpack.c.l.b16 %v4689_v3  ;;  %v3870_v62 = vpop.f32.mrf.mxu2  ;;  %v12910_v3 = vld [vmem:[#allocation2 + $0x8c] sm:$0x1]  ;;  %v10664_v41 = vrot.slane %v4575_v2, 9 }
 0x27d   : > { %v4160_v11 = vrot.slane %v4159_v44, 4  ;;  %v4698_v55 = vrot.slane %v12910_v3, 5  ;;  %v3939_v44 = vld [vmem:[#allocation2 + $0x84] sm:$0xf] }
 0x27e   : > { %15861 = vst [vmem:[#allocation16_spill] sm:$0xff] %v12890_v51  ;;  %v12892_v48 = vpop.f32.mrf.mxu0  ;;  %10645 = vmatmul.msk.bf16.gmra.mxu3 %vm1540_vm14, %v4384_v56  ;;  %v4784_v0 = vpack.c.b16 %v4761_v6, %v4760_v45  ;;  %v4169_v56 = vor.u32 %v4168_v9, %v4164_v20  ;;  %v4180_v2 = vshll.u32 %v3939_v44, 16 }
 0x280   : > { %v4170_v7 = vrot.slane %v4169_v56, 4 }
 0x281   : > { %v2531_v37 = vpop.f32.mrf.mxu3 }
 0x282   : > { %v2569_v51 = vadd.f32 %v2531_v37, %v15862_v14  ;;  %v4360_v14 = vunpack.c.l.b16 %v4141_v17  ;;  %v5080_v37 = vld [vmem:[#allocation3 + $0xc] sm:$0x1]  ;;  %v4165_v17 = vsel %vm11429_vm15, %v4160_v11, %v4164_v20  ;;  %v5643_v20 = vld [vmem:[#allocation3] sm:$0xf] }
 0x283   : > { %v5081_v21 = vsel %vm12921_vm1, 0, %v5080_v37  ;;  %v5693_v11 = vshrl.u32 %v5643_v20, 16 }
 0x284   : > { %v3223_v15 = vadd.f32 %v12849_v49, %v2569_v51  ;;  %v4174_v49 = vrot.slane %v4172_v36, 5  ;;  %v4385_v6 = vpack.c.b16 %v4361_v39, %v4360_v14  ;;  %5082 = vst [vmem:[#allocation3 + $0xc] sm:$0x1] %v5081_v21  ;;  %v4696_v36 = vsel %vm11410_vm12, %v10664_v41, %v4695_v27  ;;  %v5644_v14 = vld [vmem:[#allocation3 + $0x4] sm:$0xf] }
 0x285   : > { %v12943_v39 = vunpack.c.l.b16 %v4165_v17  ;;  %v4762_v41 = vunpack.c.l.b16 %v4696_v36  ;;  %v4190_v17 = vshrl.u32 %v12900_v30, 16  ;;  %v5676_v21 = vld [vmem:[#allocation3 + $0x8] sm:$0x1]  ;;  %v3588_v36 = vpop.f32.mrf.mxu1 }
 0x286   : > { %v12907_v43 = vpop.f32.mrf.mxu0  ;;  %v3621_v16 = vadd.f32 %v3583_v34, %v3223_v15  ;;  %v15865_v34 = vld [vmem:[#allocation19_spill] sm:$0xff]  ;;  %v5712_v54 = vshll.u32 %v5676_v21, 16 }
 0x287   : > { %v4192_v21 = vrot.slane %v4190_v17, 4 }
 0x288   : > { %v12912_v35 = vadd.f32 %v3870_v62, %v3621_v16  ;;  %v12925_v62 = vpop.f32.mrf.mxu2  ;;  %v4699_v16 = vsel %vm11410_vm12, %v4697_v13, %v4698_v55  ;;  %v4186_v55 = vshll.u32 %v12900_v30, 16 }
 0x289   : > { %10680 = vmatmul.msk.bf16.gmra.mxu0 %vm1540_vm14, %v4784_v0  ;;  %v2533_v51 = vpop.f32.mrf.mxu3  ;;  %15868 = vst [vmem:[#allocation19_spill] sm:$0xff] %v12925_v62  ;;  %v4175_v0 = vsel %vm11429_vm15, %v4170_v7, %v4174_v49  ;;  %v5696_v7 = vshll.u32 %v5643_v20, 16  ;;  %v5702_v49 = vshll.u32 %v5644_v14, 16  ;;  %v4763_v13 = vunpack.c.l.b16 %v4699_v16 }
 0x28a   : > { %15863 = vst [vmem:[#allocation18_spill] sm:$0xff] %v12912_v35  ;;  %v2570_v45 = vadd.f32 %v2533_v51, %v15865_v34  ;;  %v12945_v51 = vunpack.c.l.b16 %v4175_v0  ;;  %v5706_v34 = vshrl.u32 %v5644_v14, 16  ;;  %v15872_v14 = vld [vmem:[#allocation20_spill] sm:$0xff]  ;;  %v5129_v35 = vld [vmem:[#allocation3 + $0x14] sm:$0x1] }
 0x28b   : > { %v5704_v0 = vrot.slane %v5702_v49, 5  ;;  %v5130_v16 = vsel %vm12949_vm3, 0, %v5129_v35  ;;  %v4576_v49 = vld [vmem:[#allocation2 + $0x90] sm:$0xe] }
 0x28c   : > { %v12932_v15 = vadd.f32 %v12863_v42, %v2570_v45  ;;  %v4177_v42 = vshrl.u32 %v3939_v44, 16  ;;  %v12954_v45 = vld [vmem:[#allocation2 + $0x94] sm:$0xf]  ;;  %v5698_v44 = vrot.slane %v5696_v7, 5  ;;  %v5708_v20 = vrot.slane %v5706_v34, 4 }
 0x28d   : > { %v4702_v1 = vrot.slane %v12954_v45, 5  ;;  %v4785_v7 = vpack.c.b16 %v4763_v13, %v4762_v41  ;;  %5131 = vst [vmem:[#allocation3 + $0x14] sm:$0x1] %v5130_v16  ;;  %v5714_v34 = vrot.slane %v5712_v54, 5  ;;  %v3942_v41 = vld [vmem:[#allocation2 + $0x90] sm:$0xf] }
 0x28e   : > { %15869 = vst [vmem:[#allocation34_spill] sm:$0xff] %v12932_v15  ;;  %v12936_v56 = vpop.f32.mrf.mxu0  ;;  %10646 = vmatmul.msk.bf16.gmra.mxu3 %vm1540_vm14, %v4385_v6  ;;  %v5695_v6 = vrot.slane %v5693_v11, 4  ;;  %v4179_v10 = vrot.slane %v4177_v42, 4  ;;  %v4182_v15 = vrot.slane %v4180_v2, 5  ;;  %v11148_v11 = vld [vmem:[#allocation3] sm:$0xff]  ;;  %v5709_v58 = vor.u32 %v5708_v20, %v5704_v0 }
 0x28f   : > { %v12964_v2 = vrot.slane %v4186_v55, 5  ;;  %10769 = vmatmul.msk.bf16.vlgmr.msra.gmra.mxu2 %vm6126_vm8, %v11148_v11  ;;  %v10665_v20 = vrot.slane %v4576_v49, 9 }
 0x290   : > { %v5699_v57 = vor.u32 %v5698_v44, %v5695_v6  ;;  %v5710_v6 = vrot.slane %v5709_v58, 4  ;;  %v4386_v58 = vpack.c.b16 %v12945_v51, %v12943_v39 }
 0x291   : > { %v2536_v37 = vpop.f32.mrf.mxu3  ;;  %v4193_v11 = vor.u32 %v4192_v21, %v12964_v2 }
 0x292   : > { %v2571_v62 = vadd.f32 %v2536_v37, %v15872_v14  ;;  %v3875_v37 = vpop.f32.mrf.mxu2  ;;  %v12966_v14 = vld [vmem:[#allocation2 + $0x98] sm:$0x1]  ;;  %v5700_v35 = vrot.slane %v5699_v57, 4  ;;  %v5715_v54 = vsel %vm11429_vm15, %v5710_v6, %v5714_v34  ;;  %v5083_v6 = vld [vmem:[#allocation3 + $0x18] sm:$0x1] }
 0x293   : > { %v4705_v55 = vrot.slane %v12966_v14, 5  ;;  %v6079_v16 = vunpack.c.l.b16 %v5715_v54  ;;  %v4194_v21 = vrot.slane %v4193_v11, 4 }
 0x294   : > { %v3225_v30 = vadd.f32 %v12878_v52, %v2571_v62  ;;  %v4704_v52 = vrot.slane %v4702_v1, 4  ;;  %v5705_v62 = vsel %vm11429_vm15, %v5700_v35, %v5704_v0  ;;  %v4196_v0 = vshll.u32 %v12910_v3, 16 }
 0x295   : > { %v6078_v17 = vunpack.c.l.b16 %v5705_v62  ;;  %v4204_v35 = vshll.u32 %v3942_v41, 16  ;;  %v5084_v3 = vsel %vm12921_vm1, 0, %v5083_v6 }
 0x296   : > { %v12962_v42 = vpop.f32.mrf.mxu0  ;;  %v3623_v44 = vadd.f32 %v3588_v36, %v3225_v30  ;;  %v4183_v36 = vor.u32 %v4182_v15, %v4179_v10  ;;  %v15873_v30 = vld [vmem:[#allocation21_spill] sm:$0xff]  ;;  %v4703_v10 = vsel %vm11410_vm12, %v10665_v20, %v4702_v1  ;;  %v4706_v15 = vsel %vm11410_vm12, %v4704_v52, %v4705_v55  ;;  %5085 = vst [vmem:[#allocation3 + $0x18] sm:$0x1] %v5084_v3 }
 0x297   : > { %v6110_v34 = vpack.c.b16 %v6079_v16, %v6078_v17  ;;  %v4198_v54 = vrot.slane %v4196_v0, 5  ;;  %v4764_v1 = vunpack.c.l.b16 %v4703_v10  ;;  %v4765_v20 = vunpack.c.l.b16 %v4706_v15 }
 0x298   : > { %v12973_v13 = vadd.f32 %v3875_v37, %v3623_v44  ;;  %v4201_v37 = vshrl.u32 %v3942_v41, 16  ;;  %v4214_v44 = vshrl.u32 %v12954_v45, 16  ;;  %v4184_v51 = vrot.slane %v4183_v36, 4  ;;  %v3946_v41 = vld [vmem:[#allocation2 + $0xa0] sm:$0xf] }
 0x299   : > { %10681 = vmatmul.msk.bf16.gmra.mxu0 %vm1540_vm14, %v4785_v7  ;;  %v2538_v57 = vpop.f32.mrf.mxu3  ;;  %v4210_v7 = vshll.u32 %v12954_v45, 16  ;;  %10689 = vmatmul.msk.bf16.vlgmr.msra.gmra.mxu1 %vm6126_vm8, %v6110_v34  ;;  %v4206_v45 = vrot.slane %v4204_v35, 5  ;;  %v4220_v36 = vshll.u32 %v12966_v14, 16  ;;  %v4709_v11 = vrot.slane %v3946_v41, 5  ;;  %v4577_v34 = vld [vmem:[#allocation2 + $0x9c] sm:$0xe] }
 0x29a   : > { %v2572_v49 = vadd.f32 %v2538_v57, %v15873_v30  ;;  %v4216_v52 = vrot.slane %v4214_v44, 4  ;;  %v4189_v16 = vsel %vm11429_vm15, %v4184_v51, %v12964_v2  ;;  %v4199_v57 = vsel %vm11429_vm15, %v4194_v21, %v4198_v54  ;;  %v13009_v30 = vld [vmem:[%s15787_s4] ss:$0 sm:$0xff]  ;;  %v5132_v2 = vld [vmem:[#allocation3 + $0x20] sm:$0x1] }
 0x29b   : > { %v12997_v17 = vrot.slane %v4210_v7, 5  ;;  %v4786_v6 = vpack.c.b16 %v4765_v20, %v4764_v1  ;;  %v3947_v44 = vld [vmem:[#allocation2 + $0xa4] sm:$0x1]  ;;  %v4234_v10 = vshll.u32 %v3946_v41, 16  ;;  %v4238_v14 = vshrl.u32 %v3946_v41, 16 }
 0x29c   : > { %v12985_v62 = vadd.f32 %v12892_v48, %v2572_v49  ;;  %v4203_v48 = vrot.slane %v4201_v37, 4  ;;  %v5133_v3 = vsel %vm12949_vm3, 0, %v5132_v2  ;;  %v10801_v41 = vld [vmem:[%s15789_s6 + $0x8] sm:$0xf]  ;;  %v4711_v1 = vrot.slane %v4709_v11, 4 }
 0x29d   : > { %v4217_v7 = vor.u32 %v4216_v52, %v12997_v17  ;;  %5134 = vst [vmem:[#allocation3 + $0x20] sm:$0x1] %v5133_v3  ;;  %v6747_v52 = vsel %vm6175_vm9, %v10801_v41, 0 }
 0x29e   : > { %15874 = vst [vmem:[#allocation20_spill] sm:$0xff] %v12985_v62  ;;  %v12994_v39 = vpop.f32.mrf.mxu0  ;;  %10647 = vmatmul.msk.bf16.gmra.mxu3 %vm1540_vm14, %v4386_v58  ;;  %v3945_v58 = vld [vmem:[#allocation2 + $0x9c] sm:$0xf]  ;;  %v4207_v49 = vor.u32 %v4206_v45, %v4203_v48  ;;  %v4364_v48 = vunpack.c.l.b16 %v4189_v16  ;;  %v4365_v45 = vunpack.c.l.b16 %v4199_v57  ;;  %v4240_v16 = vrot.slane %v4238_v14, 4 }
 0x29f   : > { %v4225_v37 = vshrl.u32 %v3945_v58, 16  ;;  %v4228_v35 = vshll.u32 %v3945_v58, 16  ;;  %v4712_v58 = vrot.slane %v3947_v44, 5  ;;  %6756 = vmatpush.bf16.msrb.mxu3 %v6747_v52 }
 0x2a1   : > { %v4454_v55 = vpop.f32.mrf.mxu3  ;;  %v4227_v51 = vrot.slane %v4225_v37, 4  ;;  %v4230_v21 = vrot.slane %v4228_v35, 5  ;;  %v4222_v37 = vrot.slane %v4220_v36, 5  ;;  %v13027_v35 = vrot.slane %v4234_v10, 5  ;;  %v13039_v10 = vld [vmem:[#allocation2 + $0xac] sm:$0xf] }
 0x2a2   : > { %v4534_v0 = vadd.f32 %v4454_v55, %v12361_v18  ;;  %v13016_v18 = vld [vmem:[%s15788_s5] ss:$0 sm:$0xff]  ;;  %v4208_v55 = vrot.slane %v4207_v49, 4  ;;  %v4716_v52 = vrot.slane %v13039_v10, 5 }
 0x2a3   : > { %v4231_v2 = vor.u32 %v4230_v21, %v4227_v51  ;;  %v5086_v51 = vld [vmem:[#allocation3 + $0x24] sm:$0x1]  ;;  %v4244_v21 = vshll.u32 %v3947_v44, 16 }
 0x2a4   : > { %v4932_v15 = vadd.f32 %v12907_v43, %v4534_v0  ;;  %v10666_v43 = vrot.slane %v4577_v34, 9  ;;  %v4218_v0 = vrot.slane %v4217_v7, 4  ;;  %v4387_v34 = vpack.c.b16 %v4365_v45, %v4364_v48 }
 0x2a5   : > { %v4213_v36 = vsel %vm11429_vm15, %v4208_v55, %v12997_v17  ;;  %v4713_v7 = vsel %vm11410_vm12, %v4711_v1, %v4712_v58  ;;  %v5087_v17 = vsel %vm12921_vm1, 0, %v5086_v51  ;;  %v4232_v41 = vrot.slane %v4231_v2, 4  ;;  %v10932_v55 = vld [vmem:[%s15789_s6 + $0x14] sm:$0xf]  ;;  %v10818_v58 = vld [vmem:[%s15789_s6 + $0xc] sm:$0xf] }
 0x2a6   : > { %v13020_v54 = vpop.f32.mrf.mxu0  ;;  %v4968_v20 = vmul.f32 %v13009_v30, %v4932_v15  ;;  %v4710_v15 = vsel %vm11410_vm12, %v10666_v43, %v4709_v11  ;;  %v4223_v14 = vsel %vm11429_vm15, %v4218_v0, %v4222_v37  ;;  %v4241_v11 = vor.u32 %v4240_v16, %v13027_v35  ;;  %5088 = vst [vmem:[#allocation3 + $0x24] sm:$0x1] %v5087_v17  ;;  %v5531_v51 = vld [vmem:[#allocation3 + $0xc] sm:$0xf] }
 0x2a7   : > { %v13051_v1 = vunpack.c.l.b16 %v4213_v36  ;;  %v8085_v37 = vsel %vm6175_vm9, %v10932_v55, 0  ;;  %v7033_v16 = vsel %vm6175_vm9, %v10818_v58, 0  ;;  %v4246_v2 = vrot.slane %v4244_v21, 5 }
 0x2a8   : > { %v5004_v57 = vadd.f32 %v13016_v18, %v4968_v20  ;;  %v13053_v20 = vld [vmem:[#allocation2 + $0xb0] sm:$0x1]  ;;  %8094 = vmatpush.bf16.msrb.mxu2 %v8085_v37  ;;  %7042 = vmatpush.bf16.msrb.mxu0 %v7033_v16  ;;  %v4718_v21 = vrot.slane %v4716_v52, 4 }
 0x2a9   : > { %10682 = vmatmul.msk.bf16.gmra.mxu0 %vm1540_vm14, %v4786_v6  ;;  %v4456_v3 = vpop.f32.mrf.mxu3  ;;  %v3602_v6 = vadd.f32 %v12491_v24, %v12575_v31  ;;  %v4766_v24 = vunpack.c.l.b16 %v4710_v15  ;;  %v4767_v31 = vunpack.c.l.b16 %v4713_v7 }
 0x2aa   : > { %v5036_v62 = vmax.f32 %v5004_v57, 0.0  ;;  %v4535_v49 = vadd.f32 %v4456_v3, %v12386_v47  ;;  %v4578_v47 = vld [vmem:[#allocation2 + $0xa8] sm:$0xe]  ;;  %v4242_v57 = vrot.slane %v4241_v11, 4 }
 0x2ab   : > { %v10667_v0 = vrot.slane %v4578_v47, 9  ;;  %v13081_v7 = vadd.f32 %v12502_v8, %v3602_v6  ;;  %v4719_v47 = vrot.slane %v13053_v20, 5  ;;  %v4787_v6 = vpack.c.b16 %v4767_v31, %v4766_v24  ;;  %v10899_v24 = vld [vmem:[%s15789_s6 + $0x10] sm:$0xf] }
 0x2ac   : > { %v5177_v48 = vpack.c.bf16 %v5036_v62, %v5036_v62  ;;  %v4933_v45 = vadd.f32 %v12936_v56, %v4535_v49  ;;  %v13058_v56 = vunpack.c.l.b16 %v4223_v14  ;;  %v4237_v49 = vsel %vm11429_vm15, %v4232_v41, %v13027_v35 }
 0x2ad   : > { %v13085_v14 = vadd.f32 %v12542_v50, %v12610_v5  ;;  %v13092_v17 = vsel %vm11410_vm12, %v10667_v0, %v4716_v52  ;;  %v5135_v50 = vld [vmem:[#allocation3 + $0x2c] sm:$0x1]  ;;  %v4247_v5 = vsel %vm11429_vm15, %v4242_v57, %v4246_v2  ;;  %v13098_v41 = vunpack.c.l.b16 %v4237_v49 }
 0x2ae   : > { %v13049_v43 = vpop.f32.mrf.mxu0  ;;  %v5210_v44 = vshrl.u32 %v5177_v48, 16  ;;  %v4969_v62 = vmul.f32 %v13009_v30, %v4933_v45  ;;  %10648 = vmatmul.msk.bf16.gmra.mxu3 %vm1540_vm14, %v4387_v34  ;;  %v5213_v34 = vshll.u32 %v5177_v48, 16  ;;  %v4388_v8 = vpack.c.b16 %v13058_v56, %v13051_v1 }
 0x2af   : > { %v5136_v52 = vsel %vm12949_vm3, 0, %v5135_v50  ;;  %v13112_v31 = vsel %vm11410_vm12, %v4718_v21, %v4719_v47  ;;  %v4768_v0 = vunpack.c.l.b16 %v13092_v17  ;;  %v7687_v2 = vsel %vm6175_vm9, %v10899_v24, 0  ;;  %v5535_v50 = vld [vmem:[#allocation3 + $0x14] sm:$0x1] }
 0x2b0   : > { %v13068_v3 = vrot.slane %v5210_v44, 7  ;;  %v5005_v15 = vadd.f32 %v13016_v18, %v4969_v62  ;;  %v3948_v44 = vld [vmem:[#allocation2 + $0xa8] sm:$0xf]  ;;  %5137 = vst [vmem:[#allocation3 + $0x2c] sm:$0x1] %v5136_v52  ;;  %7696 = vmatpush.bf16.msrb.mxu1 %v7687_v2  ;;  %v4268_v52 = vshll.u32 %v13053_v20, 16  ;;  %v13155_v1 = vadd.f32 %v12547_v4, %v13085_v14 }
 0x2b1   : > { %v4459_v11 = vpop.f32.mrf.mxu3  ;;  %v4249_v37 = vshrl.u32 %v3948_v44, 16  ;;  %v4252_v16 = vshll.u32 %v3948_v44, 16  ;;  %v13159_v56 = vadd.f32 %v12583_v40, %v12641_v59 }
 0x2b2   : > { %v5215_v35 = vor.u32 %v5213_v34, %v13068_v3  ;;  %v5037_v48 = vmax.f32 %v5005_v15, 0.0  ;;  %v4536_v45 = vadd.f32 %v4459_v11, %v12412_v61  ;;  %v13117_v34 = vunpack.c.l.b16 %v4247_v5 }
 0x2b3   : > { %v4251_v15 = vrot.slane %v4249_v37, 4  ;;  %v4254_v49 = vrot.slane %v4252_v16, 5  ;;  %v4262_v11 = vshrl.u32 %v13039_v10, 16  ;;  %v5216_v21 = vrot.slane %v13068_v3, 4  ;;  %v4579_v16 = vld [vmem:[#allocation2 + $0xb4] sm:$0xe] }
 0x2b4   : > { %v5532_v62 = vsel %vm13076_vm10, %v5215_v35, %v5531_v51  ;;  %v5178_v55 = vpack.c.bf16 %v5037_v48, %v5037_v48  ;;  %v4934_v61 = vadd.f32 %v12962_v42, %v4536_v45  ;;  %v4258_v51 = vshll.u32 %v13039_v10, 16  ;;  %v13124_v45 = vld [vmem:[#allocation2 + $0xb8] sm:$0xf] }
 0x2b5   : > { %5533 = vst [vmem:[#allocation3 + $0xc] sm:$0xf] %v5532_v62  ;;  %v4255_v44 = vor.u32 %v4254_v49, %v4251_v15  ;;  %v4723_v2 = vrot.slane %v13124_v45, 5 }
 0x2b6   : > { %v13105_v58 = vpop.f32.mrf.mxu0  ;;  %v5218_v57 = vshrl.u32 %v5178_v55, 16  ;;  %v4970_v42 = vmul.f32 %v13009_v30, %v4934_v61  ;;  %v5221_v35 = vshll.u32 %v5178_v55, 16  ;;  %v4260_v62 = vrot.slane %v4258_v51, 5 }
 0x2b7   : > { %v4264_v61 = vrot.slane %v4262_v11, 4  ;;  %v4769_v55 = vunpack.c.l.b16 %v13112_v31 }
 0x2b8   : > { %v5220_v47 = vrot.slane %v5218_v57, 7  ;;  %v5006_v48 = vadd.f32 %v13016_v18, %v4970_v42  ;;  %v5089_v57 = vld [vmem:[#allocation3 + $0x30] sm:$0x1]  ;;  %v4256_v42 = vrot.slane %v4255_v44, 4 }
 0x2b9   : > { %10683 = vmatmul.msk.bf16.gmra.mxu0 %vm1540_vm14, %v4787_v6  ;;  %v4461_v5 = vpop.f32.mrf.mxu3  ;;  %v4265_v6 = vor.u32 %v4264_v61, %v4260_v62  ;;  %v5090_v31 = vsel %vm12921_vm1, 0, %v5089_v57  ;;  %v4788_v40 = vpack.c.b16 %v4769_v55, %v4768_v0 }
 0x2ba   : > { %v5223_v24 = vor.u32 %v5221_v35, %v5220_v47  ;;  %v5225_v37 = vrot.slane %v5220_v47, 4  ;;  %v5038_v10 = vmax.f32 %v5006_v48, 0.0  ;;  %v4537_v3 = vadd.f32 %v4461_v5, %v12446_v32  ;;  %v13135_v47 = vld [vmem:[#allocation2 + $0xbc] sm:$0x1]  ;;  %5091 = vst [vmem:[#allocation3 + $0x30] sm:$0x1] %v5090_v31 }
 0x2bb   : > { %v4270_v48 = vrot.slane %v4268_v52, 5  ;;  %v10668_v5 = vrot.slane %v4579_v16, 9  ;;  %v4261_v44 = vsel %vm11429_vm15, %v4256_v42, %v4260_v62  ;;  %v4726_v57 = vrot.slane %v13135_v47, 5 }
 0x2bc   : > { %v5224_v15 = vsel %vm11500_vm6, %v5216_v21, %v5223_v24  ;;  %v5536_v49 = vsel %vm12921_vm1, %v5225_v37, %v5535_v50  ;;  %v5179_v20 = vpack.c.bf16 %v5038_v10, %v5038_v10  ;;  %v4935_v51 = vadd.f32 %v12994_v39, %v4537_v3  ;;  %v5645_v11 = vld [vmem:[#allocation3 + $0xc] sm:$0xf] }
 0x2bd   : > { %5534 = vst.msk [vmem:[#allocation3 + $0x10] sm:$0xf] %vm5068_vm7, %v5224_v15  ;;  %v5717_v35 = vshrl.u32 %v5645_v11, 16  ;;  %v5720_v39 = vshll.u32 %v5645_v11, 16  ;;  %v4266_v37 = vrot.slane %v4265_v6, 4  ;;  %v4725_v10 = vrot.slane %v4723_v2, 4 }
 0x2be   : > { %v13138_v32 = vpop.f32.mrf.mxu0  ;;  %5537 = vst [vmem:[#allocation3 + $0x14] sm:$0x1] %v5536_v49  ;;  %v5227_v21 = vshrl.u32 %v5179_v20, 16  ;;  %v4971_v50 = vmul.f32 %v13009_v30, %v4935_v51  ;;  %10649 = vmatmul.msk.bf16.gmra.mxu3 %vm1540_vm14, %v4388_v8  ;;  %v5230_v61 = vshll.u32 %v5179_v20, 16  ;;  %v5538_v8 = vld [vmem:[#allocation3 + $0x18] sm:$0xf]  ;;  %v4389_v42 = vpack.c.b16 %v13117_v34, %v13098_v41 }
 0x2bf   : > { %v5719_v24 = vrot.slane %v5717_v35, 4  ;;  %v5722_v16 = vrot.slane %v5720_v39, 5  ;;  %v4724_v6 = vsel %vm11410_vm12, %v10668_v5, %v4723_v2  ;;  %v4271_v4 = vsel %vm11429_vm15, %v4266_v37, %v4270_v48  ;;  %v3951_v48 = vld [vmem:[#allocation2 + $0xb4] sm:$0xf]  ;;  %v5545_v34 = vld [vmem:[#allocation3 + $0x24] sm:$0xf] }
 0x2c0   : > { %v13149_v52 = vrot.slane %v5227_v21, 7  ;;  %v5007_v3 = vadd.f32 %v13016_v18, %v4971_v50  ;;  %v13171_v14 = vunpack.c.l.b16 %v4261_v44  ;;  %v4727_v51 = vsel %vm11410_vm12, %v4725_v10, %v4726_v57 }
 0x2c1   : > { %v4464_v62 = vpop.f32.mrf.mxu3  ;;  %v5723_v59 = vor.u32 %v5722_v16, %v5719_v24  ;;  %v4770_v5 = vunpack.c.l.b16 %v4724_v6  ;;  %v13186_v50 = vunpack.c.l.b16 %v4271_v4  ;;  %v4771_v39 = vunpack.c.l.b16 %v4727_v51 }
 0x2c2   : > { %v5232_v15 = vor.u32 %v5230_v61, %v13149_v52  ;;  %v5039_v49 = vmax.f32 %v5007_v3, 0.0  ;;  %v4538_v20 = vadd.f32 %v4464_v62, %v12473_v22  ;;  %v5233_v17 = vrot.slane %v13149_v52, 4  ;;  %v5138_v3 = vld [vmem:[#allocation3 + $0x38] sm:$0x1] }
 0x2c3   : > { %v5724_v61 = vrot.slane %v5723_v59, 4  ;;  %v4273_v16 = vshrl.u32 %v3951_v48, 16  ;;  %v5139_v6 = vsel %vm12949_vm3, 0, %v5138_v3  ;;  %v4390_v4 = vpack.c.b16 %v13186_v50, %v13171_v14  ;;  %v5552_v50 = vld [vmem:[#allocation3 + $0x30] sm:$0xf] }
 0x2c4   : > { %v5539_v2 = vsel %vm13076_vm10, %v5232_v15, %v5538_v8  ;;  %v5180_v11 = vpack.c.bf16 %v5039_v49, %v5039_v49  ;;  %v4936_v31 = vadd.f32 %v13020_v54, %v4538_v20  ;;  %v11149_v35 = vld [vmem:[#allocation3 + $0xc] sm:$0xff]  ;;  %v5542_v15 = vld [vmem:[#allocation3 + $0x20] sm:$0x1]  ;;  %5140 = vst [vmem:[#allocation3 + $0x38] sm:$0x1] %v5139_v6  ;;  %v4276_v51 = vshll.u32 %v3951_v48, 16 }
 0x2c5   : > { %v13178_v22 = vld [vmem:[#allocation3 + $0x10] sm:$0xf]  ;;  %5540 = vst [vmem:[#allocation3 + $0x18] sm:$0xf] %v5539_v2  ;;  %v13183_v55 = vld [vmem:[#allocation3 + $0x14] sm:$0x1]  ;;  %10770 = vmatmul.msk.bf16.gmra.mxu2 %vm6126_vm8, %v11149_v35 }
 0x2c6   : > { %v13181_v0 = vpop.f32.mrf.mxu0  ;;  %v5726_v21 = vshll.u32 %v13178_v22, 16  ;;  %v5235_v44 = vshrl.u32 %v5180_v11, 16  ;;  %v4972_v54 = vmul.f32 %v13009_v30, %v4936_v31  ;;  %v5730_v24 = vshrl.u32 %v13178_v22, 16 }
 0x2c7   : > { %v5238_v37 = vshll.u32 %v5180_v11, 16  ;;  %v5736_v52 = vshll.u32 %v13183_v55, 16  ;;  %v4275_v59 = vrot.slane %v4273_v16, 4 }
 0x2c8   : > { %v5728_v10 = vrot.slane %v5726_v21, 5  ;;  %v5237_v57 = vrot.slane %v5235_v44, 7  ;;  %v5008_v8 = vadd.f32 %v13016_v18, %v4972_v54  ;;  %v5732_v62 = vrot.slane %v5730_v24, 4 }
 0x2c9   : > { %10684 = vmatmul.msk.bf16.gmra.mxu0 %vm1540_vm14, %v4788_v40  ;;  %v4466_v49 = vpop.f32.mrf.mxu3  ;;  %v5738_v21 = vrot.slane %v5736_v52, 5  ;;  %v4278_v44 = vrot.slane %v4276_v51, 5  ;;  %v4282_v54 = vshll.u32 %v13124_v45, 16 }
 0x2ca   : > { %v5729_v20 = vsel %vm11429_vm15, %v5724_v61, %v5728_v10  ;;  %v5240_v2 = vor.u32 %v5238_v37, %v5237_v57  ;;  %v5242_v11 = vrot.slane %v5237_v57, 4  ;;  %v5040_v31 = vmax.f32 %v5008_v8, 0.0 }
 0x2cb   : > { %v4539_v40 = vadd.f32 %v4466_v49, %v12506_v12  ;;  %v5733_v35 = vor.u32 %v5732_v62, %v5728_v10  ;;  %v4789_v12 = vpack.c.b16 %v4771_v39, %v4770_v5  ;;  %v5092_v10 = vld [vmem:[#allocation3 + $0x3c] sm:$0x1]  ;;  %v4279_v8 = vor.u32 %v4278_v44, %v4275_v59 }
 0x2cc   : > { %v5241_v24 = vsel %vm11500_vm6, %v5233_v17, %v5240_v2  ;;  %v5543_v61 = vsel %vm12921_vm1, %v5242_v11, %v5542_v15  ;;  %v5181_v3 = vpack.c.bf16 %v5040_v31, %v5040_v31  ;;  %v5647_v48 = vld [vmem:[#allocation3 + $0x18] sm:$0xf]  ;;  %v5093_v6 = vsel %vm12921_vm1, 0, %v5092_v10  ;;  %v4580_v15 = vld [vmem:[#allocation2 + $0xc0] sm:$0xe] }
 0x2cd   : > { %v4937_v16 = vadd.f32 %v13049_v43, %v4539_v40  ;;  %5541 = vst.msk [vmem:[#allocation3 + $0x1c] sm:$0xf] %vm5068_vm7, %v5241_v24  ;;  %v5734_v37 = vrot.slane %v5733_v35, 4  ;;  %v5741_v52 = vshrl.u32 %v5647_v48, 16  ;;  %v6080_v43 = vunpack.c.l.b16 %v5729_v20 }
 0x2ce   : > { %v13208_v57 = vpop.f32.mrf.mxu0  ;;  %5544 = vst [vmem:[#allocation3 + $0x20] sm:$0x1] %v5543_v61  ;;  %v5244_v62 = vshrl.u32 %v5181_v3, 16  ;;  %10650 = vmatmul.msk.bf16.gmra.mxu3 %vm1540_vm14, %v4389_v42  ;;  %v5247_v49 = vshll.u32 %v5181_v3, 16  ;;  %v5744_v59 = vshll.u32 %v5647_v48, 16  ;;  %v4280_v41 = vrot.slane %v4279_v8, 4 }
 0x2cf   : > { %v4973_v17 = vmul.f32 %v13009_v30, %v4937_v16  ;;  %v5739_v5 = vsel %vm11429_vm15, %v5734_v37, %v5738_v21  ;;  %5094 = vst [vmem:[#allocation3 + $0x3c] sm:$0x1] %v5093_v6  ;;  %v5743_v39 = vrot.slane %v5741_v52, 4  ;;  %v4284_v31 = vrot.slane %v4282_v54, 5 }
 0x2d0   : > { %v13219_v51 = vrot.slane %v5244_v62, 7  ;;  %v6081_v11 = vunpack.c.l.b16 %v5739_v5  ;;  %v5746_v20 = vrot.slane %v5744_v59, 5  ;;  %v4286_v40 = vshrl.u32 %v13124_v45, 16  ;;  %v13232_v62 = vld [vmem:[#allocation2 + $0xc4] sm:$0xf] }
 0x2d1   : > { %v5009_v2 = vadd.f32 %v13016_v18, %v4973_v17  ;;  %v4469_v42 = vpop.f32.mrf.mxu3  ;;  %v4292_v35 = vshll.u32 %v13135_v47, 16  ;;  %v10669_v61 = vrot.slane %v4580_v15, 9  ;;  %v4285_v15 = vsel %vm11429_vm15, %v4280_v41, %v4284_v31 }
 0x2d2   : > { %v5249_v44 = vor.u32 %v5247_v49, %v13219_v51  ;;  %v4540_v24 = vadd.f32 %v4469_v42, %v12528_v29  ;;  %v5250_v3 = vrot.slane %v13219_v51, 4  ;;  %v6111_v16 = vpack.c.b16 %v6081_v11, %v6080_v43  ;;  %v5141_v11 = vld [vmem:[#allocation3 + $0x44] sm:$0x1] }
 0x2d3   : > { %v5041_v21 = vmax.f32 %v5009_v2, 0.0  ;;  %v5747_v48 = vor.u32 %v5746_v20, %v5743_v39  ;;  %v4288_v37 = vrot.slane %v4286_v40, 4  ;;  %v4294_v47 = vrot.slane %v4292_v35, 5  ;;  %v5549_v35 = vld [vmem:[#allocation3 + $0x2c] sm:$0x1] }
 0x2d4   : > { %v5546_v10 = vsel %vm13076_vm10, %v5249_v44, %v5545_v34  ;;  %v4938_v54 = vadd.f32 %v13105_v58, %v4540_v24  ;;  %v11150_v45 = vld [vmem:[#allocation3 + $0x18] sm:$0xff]  ;;  %10690 = vmatmul.msk.bf16.gmra.mxu1 %vm6126_vm8, %v6111_v16  ;;  %v4730_v42 = vrot.slane %v13232_v62, 5  ;;  %v13255_v16 = vunpack.c.l.b16 %v4285_v15 }
 0x2d5   : > { %v5182_v52 = vpack.c.bf16 %v5041_v21, %v5041_v21  ;;  %v13230_v8 = vld [vmem:[#allocation3 + $0x1c] sm:$0xf]  ;;  %5547 = vst [vmem:[#allocation3 + $0x24] sm:$0xf] %v5546_v10  ;;  %v13237_v17 = vld [vmem:[#allocation3 + $0x20] sm:$0x1]  ;;  %v4289_v58 = vor.u32 %v4288_v37, %v4284_v31  ;;  %10771 = vmatmul.msk.bf16.gmra.mxu2 %vm6126_vm8, %v11150_v45 }
 0x2d6   : > { %v13235_v29 = vpop.f32.mrf.mxu0  ;;  %v5748_v43 = vrot.slane %v5747_v48, 4  ;;  %v5750_v6 = vshll.u32 %v13230_v8, 16  ;;  %v4974_v39 = vmul.f32 %v13009_v30, %v4938_v54  ;;  %v5754_v59 = vshrl.u32 %v13230_v8, 16  ;;  %v13260_v54 = vld [vmem:[#allocation2 + $0xc8] sm:$0x1] }
 0x2d7   : > { %v5252_v49 = vshrl.u32 %v5182_v52, 16  ;;  %v5255_v5 = vshll.u32 %v5182_v52, 16  ;;  %v5760_v2 = vshll.u32 %v13237_v17, 16  ;;  %v4290_v34 = vrot.slane %v4289_v58, 4 }
 0x2d8   : > { %v5752_v51 = vrot.slane %v5750_v6, 5  ;;  %v5010_v40 = vadd.f32 %v13016_v18, %v4974_v39  ;;  %v5756_v41 = vrot.slane %v5754_v59, 4  ;;  %v5142_v31 = vsel %vm12949_vm3, 0, %v5141_v11  ;;  %v3954_v39 = vld [vmem:[#allocation2 + $0xc0] sm:$0xf] }
 0x2d9   : > { %v5254_v20 = vrot.slane %v5252_v49, 7  ;;  %10685 = vmatmul.msk.bf16.gmra.mxu0 %vm1540_vm14, %v4789_v12  ;;  %v4471_v44 = vpop.f32.mrf.mxu3  ;;  %5143 = vst [vmem:[#allocation3 + $0x44] sm:$0x1] %v5142_v31  ;;  %v4295_v24 = vsel %vm11429_vm15, %v4290_v34, %v4294_v47  ;;  %v4731_v48 = vsel %vm11410_vm12, %v10669_v61, %v4730_v42  ;;  %v5762_v6 = vrot.slane %v5760_v2, 5  ;;  %v5095_v34 = vld [vmem:[#allocation3 + $0x48] sm:$0x1] }
 0x2da   : > { %v5753_v21 = vsel %vm11429_vm15, %v5748_v43, %v5752_v51  ;;  %v5042_v10 = vmax.f32 %v5010_v40, 0.0  ;;  %v4541_v52 = vadd.f32 %v4471_v44, %v12551_v60  ;;  %v5757_v45 = vor.u32 %v5756_v41, %v5752_v51 }
 0x2db   : > { %v5257_v37 = vor.u32 %v5255_v5, %v5254_v20  ;;  %v5259_v12 = vrot.slane %v5254_v20, 4  ;;  %v6082_v58 = vunpack.c.l.b16 %v5753_v21  ;;  %v4732_v43 = vrot.slane %v4730_v42, 4 }
 0x2dc   : > { %v5183_v15 = vpack.c.bf16 %v5042_v10, %v5042_v10  ;;  %v4939_v61 = vadd.f32 %v13138_v32, %v4541_v52  ;;  %v5649_v5 = vld [vmem:[#allocation3 + $0x24] sm:$0xf]  ;;  %v5758_v60 = vrot.slane %v5757_v45, 4  ;;  %v13270_v51 = vunpack.c.l.b16 %v4295_v24 }
 0x2dd   : > { %v5258_v49 = vsel %vm11500_vm6, %v5250_v3, %v5257_v37  ;;  %v5550_v47 = vsel %vm12921_vm1, %v5259_v12, %v5549_v35  ;;  %v4733_v2 = vrot.slane %v13260_v54, 5  ;;  %v4772_v11 = vunpack.c.l.b16 %v4731_v48 }
 0x2de   : > { %5548 = vst.msk [vmem:[#allocation3 + $0x28] sm:$0xf] %vm5068_vm7, %v5258_v49  ;;  %v13268_v59 = vpop.f32.mrf.mxu0  ;;  %v5261_v3 = vshrl.u32 %v5183_v15, 16  ;;  %v5264_v42 = vshll.u32 %v5183_v15, 16  ;;  %v4975_v20 = vmul.f32 %v13009_v30, %v4939_v61  ;;  %10651 = vmatmul.msk.bf16.gmra.mxu3 %vm1540_vm14, %v4390_v4  ;;  %v5096_v32 = vsel %vm12921_vm1, 0, %v5095_v34 }
 0x2df   : > { %5551 = vst [vmem:[#allocation3 + $0x2c] sm:$0x1] %v5550_v47  ;;  %v5763_v40 = vsel %vm11429_vm15, %v5758_v60, %v5762_v6  ;;  %v4734_v41 = vsel %vm11410_vm12, %v4732_v43, %v4733_v2  ;;  %v5765_v31 = vshrl.u32 %v5649_v5, 16  ;;  %v5768_v35 = vshll.u32 %v5649_v5, 16 }
 0x2e0   : > { %5097 = vst [vmem:[#allocation3 + $0x48] sm:$0x1] %v5096_v32  ;;  %v13284_v44 = vrot.slane %v5261_v3, 7  ;;  %v5011_v21 = vadd.f32 %v13016_v18, %v4975_v20  ;;  %v6083_v24 = vunpack.c.l.b16 %v5763_v40  ;;  %v4773_v14 = vunpack.c.l.b16 %v4734_v41 }
 0x2e1   : > { %v4474_v4 = vpop.f32.mrf.mxu3  ;;  %v5767_v48 = vrot.slane %v5765_v31, 4  ;;  %v5770_v37 = vrot.slane %v5768_v35, 5  ;;  %v4297_v12 = vshrl.u32 %v3954_v39, 16  ;;  %v4300_v10 = vshll.u32 %v3954_v39, 16  ;;  %v5144_v35 = vld [vmem:[#allocation3 + $0x50] sm:$0x1] }
 0x2e2   : > { %v5266_v52 = vor.u32 %v5264_v42, %v13284_v44  ;;  %v5267_v45 = vrot.slane %v13284_v44, 4  ;;  %v5043_v6 = vmax.f32 %v5011_v21, 0.0  ;;  %v4542_v43 = vadd.f32 %v4474_v4, %v12569_v33  ;;  %v5556_v21 = vld [vmem:[#allocation3 + $0x38] sm:$0x1] }
 0x2e3   : > { %v6112_v49 = vpack.c.b16 %v6083_v24, %v6082_v58  ;;  %v4790_v47 = vpack.c.b16 %v4773_v14, %v4772_v11  ;;  %v5771_v15 = vor.u32 %v5770_v37, %v5767_v48  ;;  %v4299_v61 = vrot.slane %v4297_v12, 4 }
 0x2e4   : > { %v5553_v5 = vsel %vm13076_vm10, %v5266_v52, %v5552_v50  ;;  %v5184_v60 = vpack.c.bf16 %v5043_v6, %v5043_v6  ;;  %v4940_v2 = vadd.f32 %v13181_v0, %v4542_v43  ;;  %v4302_v39 = vrot.slane %v4300_v10, 5 }
 0x2e5   : > { %v11151_v34 = vld [vmem:[#allocation3 + $0x24] sm:$0xff]  ;;  %v13297_v42 = vadd.f32 %v12586_v23, %v13159_v56  ;;  %5554 = vst [vmem:[#allocation3 + $0x30] sm:$0xf] %v5553_v5  ;;  %10691 = vmatmul.msk.bf16.gmra.mxu1 %vm6126_vm8, %v6112_v49  ;;  %v4391_v58 = vpack.c.b16 %v13270_v51, %v13255_v16  ;;  %v5772_v20 = vrot.slane %v5771_v15, 4  ;;  %v4306_v16 = vshll.u32 %v13232_v62, 16 }
 0x2e6   : > { %v13293_v3 = vld [vmem:[#allocation3 + $0x28] sm:$0xf]  ;;  %v13300_v33 = vpop.f32.mrf.mxu0  ;;  %v13304_v11 = vld [vmem:[#allocation3 + $0x2c] sm:$0x1]  ;;  %v5269_v32 = vshrl.u32 %v5184_v60, 16  ;;  %v5272_v40 = vshll.u32 %v5184_v60, 16  ;;  %v4976_v41 = vmul.f32 %v13009_v30, %v4940_v2  ;;  %10772 = vmatmul.msk.bf16.gmra.mxu2 %vm6126_vm8, %v11151_v34  ;;  %v4303_v44 = vor.u32 %v4302_v39, %v4299_v61 }
 0x2e7   : > { %v5774_v0 = vshll.u32 %v13293_v3, 16  ;;  %v5778_v23 = vshrl.u32 %v13293_v3, 16  ;;  %v5784_v31 = vshll.u32 %v13304_v11, 16  ;;  %v5145_v50 = vsel %vm12949_vm3, 0, %v5144_v35  ;;  %v4581_v60 = vld [vmem:[#allocation2 + $0xcc] sm:$0xe] }
 0x2e8   : > { %v5271_v51 = vrot.slane %v5269_v32, 7  ;;  %v5012_v24 = vadd.f32 %v13016_v18, %v4976_v41  ;;  %5146 = vst [vmem:[#allocation3 + $0x50] sm:$0x1] %v5145_v50  ;;  %v4304_v12 = vrot.slane %v4303_v44, 4  ;;  %v4308_v10 = vrot.slane %v4306_v16, 5 }
 0x2e9   : > { %v5776_v56 = vrot.slane %v5774_v0, 5  ;;  %10686 = vmatmul.msk.bf16.gmra.mxu0 %vm1540_vm14, %v4790_v47  ;;  %v5780_v14 = vrot.slane %v5778_v23, 4  ;;  %v4476_v4 = vpop.f32.mrf.mxu3  ;;  %v5786_v37 = vrot.slane %v5784_v31, 5  ;;  %v4310_v5 = vshrl.u32 %v13232_v62, 16  ;;  %v13327_v0 = vld [vmem:[#allocation2 + $0xd0] sm:$0xf] }
 0x2ea   : > { %v5274_v52 = vor.u32 %v5272_v40, %v5271_v51  ;;  %v5276_v6 = vrot.slane %v5271_v51, 4  ;;  %v5044_v43 = vmax.f32 %v5012_v24, 0.0  ;;  %v4543_v49 = vadd.f32 %v4476_v4, %v13081_v7  ;;  %v13329_v7 = vld [vmem:[#allocation2 + $0xd4] sm:$0x1] }
 0x2eb   : > { %v5777_v48 = vsel %vm11429_vm15, %v5772_v20, %v5776_v56  ;;  %v5781_v15 = vor.u32 %v5780_v14, %v5776_v56  ;;  %v4309_v47 = vsel %vm11429_vm15, %v4304_v12, %v4308_v10  ;;  %v4312_v62 = vrot.slane %v4310_v5, 4  ;;  %v5559_v4 = vld [vmem:[#allocation3 + $0x3c] sm:$0xf] }
 0x2ec   : > { %v6084_v61 = vunpack.c.l.b16 %v5777_v48  ;;  %v5275_v2 = vsel %vm11500_vm6, %v5267_v45, %v5274_v52  ;;  %v5557_v34 = vsel %vm12921_vm1, %v5276_v6, %v5556_v21  ;;  %v5185_v39 = vpack.c.bf16 %v5044_v43, %v5044_v43  ;;  %v5098_v21 = vld [vmem:[#allocation3 + $0x54] sm:$0x1] }
 0x2ed   : > { %v4941_v20 = vadd.f32 %v13208_v57, %v4543_v49  ;;  %5555 = vst.msk [vmem:[#allocation3 + $0x34] sm:$0xf] %vm5068_vm7, %v5275_v2  ;;  %v5782_v32 = vrot.slane %v5781_v15, 4  ;;  %v4316_v41 = vshll.u32 %v13260_v54, 16  ;;  %v13335_v23 = vunpack.c.l.b16 %v4309_v47  ;;  %v5651_v15 = vld [vmem:[#allocation3 + $0x30] sm:$0xf] }
 0x2ee   : > { %v13332_v40 = vpop.f32.mrf.mxu0  ;;  %5558 = vst [vmem:[#allocation3 + $0x38] sm:$0x1] %v5557_v34  ;;  %v5278_v45 = vshrl.u32 %v5185_v39, 16  ;;  %v5281_v56 = vshll.u32 %v5185_v39, 16  ;;  %10652 = vmatmul.msk.bf16.gmra.mxu3 %vm1540_vm14, %v4391_v58  ;;  %v10670_v57 = vrot.slane %v4581_v60, 9  ;;  %v4313_v44 = vor.u32 %v4312_v62, %v4308_v10 }
 0x2ef   : > { %v4977_v31 = vmul.f32 %v13009_v30, %v4941_v20  ;;  %v5787_v35 = vsel %vm11429_vm15, %v5782_v32, %v5786_v37  ;;  %v4318_v16 = vrot.slane %v4316_v41, 5  ;;  %v4737_v51 = vrot.slane %v13327_v0, 5 }
 0x2f0   : > { %v13342_v24 = vrot.slane %v5278_v45, 7  ;;  %v6085_v14 = vunpack.c.l.b16 %v5787_v35  ;;  %v4740_v50 = vrot.slane %v13329_v7, 5  ;;  %v4314_v12 = vrot.slane %v4313_v44, 4 }
 0x2f1   : > { %v5013_v54 = vadd.f32 %v13016_v18, %v4977_v31  ;;  %v4479_v48 = vpop.f32.mrf.mxu3  ;;  %v4738_v58 = vsel %vm11410_vm12, %v10670_v57, %v4737_v51  ;;  %v4739_v52 = vrot.slane %v4737_v51, 4  ;;  %v5099_v37 = vsel %vm12921_vm1, 0, %v5098_v21 }
 0x2f2   : > { %v5283_v10 = vor.u32 %v5281_v56, %v13342_v24  ;;  %v5284_v6 = vrot.slane %v13342_v24, 4  ;;  %v4544_v49 = vadd.f32 %v4479_v48, %v12604_v63  ;;  %5100 = vst [vmem:[#allocation3 + $0x54] sm:$0x1] %v5099_v37  ;;  %v6113_v47 = vpack.c.b16 %v6085_v14, %v6084_v61 }
 0x2f3   : > { %v5045_v43 = vmax.f32 %v5013_v54, 0.0  ;;  %v4319_v5 = vsel %vm11429_vm15, %v4314_v12, %v4318_v16  ;;  %v4741_v60 = vsel %vm11410_vm12, %v4739_v52, %v4740_v50  ;;  %v4774_v2 = vunpack.c.l.b16 %v4738_v58  ;;  %v5563_v12 = vld [vmem:[#allocation3 + $0x44] sm:$0x1] }
 0x2f4   : > { %v5560_v34 = vsel %vm13076_vm10, %v5283_v10, %v5559_v4  ;;  %v4942_v20 = vadd.f32 %v13235_v29, %v4544_v49  ;;  %v11152_v32 = vld [vmem:[#allocation3 + $0x30] sm:$0xff]  ;;  %v4375_v62 = vunpack.c.l.b16 %v4319_v5  ;;  %v13364_v63 = vadd.f32 %v12618_v26, %v12678_v25  ;;  %v5147_v26 = vld [vmem:[#allocation3 + $0x5c] sm:$0x1] }
 0x2f5   : > { %v5186_v39 = vpack.c.bf16 %v5045_v43, %v5045_v43  ;;  %v13360_v41 = vld [vmem:[#allocation3 + $0x34] sm:$0xf]  ;;  %5561 = vst [vmem:[#allocation3 + $0x3c] sm:$0xf] %v5560_v34  ;;  %10692 = vmatmul.msk.bf16.gmra.mxu1 %vm6126_vm8, %v6113_v47  ;;  %v4775_v45 = vunpack.c.l.b16 %v4741_v60  ;;  %v13369_v56 = vld [vmem:[#allocation3 + $0x38] sm:$0x1] }
 0x2f6   : > { %v13367_v61 = vpop.f32.mrf.mxu0  ;;  %v5789_v31 = vshrl.u32 %v5651_v15, 16  ;;  %v5792_v57 = vshll.u32 %v5651_v15, 16  ;;  %v4978_v44 = vmul.f32 %v13009_v30, %v4942_v20  ;;  %10773 = vmatmul.msk.bf16.gmra.mxu2 %vm6126_vm8, %v11152_v32  ;;  %v4392_v16 = vpack.c.b16 %v4375_v62, %v13335_v23  ;;  %v3957_v25 = vld [vmem:[#allocation2 + $0xcc] sm:$0xf] }
 0x2f7   : > { %v5286_v35 = vshrl.u32 %v5186_v39, 16  ;;  %v5289_v29 = vshll.u32 %v5186_v39, 16  ;;  %v4791_v51 = vpack.c.b16 %v4775_v45, %v4774_v2  ;;  %v5798_v54 = vshll.u32 %v13360_v41, 16 }
 0x2f8   : > { %v5791_v21 = vrot.slane %v5789_v31, 4  ;;  %v5794_v24 = vrot.slane %v5792_v57, 5  ;;  %v5014_v50 = vadd.f32 %v13016_v18, %v4978_v44  ;;  %v5802_v4 = vshrl.u32 %v13360_v41, 16 }
 0x2f9   : > { %v5288_v14 = vrot.slane %v5286_v35, 7  ;;  %v5808_v48 = vshll.u32 %v13369_v56, 16  ;;  %v4481_v58 = vpop.f32.mrf.mxu3  ;;  %10687 = vmatmul.msk.bf16.gmra.mxu0 %vm1540_vm14, %v4791_v51  ;;  %v5800_v23 = vrot.slane %v5798_v54, 5  ;;  %v5148_v37 = vsel %vm12949_vm3, 0, %v5147_v26  ;;  %v5101_v51 = vld [vmem:[#allocation3 + $0x60] sm:$0x1] }
 0x2fa   : > { %v5795_v52 = vor.u32 %v5794_v24, %v5791_v21  ;;  %v4321_v10 = vshrl.u32 %v3957_v25, 16  ;;  %v5046_v15 = vmax.f32 %v5014_v50, 0.0  ;;  %v4545_v47 = vadd.f32 %v4481_v58, %v13155_v1  ;;  %5149 = vst [vmem:[#allocation3 + $0x5c] sm:$0x1] %v5148_v37 }
 0x2fb   : > { %v5291_v43 = vor.u32 %v5289_v29, %v5288_v14  ;;  %v5293_v49 = vrot.slane %v5288_v14, 4  ;;  %v5804_v60 = vrot.slane %v5802_v4, 4  ;;  %v5810_v2 = vrot.slane %v5808_v48, 5 }
 0x2fc   : > { %v5796_v5 = vrot.slane %v5795_v52, 4  ;;  %v4323_v34 = vrot.slane %v4321_v10, 4  ;;  %v5187_v32 = vpack.c.bf16 %v5046_v15, %v5046_v15  ;;  %v4943_v62 = vadd.f32 %v13268_v59, %v4545_v47  ;;  %v5653_v29 = vld [vmem:[#allocation3 + $0x3c] sm:$0xf] }
 0x2fd   : > { %v5292_v39 = vsel %vm11500_vm6, %v5284_v6, %v5291_v43  ;;  %v5564_v20 = vsel %vm12921_vm1, %v5293_v49, %v5563_v12  ;;  %v5805_v1 = vor.u32 %v5804_v60, %v5800_v23  ;;  %v4324_v57 = vshll.u32 %v3957_v25, 16  ;;  %v5566_v12 = vld [vmem:[#allocation3 + $0x48] sm:$0xf] }
 0x2fe   : > { %5562 = vst.msk [vmem:[#allocation3 + $0x40] sm:$0xf] %vm5068_vm7, %v5292_v39  ;;  %v5801_v45 = vsel %vm11429_vm15, %v5796_v5, %v5800_v23  ;;  %v13390_v31 = vpop.f32.mrf.mxu0  ;;  %v4330_v35 = vshll.u32 %v13327_v0, 16  ;;  %v5295_v6 = vshrl.u32 %v5187_v32, 16  ;;  %v5298_v44 = vshll.u32 %v5187_v32, 16  ;;  %10653 = vmatmul.msk.bf16.gmra.mxu3 %vm1540_vm14, %v4392_v16 }
 0x2ff   : > { %5565 = vst [vmem:[#allocation3 + $0x44] sm:$0x1] %v5564_v20  ;;  %v4979_v26 = vmul.f32 %v13009_v30, %v4943_v62  ;;  %v6086_v59 = vunpack.c.l.b16 %v5801_v45  ;;  %v5806_v21 = vrot.slane %v5805_v1, 4  ;;  %v4326_v24 = vrot.slane %v4324_v57, 5 }
 0x300   : > { %v4332_v54 = vrot.slane %v4330_v35, 5  ;;  %v4334_v14 = vshrl.u32 %v13327_v0, 16  ;;  %v13396_v50 = vrot.slane %v5295_v6, 7  ;;  %v4340_v4 = vshll.u32 %v13329_v7, 16 }
 0x301   : > { %v5015_v25 = vadd.f32 %v13016_v18, %v4979_v26  ;;  %v5102_v48 = vsel %vm12921_vm1, 0, %v5101_v51  ;;  %v4484_v30 = vpop.f32.mrf.mxu3  ;;  %v5811_v16 = vsel %vm11429_vm15, %v5806_v21, %v5810_v2  ;;  %v4327_v58 = vor.u32 %v4326_v24, %v4323_v34  ;;  %v5150_v26 = vld [vmem:[#allocation3 + $0x68] sm:$0x1]  ;;  %v11164_v51 = vld [vmem:[#allocation3 + $0xc] sm:$0xff] }
 0x302   : > { %v4336_v52 = vrot.slane %v4334_v14, 4  ;;  %5103 = vst [vmem:[#allocation3 + $0x60] sm:$0x1] %v5102_v48  ;;  %v5813_v23 = vshrl.u32 %v5653_v29, 16  ;;  %v5300_v0 = vor.u32 %v5298_v44, %v13396_v50  ;;  %v5301_v37 = vrot.slane %v13396_v50, 4 }
 0x303   : > { %v5047_v10 = vmax.f32 %v5015_v25, 0.0  ;;  %v4546_v18 = vadd.f32 %v4484_v30, %v12633_v53  ;;  %v6087_v7 = vunpack.c.l.b16 %v5811_v16  ;;  %v4328_v43 = vrot.slane %v4327_v58, 4  ;;  %v13433_v14 = vld [vmem:[%s15788_s5] ss:$0 sm:$0xff]  ;;  %v5570_v48 = vld [vmem:[#allocation3 + $0x50] sm:$0x1] }
 0x304   : > { %v4337_v49 = vor.u32 %v4336_v52, %v4332_v54  ;;  %v4342_v15 = vrot.slane %v4340_v4, 5  ;;  %v5567_v47 = vsel %vm13076_vm10, %v5300_v0, %v5566_v12  ;;  %v5815_v39 = vrot.slane %v5813_v23, 4 }
 0x305   : > { %v5188_v5 = vpack.c.bf16 %v5047_v10, %v5047_v10  ;;  %v4944_v60 = vadd.f32 %v13300_v33, %v4546_v18  ;;  %v11153_v2 = vld [vmem:[#allocation3 + $0x3c] sm:$0xff]  ;;  %5568 = vst [vmem:[#allocation3 + $0x48] sm:$0xf] %v5567_v47  ;;  %v6114_v20 = vpack.c.b16 %v6087_v7, %v6086_v59  ;;  %v4333_v53 = vsel %vm11429_vm15, %v4328_v43, %v4332_v54  ;;  %v13421_v33 = vld [vmem:[%s15787_s4] ss:$0 sm:$0xff] }
 0x306   : > { %v13410_v34 = vld [vmem:[#allocation3 + $0x40] sm:$0xf]  ;;  %v13412_v32 = vpop.f32.mrf.mxu0  ;;  %v4338_v62 = vrot.slane %v4337_v49, 4  ;;  %v13416_v45 = vld [vmem:[#allocation3 + $0x44] sm:$0x1]  ;;  %v5816_v1 = vshll.u32 %v5653_v29, 16  ;;  %10774 = vmatmul.msk.bf16.gmra.mxu2 %vm6126_vm8, %v11153_v2  ;;  %v4376_v44 = vunpack.c.l.b16 %v4333_v53 }
 0x307   : > { %v5303_v57 = vshrl.u32 %v5188_v5, 16  ;;  %v5306_v35 = vshll.u32 %v5188_v5, 16  ;;  %v4980_v6 = vmul.f32 %v13421_v33, %v4944_v60  ;;  %10693 = vmatmul.msk.bf16.gmra.mxu1 %vm6126_vm8, %v6114_v20  ;;  %v5822_v21 = vshll.u32 %v13410_v34, 16  ;;  %v6488_v7 = vld [vmem:[#allocation3] sm:$0xe] }
 0x308   : > { %v4343_v59 = vsel %vm11429_vm15, %v4338_v62, %v4342_v15  ;;  %v5818_v29 = vrot.slane %v5816_v1, 5  ;;  %v5826_v24 = vshrl.u32 %v13410_v34, 16  ;;  %v5832_v4 = vshll.u32 %v13416_v45, 16  ;;  %v11304_v1 = vld [vmem:[#allocation3 + $0x4] sm:$0xf] }
 0x309   : > { %v5305_v54 = vrot.slane %v5303_v57, 7  ;;  %v5016_v50 = vadd.f32 %v13433_v14, %v4980_v6  ;;  %v4377_v25 = vunpack.c.l.b16 %v4343_v59  ;;  %v4486_v12 = vpop.f32.mrf.mxu3  ;;  %10883 = vmatmul.msk.bf16.vlgmr.msrb.gmra.mxu0 %vm6126_vm8, %v11164_v51  ;;  %v5824_v16 = vrot.slane %v5822_v21, 5  ;;  %v11305_v21 = vld [vmem:[#allocation3 + $0x8] sm:$0x1] }
 0x30a   : > { %v5819_v30 = vor.u32 %v5818_v29, %v5815_v39  ;;  %v5828_v58 = vrot.slane %v5826_v24, 4  ;;  %v5151_v52 = vsel %vm12949_vm3, 0, %v5150_v26  ;;  %v4547_v18 = vadd.f32 %v4486_v12, %v13297_v42  ;;  %v5104_v26 = vld [vmem:[#allocation3 + $0x6c] sm:$0x1] }
 0x30b   : > { %v5308_v23 = vor.u32 %v5306_v35, %v5305_v54  ;;  %v5310_v0 = vrot.slane %v5305_v54, 4  ;;  %v5048_v10 = vmax.f32 %v5016_v50, 0.0  ;;  %5152 = vst [vmem:[#allocation3 + $0x68] sm:$0x1] %v5151_v52  ;;  %v4393_v43 = vpack.c.b16 %v4377_v25, %v4376_v44  ;;  %v15877_v35 = vld [vmem:[#allocation4_spill] sm:$0xff] }
 0x30c   : > { %v5820_v49 = vrot.slane %v5819_v30, 4  ;;  %v5829_v15 = vor.u32 %v5828_v58, %v5824_v16  ;;  %v4945_v2 = vadd.f32 %v13332_v40, %v4547_v18  ;;  %v5655_v39 = vld [vmem:[#allocation3 + $0x48] sm:$0xf]  ;;  %v5834_v53 = vrot.slane %v5832_v4, 5  ;;  %v5573_v4 = vld [vmem:[#allocation3 + $0x54] sm:$0xf] }
 0x30d   : > { %v5309_v47 = vsel %vm11500_vm6, %v5301_v37, %v5308_v23  ;;  %v5571_v5 = vsel %vm12921_vm1, %v5310_v0, %v5570_v48  ;;  %v5189_v60 = vpack.c.bf16 %v5048_v10, %v5048_v10  ;;  %v10785_v62 = vrot.slane %v6488_v7, 9  ;;  %v15878_v0 = vld [vmem:[#allocation7_spill] sm:$0xff] }
 0x30e   : > { %5569 = vst.msk [vmem:[#allocation3 + $0x4c] sm:$0xf] %vm5068_vm7, %v5309_v47  ;;  %v5830_v20 = vrot.slane %v5829_v15, 4  ;;  %v13447_v42 = vpop.f32.mrf.mxu0  ;;  %v6538_v57 = vrot.slane %v11304_v1, 5  ;;  %v13451_v6 = vadd.f32 %v15877_v35, %v13364_v63  ;;  %v4981_v44 = vmul.f32 %v13421_v33, %v4945_v2  ;;  %10654 = vmatmul.msk.bf16.gmra.mxu3 %vm1540_vm14, %v4393_v43  ;;  %v6489_v47 = vld [vmem:[#allocation3 + $0xc] sm:$0xe] }
 0x30f   : > { %5572 = vst [vmem:[#allocation3 + $0x50] sm:$0x1] %v5571_v5  ;;  %v5312_v37 = vshrl.u32 %v5189_v60, 16  ;;  %v5825_v40 = vsel %vm11429_vm15, %v5820_v49, %v5824_v16  ;;  %v5315_v59 = vshll.u32 %v5189_v60, 16  ;;  %v6541_v24 = vrot.slane %v11305_v21, 5 }
 0x310   : > { %v5835_v51 = vsel %vm11429_vm15, %v5830_v20, %v5834_v53  ;;  %v6540_v29 = vrot.slane %v6538_v57, 4  ;;  %v5017_v63 = vadd.f32 %v13433_v14, %v4981_v44  ;;  %v6539_v25 = vsel %vm11410_vm12, %v10785_v62, %v6538_v57 }
 0x311   : > { %v13459_v54 = vrot.slane %v5312_v37, 7  ;;  %v6089_v50 = vunpack.c.l.b16 %v5835_v51  ;;  %v4489_v48 = vpop.f32.mrf.mxu3  ;;  %v6088_v12 = vunpack.c.l.b16 %v5825_v40  ;;  %v5105_v30 = vsel %vm12921_vm1, 0, %v5104_v26  ;;  %v15879_v40 = vld [vmem:[#allocation5_spill] sm:$0xff] }
 0x312   : > { %v5837_v16 = vshrl.u32 %v5655_v39, 16  ;;  %v5840_v58 = vshll.u32 %v5655_v39, 16  ;;  %v5049_v23 = vmax.f32 %v5017_v63, 0.0  ;;  %v4548_v10 = vadd.f32 %v4489_v48, %v15878_v0  ;;  %5106 = vst [vmem:[#allocation3 + $0x6c] sm:$0x1] %v5105_v30 }
 0x313   : > { %v5317_v52 = vor.u32 %v5315_v59, %v13459_v54  ;;  %v6542_v18 = vsel %vm11410_vm12, %v6540_v29, %v6541_v24  ;;  %v6115_v7 = vpack.c.b16 %v6089_v50, %v6088_v12  ;;  %v6650_v43 = vunpack.c.l.b16 %v6539_v25  ;;  %v11165_v29 = vld [vmem:[#allocation3 + $0x18] sm:$0xff] }
 0x314   : > { %v5839_v49 = vrot.slane %v5837_v16, 4  ;;  %v5842_v15 = vrot.slane %v5840_v58, 5  ;;  %v5190_v60 = vpack.c.bf16 %v5049_v23, %v5049_v23  ;;  %v4946_v2 = vadd.f32 %v13367_v61, %v4548_v10  ;;  %v5577_v12 = vld [vmem:[#allocation3 + $0x5c] sm:$0x1] }
 0x315   : > { %v5574_v5 = vsel %vm13076_vm10, %v5317_v52, %v5573_v4  ;;  %v11154_v39 = vld [vmem:[#allocation3 + $0x48] sm:$0xff]  ;;  %v6545_v53 = vrot.slane %v13178_v22, 5  ;;  %v6651_v1 = vunpack.c.l.b16 %v6542_v18  ;;  %v3610_v26 = vadd.f32 %v15879_v40, %v12717_v38  ;;  %v5153_v22 = vld [vmem:[#allocation3 + $0x74] sm:$0x1] }
 0x316   : > { %v13473_v20 = vld [vmem:[#allocation3 + $0x4c] sm:$0xf]  ;;  %5575 = vst [vmem:[#allocation3 + $0x54] sm:$0xf] %v5574_v5  ;;  %v13476_v62 = vpop.f32.mrf.mxu0  ;;  %v13478_v57 = vld [vmem:[#allocation3 + $0x50] sm:$0x1]  ;;  %v5843_v35 = vor.u32 %v5842_v15, %v5839_v49  ;;  %v4982_v59 = vmul.f32 %v13421_v33, %v4946_v2  ;;  %10775 = vmatmul.msk.bf16.gmra.mxu2 %vm6126_vm8, %v11154_v39 }
 0x317   : > { %v5846_v37 = vshll.u32 %v13473_v20, 16  ;;  %v5850_v44 = vshrl.u32 %v13473_v20, 16  ;;  %v5320_v61 = vshrl.u32 %v5190_v60, 16  ;;  %v10786_v51 = vrot.slane %v6489_v47, 9  ;;  %10694 = vmatmul.msk.bf16.gmra.mxu1 %vm6126_vm8, %v6115_v7 }
 0x318   : > { %v5856_v63 = vshll.u32 %v13478_v57, 16  ;;  %v5154_v50 = vsel %vm12949_vm3, 0, %v5153_v22  ;;  %v5318_v25 = vrot.slane %v13459_v54, 4  ;;  %v5323_v4 = vshll.u32 %v5190_v60, 16 }
 0x319   : > { %v5848_v21 = vrot.slane %v5846_v37, 5  ;;  %v5852_v24 = vrot.slane %v5850_v44, 4  ;;  %v5322_v38 = vrot.slane %v5320_v61, 7  ;;  %v5018_v48 = vadd.f32 %v13433_v14, %v4982_v59  ;;  %5155 = vst [vmem:[#allocation3 + $0x74] sm:$0x1] %v5154_v50  ;;  %v4491_v30 = vpop.f32.mrf.mxu3  ;;  %10884 = vmatmul.msk.bf16.gmra.mxu0 %vm6126_vm8, %v11165_v29  ;;  %v15880_v59 = vld [vmem:[#allocation6_spill] sm:$0xff] }
 0x31a   : > { %v6682_v16 = vpack.c.b16 %v6651_v1, %v6650_v43  ;;  %v5844_v58 = vrot.slane %v5843_v35, 4  ;;  %v6547_v23 = vrot.slane %v6545_v53, 4  ;;  %v4549_v7 = vadd.f32 %v4491_v30, %v13451_v6  ;;  %v5107_v61 = vld [vmem:[#allocation3 + $0x78] sm:$0x1]  ;;  %v15881_v29 = vld [vmem:[#allocation23_spill] sm:$0xff] }
 0x31b   : > { %v5853_v52 = vor.u32 %v5852_v24, %v5848_v21  ;;  %v5325_v0 = vor.u32 %v5323_v4, %v5322_v38  ;;  %v5327_v10 = vrot.slane %v5322_v38, 4  ;;  %v5050_v18 = vmax.f32 %v5018_v48, 0.0  ;;  %v5580_v48 = vld [vmem:[#allocation3 + $0x60] sm:$0xf] }
 0x31c   : > { %v5849_v54 = vsel %vm11429_vm15, %v5844_v58, %v5848_v21  ;;  %v5858_v15 = vrot.slane %v5856_v63, 5  ;;  %v6548_v47 = vrot.slane %v13183_v55, 5  ;;  %v4947_v2 = vadd.f32 %v13390_v31, %v4549_v7  ;;  %v6490_v55 = vld [vmem:[#allocation3 + $0x18] sm:$0xe] }
 0x31d   : > { %v5854_v49 = vrot.slane %v5853_v52, 4  ;;  %v5326_v43 = vsel %vm11500_vm6, %v5318_v25, %v5325_v0  ;;  %v5578_v5 = vsel %vm12921_vm1, %v5327_v10, %v5577_v12  ;;  %v5191_v60 = vpack.c.bf16 %v5050_v18, %v5050_v18  ;;  %v15882_v21 = vld [vmem:[#allocation8_spill] sm:$0xff]  ;;  %v15883_v10 = vld [vmem:[#allocation10_spill] sm:$0xff] }
 0x31e   : > { %5576 = vst.msk [vmem:[#allocation3 + $0x58] sm:$0xf] %vm5068_vm7, %v5326_v43  ;;  %v13505_v39 = vpop.f32.mrf.mxu0  ;;  %v6546_v1 = vsel %vm11410_vm12, %v10786_v51, %v6545_v53  ;;  %v6552_v35 = vrot.slane %v13230_v8, 5  ;;  %v4983_v44 = vmul.f32 %v13421_v33, %v4947_v2  ;;  %10802 = vmatmul.msk.bf16.vlgmr.msrb.gmra.mxu3 %vm6126_vm8, %v6682_v16  ;;  %v6549_v40 = vsel %vm11410_vm12, %v6547_v23, %v6548_v47  ;;  %v13521_v51 = vpop.f32.mrf.mxu1 }
 0x31f   : > { %v5859_v6 = vsel %vm11429_vm15, %v5854_v49, %v5858_v15  ;;  %5579 = vst [vmem:[#allocation3 + $0x5c] sm:$0x1] %v5578_v5  ;;  %v5329_v37 = vshrl.u32 %v5191_v60, 16  ;;  %v13515_v22 = vadd.f32 %v15880_v59, %v3610_v26  ;;  %v13519_v53 = vadd.f32 %v15882_v21, %v15881_v29  ;;  %v13523_v8 = vpop.f32.mrf.mxu2  ;;  %v6491_v26 = vld [vmem:[#allocation3 + $0x24] sm:$0xe] }
 0x320   : > { %v6091_v31 = vunpack.c.l.b16 %v5859_v6  ;;  %v6090_v24 = vunpack.c.l.b16 %v5849_v54  ;;  %v5108_v63 = vsel %vm12921_vm1, 0, %v5107_v61  ;;  %v5332_v25 = vshll.u32 %v5191_v60, 16 }
 0x321   : > { %v13527_v50 = vrot.slane %v5329_v37, 7  ;;  %v5019_v38 = vadd.f32 %v13433_v14, %v4983_v44  ;;  %v6652_v4 = vunpack.c.l.b16 %v6546_v1  ;;  %5109 = vst [vmem:[#allocation3 + $0x78] sm:$0x1] %v5108_v63  ;;  %v4494_v12 = vpop.f32.mrf.mxu3  ;;  %v6653_v30 = vunpack.c.l.b16 %v6549_v40 }
 0x322   : > { %v10787_v16 = vrot.slane %v6490_v55, 9  ;;  %v6554_v58 = vrot.slane %v6552_v35, 4  ;;  %v6559_v52 = vrot.slane %v13293_v3, 5  ;;  %v4550_v18 = vadd.f32 %v4494_v12, %v15883_v10  ;;  %v5657_v55 = vld [vmem:[#allocation3 + $0x54] sm:$0xf] }
 0x323   : > { %v5334_v23 = vor.u32 %v5332_v25, %v13527_v50  ;;  %v5051_v0 = vmax.f32 %v5019_v38, 0.0  ;;  %v6116_v7 = vpack.c.b16 %v6091_v31, %v6090_v24  ;;  %v6555_v54 = vrot.slane %v13237_v17, 5  ;;  %v5156_v12 = vld [vmem:[#allocation3 + $0x80] sm:$0x1] }
 0x324   : > { %v10788_v49 = vrot.slane %v6491_v26, 9  ;;  %v6561_v15 = vrot.slane %v6559_v52, 4  ;;  %v6562_v47 = vrot.slane %v13304_v11, 5  ;;  %v5335_v43 = vrot.slane %v13527_v50, 4 }
 0x325   : > { %v5581_v5 = vsel %vm13076_vm10, %v5334_v23, %v5580_v48  ;;  %v5192_v60 = vpack.c.bf16 %v5051_v0, %v5051_v0  ;;  %v4948_v3 = vadd.f32 %v13412_v32, %v4550_v18  ;;  %v11155_v2 = vld [vmem:[#allocation3 + $0x54] sm:$0xff]  ;;  %v6683_v1 = vpack.c.b16 %v6653_v30, %v6652_v4  ;;  %v5584_v30 = vld [vmem:[#allocation3 + $0x68] sm:$0x1] }
 0x326   : > { %5582 = vst [vmem:[#allocation3 + $0x60] sm:$0xf] %v5581_v5  ;;  %v13539_v6 = vpop.f32.mrf.mxu0  ;;  %v13541_v37 = vld [vmem:[#allocation3 + $0x58] sm:$0xf]  ;;  %v13545_v17 = vsel %vm11410_vm12, %v10787_v16, %v6552_v35  ;;  %v13549_v11 = vsel %vm11410_vm12, %v6554_v58, %v6555_v54  ;;  %v13553_v44 = vsel %vm11410_vm12, %v6561_v15, %v6562_v47  ;;  %10776 = vmatmul.msk.bf16.gmra.mxu2 %vm6126_vm8, %v11155_v2  ;;  %v13557_v61 = vld [vmem:[#allocation3 + $0x5c] sm:$0x1]  ;;  %v6188_v50 = vpop.f32.mrf.mxu1 }
 0x327   : > { %v5337_v32 = vshrl.u32 %v5192_v60, 16  ;;  %v5340_v31 = vshll.u32 %v5192_v60, 16  ;;  %v4984_v40 = vmul.f32 %v13421_v33, %v4948_v3  ;;  %v5861_v59 = vshrl.u32 %v5657_v55, 16  ;;  %10695 = vmatmul.msk.bf16.gmra.mxu1 %vm6126_vm8, %v6116_v7  ;;  %v11166_v35 = vld [vmem:[#allocation3 + $0x24] sm:$0xff]  ;;  %v6408_v25 = vpop.f32.mrf.mxu2  ;;  %v6492_v2 = vld [vmem:[#allocation3 + $0x30] sm:$0xe] }
 0x328   : > { %v5864_v29 = vshll.u32 %v5657_v55, 16  ;;  %v5870_v21 = vshll.u32 %v13541_v37, 16  ;;  %v5874_v24 = vshrl.u32 %v13541_v37, 16  ;;  %v5880_v63 = vshll.u32 %v13557_v61, 16 }
 0x329   : > { %v5339_v38 = vrot.slane %v5337_v32, 7  ;;  %v5020_v4 = vadd.f32 %v13433_v14, %v4984_v40  ;;  %v5863_v26 = vrot.slane %v5861_v59, 4  ;;  %v13564_v48 = vadd.f32 %v6408_v25, %v6188_v50  ;;  %v4496_v16 = vpop.f32.mrf.mxu3  ;;  %10885 = vmatmul.msk.bf16.gmra.mxu0 %vm6126_vm8, %v11166_v35 }
 0x32a   : > { %v5866_v58 = vrot.slane %v5864_v29, 5  ;;  %v5872_v23 = vrot.slane %v5870_v21, 5  ;;  %v5876_v0 = vrot.slane %v5874_v24, 4  ;;  %v6560_v10 = vsel %vm11410_vm12, %v10788_v49, %v6559_v52 }
 0x32b   : > { %v5342_v18 = vor.u32 %v5340_v31, %v5339_v38  ;;  %v5344_v7 = vrot.slane %v5339_v38, 4  ;;  %v5052_v54 = vmax.f32 %v5020_v4, 0.0  ;;  %v4551_v15 = vadd.f32 %v4496_v16, %v13515_v22 }
 0x32c   : > { %v5867_v47 = vor.u32 %v5866_v58, %v5863_v26  ;;  %v5877_v5 = vor.u32 %v5876_v0, %v5872_v23  ;;  %v5882_v60 = vrot.slane %v5880_v63, 5  ;;  %v5157_v3 = vsel %vm12949_vm3, 0, %v5156_v12 }
 0x32d   : > { %v5343_v55 = vsel %vm11500_vm6, %v5335_v43, %v5342_v18  ;;  %v5585_v32 = vsel %vm12921_vm1, %v5344_v7, %v5584_v30  ;;  %v5193_v40 = vpack.c.bf16 %v5052_v54, %v5052_v54  ;;  %v4949_v52 = vadd.f32 %v13447_v42, %v4551_v15  ;;  %5158 = vst [vmem:[#allocation3 + $0x80] sm:$0x1] %v5157_v3  ;;  %v5110_v42 = vld [vmem:[#allocation3 + $0x84] sm:$0x1]  ;;  %v15884_v18 = vld [vmem:[#allocation11_spill] sm:$0xff] }
 0x32e   : > { %5583 = vst.msk [vmem:[#allocation3 + $0x64] sm:$0xf] %vm5068_vm7, %v5343_v55  ;;  %v5868_v22 = vrot.slane %v5867_v47, 4  ;;  %v5878_v49 = vrot.slane %v5877_v5, 4  ;;  %v13578_v31 = vpop.f32.mrf.mxu0  ;;  %v6657_v59 = vunpack.c.l.b16 %v13553_v44  ;;  %v6566_v35 = vrot.slane %v13360_v41, 5  ;;  %10803 = vmatmul.msk.bf16.gmra.mxu3 %vm6126_vm8, %v6683_v1 }
 0x32f   : > { %5586 = vst [vmem:[#allocation3 + $0x68] sm:$0x1] %v5585_v32  ;;  %v5346_v29 = vshrl.u32 %v5193_v40, 16  ;;  %v4985_v43 = vmul.f32 %v13421_v33, %v4949_v52  ;;  %v6655_v21 = vunpack.c.l.b16 %v13549_v11  ;;  %v10789_v24 = vrot.slane %v6492_v2, 9  ;;  %v5587_v11 = vld [vmem:[#allocation3 + $0x6c] sm:$0xf] }
 0x330   : > { %v5873_v63 = vsel %vm11429_vm15, %v5868_v22, %v5872_v23  ;;  %v5883_v50 = vsel %vm11429_vm15, %v5878_v49, %v5882_v60  ;;  %v5111_v44 = vsel %vm12921_vm1, 0, %v5110_v42  ;;  %v6656_v41 = vunpack.c.l.b16 %v6560_v10  ;;  %v13605_v60 = vld [vmem:[#allocation3 + $0x3c] sm:$0xe]  ;;  %v5659_v49 = vld [vmem:[#allocation3 + $0x60] sm:$0xf] }
 0x331   : > { %v13591_v25 = vrot.slane %v5346_v29, 7  ;;  %v5349_v38 = vshll.u32 %v5193_v40, 16  ;;  %v5021_v4 = vadd.f32 %v13433_v14, %v4985_v43  ;;  %v6093_v1 = vunpack.c.l.b16 %v5883_v50  ;;  %5112 = vst [vmem:[#allocation3 + $0x84] sm:$0x1] %v5111_v44  ;;  %v4499_v26 = vpop.f32.mrf.mxu3  ;;  %v15885_v40 = vld [vmem:[#allocation9_spill] sm:$0xff] }
 0x332   : > { %v6092_v12 = vunpack.c.l.b16 %v5873_v63  ;;  %v13594_v30 = vpack.c.b16 %v6657_v59, %v6656_v41  ;;  %v6568_v16 = vrot.slane %v6566_v35, 4  ;;  %v6569_v58 = vrot.slane %v13369_v56, 5 }
 0x333   : > { %v5351_v23 = vor.u32 %v5349_v38, %v13591_v25  ;;  %v5053_v0 = vmax.f32 %v5021_v4, 0.0  ;;  %v4552_v10 = vadd.f32 %v4499_v26, %v15884_v18  ;;  %v6567_v7 = vsel %vm11410_vm12, %v10789_v24, %v6566_v35  ;;  %v5159_v4 = vld [vmem:[#allocation3 + $0x8c] sm:$0x1] }
 0x334   : > { %v5352_v54 = vrot.slane %v13591_v25, 4  ;;  %v6117_v15 = vpack.c.b16 %v6093_v1, %v6092_v12  ;;  %v6654_v47 = vunpack.c.l.b16 %v13545_v17  ;;  %v6570_v5 = vsel %vm11410_vm12, %v6568_v16, %v6569_v58 }
 0x335   : > { %v5588_v56 = vsel %vm13076_vm10, %v5351_v23, %v5587_v11  ;;  %v5194_v3 = vpack.c.bf16 %v5053_v0, %v5053_v0  ;;  %v4950_v2 = vadd.f32 %v13476_v62, %v4552_v10  ;;  %v11156_v55 = vld [vmem:[#allocation3 + $0x60] sm:$0xff]  ;;  %v6659_v32 = vunpack.c.l.b16 %v6570_v5  ;;  %v5591_v11 = vld [vmem:[#allocation3 + $0x74] sm:$0x1] }
 0x336   : > { %v3899_v52 = vadd.f32 %v15885_v40, %v13519_v53  ;;  %5589 = vst [vmem:[#allocation3 + $0x6c] sm:$0xf] %v5588_v56  ;;  %v13612_v22 = vpop.f32.mrf.mxu0  ;;  %v6684_v17 = vpack.c.b16 %v6655_v21, %v6654_v47  ;;  %v13614_v59 = vld [vmem:[#allocation3 + $0x64] sm:$0xf]  ;;  %v6658_v35 = vunpack.c.l.b16 %v6567_v7  ;;  %10777 = vmatmul.msk.bf16.gmra.mxu2 %vm6126_vm8, %v11156_v55  ;;  %v13618_v42 = vld [vmem:[#allocation3 + $0x68] sm:$0x1] }
 0x337   : > { %v5354_v29 = vshrl.u32 %v5194_v3, 16  ;;  %v4986_v43 = vmul.f32 %v13421_v33, %v4950_v2  ;;  %v5885_v62 = vshrl.u32 %v5659_v49, 16  ;;  %v10790_v24 = vrot.slane %v13605_v60, 9  ;;  %10696 = vmatmul.msk.bf16.gmra.mxu1 %vm6126_vm8, %v6117_v15  ;;  %v11167_v53 = vld [vmem:[#allocation3 + $0x30] sm:$0xff] }
 0x338   : > { %v5357_v63 = vshll.u32 %v5194_v3, 16  ;;  %v5888_v50 = vshll.u32 %v5659_v49, 16  ;;  %v5894_v21 = vshll.u32 %v13614_v59, 16  ;;  %v5898_v44 = vshrl.u32 %v13614_v59, 16 }
 0x339   : > { %v5356_v41 = vrot.slane %v5354_v29, 7  ;;  %v5022_v25 = vadd.f32 %v13433_v14, %v4986_v43  ;;  %v5887_v38 = vrot.slane %v5885_v62, 4  ;;  %v13625_v1 = vpack.c.b16 %v6659_v32, %v6658_v35  ;;  %v4501_v26 = vpop.f32.mrf.mxu3  ;;  %10886 = vmatmul.msk.bf16.gmra.mxu0 %vm6126_vm8, %v11167_v53 }
 0x33a   : > { %v5890_v12 = vrot.slane %v5888_v50, 5  ;;  %v5896_v16 = vrot.slane %v5894_v21, 5  ;;  %v5900_v58 = vrot.slane %v5898_v44, 4  ;;  %v5904_v23 = vshll.u32 %v13618_v42, 16 }
 0x33b   : > { %v5359_v0 = vor.u32 %v5357_v63, %v5356_v41  ;;  %v5361_v18 = vrot.slane %v5356_v41, 4  ;;  %v5054_v10 = vmax.f32 %v5022_v25, 0.0  ;;  %v4553_v7 = vadd.f32 %v4501_v26, %v3899_v52  ;;  %v15886_v41 = vld [vmem:[#allocation25_spill] sm:$0xff] }
 0x33c   : > { %v5891_v15 = vor.u32 %v5890_v12, %v5887_v38  ;;  %v5901_v47 = vor.u32 %v5900_v58, %v5896_v16  ;;  %v5160_v5 = vsel %vm12949_vm3, 0, %v5159_v4  ;;  %v6573_v60 = vrot.slane %v13410_v34, 5  ;;  %v5594_v38 = vld [vmem:[#allocation3 + $0x78] sm:$0xf]  ;;  %v13656_v4 = vpop.f32.mrf.mxu2 }
 0x33d   : > { %v5360_v56 = vsel %vm11500_vm6, %v5352_v54, %v5359_v0  ;;  %v5592_v3 = vsel %vm12921_vm1, %v5361_v18, %v5591_v11  ;;  %v5195_v2 = vpack.c.bf16 %v5054_v10, %v5054_v10  ;;  %v4951_v55 = vadd.f32 %v13505_v39, %v4553_v7  ;;  %5161 = vst [vmem:[#allocation3 + $0x8c] sm:$0x1] %v5160_v5  ;;  %v5113_v54 = vld [vmem:[#allocation3 + $0x90] sm:$0x1]  ;;  %v15888_v58 = vld [vmem:[#allocation24_spill] sm:$0xff] }
 0x33e   : > { %5590 = vst.msk [vmem:[#allocation3 + $0x70] sm:$0xf] %vm5068_vm7, %v5360_v56  ;;  %v5892_v32 = vrot.slane %v5891_v15, 4  ;;  %v5902_v40 = vrot.slane %v5901_v47, 4  ;;  %v5906_v52 = vrot.slane %v5904_v23, 5  ;;  %v13638_v49 = vpop.f32.mrf.mxu0  ;;  %v6575_v35 = vrot.slane %v6573_v60, 4  ;;  %10804 = vmatmul.msk.bf16.gmra.mxu3 %vm6126_vm8, %v6684_v17 }
 0x33f   : > { %5593 = vst [vmem:[#allocation3 + $0x74] sm:$0x1] %v5592_v3  ;;  %v5363_v34 = vshrl.u32 %v5195_v2, 16  ;;  %v4987_v29 = vmul.f32 %v13421_v33, %v4951_v55  ;;  %v6574_v43 = vsel %vm11410_vm12, %v10790_v24, %v6573_v60  ;;  %v5114_v63 = vsel %vm12921_vm1, 0, %v5113_v54  ;;  %v15887_v24 = vld [vmem:[#allocation12_spill] sm:$0xff]  ;;  %v15889_v56 = vld [vmem:[#allocation22_spill] sm:$0xff] }
 0x340   : > { %v5897_v39 = vsel %vm11429_vm15, %v5892_v32, %v5896_v16  ;;  %v5907_v62 = vsel %vm11429_vm15, %v5902_v40, %v5906_v52  ;;  %v6576_v53 = vrot.slane %v13416_v45, 5  ;;  %v5366_v21 = vshll.u32 %v5195_v2, 16  ;;  %5115 = vst [vmem:[#allocation3 + $0x90] sm:$0x1] %v5114_v63  ;;  %v13662_v7 = vld [vmem:[#allocation3 + $0x48] sm:$0xe] }
 0x341   : > { %v13651_v50 = vrot.slane %v5363_v34, 7  ;;  %v5023_v17 = vadd.f32 %v13433_v14, %v4987_v29  ;;  %v6095_v44 = vunpack.c.l.b16 %v5907_v62  ;;  %v3614_v25 = vadd.f32 %v15887_v24, %v15886_v41  ;;  %v4504_v11 = vpop.f32.mrf.mxu3  ;;  %v5661_v55 = vld [vmem:[#allocation3 + $0x6c] sm:$0xf]  ;;  %v5162_v41 = vld [vmem:[#allocation3 + $0x98] sm:$0x1] }
 0x342   : > { %v6094_v26 = vunpack.c.l.b16 %v5897_v39  ;;  %v6577_v12 = vsel %vm11410_vm12, %v6575_v35, %v6576_v53  ;;  %v4554_v23 = vadd.f32 %v4504_v11, %v15888_v58  ;;  %v6660_v18 = vunpack.c.l.b16 %v6574_v43  ;;  %v11168_v43 = vld [vmem:[#allocation3 + $0x3c] sm:$0xff]  ;;  %v13686_v58 = vpop.f32.mrf.mxu1 }
 0x343   : > { %v5368_v45 = vor.u32 %v5366_v21, %v13651_v50  ;;  %v5055_v16 = vmax.f32 %v5023_v17, 0.0  ;;  %v6661_v10 = vunpack.c.l.b16 %v6577_v12  ;;  %v3901_v3 = vadd.f32 %v15889_v56, %v3614_v25  ;;  %v5598_v24 = vld [vmem:[#allocation3 + $0x80] sm:$0x1] }
 0x344   : > { %v6118_v0 = vpack.c.b16 %v6095_v44, %v6094_v26  ;;  %v4952_v5 = vadd.f32 %v13539_v6, %v4554_v23  ;;  %v5909_v29 = vshrl.u32 %v5661_v55, 16  ;;  %v10791_v6 = vrot.slane %v13662_v7, 9 }
 0x345   : > { %v5595_v15 = vsel %vm13076_vm10, %v5368_v45, %v5594_v38  ;;  %v5196_v47 = vpack.c.bf16 %v5055_v16, %v5055_v16  ;;  %v11157_v60 = vld [vmem:[#allocation3 + $0x6c] sm:$0xff]  ;;  %v13672_v40 = vpack.c.b16 %v6661_v10, %v6660_v18  ;;  %v5369_v54 = vrot.slane %v13651_v50, 4 }
 0x346   : > { %5596 = vst [vmem:[#allocation3 + $0x78] sm:$0xf] %v5595_v15  ;;  %v13668_v2 = vpop.f32.mrf.mxu0  ;;  %v13670_v32 = vld [vmem:[#allocation3 + $0x70] sm:$0xf]  ;;  %v4988_v35 = vmul.f32 %v13421_v33, %v4952_v5  ;;  %10778 = vmatmul.msk.bf16.gmra.mxu2 %vm6126_vm8, %v11157_v60  ;;  %v13676_v34 = vld [vmem:[#allocation3 + $0x74] sm:$0x1] }
 0x347   : > { %v5371_v52 = vshrl.u32 %v5196_v47, 16  ;;  %10697 = vmatmul.msk.bf16.gmra.mxu1 %vm6126_vm8, %v6118_v0  ;;  %v5912_v39 = vshll.u32 %v5661_v55, 16  ;;  %v5918_v62 = vshll.u32 %v13670_v32, 16  ;;  %v5922_v63 = vshrl.u32 %v13670_v32, 16 }
 0x348   : > { %v5374_v21 = vshll.u32 %v5196_v47, 16  ;;  %v5024_v17 = vadd.f32 %v13433_v14, %v4988_v35  ;;  %v5911_v44 = vrot.slane %v5909_v29, 4  ;;  %v6413_v38 = vpop.f32.mrf.mxu2  ;;  %v5928_v12 = vshll.u32 %v13676_v34, 16 }
 0x349   : > { %v5373_v53 = vrot.slane %v5371_v52, 7  ;;  %v4506_v25 = vpop.f32.mrf.mxu3  ;;  %10887 = vmatmul.msk.bf16.gmra.mxu0 %vm6126_vm8, %v11168_v43  ;;  %v5914_v50 = vrot.slane %v5912_v39, 5  ;;  %v5920_v11 = vrot.slane %v5918_v62, 5  ;;  %v5924_v26 = vrot.slane %v5922_v63, 4 }
 0x34a   : > { %v5056_v23 = vmax.f32 %v5024_v17, 0.0  ;;  %v4555_v0 = vadd.f32 %v4506_v25, %v3901_v3  ;;  %v5163_v7 = vsel %vm12949_vm3, 0, %v5162_v41  ;;  %v6580_v15 = vrot.slane %v13473_v20, 5  ;;  %v5601_v41 = vld [vmem:[#allocation3 + $0x84] sm:$0xf] }
 0x34b   : > { %v5376_v45 = vor.u32 %v5374_v21, %v5373_v53  ;;  %v5378_v16 = vrot.slane %v5373_v53, 4  ;;  %v5915_v18 = vor.u32 %v5914_v50, %v5911_v44  ;;  %v5925_v10 = vor.u32 %v5924_v26, %v5920_v11  ;;  %5164 = vst [vmem:[#allocation3 + $0x98] sm:$0x1] %v5163_v7  ;;  %v15891_v26 = vld [vmem:[#allocation26_spill] sm:$0xff] }
 0x34c   : > { %v5197_v60 = vpack.c.bf16 %v5056_v23, %v5056_v23  ;;  %v4953_v56 = vadd.f32 %v13578_v31, %v4555_v0  ;;  %v5930_v52 = vrot.slane %v5928_v12, 5  ;;  %v6582_v29 = vrot.slane %v6580_v15, 4  ;;  %v15892_v23 = vld [vmem:[#allocation28_spill] sm:$0xff] }
 0x34d   : > { %v5377_v47 = vsel %vm11500_vm6, %v5369_v54, %v5376_v45  ;;  %v5599_v5 = vsel %vm12921_vm1, %v5378_v16, %v5598_v24  ;;  %v5916_v3 = vrot.slane %v5915_v18, 4  ;;  %v5926_v55 = vrot.slane %v5925_v10, 4  ;;  %v5116_v54 = vld [vmem:[#allocation3 + $0x9c] sm:$0x1] }
 0x34e   : > { %5597 = vst.msk [vmem:[#allocation3 + $0x7c] sm:$0xf] %vm5068_vm7, %v5377_v47  ;;  %v13697_v35 = vpop.f32.mrf.mxu0  ;;  %v5380_v20 = vshrl.u32 %v5197_v60, 16  ;;  %v4989_v43 = vmul.f32 %v13421_v33, %v4953_v56  ;;  %10805 = vmatmul.msk.bf16.gmra.mxu3 %vm6126_vm8, %v13594_v30  ;;  %v6581_v31 = vsel %vm11410_vm12, %v10791_v6, %v6580_v15  ;;  %v5117_v63 = vsel %vm12921_vm1, 0, %v5116_v54 }
 0x34f   : > { %5600 = vst [vmem:[#allocation3 + $0x80] sm:$0x1] %v5599_v5  ;;  %v5921_v39 = vsel %vm11429_vm15, %v5916_v3, %v5920_v11  ;;  %v5931_v62 = vsel %vm11429_vm15, %v5926_v55, %v5930_v52  ;;  %v6583_v53 = vrot.slane %v13478_v57, 5  ;;  %v5383_v17 = vshll.u32 %v5197_v60, 16  ;;  %v15890_v11 = vld [vmem:[#allocation17_spill] sm:$0xff] }
 0x350   : > { %v13711_v21 = vrot.slane %v5380_v20, 7  ;;  %v5025_v30 = vadd.f32 %v13433_v14, %v4989_v43  ;;  %v6097_v44 = vunpack.c.l.b16 %v5931_v62  ;;  %5118 = vst [vmem:[#allocation3 + $0x9c] sm:$0x1] %v5117_v63  ;;  %v6096_v24 = vunpack.c.l.b16 %v5921_v39  ;;  %v6415_v25 = vpop.f32.mrf.mxu2  ;;  %v5663_v55 = vld [vmem:[#allocation3 + $0x78] sm:$0xf]  ;;  %v11169_v62 = vld [vmem:[#allocation3 + $0x48] sm:$0xff] }
 0x351   : > { %v4509_v6 = vpop.f32.mrf.mxu3  ;;  %v6584_v50 = vsel %vm11410_vm12, %v6582_v29, %v6583_v53  ;;  %v3616_v12 = vadd.f32 %v15891_v26, %v15890_v11  ;;  %v6193_v16 = vpop.f32.mrf.mxu1  ;;  %v6662_v7 = vunpack.c.l.b16 %v6581_v31  ;;  %v5933_v39 = vshrl.u32 %v5663_v55, 16 }
 0x352   : > { %v5385_v45 = vor.u32 %v5383_v17, %v13711_v21  ;;  %v5057_v57 = vmax.f32 %v5025_v30, 0.0  ;;  %v4556_v0 = vadd.f32 %v4509_v6, %v15892_v23  ;;  %v13720_v18 = vadd.f32 %v6413_v38, %v6193_v16  ;;  %v15893_v38 = vld [vmem:[#allocation27_spill] sm:$0xff] }
 0x353   : > { %v6119_v10 = vpack.c.b16 %v6097_v44, %v6096_v24  ;;  %v6663_v15 = vunpack.c.l.b16 %v6584_v50  ;;  %v3903_v20 = vadd.f32 %v15893_v38, %v3616_v12  ;;  %v5936_v63 = vshll.u32 %v5663_v55, 16  ;;  %v5165_v24 = vld [vmem:[#allocation3 + $0xa4] sm:$0x1]  ;;  %v5605_v50 = vld [vmem:[#allocation3 + $0x8c] sm:$0x1] }
 0x354   : > { %v5602_v47 = vsel %vm13076_vm10, %v5385_v45, %v5601_v41  ;;  %v5198_v5 = vpack.c.bf16 %v5057_v57, %v5057_v57  ;;  %v4954_v60 = vadd.f32 %v13612_v22, %v4556_v0  ;;  %v5386_v22 = vrot.slane %v13711_v21, 4 }
 0x355   : > { %v11158_v56 = vld [vmem:[#allocation3 + $0x78] sm:$0xff]  ;;  %5603 = vst [vmem:[#allocation3 + $0x84] sm:$0xf] %v5602_v47  ;;  %v13729_v29 = vpack.c.b16 %v6663_v15, %v6662_v7  ;;  %v5935_v6 = vrot.slane %v5933_v39, 4  ;;  %v5938_v21 = vrot.slane %v5936_v63, 5  ;;  %v6587_v63 = vrot.slane %v13541_v37, 5 }
 0x356   : > { %v13725_v3 = vpop.f32.mrf.mxu0  ;;  %v13727_v52 = vld [vmem:[#allocation3 + $0x7c] sm:$0xf]  ;;  %v5388_v43 = vshrl.u32 %v5198_v5, 16  ;;  %v4990_v54 = vmul.f32 %v13421_v33, %v4954_v60  ;;  %10779 = vmatmul.msk.bf16.gmra.mxu2 %vm6126_vm8, %v11158_v56  ;;  %v13734_v31 = vld [vmem:[#allocation3 + $0x80] sm:$0x1]  ;;  %v5391_v44 = vshll.u32 %v5198_v5, 16 }
 0x357   : > { %10698 = vmatmul.msk.bf16.gmra.mxu1 %vm6126_vm8, %v6119_v10  ;;  %v5942_v53 = vshll.u32 %v13727_v52, 16  ;;  %v5946_v17 = vshrl.u32 %v13727_v52, 16  ;;  %v5952_v57 = vshll.u32 %v13734_v31, 16  ;;  %v5939_v47 = vor.u32 %v5938_v21, %v5935_v6  ;;  %v5608_v21 = vld [vmem:[#allocation3 + $0x90] sm:$0xf] }
 0x358   : > { %v5390_v30 = vrot.slane %v5388_v43, 7  ;;  %v5026_v41 = vadd.f32 %v13433_v14, %v4990_v54  ;;  %v6418_v26 = vpop.f32.mrf.mxu2  ;;  %v5166_v60 = vsel %vm12949_vm3, 0, %v5165_v24  ;;  %v6495_v54 = vld [vmem:[#allocation3 + $0x54] sm:$0xe]  ;;  %v6608_v46 = vrot.slane %v13727_v52, 5 }
 0x359   : > { %v4511_v11 = vpop.f32.mrf.mxu3  ;;  %10888 = vmatmul.msk.bf16.gmra.mxu0 %vm6126_vm8, %v11169_v62  ;;  %v5944_v12 = vrot.slane %v5942_v53, 5  ;;  %v5948_v45 = vrot.slane %v5946_v17, 4  ;;  %v6195_v10 = vpop.f32.mrf.mxu1  ;;  %5167 = vst [vmem:[#allocation3 + $0xa4] sm:$0x1] %v5166_v60  ;;  %v5954_v39 = vrot.slane %v5952_v57, 5 }
 0x35a   : > { %v5393_v16 = vor.u32 %v5391_v44, %v5390_v30  ;;  %v5395_v23 = vrot.slane %v5390_v30, 4  ;;  %v5058_v0 = vmax.f32 %v5026_v41, 0.0  ;;  %v4557_v7 = vadd.f32 %v4511_v11, %v3903_v20  ;;  %v5119_v17 = vld [vmem:[#allocation3 + $0xa8] sm:$0x1] }
 0x35b   : > { %v13743_v15 = vadd.f32 %v6415_v25, %v6195_v10  ;;  %v5949_v5 = vor.u32 %v5948_v45, %v5944_v12  ;;  %v5940_v25 = vrot.slane %v5939_v47, 4  ;;  %v5120_v44 = vsel %vm12921_vm1, 0, %v5119_v17  ;;  %v15896_v47 = vld [vmem:[#allocation30_spill] sm:$0xff] }
 0x35c   : > { %v5394_v56 = vsel %vm11500_vm6, %v5386_v22, %v5393_v16  ;;  %v5606_v55 = vsel %vm12921_vm1, %v5395_v23, %v5605_v50  ;;  %v5199_v38 = vpack.c.bf16 %v5058_v0, %v5058_v0  ;;  %v4955_v43 = vadd.f32 %v13638_v49, %v4557_v7  ;;  %5121 = vst [vmem:[#allocation3 + $0xa8] sm:$0x1] %v5120_v44  ;;  %v15894_v50 = vld [vmem:[#allocation14_spill] sm:$0xff] }
 0x35d   : > { %5604 = vst.msk [vmem:[#allocation3 + $0x88] sm:$0xf] %vm5068_vm7, %v5394_v56  ;;  %v5950_v20 = vrot.slane %v5949_v5, 4  ;;  %v5945_v49 = vsel %vm11429_vm15, %v5940_v25, %v5944_v12  ;;  %v10792_v41 = vrot.slane %v6495_v54, 9  ;;  %v6589_v16 = vrot.slane %v6587_v63, 4 }
 0x35e   : > { %v13753_v62 = vpop.f32.mrf.mxu0  ;;  %5607 = vst [vmem:[#allocation3 + $0x8c] sm:$0x1] %v5606_v55  ;;  %v5397_v53 = vshrl.u32 %v5199_v38, 16  ;;  %v4991_v22 = vmul.f32 %v13421_v33, %v4955_v43  ;;  %10806 = vmatmul.msk.bf16.gmra.mxu3 %vm6126_vm8, %v13625_v1  ;;  %v5400_v37 = vshll.u32 %v5199_v38, 16  ;;  %v15895_v1 = vld [vmem:[#allocation29_spill] sm:$0xff]  ;;  %v6098_v12 = vunpack.c.l.b16 %v5945_v49 }
 0x35f   : > { %v5955_v30 = vsel %vm11429_vm15, %v5950_v20, %v5954_v39  ;;  %v3618_v11 = vadd.f32 %v15895_v1, %v15894_v50  ;;  %v6590_v23 = vrot.slane %v13557_v61, 5  ;;  %v15897_v20 = vld [vmem:[#allocation13_spill] sm:$0xff] }
 0x360   : > { %v13765_v6 = vrot.slane %v5397_v53, 7  ;;  %v5027_v24 = vadd.f32 %v13433_v14, %v4991_v22  ;;  %v6099_v33 = vunpack.c.l.b16 %v5955_v30  ;;  %v6420_v57 = vpop.f32.mrf.mxu2  ;;  %v6588_v14 = vsel %vm11410_vm12, %v10792_v41, %v6587_v63  ;;  %v5665_v63 = vld [vmem:[#allocation3 + $0x84] sm:$0xf]  ;;  %v13791_v30 = vld [vmem:[%s15787_s4] ss:$0 sm:$0xff] }
 0x361   : > { %v4514_v45 = vpop.f32.mrf.mxu3  ;;  %v6591_v55 = vsel %vm11410_vm12, %v6589_v16, %v6590_v23  ;;  %v3905_v39 = vadd.f32 %v15897_v20, %v3618_v11  ;;  %v6664_v22 = vunpack.c.l.b16 %v6588_v14  ;;  %v5957_v41 = vshrl.u32 %v5665_v63, 16  ;;  %v13803_v11 = vld [vmem:[%s15788_s5] ss:$0 sm:$0xff]  ;;  %v5612_v23 = vld [vmem:[#allocation3 + $0x98] sm:$0x1] }
 0x362   : > { %v5402_v0 = vor.u32 %v5400_v37, %v13765_v6  ;;  %v5059_v10 = vmax.f32 %v5027_v24, 0.0  ;;  %v6198_v7 = vpop.f32.mrf.mxu1  ;;  %v4558_v5 = vadd.f32 %v4514_v45, %v15896_v47  ;;  %v6120_v56 = vpack.c.b16 %v6099_v33, %v6098_v12  ;;  %v11170_v24 = vld [vmem:[#allocation3 + $0x54] sm:$0xff]  ;;  %v5168_v12 = vld [vmem:[#allocation3 + $0xb0] sm:$0x1] }
 0x363   : > { %v13775_v60 = vadd.f32 %v6418_v26, %v6198_v7  ;;  %v6665_v25 = vunpack.c.l.b16 %v6591_v55  ;;  %v5403_v17 = vrot.slane %v13765_v6, 4  ;;  %v5960_v33 = vshll.u32 %v5665_v63, 16 }
 0x364   : > { %v5609_v38 = vsel %vm13076_vm10, %v5402_v0, %v5608_v21  ;;  %v5200_v43 = vpack.c.bf16 %v5059_v10, %v5059_v10  ;;  %v4956_v61 = vadd.f32 %v13668_v2, %v4558_v5  ;;  %v11159_v54 = vld [vmem:[#allocation3 + $0x84] sm:$0xff]  ;;  %v5959_v45 = vrot.slane %v5957_v41, 4 }
 0x365   : > { %5610 = vst [vmem:[#allocation3 + $0x90] sm:$0xf] %v5609_v38  ;;  %v13785_v26 = vld [vmem:[#allocation3 + $0x88] sm:$0xf]  ;;  %v13795_v44 = vld [vmem:[#allocation3 + $0x8c] sm:$0x1]  ;;  %v13806_v16 = vpack.c.b16 %v6665_v25, %v6664_v22 }
 0x366   : > { %v13783_v53 = vpop.f32.mrf.mxu0  ;;  %v5405_v49 = vshrl.u32 %v5200_v43, 16  ;;  %v4992_v2 = vmul.f32 %v13791_v30, %v4956_v61  ;;  %10780 = vmatmul.msk.bf16.gmra.mxu2 %vm6126_vm8, %v11159_v54  ;;  %v5408_v37 = vshll.u32 %v5200_v43, 16  ;;  %v5966_v6 = vshll.u32 %v13785_v26, 16 }
 0x367   : > { %10699 = vmatmul.msk.bf16.gmra.mxu1 %vm6126_vm8, %v6120_v56  ;;  %v5970_v50 = vshrl.u32 %v13785_v26, 16  ;;  %v5962_v7 = vrot.slane %v5960_v33, 5  ;;  %v5976_v14 = vshll.u32 %v13795_v44, 16  ;;  %v5169_v63 = vsel %vm12949_vm3, 0, %v5168_v12 }
 0x368   : > { %v5407_v1 = vrot.slane %v5405_v49, 7  ;;  %v5028_v21 = vadd.f32 %v13803_v11, %v4992_v2  ;;  %v5968_v47 = vrot.slane %v5966_v6, 5  ;;  %5170 = vst [vmem:[#allocation3 + $0xb0] sm:$0x1] %v5169_v63  ;;  %v6594_v6 = vrot.slane %v13614_v59, 5 }
 0x369   : > { %v4516_v0 = vpop.f32.mrf.mxu3  ;;  %v6423_v10 = vpop.f32.mrf.mxu2  ;;  %10889 = vmatmul.msk.bf16.gmra.mxu0 %vm6126_vm8, %v11170_v24  ;;  %v5972_v5 = vrot.slane %v5970_v50, 4  ;;  %v5963_v20 = vor.u32 %v5962_v7, %v5959_v45  ;;  %v5978_v24 = vrot.slane %v5976_v14, 5 }
 0x36a   : > { %v5410_v56 = vor.u32 %v5408_v37, %v5407_v1  ;;  %v5412_v55 = vrot.slane %v5407_v1, 4  ;;  %v5060_v38 = vmax.f32 %v5028_v21, 0.0  ;;  %v6200_v43 = vpop.f32.mrf.mxu1  ;;  %v4559_v61 = vadd.f32 %v4516_v0, %v3905_v39  ;;  %v6496_v37 = vld [vmem:[#allocation3 + $0x60] sm:$0xe]  ;;  %v5122_v1 = vld [vmem:[#allocation3 + $0xb4] sm:$0x1] }
 0x36b   : > { %v13810_v54 = vadd.f32 %v6420_v57, %v6200_v43  ;;  %v5973_v25 = vor.u32 %v5972_v5, %v5968_v47  ;;  %v5964_v57 = vrot.slane %v5963_v20, 4  ;;  %v5123_v45 = vsel %vm12921_vm1, 0, %v5122_v1  ;;  %v15898_v5 = vld [vmem:[#allocation16_spill] sm:$0xff]  ;;  %v15901_v1 = vld [vmem:[#allocation31_spill] sm:$0xff] }
 0x36c   : > { %v5411_v22 = vsel %vm11500_vm6, %v5403_v17, %v5410_v56  ;;  %v5613_v49 = vsel %vm12921_vm1, %v5412_v55, %v5612_v23  ;;  %v5201_v2 = vpack.c.bf16 %v5060_v38, %v5060_v38  ;;  %v4957_v41 = vadd.f32 %v13697_v35, %v4559_v61  ;;  %5124 = vst [vmem:[#allocation3 + $0xb4] sm:$0x1] %v5123_v45  ;;  %v5615_v56 = vld [vmem:[#allocation3 + $0x9c] sm:$0xf] }
 0x36d   : > { %5611 = vst.msk [vmem:[#allocation3 + $0x94] sm:$0xf] %vm5068_vm7, %v5411_v22  ;;  %v5974_v39 = vrot.slane %v5973_v25, 4  ;;  %v5969_v35 = vsel %vm11429_vm15, %v5964_v57, %v5968_v47  ;;  %v10793_v12 = vrot.slane %v6496_v37, 9  ;;  %v6596_v43 = vrot.slane %v6594_v6, 4  ;;  %v15900_v22 = vld [vmem:[#allocation32_spill] sm:$0xff] }
 0x36e   : > { %v13820_v33 = vpop.f32.mrf.mxu0  ;;  %5614 = vst [vmem:[#allocation3 + $0x98] sm:$0x1] %v5613_v49  ;;  %v5414_v50 = vshrl.u32 %v5201_v2, 16  ;;  %v4993_v17 = vmul.f32 %v13791_v30, %v4957_v41  ;;  %10807 = vmatmul.msk.bf16.gmra.mxu3 %vm6126_vm8, %v13672_v40  ;;  %v5417_v59 = vshll.u32 %v5201_v2, 16  ;;  %v15899_v40 = vld [vmem:[#allocation15_spill] sm:$0xff]  ;;  %v6100_v47 = vunpack.c.l.b16 %v5969_v35 }
 0x36f   : > { %v5979_v21 = vsel %vm11429_vm15, %v5974_v39, %v5978_v24  ;;  %v3620_v14 = vadd.f32 %v15899_v40, %v15898_v5  ;;  %v6597_v61 = vrot.slane %v13618_v42, 5  ;;  %v6595_v2 = vsel %vm11410_vm12, %v10793_v12, %v6594_v6  ;;  %v11171_v40 = vld [vmem:[#allocation3 + $0x60] sm:$0xff] }
 0x370   : > { %v13832_v23 = vrot.slane %v5414_v50, 7  ;;  %v5029_v0 = vadd.f32 %v13803_v11, %v4993_v17  ;;  %v6101_v7 = vunpack.c.l.b16 %v5979_v21  ;;  %v5667_v21 = vld [vmem:[#allocation3 + $0x90] sm:$0xf] }
 0x371   : > { %v4519_v55 = vpop.f32.mrf.mxu3  ;;  %v6425_v38 = vpop.f32.mrf.mxu2  ;;  %v6598_v57 = vsel %vm11410_vm12, %v6596_v43, %v6597_v61  ;;  %v3907_v35 = vadd.f32 %v15901_v1, %v3620_v14  ;;  %v5984_v14 = vshll.u32 %v5667_v21, 16  ;;  %v5171_v61 = vld [vmem:[#allocation3 + $0xbc] sm:$0x1] }
 0x372   : > { %v5419_v20 = vor.u32 %v5417_v59, %v13832_v23  ;;  %v5061_v25 = vmax.f32 %v5029_v0, 0.0  ;;  %v6203_v63 = vpop.f32.mrf.mxu1  ;;  %v4560_v49 = vadd.f32 %v4519_v55, %v15900_v22  ;;  %v6121_v37 = vpack.c.b16 %v6101_v7, %v6100_v47 }
 0x373   : > { %v13842_v41 = vadd.f32 %v6423_v10, %v6203_v63  ;;  %v6667_v17 = vunpack.c.l.b16 %v6598_v57  ;;  %v6666_v10 = vunpack.c.l.b16 %v6595_v2  ;;  %v5420_v6 = vrot.slane %v13832_v23, 4 }
 0x374   : > { %v5616_v39 = vsel %vm13076_vm10, %v5419_v20, %v5615_v56  ;;  %v5202_v24 = vpack.c.bf16 %v5061_v25, %v5061_v25  ;;  %v4958_v42 = vadd.f32 %v13725_v3, %v4560_v49  ;;  %v11160_v50 = vld [vmem:[#allocation3 + $0x90] sm:$0xff]  ;;  %v5981_v3 = vshrl.u32 %v5667_v21, 16  ;;  %v5619_v25 = vld [vmem:[#allocation3 + $0xa4] sm:$0x1] }
 0x375   : > { %5617 = vst [vmem:[#allocation3 + $0x9c] sm:$0xf] %v5616_v39  ;;  %v13850_v45 = vld [vmem:[#allocation3 + $0x94] sm:$0xf]  ;;  %v13857_v7 = vld [vmem:[#allocation3 + $0x98] sm:$0x1]  ;;  %v13863_v20 = vpack.c.b16 %v6667_v17, %v6666_v10 }
 0x376   : > { %v5422_v12 = vshrl.u32 %v5202_v24, 16  ;;  %v4994_v59 = vmul.f32 %v13791_v30, %v4958_v42  ;;  %10781 = vmatmul.msk.bf16.gmra.mxu2 %vm6126_vm8, %v11160_v50  ;;  %v13855_v0 = vpop.f32.mrf.mxu0  ;;  %v5425_v5 = vshll.u32 %v5202_v24, 16  ;;  %v5990_v56 = vshll.u32 %v13850_v45, 16 }
 0x377   : > { %10700 = vmatmul.msk.bf16.gmra.mxu1 %vm6126_vm8, %v6121_v37  ;;  %v5994_v55 = vshrl.u32 %v13850_v45, 16  ;;  %v5983_v43 = vrot.slane %v5981_v3, 4  ;;  %v5986_v49 = vrot.slane %v5984_v14, 5  ;;  %v6000_v57 = vshll.u32 %v13857_v7, 16  ;;  %v6497_v14 = vld [vmem:[#allocation3 + $0x6c] sm:$0xe] }
 0x378   : > { %v5424_v23 = vrot.slane %v5422_v12, 7  ;;  %v5030_v47 = vadd.f32 %v13803_v11, %v4994_v59  ;;  %v5992_v2 = vrot.slane %v5990_v56, 5  ;;  %v5172_v10 = vsel %vm12949_vm3, 0, %v5171_v61 }
 0x379   : > { %v4521_v63 = vpop.f32.mrf.mxu3  ;;  %v6428_v22 = vpop.f32.mrf.mxu2  ;;  %10890 = vmatmul.msk.bf16.gmra.mxu0 %vm6126_vm8, %v11171_v40  ;;  %v5996_v37 = vrot.slane %v5994_v55, 4  ;;  %v5987_v12 = vor.u32 %v5986_v49, %v5983_v43  ;;  %5173 = vst [vmem:[#allocation3 + $0xbc] sm:$0x1] %v5172_v10  ;;  %v6002_v56 = vrot.slane %v6000_v57, 5  ;;  %v6601_v55 = vrot.slane %v13670_v32, 5 }
 0x37a   : > { %v5427_v39 = vor.u32 %v5425_v5, %v5424_v23  ;;  %v5429_v24 = vrot.slane %v5424_v23, 4  ;;  %v5062_v42 = vmax.f32 %v5030_v47, 0.0  ;;  %v6205_v50 = vpop.f32.mrf.mxu1  ;;  %v4561_v1 = vadd.f32 %v4521_v63, %v3907_v35  ;;  %v5125_v43 = vld [vmem:[#allocation3 + $0xc0] sm:$0x1] }
 0x37b   : > { %v13867_v21 = vadd.f32 %v6425_v38, %v6205_v50  ;;  %v5997_v17 = vor.u32 %v5996_v37, %v5992_v2  ;;  %v5988_v38 = vrot.slane %v5987_v12, 4  ;;  %v10794_v32 = vrot.slane %v6497_v14, 9 }
 0x37c   : > { %v5428_v59 = vsel %vm11500_vm6, %v5420_v6, %v5427_v39  ;;  %v5620_v3 = vsel %vm12921_vm1, %v5429_v24, %v5619_v25  ;;  %v5203_v40 = vpack.c.bf16 %v5062_v42, %v5062_v42  ;;  %v4959_v5 = vadd.f32 %v13753_v62, %v4561_v1  ;;  %v15903_v39 = vld [vmem:[#allocation33_spill] sm:$0xff]  ;;  %v5622_v42 = vld [vmem:[#allocation3 + $0xa8] sm:$0xf] }
 0x37d   : > { %5618 = vst.msk [vmem:[#allocation3 + $0xa0] sm:$0xf] %vm5068_vm7, %v5428_v59  ;;  %v5998_v35 = vrot.slane %v5997_v17, 4  ;;  %v5993_v62 = vsel %vm11429_vm15, %v5988_v38, %v5992_v2  ;;  %v5126_v25 = vsel %vm12921_vm1, 0, %v5125_v43  ;;  %v6603_v12 = vrot.slane %v6601_v55, 4 }
 0x37e   : > { %5621 = vst [vmem:[#allocation3 + $0xa4] sm:$0x1] %v5620_v3  ;;  %v5431_v23 = vshrl.u32 %v5203_v40, 16  ;;  %v4995_v47 = vmul.f32 %v13791_v30, %v4959_v5  ;;  %10808 = vmatmul.msk.bf16.gmra.mxu3 %vm6126_vm8, %v13729_v29  ;;  %v13881_v6 = vpop.f32.mrf.mxu0  ;;  %v5434_v49 = vshll.u32 %v5203_v40, 16  ;;  %v15902_v29 = vld [vmem:[#allocation34_spill] sm:$0xff]  ;;  %v6102_v2 = vunpack.c.l.b16 %v5993_v62  ;;  %v15905_v62 = vld [vmem:[#allocation19_spill] sm:$0xff] }
 0x37f   : > { %v6003_v61 = vsel %vm11429_vm15, %v5998_v35, %v6002_v56  ;;  %5127 = vst [vmem:[#allocation3 + $0xc0] sm:$0x1] %v5126_v25  ;;  %v3622_v24 = vadd.f32 %v15903_v39, %v15902_v29  ;;  %v6604_v17 = vrot.slane %v13676_v34, 5  ;;  %v15904_v3 = vld [vmem:[#allocation18_spill] sm:$0xff]  ;;  %v6602_v40 = vsel %vm11410_vm12, %v10794_v32, %v6601_v55 }
 0x380   : > { %v13889_v63 = vrot.slane %v5431_v23, 7  ;;  %v5031_v37 = vadd.f32 %v13803_v11, %v4995_v47  ;;  %v6103_v57 = vunpack.c.l.b16 %v6003_v61  ;;  %v6668_v32 = vunpack.c.l.b16 %v6602_v40 }
 0x381   : > { %v4524_v50 = vpop.f32.mrf.mxu3  ;;  %v6430_v1 = vpop.f32.mrf.mxu2  ;;  %v6605_v38 = vsel %vm11410_vm12, %v6603_v12, %v6604_v17  ;;  %v3909_v61 = vadd.f32 %v15905_v62, %v3622_v24 }
 0x382   : > { %v5436_v10 = vor.u32 %v5434_v49, %v13889_v63  ;;  %v5063_v59 = vmax.f32 %v5031_v37, 0.0  ;;  %v4562_v5 = vadd.f32 %v4524_v50, %v15904_v3  ;;  %v6122_v14 = vpack.c.b16 %v6103_v57, %v6102_v2  ;;  %v5669_v49 = vld [vmem:[#allocation3 + $0x9c] sm:$0xf] }
 0x383   : > { %v6669_v43 = vunpack.c.l.b16 %v6605_v38  ;;  %v5437_v37 = vrot.slane %v13889_v63, 4  ;;  %v6008_v50 = vshll.u32 %v5669_v49, 16 }
 0x384   : > { %v5623_v35 = vsel %vm13076_vm10, %v5436_v10, %v5622_v42  ;;  %v5204_v56 = vpack.c.bf16 %v5063_v59, %v5063_v59  ;;  %v6208_v23 = vpop.f32.mrf.mxu1  ;;  %v4960_v47 = vadd.f32 %v13783_v53, %v4562_v5  ;;  %v11161_v34 = vld [vmem:[#allocation3 + $0x9c] sm:$0xff]  ;;  %v6005_v42 = vshrl.u32 %v5669_v49, 16  ;;  %v5174_v59 = vld [vmem:[#allocation3 + $0xc8] sm:$0x1]  ;;  %v5626_v5 = vld [vmem:[#allocation3 + $0xb0] sm:$0x1] }
 0x385   : > { %5624 = vst [vmem:[#allocation3 + $0xa8] sm:$0xf] %v5623_v35  ;;  %v13905_v25 = vadd.f32 %v6428_v22, %v6208_v23  ;;  %v13907_v55 = vld [vmem:[#allocation3 + $0xa0] sm:$0xf]  ;;  %v13914_v53 = vld [vmem:[#allocation3 + $0xa4] sm:$0x1]  ;;  %v13920_v3 = vpack.c.b16 %v6669_v43, %v6668_v32 }
 0x386   : > { %v5439_v57 = vshrl.u32 %v5204_v56, 16  ;;  %v4996_v29 = vmul.f32 %v13791_v30, %v4960_v47  ;;  %10782 = vmatmul.msk.bf16.gmra.mxu2 %vm6126_vm8, %v11161_v34  ;;  %v13912_v39 = vpop.f32.mrf.mxu0  ;;  %v5442_v24 = vshll.u32 %v5204_v56, 16  ;;  %v11172_v22 = vld [vmem:[#allocation3 + $0x6c] sm:$0xff]  ;;  %v6014_v2 = vshll.u32 %v13907_v55, 16 }
 0x387   : > { %10701 = vmatmul.msk.bf16.gmra.mxu1 %vm6126_vm8, %v6122_v14  ;;  %v6018_v12 = vshrl.u32 %v13907_v55, 16  ;;  %v6007_v10 = vrot.slane %v6005_v42, 4  ;;  %v6010_v35 = vrot.slane %v6008_v50, 5  ;;  %v6024_v23 = vshll.u32 %v13914_v53, 16 }
 0x388   : > { %v5441_v63 = vrot.slane %v5439_v57, 7  ;;  %v5032_v17 = vadd.f32 %v13803_v11, %v4996_v29  ;;  %v6016_v14 = vrot.slane %v6014_v2, 5  ;;  %v5175_v43 = vsel %vm12949_vm3, 0, %v5174_v59 }
 0x389   : > { %v4526_v40 = vpop.f32.mrf.mxu3  ;;  %v6433_v38 = vpop.f32.mrf.mxu2  ;;  %10891 = vmatmul.msk.bf16.gmra.mxu0 %vm6126_vm8, %v11172_v22  ;;  %v6020_v56 = vrot.slane %v6018_v12, 4  ;;  %v6011_v57 = vor.u32 %v6010_v35, %v6007_v10  ;;  %5176 = vst [vmem:[#allocation3 + $0xc8] sm:$0x1] %v5175_v43  ;;  %v15907_v43 = vld [vmem:[#allocation20_spill] sm:$0xff] }
 0x38a   : > { %v5444_v47 = vor.u32 %v5442_v24, %v5441_v63  ;;  %v5446_v34 = vrot.slane %v5441_v63, 4  ;;  %v5064_v62 = vmax.f32 %v5032_v17, 0.0  ;;  %v4563_v49 = vadd.f32 %v4526_v40, %v3909_v61 }
 0x38b   : > { %v6021_v29 = vor.u32 %v6020_v56, %v6016_v14  ;;  %v6012_v61 = vrot.slane %v6011_v57, 4  ;;  %v6026_v63 = vrot.slane %v6024_v23, 5 }
 0x38c   : > { %v5445_v32 = vsel %vm11500_vm6, %v5437_v37, %v5444_v47  ;;  %v5627_v42 = vsel %vm12921_vm1, %v5446_v34, %v5626_v5  ;;  %v5205_v22 = vpack.c.bf16 %v5064_v62, %v5064_v62  ;;  %v6210_v50 = vpop.f32.mrf.mxu1  ;;  %v4961_v2 = vadd.f32 %v13820_v33, %v4563_v49  ;;  %v5671_v10 = vld [vmem:[#allocation3 + $0xa8] sm:$0xf]  ;;  %v5629_v47 = vld [vmem:[#allocation3 + $0xb4] sm:$0xf] }
 0x38d   : > { %5625 = vst.msk [vmem:[#allocation3 + $0xac] sm:$0xf] %vm5068_vm7, %v5445_v32  ;;  %v13932_v24 = vadd.f32 %v6430_v1, %v6210_v50  ;;  %v6022_v12 = vrot.slane %v6021_v29, 4  ;;  %v6017_v33 = vsel %vm11429_vm15, %v6012_v61, %v6016_v14  ;;  %v6029_v59 = vshrl.u32 %v5671_v10, 16 }
 0x38e   : > { %5628 = vst [vmem:[#allocation3 + $0xb0] sm:$0x1] %v5627_v42  ;;  %v5448_v27 = vshrl.u32 %v5205_v22, 16  ;;  %v4997_v17 = vmul.f32 %v13791_v30, %v4961_v2  ;;  %10809 = vmatmul.msk.bf16.gmra.mxu3 %vm6126_vm8, %v13806_v16  ;;  %v13937_v37 = vpop.f32.mrf.mxu0  ;;  %v6032_v5 = vshll.u32 %v5671_v10, 16  ;;  %v5451_v35 = vshll.u32 %v5205_v22, 16 }
 0x38f   : > { %15906 = vst [vmem:[#allocation21_spill] sm:$0xff] %v13937_v37  ;;  %v6027_v1 = vsel %vm11429_vm15, %v6022_v12, %v6026_v63  ;;  %v6104_v62 = vunpack.c.l.b16 %v6017_v33  ;;  %v3624_v14 = vadd.f32 %v13521_v51, %v15907_v43  ;;  %v6031_v42 = vrot.slane %v6029_v59, 4 }
 0x390   : > { %v5450_v40 = vrot.slane %v5448_v27, 7  ;;  %v5033_v56 = vadd.f32 %v13803_v11, %v4997_v17  ;;  %v6105_v23 = vunpack.c.l.b16 %v6027_v1  ;;  %v6034_v50 = vrot.slane %v6032_v5, 5  ;;  %v11173_v5 = vld [vmem:[#allocation3 + $0x78] sm:$0xff] }
 0x391   : > { %v4529_v34 = vpop.f32.mrf.mxu3  ;;  %v6435_v16 = vpop.f32.mrf.mxu2 }
 0x392   : > { %v5453_v49 = vor.u32 %v5451_v35, %v5450_v40  ;;  %v5065_v57 = vmax.f32 %v5033_v56, 0.0  ;;  %v4564_v29 = vadd.f32 %v4529_v34, %v12973_v13  ;;  %v6123_v32 = vpack.c.b16 %v6105_v23, %v6104_v62 }
 0x393   : > { %v5454_v62 = vrot.slane %v5450_v40, 4 }
 0x394   : > { %v5630_v22 = vsel %vm13076_vm10, %v5453_v49, %v5629_v47  ;;  %v5206_v2 = vpack.c.bf16 %v5065_v57, %v5065_v57  ;;  %v6213_v61 = vpop.f32.mrf.mxu1  ;;  %v4962_v12 = vadd.f32 %v13855_v0, %v4564_v29  ;;  %v11162_v63 = vld [vmem:[#allocation3 + $0xa8] sm:$0xff]  ;;  %v3911_v0 = vadd.f32 %v13523_v8, %v3624_v14  ;;  %v5633_v49 = vld [vmem:[#allocation3 + $0xbc] sm:$0x1] }
 0x395   : > { %v13950_v27 = vld [vmem:[#allocation3 + $0xac] sm:$0xf]  ;;  %5631 = vst [vmem:[#allocation3 + $0xb4] sm:$0xf] %v5630_v22  ;;  %v13952_v17 = vadd.f32 %v6433_v38, %v6213_v61  ;;  %v13959_v1 = vld [vmem:[#allocation3 + $0xb0] sm:$0x1]  ;;  %v6035_v38 = vor.u32 %v6034_v50, %v6031_v42 }
 0x396   : > { %v6038_v13 = vshll.u32 %v13950_v27, 16  ;;  %v5456_v10 = vshrl.u32 %v5206_v2, 16  ;;  %v4998_v51 = vmul.f32 %v13791_v30, %v4962_v12  ;;  %10783 = vmatmul.msk.bf16.gmra.mxu2 %vm6126_vm8, %v11162_v63  ;;  %v13957_v33 = vpop.f32.mrf.mxu0  ;;  %v6042_v59 = vshrl.u32 %v13950_v27, 16 }
 0x397   : > { %15908 = vst [vmem:[#allocation4_spill] sm:$0xff] %v13957_v33  ;;  %10702 = vmatmul.msk.bf16.gmra.mxu1 %vm6126_vm8, %v6123_v32  ;;  %v5459_v23 = vshll.u32 %v5206_v2, 16  ;;  %v6048_v43 = vshll.u32 %v13959_v1, 16  ;;  %v6036_v61 = vrot.slane %v6035_v38, 4 }
 0x398   : > { %v6040_v35 = vrot.slane %v6038_v13, 5  ;;  %v5458_v56 = vrot.slane %v5456_v10, 7  ;;  %v5034_v47 = vadd.f32 %v13803_v11, %v4998_v51  ;;  %v6044_v34 = vrot.slane %v6042_v59, 4 }
 0x399   : > { %v4531_v57 = vpop.f32.mrf.mxu3  ;;  %v6438_v29 = vpop.f32.mrf.mxu2  ;;  %10892 = vmatmul.msk.bf16.gmra.mxu0 %vm6126_vm8, %v11173_v5  ;;  %v6050_v59 = vrot.slane %v6048_v43, 5  ;;  %v5636_v43 = vld [vmem:[#allocation3 + $0xc0] sm:$0xf] }
 0x39a   : > { %v5461_v22 = vor.u32 %v5459_v23, %v5458_v56  ;;  %v5463_v8 = vrot.slane %v5458_v56, 4  ;;  %v5066_v14 = vmax.f32 %v5034_v47, 0.0  ;;  %v4565_v32 = vadd.f32 %v4531_v57, %v3911_v0  ;;  %v9979_v57 = vld [vmem:[%s15790_s7] sm:$0x3] }
 0x39b   : > { %v6045_v42 = vor.u32 %v6044_v34, %v6040_v35  ;;  %v6041_v38 = vsel %vm11429_vm15, %v6036_v61, %v6040_v35  ;;  %v13991_v35 = vld [vmem:[#allocation3 + $0x10] sm:$0xf] }
 0x39c   : > { %v5462_v50 = vsel %vm11500_vm6, %v5454_v62, %v5461_v22  ;;  %v5634_v2 = vsel %vm12921_vm1, %v5463_v8, %v5633_v49  ;;  %v5207_v40 = vpack.c.bf16 %v5066_v14, %v5066_v14  ;;  %v6215_v12 = vpop.f32.mrf.mxu1  ;;  %v4963_v63 = vadd.f32 %v13881_v6, %v4565_v32  ;;  %v5673_v13 = vld [vmem:[#allocation3 + $0xb4] sm:$0xf]  ;;  %v10949_v6 = vld [vmem:[%s15789_s6 + $0x18] sm:$0xf] }
 0x39d   : > { %5632 = vst.msk [vmem:[#allocation3 + $0xb8] sm:$0xf] %vm5068_vm7, %v5462_v50  ;;  %v13973_v10 = vadd.f32 %v6435_v16, %v6215_v12  ;;  %v6046_v51 = vrot.slane %v6045_v42, 4  ;;  %v6053_v23 = vshrl.u32 %v5673_v13, 16  ;;  %v6056_v47 = vshll.u32 %v5673_v13, 16 }
 0x39e   : > { %5635 = vst [vmem:[#allocation3 + $0xbc] sm:$0x1] %v5634_v2  ;;  %v5465_v0 = vshrl.u32 %v5207_v40, 16  ;;  %v4999_v5 = vmul.f32 %v13791_v30, %v4963_v63  ;;  %10810 = vmatmul.msk.bf16.gmra.mxu3 %vm6126_vm8, %v13863_v20  ;;  %v13980_v56 = vpop.f32.mrf.mxu0  ;;  %v8372_v34 = vsel %vm6175_vm9, %v10949_v6, 0  ;;  %v5468_v62 = vshll.u32 %v5207_v40, 16 }
 0x39f   : > { %15909 = vst [vmem:[#allocation7_spill] sm:$0xff] %v13980_v56  ;;  %v6051_v16 = vsel %vm11429_vm15, %v6046_v51, %v6050_v59  ;;  %8381 = vmatpush.bf16.msra.mxu3 %v8372_v34  ;;  %v6106_v8 = vunpack.c.l.b16 %v6041_v38  ;;  %v10077_v32 = vsel %vm1589_vm0, %v9979_v57, 0  ;;  %v15792_v2 = vrot.slane %v13991_v35, 5  ;;  %v11174_v34 = vld [vmem:[#allocation3 + $0x84] sm:$0xff] }
 0x3a0   : > { %v13988_v30 = vrot.slane %v5465_v0, 7  ;;  %v5035_v20 = vadd.f32 %v13803_v11, %v4999_v5  ;;  %v6107_v49 = vunpack.c.l.b16 %v6051_v16  ;;  %10086 = vmatpush.bf16.msra.mxu2 %v10077_v32  ;;  %v6055_v59 = vrot.slane %v6053_v23, 4  ;;  %v11030_v23 = vld [vmem:[%s15789_s6 + $0x1c] sm:$0xf]  ;;  %v11063_v57 = vld [vmem:[%s15789_s6 + $0x20] sm:$0xf] }
 0x3a1   : > { %v6758_v22 = vpop.f32.mrf.mxu3  ;;  %v6440_v14 = vpop.f32.mrf.mxu2  ;;  %v6058_v0 = vrot.slane %v6056_v47, 5  ;;  %v14024_v32 = vld [vmem:[#allocation3 + $0x14] sm:$0x1] }
 0x3a2   : > { %v5470_v61 = vor.u32 %v5468_v62, %v13988_v30  ;;  %v5067_v42 = vmax.f32 %v5035_v20, 0.0  ;;  %v13999_v50 = vadd.f32 %v6758_v22, %v13564_v48  ;;  %v6124_v11 = vpack.c.b16 %v6107_v49, %v6106_v8  ;;  %v7810_v62 = vld [vmem:[#allocation3 + $0xc] sm:$0xe] }
 0x3a3   : > { %v9026_v49 = vsel %vm6175_vm9, %v11030_v23, 0  ;;  %v6059_v8 = vor.u32 %v6058_v0, %v6055_v59  ;;  %v10916_v0 = vrot.slane %v7810_v62, 9  ;;  %v7879_v23 = vrot.slane %v14024_v32, 5 }
 0x3a4   : > { %v5637_v40 = vsel %vm13076_vm10, %v5470_v61, %v5636_v43  ;;  %v5208_v12 = vpack.c.bf16 %v5067_v42, %v5067_v42  ;;  %v6218_v63 = vpop.f32.mrf.mxu1  ;;  %v11163_v13 = vld [vmem:[#allocation3 + $0xb4] sm:$0xff]  ;;  %9035 = vmatpush.bf16.msra.mxu0 %v9026_v49  ;;  %v9424_v61 = vsel %vm6175_vm9, %v11063_v57, 0  ;;  %v5640_v42 = vld [vmem:[#allocation3 + $0xc8] sm:$0x1]  ;;  %v7214_v49 = vshll.u32 %v13991_v35, 16 }
 0x3a5   : > { %v14004_v51 = vld [vmem:[#allocation3 + $0xb8] sm:$0xf]  ;;  %5638 = vst [vmem:[#allocation3 + $0xc0] sm:$0xf] %v5637_v40  ;;  %v14006_v5 = vadd.f32 %v6438_v29, %v6218_v63  ;;  %v14008_v38 = vld [vmem:[#allocation3 + $0xbc] sm:$0x1]  ;;  %9433 = vmatpush.bf16.msra.mxu1 %v9424_v61 }
 0x3a6   : > { %v6062_v48 = vshll.u32 %v14004_v51, 16  ;;  %v6066_v6 = vshrl.u32 %v14004_v51, 16  ;;  %v5473_v16 = vshrl.u32 %v5208_v12, 16  ;;  %10784 = vmatmul.msk.bf16.gmra.mxu2 %vm6126_vm8, %v11163_v13  ;;  %v14013_v36 = vpop.f32.mrf.mxu0  ;;  %v6072_v20 = vshll.u32 %v14008_v38, 16  ;;  %v7156_v61 = vld [vmem:[#allocation3 + $0xc] sm:$0xf] }
 0x3a7   : > { %15910 = vst [vmem:[#allocation5_spill] sm:$0xff] %v14013_v36  ;;  %10703 = vmatmul.msk.bf16.gmra.mxu1 %vm6126_vm8, %v6124_v11  ;;  %v5476_v22 = vshll.u32 %v5208_v12, 16  ;;  %v7878_v13 = vrot.slane %v15792_v2, 4  ;;  %v6060_v2 = vrot.slane %v6059_v8, 4 }
 0x3a8   : > { %v6064_v29 = vrot.slane %v6062_v48, 5  ;;  %v6068_v47 = vrot.slane %v6066_v6, 4  ;;  %v5475_v43 = vrot.slane %v5473_v16, 7  ;;  %v5471_v48 = vrot.slane %v13988_v30, 4 }
 0x3a9   : > { %v14027_v11 = vpop.f32.mrf.mxu3  ;;  %v6443_v40 = vpop.f32.mrf.mxu2  ;;  %10893 = vmatmul.msk.bf16.gmra.mxu0 %vm6126_vm8, %v11174_v34  ;;  %v6074_v16 = vrot.slane %v6072_v20, 5  ;;  %v7218_v30 = vshrl.u32 %v13991_v35, 16 }
 0x3aa   : > { %15911 = vst [vmem:[#allocation6_spill] sm:$0xff] %v14027_v11  ;;  %v6069_v63 = vor.u32 %v6068_v47, %v6064_v29  ;;  %v5478_v12 = vor.u32 %v5476_v22, %v5475_v43  ;;  %v5480_v59 = vrot.slane %v5475_v43, 4  ;;  %v7880_v43 = vsel %vm11410_vm12, %v7878_v13, %v7879_v23  ;;  %v6498_v23 = vld [vmem:[#allocation3 + $0x78] sm:$0xe] }
 0x3ab   : > { %v6065_v9 = vsel %vm11429_vm15, %v6060_v2, %v6064_v29  ;;  %v7989_v13 = vunpack.c.l.b16 %v7880_v43  ;;  %v7220_v52 = vrot.slane %v7218_v30, 4  ;;  %v10795_v43 = vrot.slane %v6498_v23, 9  ;;  %v7811_v23 = vld [vmem:[#allocation3 + $0x18] sm:$0xe] }
 0x3ac   : > { %v6070_v6 = vrot.slane %v6069_v63, 4  ;;  %v5479_v57 = vsel %vm11500_vm6, %v5471_v48, %v5478_v12  ;;  %v5641_v34 = vsel %vm12921_vm1, %v5480_v59, %v5640_v42  ;;  %v6220_v47 = vpop.f32.mrf.mxu1  ;;  %v7205_v63 = vshrl.u32 %v7156_v61, 16 }
 0x3ad   : > { %5639 = vst.msk [vmem:[#allocation3 + $0xc4] sm:$0xf] %vm5068_vm7, %v5479_v57  ;;  %v14041_v62 = vadd.f32 %v6440_v14, %v6220_v47  ;;  %v15913_v14 = vrot.slane %v13991_v35, 5  ;;  %v7208_v48 = vshll.u32 %v7156_v61, 16  ;;  %v14058_v12 = vrot.slane %v7214_v49, 5 }
 0x3ae   : > { %v6075_v20 = vsel %vm11429_vm15, %v6070_v6, %v6074_v16  ;;  %5642 = vst [vmem:[#allocation3 + $0xc8] sm:$0x1] %v5641_v34  ;;  %10811 = vmatmul.msk.bf16.gmra.mxu3 %vm6126_vm8, %v13920_v3  ;;  %v14052_v22 = vpop.f32.mrf.mxu0  ;;  %v6108_v6 = vunpack.c.l.b16 %v6065_v9  ;;  %v6610_v16 = vrot.slane %v6608_v46, 4  ;;  %v7160_v57 = vld [vmem:[#allocation3 + $0x1c] sm:$0xf]  ;;  %v6611_v34 = vrot.slane %v13734_v31, 5 }
 0x3af   : > { %15912 = vst [vmem:[#allocation23_spill] sm:$0xff] %v14052_v22  ;;  %v6109_v8 = vunpack.c.l.b16 %v6075_v20  ;;  %v7877_v42 = vsel %vm11410_vm12, %v10916_v0, %v15913_v14  ;;  %v7207_v0 = vrot.slane %v7205_v63, 4  ;;  %v7210_v47 = vrot.slane %v7208_v48, 5 }
 0x3b0   : > { %v7988_v29 = vunpack.c.l.b16 %v7877_v42  ;;  %v7221_v49 = vor.u32 %v7220_v52, %v14058_v12  ;;  %v6612_v9 = vsel %vm11410_vm12, %v6610_v16, %v6611_v34  ;;  %v6609_v31 = vsel %vm11410_vm12, %v10795_v43, %v6608_v46  ;;  %v11175_v42 = vld [vmem:[#allocation3 + $0x90] sm:$0xff] }
 0x3b1   : > { %v6763_v59 = vpop.f32.mrf.mxu3  ;;  %v6445_v3 = vpop.f32.mrf.mxu2  ;;  %v6125_v35 = vpack.c.b16 %v6109_v8, %v6108_v6  ;;  %v7224_v8 = vshll.u32 %v14024_v32, 16  ;;  %v7211_v63 = vor.u32 %v7210_v47, %v7207_v0  ;;  %v6670_v32 = vunpack.c.l.b16 %v6609_v31 }
 0x3b2   : > { %v14061_v2 = vadd.f32 %v6763_v59, %v13720_v18  ;;  %v8020_v20 = vpack.c.b16 %v7989_v13, %v7988_v29  ;;  %v7883_v18 = vrot.slane %v7160_v57, 5  ;;  %v7222_v48 = vrot.slane %v7221_v49, 4  ;;  %v14076_v13 = vld [vmem:[#allocation3 + $0x20] sm:$0x1] }
 0x3b3   : > { %v7226_v29 = vrot.slane %v7224_v8, 5  ;;  %v7886_v46 = vrot.slane %v14076_v13, 5  ;;  %v7242_v49 = vshrl.u32 %v7160_v57, 16  ;;  %v6615_v8 = vrot.slane %v13785_v26, 5 }
 0x3b4   : > { %15914 = vst [vmem:[#allocation8_spill] sm:$0xff] %v14061_v2  ;;  %v6223_v61 = vpop.f32.mrf.mxu1  ;;  %v7885_v6 = vrot.slane %v7883_v18, 4  ;;  %v6625_v22 = vrot.slane %v13857_v7, 5  ;;  %v6639_v2 = vrot.slane %v13959_v1, 5 }
 0x3b5   : > { %v14065_v30 = vadd.f32 %v6443_v40, %v6223_v61  ;;  %v6671_v40 = vunpack.c.l.b16 %v6612_v9  ;;  %v7227_v47 = vsel %vm11429_vm15, %v7222_v48, %v7226_v29  ;;  %v7159_v61 = vld [vmem:[#allocation3 + $0x18] sm:$0xf]  ;;  %v10917_v9 = vrot.slane %v7811_v23, 9 }
 0x3b6   : > { %10933 = vmatmul.msk.bf16.vlgmr.msrb.gmra.mxu2 %vm6126_vm8, %v8020_v20  ;;  %v14070_v14 = vpop.f32.mrf.mxu0  ;;  %v7238_v20 = vshll.u32 %v7160_v57, 16  ;;  %v7232_v48 = vshll.u32 %v7159_v61, 16  ;;  %v6617_v23 = vrot.slane %v6615_v8, 4 }
 0x3b7   : > { %15915 = vst [vmem:[#allocation10_spill] sm:$0xff] %v14070_v14  ;;  %10704 = vmatmul.msk.bf16.gmra.mxu1 %vm6126_vm8, %v6125_v35  ;;  %v7212_v35 = vrot.slane %v7211_v63, 4  ;;  %v6692_v0 = vpack.c.b16 %v6671_v40, %v6670_v32  ;;  %v7591_v63 = vunpack.c.l.b16 %v7227_v47  ;;  %v7884_v57 = vsel %vm11410_vm12, %v10917_v9, %v7883_v18 }
 0x3b8   : > { %v6618_v47 = vrot.slane %v13795_v44, 5  ;;  %v14113_v44 = vld [vmem:[#allocation3 + $0x2c] sm:$0x1] }
 0x3b9   : > { %v6765_v52 = vpop.f32.mrf.mxu3  ;;  %v6448_v59 = vpop.f32.mrf.mxu2  ;;  %10894 = vmatmul.msk.bf16.gmra.mxu0 %vm6126_vm8, %v11175_v42  ;;  %v7217_v31 = vsel %vm11429_vm15, %v7212_v35, %v14058_v12  ;;  %v7990_v12 = vunpack.c.l.b16 %v7884_v57  ;;  %v6499_v35 = vld [vmem:[#allocation3 + $0x84] sm:$0xe] }
 0x3ba   : > { %v14080_v16 = vadd.f32 %v6765_v52, %v13743_v15  ;;  %v7887_v15 = vsel %vm11410_vm12, %v7885_v6, %v7886_v46  ;;  %v14098_v52 = vrot.slane %v7238_v20, 5  ;;  %v7244_v6 = vrot.slane %v7242_v49, 4  ;;  %v7163_v46 = vld [vmem:[#allocation3 + $0x28] sm:$0xf] }
 0x3bb   : > { %v7991_v40 = vunpack.c.l.b16 %v7887_v15  ;;  %v7590_v29 = vunpack.c.l.b16 %v7217_v31  ;;  %v7890_v49 = vrot.slane %v7163_v46, 5  ;;  %v10796_v31 = vrot.slane %v6499_v35, 9 }
 0x3bc   : > { %15916 = vst [vmem:[#allocation11_spill] sm:$0xff] %v14080_v16  ;;  %v6225_v34 = vpop.f32.mrf.mxu1  ;;  %v7245_v20 = vor.u32 %v7244_v6, %v14098_v52  ;;  %v6619_v14 = vsel %vm11410_vm12, %v6617_v23, %v6618_v47  ;;  %v7812_v6 = vld [vmem:[#allocation3 + $0x24] sm:$0xe]  ;;  %v7893_v35 = vrot.slane %v14113_v44, 5 }
 0x3bd   : > { %v14085_v43 = vadd.f32 %v6445_v3, %v6225_v34  ;;  %v7229_v3 = vshrl.u32 %v7159_v61, 16  ;;  %v8021_v15 = vpack.c.b16 %v7991_v40, %v7990_v12  ;;  %v7234_v61 = vrot.slane %v7232_v48, 5 }
 0x3be   : > { %10812 = vmatmul.msk.bf16.gmra.mxu3 %vm6126_vm8, %v6692_v0  ;;  %v14094_v42 = vpop.f32.mrf.mxu0  ;;  %v7622_v0 = vpack.c.b16 %v7591_v63, %v7590_v29  ;;  %v6616_v57 = vsel %vm11410_vm12, %v10796_v31, %v6615_v8  ;;  %v7246_v48 = vrot.slane %v7245_v20, 4  ;;  %v7162_v29 = vld [vmem:[#allocation3 + $0x24] sm:$0xf]  ;;  %v7266_v8 = vshrl.u32 %v7163_v46, 16 }
 0x3bf   : > { %15917 = vst [vmem:[#allocation9_spill] sm:$0xff] %v14094_v42  ;;  %v7231_v18 = vrot.slane %v7229_v3, 4  ;;  %v11176_v3 = vld [vmem:[#allocation3 + $0x9c] sm:$0xff] }
 0x3c1   : > { %v6768_v32 = vpop.f32.mrf.mxu3  ;;  %v6450_v26 = vpop.f32.mrf.mxu2  ;;  %v7235_v40 = vor.u32 %v7234_v61, %v7231_v18  ;;  %v7256_v18 = vshll.u32 %v7162_v29, 16 }
 0x3c2   : > { %v14101_v34 = vadd.f32 %v6768_v32, %v13775_v60  ;;  %v7248_v60 = vshll.u32 %v14076_v13, 16  ;;  %v7892_v32 = vrot.slane %v7890_v49, 4 }
 0x3c3   : > { %v7236_v31 = vrot.slane %v7235_v40, 4 }
 0x3c4   : > { %15918 = vst [vmem:[#allocation25_spill] sm:$0xff] %v14101_v34  ;;  %v6228_v9 = vpop.f32.mrf.mxu1  ;;  %v7250_v12 = vrot.slane %v7248_v60, 5  ;;  %v7894_v60 = vsel %vm11410_vm12, %v7892_v32, %v7893_v35 }
 0x3c5   : > { %v14105_v42 = vadd.f32 %v6448_v59, %v6228_v9  ;;  %v6673_v59 = vunpack.c.l.b16 %v6619_v14  ;;  %v7262_v9 = vshll.u32 %v7163_v46, 16  ;;  %v7253_v14 = vshrl.u32 %v7162_v29, 16 }
 0x3c6   : > { %10934 = vmatmul.msk.bf16.gmra.mxu2 %vm6126_vm8, %v8021_v15  ;;  %v14111_v63 = vpop.f32.mrf.mxu0  ;;  %v10918_v15 = vrot.slane %v7812_v6, 9  ;;  %v7241_v46 = vsel %vm11429_vm15, %v7236_v31, %v14098_v52  ;;  %v7258_v29 = vrot.slane %v7256_v18, 5  ;;  %v7272_v18 = vshll.u32 %v14113_v44, 16  ;;  %v14157_v44 = vld [vmem:[#allocation3 + $0x40] sm:$0xf] }
 0x3c7   : > { %15919 = vst [vmem:[#allocation12_spill] sm:$0xff] %v14111_v63  ;;  %10900 = vmatmul.msk.bf16.vlgmr.msrb.gmra.mxu1 %vm6126_vm8, %v7622_v0  ;;  %v6672_v0 = vunpack.c.l.b16 %v6616_v57  ;;  %v7251_v63 = vsel %vm11429_vm15, %v7246_v48, %v7250_v12  ;;  %v7165_v57 = vld [vmem:[#allocation3 + $0x30] sm:$0xf]  ;;  %v14138_v40 = vrot.slane %v7262_v9, 5  ;;  %v7268_v48 = vrot.slane %v7266_v8, 4 }
 0x3c8   : > { %v7593_v6 = vunpack.c.l.b16 %v7251_v63  ;;  %v7255_v32 = vrot.slane %v7253_v14, 4  ;;  %v7277_v35 = vshrl.u32 %v7165_v57, 16  ;;  %v7592_v31 = vunpack.c.l.b16 %v7241_v46  ;;  %v6500_v8 = vld [vmem:[#allocation3 + $0x90] sm:$0xe] }
 0x3c9   : > { %v6770_v23 = vpop.f32.mrf.mxu3  ;;  %v6453_v13 = vpop.f32.mrf.mxu2  ;;  %10895 = vmatmul.msk.bf16.gmra.mxu0 %vm6126_vm8, %v11176_v3  ;;  %v6693_v20 = vpack.c.b16 %v6673_v59, %v6672_v0  ;;  %v7891_v59 = vsel %vm11410_vm12, %v10918_v15, %v7890_v49  ;;  %v7280_v15 = vshll.u32 %v7165_v57, 16  ;;  %v7269_v14 = vor.u32 %v7268_v48, %v14138_v40 }
 0x3ca   : > { %v14121_v47 = vadd.f32 %v6770_v23, %v13810_v54  ;;  %v6622_v54 = vrot.slane %v13850_v45, 5  ;;  %v14130_v23 = vld [vmem:[#allocation3 + $0x34] sm:$0xf]  ;;  %v7992_v49 = vunpack.c.l.b16 %v7891_v59  ;;  %v7279_v46 = vrot.slane %v7277_v35, 4 }
 0x3cb   : > { %v7897_v12 = vrot.slane %v14130_v23, 5  ;;  %v7286_v0 = vshll.u32 %v14130_v23, 16  ;;  %v7270_v7 = vrot.slane %v7269_v14, 4 }
 0x3cc   : > { %15920 = vst [vmem:[#allocation24_spill] sm:$0xff] %v14121_v47  ;;  %v6230_v61 = vpop.f32.mrf.mxu1  ;;  %v6624_v9 = vrot.slane %v6622_v54, 4  ;;  %v7259_v47 = vor.u32 %v7258_v29, %v7255_v32  ;;  %v11177_v29 = vld [vmem:[#allocation3 + $0xa8] sm:$0xff] }
 0x3cd   : > { %v14127_v3 = vadd.f32 %v6450_v26, %v6230_v61  ;;  %v7993_v26 = vunpack.c.l.b16 %v7894_v60  ;;  %v7290_v61 = vshrl.u32 %v14130_v23, 16  ;;  %v7623_v60 = vpack.c.b16 %v7593_v6, %v7592_v31  ;;  %v7167_v23 = vld [vmem:[#allocation3 + $0x38] sm:$0x1]  ;;  %v7813_v6 = vld [vmem:[#allocation3 + $0x30] sm:$0xe] }
 0x3ce   : > { %10813 = vmatmul.msk.bf16.gmra.mxu3 %vm6126_vm8, %v6693_v20  ;;  %v14140_v45 = vpop.f32.mrf.mxu0  ;;  %v7899_v34 = vrot.slane %v7897_v12, 4  ;;  %v14151_v59 = vrot.slane %v7286_v0, 5  ;;  %v6626_v48 = vsel %vm11410_vm12, %v6624_v9, %v6625_v22  ;;  %v7904_v0 = vrot.slane %v14157_v44, 5 }
 0x3cf   : > { %15921 = vst [vmem:[#allocation22_spill] sm:$0xff] %v14140_v45  ;;  %v8022_v45 = vpack.c.b16 %v7993_v26, %v7992_v49  ;;  %v7292_v57 = vrot.slane %v7290_v61, 4  ;;  %v7900_v26 = vrot.slane %v7167_v23, 5  ;;  %v7260_v31 = vrot.slane %v7259_v47, 4 }
 0x3d0   : > { %v10919_v49 = vrot.slane %v7813_v6, 9  ;;  %v7296_v14 = vshll.u32 %v7167_v23, 16  ;;  %v7906_v6 = vrot.slane %v7904_v0, 4 }
 0x3d1   : > { %v6773_v52 = vpop.f32.mrf.mxu3  ;;  %v6455_v20 = vpop.f32.mrf.mxu2  ;;  %v7901_v35 = vsel %vm11410_vm12, %v7899_v34, %v7900_v26  ;;  %v7293_v22 = vor.u32 %v7292_v57, %v14151_v59  ;;  %v7168_v26 = vld [vmem:[#allocation3 + $0x3c] sm:$0xf] }
 0x3d2   : > { %v14146_v63 = vadd.f32 %v6773_v52, %v13842_v41  ;;  %v10797_v41 = vrot.slane %v6500_v8, 9  ;;  %v7282_v52 = vrot.slane %v7280_v15, 5  ;;  %v7898_v47 = vsel %vm11410_vm12, %v10919_v49, %v7897_v12 }
 0x3d3   : > { %v7995_v57 = vunpack.c.l.b16 %v7901_v35  ;;  %v7298_v12 = vrot.slane %v7296_v14, 5 }
 0x3d4   : > { %15922 = vst [vmem:[#allocation17_spill] sm:$0xff] %v14146_v63  ;;  %v6233_v36 = vpop.f32.mrf.mxu1  ;;  %v6623_v32 = vsel %vm11410_vm12, %v10797_v41, %v6622_v54  ;;  %v7283_v9 = vor.u32 %v7282_v52, %v7279_v46  ;;  %v14180_v46 = vld [vmem:[#allocation3 + $0x44] sm:$0x1]  ;;  %v7294_v52 = vrot.slane %v7293_v22, 4  ;;  %v7304_v22 = vshll.u32 %v7168_v26, 16 }
 0x3d5   : > { %v14153_v56 = vadd.f32 %v6453_v13, %v6233_v36  ;;  %v7274_v36 = vrot.slane %v7272_v18, 5  ;;  %v6675_v13 = vunpack.c.l.b16 %v6626_v48  ;;  %v6674_v8 = vunpack.c.l.b16 %v6623_v32  ;;  %v7814_v18 = vld [vmem:[#allocation3 + $0x3c] sm:$0xe] }
 0x3d6   : > { %10935 = vmatmul.msk.bf16.gmra.mxu2 %vm6126_vm8, %v8022_v45  ;;  %v14171_v54 = vpop.f32.mrf.mxu0  ;;  %v6629_v48 = vrot.slane %v13907_v55, 5  ;;  %v7284_v32 = vrot.slane %v7283_v9, 4  ;;  %v7907_v35 = vrot.slane %v14180_v46, 5 }
 0x3d7   : > { %10901 = vmatmul.msk.bf16.gmra.mxu1 %vm6126_vm8, %v7623_v60  ;;  %15924 = vst [vmem:[#allocation28_spill] sm:$0xff] %v14171_v54  ;;  %v7275_v34 = vsel %vm11429_vm15, %v7270_v7, %v7274_v36  ;;  %v7265_v60 = vsel %vm11429_vm15, %v7260_v31, %v14138_v40  ;;  %v6694_v41 = vpack.c.b16 %v6675_v13, %v6674_v8  ;;  %v7994_v36 = vunpack.c.l.b16 %v7898_v47 }
 0x3d8   : > { %v7595_v23 = vunpack.c.l.b16 %v7275_v34  ;;  %v7594_v40 = vunpack.c.l.b16 %v7265_v60  ;;  %v7289_v13 = vsel %vm11429_vm15, %v7284_v32, %v14151_v59  ;;  %v7299_v31 = vsel %vm11429_vm15, %v7294_v52, %v7298_v12  ;;  %v6501_v59 = vld [vmem:[#allocation3 + $0x9c] sm:$0xe]  ;;  %v14223_v12 = vld [vmem:[#allocation3 + $0x28] sm:$0xf]  ;;  %v14232_v52 = vld [vmem:[#allocation3 + $0x2c] sm:$0x1] }
 0x3d9   : > { %v6775_v61 = vpop.f32.mrf.mxu3  ;;  %v6458_v45 = vpop.f32.mrf.mxu2  ;;  %10896 = vmatmul.msk.bf16.gmra.mxu0 %vm6126_vm8, %v11177_v29  ;;  %v10920_v29 = vrot.slane %v7814_v18, 9  ;;  %v14198_v49 = vsel %vm11410_vm12, %v7906_v6, %v7907_v35  ;;  %v8023_v14 = vpack.c.b16 %v7995_v57, %v7994_v36  ;;  %v7310_v18 = vshll.u32 %v14157_v44, 16  ;;  %v8496_v60 = vld [vmem:[#allocation3 + $0x1c] sm:$0xf]  ;;  %v9149_v6 = vld [vmem:[#allocation3 + $0x18] sm:$0xe] }
 0x3da   : > { %v14169_v15 = vadd.f32 %v6775_v61, %v13867_v21  ;;  %v6631_v61 = vrot.slane %v6629_v48, 4  ;;  %v7624_v34 = vpack.c.b16 %v7595_v23, %v7594_v40  ;;  %v7306_v32 = vrot.slane %v7304_v22, 5  ;;  %v8495_v22 = vld [vmem:[#allocation3 + $0x18] sm:$0xf] }
 0x3db   : > { %v14192_v55 = vsel %vm11410_vm12, %v10920_v29, %v7904_v0  ;;  %v7314_v0 = vshrl.u32 %v14157_v44, 16  ;;  %v14216_v29 = vld [vmem:[#allocation3 + $0x20] sm:$0x1]  ;;  %v7320_v36 = vshll.u32 %v14180_v46, 16  ;;  %v9215_v35 = vrot.slane %v8496_v60, 5 }
 0x3dc   : > { %15923 = vst [vmem:[#allocation26_spill] sm:$0xff] %v14169_v15  ;;  %v6235_v21 = vpop.f32.mrf.mxu1  ;;  %v8553_v57 = vshll.u32 %v8496_v60, 16  ;;  %v9218_v46 = vrot.slane %v14216_v29, 5 }
 0x3dd   : > { %v14183_v7 = vadd.f32 %v6455_v20, %v6235_v21  ;;  %v7301_v20 = vshrl.u32 %v7168_v26, 16  ;;  %v6632_v21 = vrot.slane %v13914_v53, 5  ;;  %v14211_v26 = vunpack.c.l.b16 %v7299_v31 }
 0x3de   : > { %10814 = vmatmul.msk.bf16.gmra.mxu3 %vm6126_vm8, %v6694_v41  ;;  %v14208_v41 = vunpack.c.l.b16 %v7289_v13  ;;  %v14218_v40 = vpop.f32.mrf.mxu0  ;;  %v14227_v31 = vrot.slane %v7310_v18, 5  ;;  %v8557_v18 = vshrl.u32 %v8496_v60, 16  ;;  %v8547_v60 = vshll.u32 %v8495_v22, 16 }
 0x3df   : > { %v14214_v23 = vrot.slane %v7301_v20, 4  ;;  %15926 = vst [vmem:[#allocation14_spill] sm:$0xff] %v14218_v40  ;;  %v6633_v53 = vsel %vm11410_vm12, %v6631_v61, %v6632_v21  ;;  %v7316_v20 = vrot.slane %v7314_v0, 4  ;;  %v9217_v61 = vrot.slane %v9215_v35, 4  ;;  %v11178_v21 = vld [vmem:[#allocation3 + $0xb4] sm:$0xff] }
 0x3e0   : > { %v14254_v16 = vrot.slane %v8553_v57, 5  ;;  %v6636_v57 = vrot.slane %v13950_v27, 5 }
 0x3e1   : > { %v6778_v9 = vpop.f32.mrf.mxu3  ;;  %v14200_v8 = vpop.f32.mrf.mxu2  ;;  %v9219_v40 = vsel %vm11410_vm12, %v9217_v61, %v9218_v46  ;;  %v7317_v61 = vor.u32 %v7316_v20, %v14227_v31  ;;  %v7815_v46 = vld [vmem:[#allocation3 + $0x48] sm:$0xe] }
 0x3e2   : > { %v14205_v47 = vadd.f32 %v6778_v9, %v13905_v25  ;;  %v10798_v25 = vrot.slane %v6501_v59, 9  ;;  %v11047_v9 = vrot.slane %v9149_v6, 9  ;;  %v9150_v6 = vld [vmem:[#allocation3 + $0x24] sm:$0xe] }
 0x3e4   : > { %15925 = vst [vmem:[#allocation27_spill] sm:$0xff] %v14205_v47  ;;  %v6238_v44 = vpop.f32.mrf.mxu1  ;;  %v6630_v59 = vsel %vm11410_vm12, %v10798_v25, %v6629_v48  ;;  %v9216_v0 = vsel %vm11410_vm12, %v11047_v9, %v9215_v35  ;;  %v8544_v25 = vshrl.u32 %v8495_v22, 16  ;;  %v14247_v35 = vld [vmem:[#allocation3 + $0x34] sm:$0xf]  ;;  %v9328_v9 = vunpack.c.l.b16 %v9219_v40  ;;  %v14256_v22 = vld [vmem:[#allocation3 + $0x4c] sm:$0xf] }
 0x3e5   : > { %v14225_v13 = vadd.f32 %v6458_v45, %v6238_v44  ;;  %v6677_v45 = vunpack.c.l.b16 %v6633_v53  ;;  %v7307_v44 = vor.u32 %v7306_v32, %v14214_v23  ;;  %v6676_v53 = vunpack.c.l.b16 %v6630_v59 }
 0x3e6   : > { %10936 = vmatmul.msk.bf16.gmra.mxu2 %vm6126_vm8, %v8023_v14  ;;  %v9222_v14 = vrot.slane %v14223_v12, 5  ;;  %v9327_v48 = vunpack.c.l.b16 %v9216_v0  ;;  %v11048_v23 = vrot.slane %v9150_v6, 9  ;;  %v9225_v32 = vrot.slane %v14232_v52, 5  ;;  %v14269_v0 = vld [vmem:[#allocation3 + $0x38] sm:$0x1]  ;;  %v14271_v6 = vpop.f32.mrf.mxu0 }
 0x3e7   : > { %10902 = vmatmul.msk.bf16.gmra.mxu1 %vm6126_vm8, %v7624_v34  ;;  %v6695_v63 = vpack.c.b16 %v6677_v45, %v6676_v53  ;;  %v8559_v59 = vrot.slane %v8557_v18, 4  ;;  %v9229_v40 = vrot.slane %v14247_v35, 5  ;;  %v8546_v20 = vrot.slane %v8544_v25, 4  ;;  %15930 = vst [vmem:[#allocation16_spill] sm:$0xff] %v14271_v6  ;;  %v8498_v25 = vld [vmem:[#allocation3 + $0x24] sm:$0xf] }
 0x3e8   : > { %v9224_v47 = vrot.slane %v9222_v14, 4  ;;  %v14258_v33 = vpack.c.b16 %v9328_v9, %v9327_v48  ;;  %v8549_v18 = vrot.slane %v8547_v60, 5  ;;  %v15932_v48 = vunpack.c.l.b16 %v14198_v49 }
 0x3e9   : > { %v6780_v54 = vpop.f32.mrf.mxu3  ;;  %v14244_v34 = vpop.f32.mrf.mxu2  ;;  %10897 = vmatmul.msk.bf16.gmra.mxu0 %vm6126_vm8, %v11178_v21  ;;  %v7308_v53 = vrot.slane %v7307_v44, 4  ;;  %v7322_v9 = vrot.slane %v7320_v36, 5  ;;  %v8560_v27 = vor.u32 %v8559_v59, %v14254_v16  ;;  %v8563_v6 = vshll.u32 %v14216_v29, 16  ;;  %v14282_v44 = vld [vmem:[#allocation3 + $0x50] sm:$0x1] }
 0x3ea   : > { %v14250_v15 = vadd.f32 %v6780_v54, %v13932_v24  ;;  %15928 = vst [vmem:[#allocation30_spill] sm:$0xff] %v14258_v33  ;;  %v9223_v24 = vsel %vm11410_vm12, %v11048_v23, %v9222_v14  ;;  %v9226_v54 = vsel %vm11410_vm12, %v9224_v47, %v9225_v32  ;;  %v15931_v14 = vunpack.c.l.b16 %v14192_v55 }
 0x3eb   : > { %v10921_v23 = vrot.slane %v7815_v46, 9  ;;  %v7911_v32 = vrot.slane %v14256_v22, 5  ;;  %v9329_v60 = vunpack.c.l.b16 %v9223_v24  ;;  %v7318_v33 = vrot.slane %v7317_v61, 4  ;;  %v6502_v24 = vld [vmem:[#allocation3 + $0xa8] sm:$0xe] }
 0x3ec   : > { %15927 = vst [vmem:[#allocation29_spill] sm:$0xff] %v14250_v15  ;;  %v6240_v21 = vpop.f32.mrf.mxu1  ;;  %v8024_v47 = vpack.c.b16 %v15932_v48, %v15931_v14  ;;  %v9232_v55 = vrot.slane %v14269_v0, 5  ;;  %v6638_v14 = vrot.slane %v6636_v57, 4  ;;  %v8550_v36 = vor.u32 %v8549_v18, %v8546_v20 }
 0x3ed   : > { %v14266_v45 = vadd.f32 %v14200_v8, %v6240_v21  ;;  %v9151_v8 = vld [vmem:[#allocation3 + $0x30] sm:$0xe]  ;;  %v9330_v21 = vunpack.c.l.b16 %v9226_v54  ;;  %v8568_v54 = vshrl.u32 %v8498_v25, 16  ;;  %v8571_v61 = vshll.u32 %v8498_v25, 16 }
 0x3ee   : > { %10815 = vmatmul.msk.bf16.gmra.mxu3 %vm6126_vm8, %v6695_v63  ;;  %v9231_v63 = vrot.slane %v9229_v40, 4  ;;  %v11049_v48 = vrot.slane %v9151_v8, 9  ;;  %v7913_v37 = vrot.slane %v7911_v32, 4  ;;  %v7313_v18 = vsel %vm11429_vm15, %v7308_v53, %v14227_v31 }
 0x3ef   : > { %15929 = vst [vmem:[#allocation13_spill] sm:$0xff] %v14266_v45  ;;  %v14284_v46 = vpack.c.b16 %v9330_v21, %v9329_v60  ;;  %v8561_v45 = vrot.slane %v8560_v27, 4  ;;  %v8565_v8 = vrot.slane %v8563_v6, 5  ;;  %v10799_v1 = vrot.slane %v6502_v24, 9  ;;  %v11179_v6 = vld [vmem:[#allocation3 + $0xc0] sm:$0xff] }
 0x3f0   : > { %v9233_v29 = vsel %vm11410_vm12, %v9231_v63, %v9232_v55  ;;  %v9230_v11 = vsel %vm11410_vm12, %v11049_v48, %v9229_v40  ;;  %v6640_v27 = vsel %vm11410_vm12, %v6638_v14, %v6639_v2  ;;  %v8551_v60 = vrot.slane %v8550_v36, 4  ;;  %v14329_v36 = vld [vmem:[#allocation3 + $0x40] sm:$0xf] }
 0x3f1   : > { %v6783_v15 = vpop.f32.mrf.mxu3  ;;  %v6465_v49 = vpop.f32.mrf.mxu2  ;;  %15933 = vst [vmem:[#allocation15_spill] sm:$0xff] %v14284_v46  ;;  %v7912_v40 = vsel %vm11410_vm12, %v10921_v23, %v7911_v32  ;;  %v8570_v31 = vrot.slane %v8568_v54, 4  ;;  %v9331_v53 = vunpack.c.l.b16 %v9230_v11  ;;  %v9332_v21 = vunpack.c.l.b16 %v9233_v29 }
 0x3f2   : > { %v14287_v59 = vadd.f32 %v6783_v15, %v13952_v17  ;;  %v7323_v17 = vsel %vm11429_vm15, %v7318_v33, %v7322_v9  ;;  %v7914_v15 = vrot.slane %v14282_v44, 5  ;;  %v15934_v33 = vpack.c.b16 %v14211_v26, %v14208_v41  ;;  %v14318_v23 = vpop.f32.mrf.mxu0  ;;  %v8501_v26 = vld [vmem:[#allocation3 + $0x30] sm:$0xf] }
 0x3f3   : > { %v8573_v9 = vrot.slane %v8571_v61, 5  ;;  %v6679_v11 = vunpack.c.l.b16 %v6640_v27  ;;  %v8577_v32 = vshll.u32 %v14223_v12, 16  ;;  %v8581_v41 = vshrl.u32 %v14223_v12, 16 }
 0x3f4   : > { %v6243_v20 = vpop.f32.mrf.mxu1  ;;  %v7915_v2 = vsel %vm11410_vm12, %v7913_v37, %v7914_v15  ;;  %v14322_v63 = vpack.c.b16 %v9332_v21, %v9331_v53  ;;  %v14325_v14 = vunpack.c.l.b16 %v7313_v18  ;;  %v14327_v37 = vunpack.c.l.b16 %v7323_v17  ;;  %v7171_v21 = vld [vmem:[#allocation3 + $0x48] sm:$0xf] }
 0x3f5   : > { %v14301_v25 = vadd.f32 %v14244_v34, %v6243_v20  ;;  %v6637_v34 = vsel %vm11410_vm12, %v10799_v1, %v6636_v57  ;;  %v7999_v54 = vunpack.c.l.b16 %v7915_v2  ;;  %v8556_v12 = vsel %vm11429_vm15, %v8551_v60, %v14254_v16  ;;  %v14348_v60 = vld [vmem:[#allocation3 + $0x44] sm:$0x1] }
 0x3f6   : > { %10937 = vmatmul.msk.bf16.gmra.mxu2 %vm6126_vm8, %v8024_v47  ;;  %v8566_v47 = vsel %vm11429_vm15, %v8561_v45, %v8565_v8  ;;  %15935 = vst [vmem:[#allocation32_spill] sm:$0xff] %v14322_v63  ;;  %v7998_v45 = vunpack.c.l.b16 %v7912_v40  ;;  %v6678_v24 = vunpack.c.l.b16 %v6637_v34  ;;  %v8574_v29 = vor.u32 %v8573_v9, %v8570_v31  ;;  %v9152_v9 = vld [vmem:[#allocation3 + $0x3c] sm:$0xe] }
 0x3f7   : > { %10903 = vmatmul.msk.bf16.gmra.mxu1 %vm6126_vm8, %v15934_v33  ;;  %v14337_v61 = vunpack.c.l.b16 %v8566_v47  ;;  %v8592_v20 = vshrl.u32 %v8501_v26, 16  ;;  %v8595_v18 = vshll.u32 %v8501_v26, 16  ;;  %v14339_v8 = vrot.slane %v8577_v32, 5 }
 0x3f8   : > { %v6696_v17 = vpack.c.b16 %v6679_v11, %v6678_v24  ;;  %v8583_v1 = vrot.slane %v8581_v41, 4  ;;  %v9236_v27 = vrot.slane %v14329_v36, 5  ;;  %v6643_v40 = vrot.slane %v14004_v51, 5 }
 0x3f9   : > { %v6785_v55 = vpop.f32.mrf.mxu3  ;;  %v6468_v57 = vpop.f32.mrf.mxu2  ;;  %10898 = vmatmul.msk.bf16.gmra.mxu0 %vm6126_vm8, %v11179_v6  ;;  %v14345_v53 = vunpack.c.l.b16 %v8556_v12  ;;  %v7334_v16 = vshll.u32 %v14256_v22, 16  ;;  %v7626_v31 = vpack.c.b16 %v14327_v37, %v14325_v14  ;;  %v8025_v33 = vpack.c.b16 %v7999_v54, %v7998_v45 }
 0x3fa   : > { %v14332_v48 = vadd.f32 %v6785_v55, %v13973_v10  ;;  %v7338_v34 = vshrl.u32 %v14256_v22, 16  ;;  %v8575_v6 = vrot.slane %v8574_v29, 4  ;;  %v14357_v2 = vrot.slane %v8592_v20, 4  ;;  %v6503_v22 = vld [vmem:[#allocation3 + $0xb4] sm:$0xe]  ;;  %v14366_v54 = vpop.f32.mrf.mxu0 }
 0x3fb   : > { %v8961_v51 = vpack.c.b16 %v14337_v61, %v14345_v53  ;;  %v8597_v47 = vrot.slane %v8595_v18, 5  ;;  %v7325_v11 = vshrl.u32 %v7171_v21, 16  ;;  %v8601_v32 = vshll.u32 %v14247_v35, 16  ;;  %15936 = vst [vmem:[#allocation31_spill] sm:$0xff] %v14366_v54  ;;  %v14371_v29 = vld [vmem:[#allocation3 + $0x58] sm:$0xf] }
 0x3fc   : > { %v6245_v15 = vpop.f32.mrf.mxu1  ;;  %v9238_v41 = vrot.slane %v9236_v27, 4  ;;  %v9239_v26 = vrot.slane %v14348_v60, 5  ;;  %v6645_v37 = vrot.slane %v6643_v40, 4  ;;  %v14363_v45 = vrot.slane %v7334_v16, 5 }
 0x3fd   : > { %v14342_v10 = vadd.f32 %v6465_v49, %v6245_v15  ;;  %v8587_v49 = vshll.u32 %v14232_v52, 16  ;;  %v7328_v52 = vshll.u32 %v7171_v21, 16  ;;  %v8584_v24 = vor.u32 %v8583_v1, %v14339_v8 }
 0x3fe   : > { %10816 = vmatmul.msk.bf16.gmra.mxu3 %vm6126_vm8, %v6696_v17  ;;  %v7340_v61 = vrot.slane %v7338_v34, 4  ;;  %v11050_v20 = vrot.slane %v9152_v9, 9  ;;  %v9240_v18 = vsel %vm11410_vm12, %v9238_v41, %v9239_v26  ;;  %v6646_v15 = vrot.slane %v14008_v38, 5 }
 0x3ff   : > { %v8580_v17 = vsel %vm11429_vm15, %v8575_v6, %v14339_v8  ;;  %v8589_v53 = vrot.slane %v8587_v49, 5  ;;  %v8605_v1 = vshrl.u32 %v14247_v35, 16  ;;  %v10800_v16 = vrot.slane %v6503_v22, 9  ;;  %v14388_v8 = vld [vmem:[#allocation3 + $0x3c] sm:$0xf] }
 0x400   : > { %v8598_v34 = vor.u32 %v8597_v47, %v14357_v2  ;;  %v9237_v9 = vsel %vm11410_vm12, %v11050_v20, %v9236_v27  ;;  %v6647_v38 = vsel %vm11410_vm12, %v6645_v37, %v6646_v15  ;;  %v7330_v41 = vrot.slane %v7328_v52, 5  ;;  %v14399_v52 = vld [vmem:[#allocation3 + $0x5c] sm:$0x1] }
 0x401   : > { %v6788_v55 = vpop.f32.mrf.mxu3  ;;  %v14361_v14 = vpop.f32.mrf.mxu2  ;;  %v7918_v26 = vrot.slane %v14371_v29, 5  ;;  %v7341_v35 = vor.u32 %v7340_v61, %v14363_v45  ;;  %v8585_v49 = vrot.slane %v8584_v24, 4  ;;  %v14392_v6 = vrot.slane %v8601_v32, 5 }
 0x402   : > { %v14369_v12 = vadd.f32 %v6788_v55, %v14006_v5  ;;  %v7327_v5 = vrot.slane %v7325_v11, 4  ;;  %v8611_v2 = vshll.u32 %v14269_v0, 16  ;;  %v8607_v27 = vrot.slane %v8605_v1, 4 }
 0x403   : > { %v9333_v47 = vunpack.c.l.b16 %v9237_v9  ;;  %v9334_v11 = vunpack.c.l.b16 %v9240_v18  ;;  %v6681_v22 = vunpack.c.l.b16 %v6647_v38  ;;  %v7344_v37 = vshll.u32 %v14282_v44, 16  ;;  %v14408_v18 = vld [vmem:[#allocation3 + $0x4c] sm:$0xf]  ;;  %v14423_v38 = vpop.f32.mrf.mxu0 }
 0x404   : > { %v6248_v21 = vpop.f32.mrf.mxu1  ;;  %v8616_v32 = vshrl.u32 %v14388_v8, 16  ;;  %v7331_v0 = vor.u32 %v7330_v41, %v7327_v5  ;;  %v8619_v20 = vshll.u32 %v14388_v8, 16  ;;  %v7342_v1 = vrot.slane %v7341_v35, 4  ;;  %15938 = vst [vmem:[#allocation33_spill] sm:$0xff] %v14423_v38 }
 0x405   : > { %v14383_v55 = vadd.f32 %v6468_v57, %v6248_v21  ;;  %v6644_v57 = vsel %vm11410_vm12, %v10800_v16, %v6643_v40  ;;  %v7920_v40 = vrot.slane %v7918_v26, 4  ;;  %v14410_v15 = vpack.c.b16 %v9334_v11, %v9333_v47  ;;  %v7174_v11 = vld [vmem:[#allocation3 + $0x54] sm:$0xf] }
 0x406   : > { %10938 = vmatmul.msk.bf16.gmra.mxu2 %vm6126_vm8, %v8025_v33  ;;  %v14401_v33 = vunpack.c.l.b16 %v8580_v17  ;;  %v6680_v17 = vunpack.c.l.b16 %v6644_v57  ;;  %v8590_v21 = vsel %vm11429_vm15, %v8585_v49, %v8589_v53  ;;  %v7921_v16 = vrot.slane %v14399_v52, 5 }
 0x407   : > { %10904 = vmatmul.msk.bf16.gmra.mxu1 %vm6126_vm8, %v7626_v31  ;;  %v7816_v31 = vld [vmem:[#allocation3 + $0x54] sm:$0xe]  ;;  %15937 = vst [vmem:[#allocation34_spill] sm:$0xff] %v14410_v15  ;;  %v8608_v5 = vor.u32 %v8607_v27, %v14392_v6  ;;  %v14421_v9 = vrot.slane %v8611_v2, 5  ;;  %v7346_v47 = vrot.slane %v7344_v37, 5  ;;  %v9243_v57 = vrot.slane %v14408_v18, 5 }
 0x408   : > { %v6697_v8 = vpack.c.b16 %v6681_v22, %v6680_v17  ;;  %v7332_v53 = vrot.slane %v7331_v0, 4  ;;  %v8932_v49 = vunpack.c.l.b16 %v8590_v21  ;;  %v14431_v27 = vld [vmem:[#allocation3 + $0x50] sm:$0x1]  ;;  %v7358_v37 = vshll.u32 %v14371_v29, 16 }
 0x409   : > { %v6790_v24 = vpop.f32.mrf.mxu3  ;;  %v14404_v61 = vpop.f32.mrf.mxu2  ;;  %11031 = vmatmul.msk.bf16.vlgmr.msra.gmra.mxu0 %vm6126_vm8, %v8961_v51  ;;  %v14418_v51 = vrot.slane %v8598_v34, 4  ;;  %v7922_v34 = vsel %vm11410_vm12, %v7920_v40, %v7921_v16  ;;  %v7347_v2 = vsel %vm11429_vm15, %v7342_v1, %v7346_v47  ;;  %v8625_v40 = vshll.u32 %v14329_v36, 16 }
 0x40a   : > { %v14413_v44 = vadd.f32 %v6790_v24, %v14041_v62  ;;  %v10922_v62 = vrot.slane %v7816_v31, 9  ;;  %v9153_v24 = vld [vmem:[#allocation3 + $0x48] sm:$0xe]  ;;  %v7337_v0 = vsel %vm11429_vm15, %v7332_v53, %v14363_v45  ;;  %v8609_v31 = vrot.slane %v8608_v5, 4  ;;  %v14451_v53 = vld [vmem:[#allocation3 + $0x64] sm:$0xf] }
 0x40b   : > { %v8629_v17 = vshrl.u32 %v14329_v36, 16  ;;  %v8001_v21 = vunpack.c.l.b16 %v7922_v34  ;;  %v7349_v16 = vshrl.u32 %v7174_v11, 16  ;;  %v9245_v1 = vrot.slane %v9243_v57, 4 }
 0x40c   : > { %v6250_v41 = vpop.f32.mrf.mxu1  ;;  %v7919_v22 = vsel %vm11410_vm12, %v10922_v62, %v7918_v26  ;;  %v7601_v47 = vunpack.c.l.b16 %v7347_v2  ;;  %v11051_v15 = vrot.slane %v9153_v24, 9  ;;  %v14449_v45 = vrot.slane %v7358_v37, 5 }
 0x40d   : > { %v14427_v35 = vadd.f32 %v14361_v14, %v6250_v41  ;;  %v7362_v14 = vshrl.u32 %v14371_v29, 16  ;;  %v9246_v41 = vrot.slane %v14431_v27, 5  ;;  %v8000_v62 = vunpack.c.l.b16 %v7919_v22 }
 0x40e   : > { %10817 = vmatmul.msk.bf16.gmra.mxu3 %vm6126_vm8, %v6697_v8  ;;  %v7352_v29 = vshll.u32 %v7174_v11, 16  ;;  %v7600_v34 = vunpack.c.l.b16 %v7337_v0  ;;  %v8618_v46 = vrot.slane %v8616_v32, 4  ;;  %v8621_v38 = vrot.slane %v8619_v20, 5 }
 0x40f   : > { %v7364_v5 = vrot.slane %v7362_v14, 4  ;;  %v9247_v36 = vsel %vm11410_vm12, %v9245_v1, %v9246_v41  ;;  %v14455_v54 = vrot.slane %v8625_v40, 5  ;;  %v8026_v22 = vpack.c.b16 %v8001_v21, %v8000_v62  ;;  %v14463_v1 = vpop.f32.mrf.mxu0 }
 0x410   : > { %v7351_v11 = vrot.slane %v7349_v16, 4  ;;  %v8631_v24 = vrot.slane %v8629_v17, 4  ;;  %v7627_v14 = vpack.c.b16 %v7601_v47, %v7600_v34  ;;  %15940 = vst [vmem:[#allocation19_spill] sm:$0xff] %v14463_v1  ;;  %v8962_v32 = vpack.c.b16 %v8932_v49, %v14401_v33  ;;  %v14478_v49 = vld [vmem:[#allocation3 + $0x68] sm:$0x1] }
 0x411   : > { %v6793_v26 = vpop.f32.mrf.mxu3  ;;  %v6475_v8 = vpop.f32.mrf.mxu2  ;;  %v7365_v20 = vor.u32 %v7364_v5, %v14449_v45  ;;  %v8622_v0 = vor.u32 %v8621_v38, %v8618_v46  ;;  %v8635_v40 = vshll.u32 %v14348_v60, 16  ;;  %v9336_v21 = vunpack.c.l.b16 %v9247_v36  ;;  %v14484_v46 = vld [vmem:[#allocation3 + $0x58] sm:$0xf] }
 0x412   : > { %v14447_v63 = vadd.f32 %v6793_v26, %v14065_v30  ;;  %v9244_v30 = vsel %vm11410_vm12, %v11051_v15, %v9243_v57  ;;  %v7354_v26 = vrot.slane %v7352_v29, 5  ;;  %v8604_v15 = vsel %vm11429_vm15, %v14418_v51, %v14392_v6  ;;  %v8507_v57 = vld [vmem:[#allocation3 + $0x48] sm:$0xf] }
 0x413   : > { %v9335_v17 = vunpack.c.l.b16 %v9244_v30  ;;  %v7368_v33 = vshll.u32 %v14399_v52, 16  ;;  %v8632_v16 = vor.u32 %v8631_v24, %v14455_v54  ;;  %v8640_v47 = vshrl.u32 %v8507_v57, 16 }
 0x414   : > { %15939 = vst [vmem:[#allocation18_spill] sm:$0xff] %v14447_v63  ;;  %v6253_v2 = vpop.f32.mrf.mxu1  ;;  %v7925_v63 = vrot.slane %v14451_v53, 5  ;;  %v7355_v51 = vor.u32 %v7354_v26, %v7351_v11  ;;  %v7366_v52 = vrot.slane %v7365_v20, 4  ;;  %v14491_v62 = vunpack.c.l.b16 %v8604_v15  ;;  %v11180_v11 = vld [vmem:[#allocation3 + $0x18] sm:$0xff]  ;;  %v7177_v15 = vld [vmem:[#allocation3 + $0x60] sm:$0xf] }
 0x415   : > { %v14460_v37 = vadd.f32 %v14404_v61, %v6253_v2  ;;  %v8614_v61 = vsel %vm11429_vm15, %v8609_v31, %v14421_v9  ;;  %v7817_v9 = vld [vmem:[#allocation3 + $0x60] sm:$0xe]  ;;  %v14486_v60 = vpack.c.b16 %v9336_v21, %v9335_v17  ;;  %v7928_v5 = vrot.slane %v14478_v49, 5  ;;  %v9154_v21 = vld [vmem:[#allocation3 + $0x54] sm:$0xe] }
 0x416   : > { %10939 = vmatmul.msk.bf16.gmra.mxu2 %vm6126_vm8, %v8026_v22  ;;  %v7927_v31 = vrot.slane %v7925_v63, 4  ;;  %v14493_v29 = vunpack.c.l.b16 %v8614_v61  ;;  %v14496_v36 = vrot.slane %v8622_v0, 4  ;;  %v14498_v34 = vrot.slane %v8635_v40, 5  ;;  %v14507_v0 = vld [vmem:[#allocation3 + $0x5c] sm:$0x1] }
 0x417   : > { %10905 = vmatmul.msk.bf16.gmra.mxu1 %vm6126_vm8, %v7627_v14  ;;  %15941 = vst [vmem:[#allocation20_spill] sm:$0xff] %v14486_v60  ;;  %v8643_v2 = vshll.u32 %v8507_v57, 16  ;;  %v7370_v24 = vrot.slane %v7368_v33, 5  ;;  %v10923_v30 = vrot.slane %v7817_v9, 9  ;;  %v8633_v14 = vrot.slane %v8632_v16, 4  ;;  %v14521_v9 = vpop.f32.mrf.mxu0 }
 0x418   : > { %v7929_v20 = vsel %vm11410_vm12, %v7927_v31, %v7928_v5  ;;  %v14505_v61 = vrot.slane %v8640_v47, 4  ;;  %v7386_v17 = vshrl.u32 %v14451_v53, 16  ;;  %15943 = vst [vmem:[#allocation36_spill] sm:$0xff] %v14521_v9  ;;  %v7373_v47 = vshrl.u32 %v7177_v15, 16 }
 0x419   : > { %v6795_v41 = vpop.f32.mrf.mxu3  ;;  %v14481_v6 = vpop.f32.mrf.mxu2  ;;  %11032 = vmatmul.msk.bf16.gmra.mxu0 %vm6126_vm8, %v8962_v32  ;;  %v7356_v32 = vrot.slane %v7355_v51, 4  ;;  %v7371_v57 = vsel %vm11429_vm15, %v7366_v52, %v7370_v24  ;;  %v7926_v40 = vsel %vm11410_vm12, %v10923_v30, %v7925_v63  ;;  %v8645_v16 = vrot.slane %v8643_v2, 5 }
 0x41a   : > { %v14489_v38 = vadd.f32 %v6795_v41, %v14085_v43  ;;  %v9250_v43 = vrot.slane %v14484_v46, 5  ;;  %v8649_v41 = vshll.u32 %v14408_v18, 16  ;;  %v8653_v51 = vshrl.u32 %v14408_v18, 16  ;;  %v14529_v18 = vld [vmem:[#allocation3 + $0x70] sm:$0xf] }
 0x41b   : > { %v7361_v33 = vsel %vm11429_vm15, %v7356_v32, %v14449_v45  ;;  %v8003_v31 = vunpack.c.l.b16 %v7929_v20  ;;  %v9253_v63 = vrot.slane %v14507_v0, 5  ;;  %v7376_v24 = vshll.u32 %v7177_v15, 16 }
 0x41c   : > { %15942 = vst [vmem:[#allocation35_spill] sm:$0xff] %v14489_v38  ;;  %v6255_v22 = vpop.f32.mrf.mxu1  ;;  %v9252_v52 = vrot.slane %v9250_v43, 4  ;;  %v11052_v30 = vrot.slane %v9154_v21, 9  ;;  %v7388_v32 = vrot.slane %v7386_v17, 4  ;;  %v7602_v60 = vunpack.c.l.b16 %v7361_v33 }
 0x41d   : > { %v14501_v26 = vadd.f32 %v6475_v8, %v6255_v22  ;;  %v7382_v8 = vshll.u32 %v14451_v53, 16  ;;  %v7603_v53 = vunpack.c.l.b16 %v7371_v57  ;;  %v8628_v57 = vsel %vm11429_vm15, %v14496_v36, %v14455_v54 }
 0x41e   : > { %11014 = vmatmul.msk.bf16.vlgmr.msra.gmra.mxu3 %vm6126_vm8, %v11180_v11  ;;  %v8002_v11 = vunpack.c.l.b16 %v7926_v40  ;;  %v9254_v20 = vsel %vm11410_vm12, %v9252_v52, %v9253_v63  ;;  %v8638_v15 = vsel %vm11429_vm15, %v8633_v14, %v14498_v34  ;;  %v7375_v17 = vrot.slane %v7373_v47, 4  ;;  %v8510_v14 = vld [vmem:[#allocation3 + $0x54] sm:$0xf] }
 0x41f   : > { %v14527_v2 = vrot.slane %v7382_v8, 5  ;;  %v8655_v21 = vrot.slane %v8653_v51, 4  ;;  %v7628_v52 = vpack.c.b16 %v7603_v53, %v7602_v60  ;;  %v7378_v63 = vrot.slane %v7376_v24, 5  ;;  %v14555_v60 = vld [vmem:[#allocation3 + $0x74] sm:$0x1] }
 0x420   : > { %v8027_v8 = vpack.c.b16 %v8003_v31, %v8002_v11  ;;  %v7932_v54 = vrot.slane %v14529_v18, 5  ;;  %v8646_v34 = vor.u32 %v8645_v16, %v14505_v61  ;;  %v9338_v51 = vunpack.c.l.b16 %v9254_v20  ;;  %v7818_v24 = vld [vmem:[#allocation3 + $0x6c] sm:$0xe] }
 0x421   : > { %v6798_v5 = vpop.f32.mrf.mxu3  ;;  %v6480_v22 = vpop.f32.mrf.mxu2  ;;  %v7389_v36 = vor.u32 %v7388_v32, %v14527_v2  ;;  %v14557_v31 = vunpack.c.l.b16 %v8628_v57  ;;  %v14559_v47 = vunpack.c.l.b16 %v8638_v15  ;;  %v7379_v16 = vor.u32 %v7378_v63, %v7375_v17  ;;  %v11181_v63 = vld [vmem:[#allocation3 + $0x24] sm:$0xff] }
 0x422   : > { %v14525_v45 = vadd.f32 %v6798_v5, %v14105_v42  ;;  %v14540_v42 = vrot.slane %v8649_v41, 5  ;;  %v9251_v5 = vsel %vm11410_vm12, %v11052_v30, %v9250_v43  ;;  %v8963_v41 = vpack.c.b16 %v14493_v29, %v14491_v62  ;;  %v14565_v30 = vld [vmem:[#allocation3 + $0x64] sm:$0xf]  ;;  %v14569_v32 = vpop.f32.mrf.mxu0 }
 0x423   : > { %v9337_v43 = vunpack.c.l.b16 %v9251_v5  ;;  %v7934_v62 = vrot.slane %v7932_v54, 4  ;;  %v8664_v29 = vshrl.u32 %v8510_v14, 16  ;;  %15946 = vst [vmem:[#allocation39_spill] sm:$0xff] %v14569_v32  ;;  %v7390_v57 = vrot.slane %v7389_v36, 4 }
 0x424   : > { %15944 = vst [vmem:[#allocation37_spill] sm:$0xff] %v14525_v45  ;;  %v6258_v40 = vpop.f32.mrf.mxu1  ;;  %v8656_v53 = vor.u32 %v8655_v21, %v14540_v42  ;;  %v14574_v15 = vrot.slane %v8646_v34, 4  ;;  %v8667_v17 = vshll.u32 %v8510_v14, 16  ;;  %v8673_v21 = vshll.u32 %v14484_v46, 16 }
 0x425   : > { %v14545_v33 = vadd.f32 %v14481_v6, %v6258_v40  ;;  %v7392_v6 = vshll.u32 %v14478_v49, 16  ;;  %v14567_v49 = vpack.c.b16 %v9338_v51, %v9337_v43  ;;  %v8659_v40 = vshll.u32 %v14431_v27, 16 }
 0x426   : > { %10940 = vmatmul.msk.bf16.gmra.mxu2 %vm6126_vm8, %v8027_v8  ;;  %v7935_v8 = vrot.slane %v14555_v60, 5  ;;  %v8677_v5 = vshrl.u32 %v14484_v46, 16  ;;  %v10924_v43 = vrot.slane %v7818_v24, 9  ;;  %v14580_v51 = vrot.slane %v8656_v53, 4 }
 0x427   : > { %10906 = vmatmul.msk.bf16.gmra.mxu1 %vm6126_vm8, %v7628_v52  ;;  %15945 = vst [vmem:[#allocation38_spill] sm:$0xff] %v14567_v49  ;;  %v7380_v34 = vrot.slane %v7379_v16, 4  ;;  %v14587_v14 = vrot.slane %v8664_v29, 4  ;;  %v14589_v49 = vld [vmem:[#allocation3 + $0x68] sm:$0x1]  ;;  %v7410_v53 = vshrl.u32 %v14529_v18, 16 }
 0x428   : > { %v7936_v27 = vsel %vm11410_vm12, %v7934_v62, %v7935_v8  ;;  %v9155_v16 = vld [vmem:[#allocation3 + $0x60] sm:$0xe]  ;;  %v8669_v62 = vrot.slane %v8667_v17, 5  ;;  %v14601_v29 = vrot.slane %v8673_v21, 5  ;;  %v8679_v8 = vrot.slane %v8677_v5, 4 }
 0x429   : > { %v6800_v11 = vpop.f32.mrf.mxu3  ;;  %v14562_v61 = vpop.f32.mrf.mxu2  ;;  %11033 = vmatmul.msk.bf16.gmra.mxu0 %vm6126_vm8, %v8963_v41  ;;  %v7394_v41 = vrot.slane %v7392_v6, 5  ;;  %v7933_v6 = vsel %vm11410_vm12, %v10924_v43, %v7932_v54  ;;  %v7385_v24 = vsel %vm11429_vm15, %v7380_v34, %v14527_v2  ;;  %v7412_v2 = vrot.slane %v7410_v53, 4  ;;  %v14609_v17 = vld [vmem:[#allocation3 + $0x7c] sm:$0xf] }
 0x42a   : > { %v14572_v20 = vadd.f32 %v6800_v11, %v14127_v3  ;;  %v9257_v3 = vrot.slane %v14565_v30, 5  ;;  %v7180_v11 = vld [vmem:[#allocation3 + $0x6c] sm:$0xf]  ;;  %v8004_v9 = vunpack.c.l.b16 %v7933_v6  ;;  %v7604_v5 = vunpack.c.l.b16 %v7385_v24 }
 0x42b   : > { %v7395_v46 = vsel %vm11429_vm15, %v7390_v57, %v7394_v41  ;;  %v9260_v57 = vrot.slane %v14589_v49, 5  ;;  %v8964_v34 = vpack.c.b16 %v14559_v47, %v14557_v31  ;;  %v8680_v53 = vor.u32 %v8679_v8, %v14601_v29 }
 0x42c   : > { %15947 = vst [vmem:[#allocation40_spill] sm:$0xff] %v14572_v20  ;;  %v6260_v52 = vpop.f32.mrf.mxu1  ;;  %v9259_v32 = vrot.slane %v9257_v3, 4  ;;  %v7605_v43 = vunpack.c.l.b16 %v7395_v46  ;;  %v7400_v20 = vshll.u32 %v7180_v11, 16 }
 0x42d   : > { %v14583_v36 = vadd.f32 %v6480_v22, %v6260_v52  ;;  %v7406_v22 = vshll.u32 %v14529_v18, 16  ;;  %v8005_v52 = vunpack.c.l.b16 %v7936_v27  ;;  %v11053_v18 = vrot.slane %v9155_v16, 9  ;;  %v8513_v16 = vld [vmem:[#allocation3 + $0x60] sm:$0xf] }
 0x42e   : > { %11015 = vmatmul.msk.bf16.gmra.mxu3 %vm6126_vm8, %v11181_v63  ;;  %v7397_v63 = vshrl.u32 %v7180_v11, 16  ;;  %v9261_v21 = vsel %vm11410_vm12, %v9259_v32, %v9260_v57  ;;  %v8652_v27 = vsel %vm11429_vm15, %v14574_v15, %v14540_v42  ;;  %v8661_v11 = vrot.slane %v8659_v40, 5 }
 0x42f   : > { %v14607_v45 = vrot.slane %v7406_v22, 5  ;;  %v8028_v6 = vpack.c.b16 %v8005_v52, %v8004_v9  ;;  %v9258_v32 = vsel %vm11410_vm12, %v11053_v18, %v9257_v3  ;;  %v7629_v31 = vpack.c.b16 %v7605_v43, %v7604_v5 }
 0x430   : > { %v7399_v22 = vrot.slane %v7397_v63, 4  ;;  %v7402_v47 = vrot.slane %v7400_v20, 5  ;;  %v7939_v57 = vrot.slane %v14609_v17, 5  ;;  %v8662_v9 = vsel %vm11429_vm15, %v14580_v51, %v8661_v11 }
 0x431   : > { %v6803_v41 = vpop.f32.mrf.mxu3  ;;  %v6485_v54 = vpop.f32.mrf.mxu2  ;;  %v7413_v42 = vor.u32 %v7412_v2, %v14607_v45  ;;  %v8670_v15 = vor.u32 %v8669_v62, %v14587_v14  ;;  %v8683_v40 = vshll.u32 %v14507_v0, 16  ;;  %v8691_v3 = vshll.u32 %v8513_v16, 16  ;;  %v7819_v62 = vld [vmem:[#allocation3 + $0x78] sm:$0xe] }
 0x432   : > { %v14605_v1 = vadd.f32 %v6803_v41, %v14153_v56  ;;  %v14619_v56 = vpop.f32.mrf.mxu0  ;;  %v9339_v8 = vunpack.c.l.b16 %v9258_v32  ;;  %v9340_v20 = vunpack.c.l.b16 %v9261_v21  ;;  %v14638_v52 = vadd.f32 %v13656_v4, %v13686_v58  ;;  %v14641_v41 = vld [vmem:[#allocation3 + $0x80] sm:$0x1]  ;;  %v14650_v21 = vld [vmem:[#allocation3 + $0x70] sm:$0xf] }
 0x433   : > { %15949 = vst [vmem:[#allocation42_spill] sm:$0xff] %v14619_v56  ;;  %v7416_v63 = vshll.u32 %v14555_v60, 16  ;;  %v14643_v43 = vunpack.c.l.b16 %v8652_v27  ;;  %v7403_v0 = vor.u32 %v7402_v47, %v7399_v22  ;;  %v7941_v18 = vrot.slane %v7939_v57, 4 }
 0x434   : > { %15948 = vst [vmem:[#allocation41_spill] sm:$0xff] %v14605_v1  ;;  %v6263_v46 = vpop.f32.mrf.mxu1  ;;  %v14648_v2 = vrot.slane %v8680_v53, 4  ;;  %v14652_v4 = vpack.c.b16 %v9340_v20, %v9339_v8  ;;  %v7414_v60 = vrot.slane %v7413_v42, 4  ;;  %v14657_v5 = vunpack.c.l.b16 %v8662_v9  ;;  %v11182_v53 = vld [vmem:[#allocation3 + $0x30] sm:$0xff] }
 0x435   : > { %v14625_v24 = vadd.f32 %v14562_v61, %v6263_v46  ;;  %v8688_v61 = vshrl.u32 %v8513_v16, 16  ;;  %v8671_v27 = vrot.slane %v8670_v15, 4  ;;  %v7942_v11 = vrot.slane %v14641_v41, 5  ;;  %v7183_v15 = vld [vmem:[#allocation3 + $0x78] sm:$0xf] }
 0x436   : > { %10941 = vmatmul.msk.bf16.gmra.mxu2 %vm6126_vm8, %v8028_v6  ;;  %15950 = vst [vmem:[#allocation43_spill] sm:$0xff] %v14652_v4  ;;  %v8685_v46 = vrot.slane %v8683_v40, 5  ;;  %v14662_v6 = vrot.slane %v8691_v3, 5  ;;  %v7418_v16 = vrot.slane %v7416_v63, 5  ;;  %v10925_v32 = vrot.slane %v7819_v62, 9 }
 0x437   : > { %10907 = vmatmul.msk.bf16.gmra.mxu1 %vm6126_vm8, %v7629_v31  ;;  %v9264_v31 = vrot.slane %v14650_v21, 5  ;;  %v7404_v42 = vrot.slane %v7403_v0, 4  ;;  %v7943_v9 = vsel %vm11410_vm12, %v7941_v18, %v7942_v11  ;;  %v7430_v8 = vshll.u32 %v14609_v17, 16  ;;  %v9156_v63 = vld [vmem:[#allocation3 + $0x6c] sm:$0xe] }
 0x438   : > { %v8686_v40 = vsel %vm11429_vm15, %v14648_v2, %v8685_v46  ;;  %v7434_v20 = vshrl.u32 %v14609_v17, 16  ;;  %v8697_v62 = vshll.u32 %v14565_v30, 16  ;;  %v8701_v18 = vshrl.u32 %v14565_v30, 16 }
 0x439   : > { %v6805_v51 = vpop.f32.mrf.mxu3  ;;  %v14645_v14 = vpop.f32.mrf.mxu2  ;;  %11034 = vmatmul.msk.bf16.gmra.mxu0 %vm6126_vm8, %v8964_v34  ;;  %v14660_v34 = vrot.slane %v8688_v61, 4  ;;  %v14675_v61 = vld [vmem:[#allocation3 + $0x74] sm:$0x1]  ;;  %v8007_v2 = vunpack.c.l.b16 %v7943_v9 }
 0x43a   : > { %v14655_v58 = vadd.f32 %v6805_v51, %v14183_v7  ;;  %v8676_v7 = vsel %vm11429_vm15, %v8671_v27, %v14601_v29  ;;  %v14677_v3 = vpop.f32.mrf.mxu0  ;;  %v7419_v29 = vsel %vm11429_vm15, %v7414_v60, %v7418_v16  ;;  %v7409_v51 = vsel %vm11429_vm15, %v7404_v42, %v14607_v45 }
 0x43b   : > { %15952 = vst [vmem:[#allocation45_spill] sm:$0xff] %v14677_v3  ;;  %v8694_v0 = vor.u32 %v14662_v6, %v14660_v34  ;;  %v7421_v60 = vshrl.u32 %v7183_v15, 16  ;;  %v9266_v27 = vrot.slane %v9264_v31, 4  ;;  %v7607_v46 = vunpack.c.l.b16 %v7419_v29 }
 0x43c   : > { %15951 = vst [vmem:[#allocation44_spill] sm:$0xff] %v14655_v58  ;;  %v6265_v22 = vpop.f32.mrf.mxu1  ;;  %v11054_v16 = vrot.slane %v9156_v63, 9  ;;  %v14699_v34 = vrot.slane %v7430_v8, 5  ;;  %v7436_v6 = vrot.slane %v7434_v20, 4  ;;  %v7124_v42 = vadd.f32 %v13912_v39, %v13999_v50  ;;  %v15954_v39 = vld [vmem:[#allocation6_spill] sm:$0xff] }
 0x43d   : > { %v14668_v47 = vadd.f32 %v6485_v54, %v6265_v22  ;;  %v7940_v54 = vsel %vm11410_vm12, %v10925_v32, %v7939_v57  ;;  %v9267_v57 = vrot.slane %v14675_v61, 5  ;;  %v14701_v32 = vld [vmem:[#allocation3 + $0x88] sm:$0xf]  ;;  %v7606_v9 = vunpack.c.l.b16 %v7409_v51 }
 0x43e   : > { %11016 = vmatmul.msk.bf16.gmra.mxu3 %vm6126_vm8, %v11182_v53  ;;  %v8006_v22 = vunpack.c.l.b16 %v7940_v54  ;;  %v7424_v53 = vshll.u32 %v7183_v15, 16  ;;  %v14707_v29 = vrot.slane %v8697_v62, 5  ;;  %v8707_v15 = vshll.u32 %v14589_v49, 16  ;;  %v8516_v62 = vld [vmem:[#allocation3 + $0x6c] sm:$0xf] }
 0x43f   : > { %v9268_v30 = vsel %vm11410_vm12, %v9266_v27, %v9267_v57  ;;  %v9265_v8 = vsel %vm11410_vm12, %v11054_v16, %v9264_v31  ;;  %v7630_v4 = vpack.c.b16 %v7607_v46, %v7606_v9  ;;  %v7946_v27 = vrot.slane %v14701_v32, 5  ;;  %v14729_v46 = vld [vmem:[#allocation3 + $0x8c] sm:$0x1] }
 0x440   : > { %v8029_v63 = vpack.c.b16 %v8007_v2, %v8006_v22  ;;  %v7426_v3 = vrot.slane %v7424_v53, 5  ;;  %v6839_v50 = vadd.f32 %v15954_v39, %v14638_v52  ;;  %v8965_v49 = vpack.c.b16 %v14657_v5, %v14643_v43 }
 0x441   : > { %v6808_v11 = vpop.f32.mrf.mxu3  ;;  %v14694_v17 = vpop.f32.mrf.mxu2  ;;  %v7437_v51 = vor.u32 %v7436_v6, %v14699_v34  ;;  %v14722_v31 = vunpack.c.l.b16 %v8676_v7  ;;  %v9341_v2 = vunpack.c.l.b16 %v9265_v8  ;;  %v7440_v52 = vshll.u32 %v14641_v41, 16 }
 0x442   : > { %v14697_v45 = vadd.f32 %v6808_v11, %v14225_v13  ;;  %v7423_v13 = vrot.slane %v7421_v60, 4  ;;  %v8703_v11 = vrot.slane %v8701_v18, 4  ;;  %v14724_v18 = vunpack.c.l.b16 %v8686_v40  ;;  %v14726_v57 = vpop.f32.mrf.mxu0  ;;  %v7820_v40 = vld [vmem:[#allocation3 + $0x84] sm:$0xe] }
 0x443   : > { %v9342_v60 = vunpack.c.l.b16 %v9268_v30  ;;  %15955 = vst [vmem:[#allocation6_spill] sm:$0xff] %v14726_v57  ;;  %v14731_v22 = vrot.slane %v8694_v0, 4  ;;  %v14734_v5 = vrot.slane %v8707_v15, 5  ;;  %v7948_v16 = vrot.slane %v7946_v27, 4  ;;  %v14739_v30 = vld [vmem:[#allocation3 + $0x7c] sm:$0xf] }
 0x444   : > { %15953 = vst [vmem:[#allocation46_spill] sm:$0xff] %v14697_v45  ;;  %v7698_v54 = vpop.f32.mrf.mxu1  ;;  %v8704_v43 = vor.u32 %v8703_v11, %v14707_v29  ;;  %v7427_v7 = vor.u32 %v7426_v3, %v7423_v13  ;;  %v8712_v6 = vshrl.u32 %v8516_v62, 16  ;;  %v7438_v9 = vrot.slane %v7437_v51, 4  ;;  %v14759_v15 = vld [vmem:[#allocation3 + $0x80] sm:$0x1] }
 0x445   : > { %v14712_v20 = vadd.f32 %v7698_v54, %v7124_v42  ;;  %v14741_v41 = vpack.c.b16 %v9342_v60, %v9341_v2  ;;  %v15957_v42 = vld [vmem:[#allocation13_spill] sm:$0xff]  ;;  %v8715_v54 = vshll.u32 %v8516_v62, 16  ;;  %v7949_v3 = vrot.slane %v14729_v46, 5 }
 0x446   : > { %10942 = vmatmul.msk.bf16.gmra.mxu2 %vm6126_vm8, %v8029_v63  ;;  %v15959_v63 = vld [vmem:[#allocation21_spill] sm:$0xff]  ;;  %v8721_v13 = vshll.u32 %v14650_v21, 16  ;;  %v8725_v8 = vshrl.u32 %v14650_v21, 16  ;;  %v7442_v2 = vrot.slane %v7440_v52, 5  ;;  %v10926_v60 = vrot.slane %v7820_v40, 9 }
 0x447   : > { %10908 = vmatmul.msk.bf16.gmra.mxu1 %vm6126_vm8, %v7630_v4  ;;  %15956 = vst [vmem:[#allocation47_spill] sm:$0xff] %v14741_v41  ;;  %v7125_v11 = vadd.f32 %v15959_v63, %v6839_v50  ;;  %v9271_v51 = vrot.slane %v14739_v30, 5  ;;  %v7428_v41 = vrot.slane %v7427_v7, 4  ;;  %v7950_v62 = vsel %vm11410_vm12, %v7948_v16, %v7949_v3  ;;  %v7186_v50 = vld [vmem:[#allocation3 + $0x84] sm:$0xf] }
 0x448   : > { %v8714_v63 = vrot.slane %v8712_v6, 4  ;;  %v7443_v21 = vsel %vm11429_vm15, %v7438_v9, %v7442_v2  ;;  %v7947_v52 = vsel %vm11410_vm12, %v10926_v60, %v7946_v27  ;;  %v7458_v40 = vshrl.u32 %v14701_v32, 16  ;;  %v9157_v7 = vld [vmem:[#allocation3 + $0x78] sm:$0xe] }
 0x449   : > { %v6810_v53 = vpop.f32.mrf.mxu3  ;;  %v14736_v4 = vpop.f32.mrf.mxu2  ;;  %11035 = vmatmul.msk.bf16.gmra.mxu0 %vm6126_vm8, %v8965_v49  ;;  %v11183_v49 = vld [vmem:[#allocation3 + $0x3c] sm:$0xff]  ;;  %v7433_v16 = vsel %vm11429_vm15, %v7428_v41, %v14699_v34  ;;  %v8717_v6 = vrot.slane %v8715_v54, 5  ;;  %v8727_v3 = vrot.slane %v8725_v8, 4  ;;  %v9273_v57 = vrot.slane %v9271_v51, 4 }
 0x44a   : > { %v14744_v0 = vadd.f32 %v6810_v53, %v15957_v42  ;;  %v8705_v53 = vrot.slane %v8704_v43, 4  ;;  %v7454_v43 = vshll.u32 %v14701_v32, 16  ;;  %v9274_v9 = vrot.slane %v14759_v15, 5  ;;  %v14776_v56 = vpop.f32.mrf.mxu0 }
 0x44b   : > { %v7609_v27 = vunpack.c.l.b16 %v7443_v21  ;;  %v7448_v32 = vshll.u32 %v7186_v50, 16  ;;  %v11055_v45 = vrot.slane %v9157_v7, 9  ;;  %15960 = vst [vmem:[#allocation21_spill] sm:$0xff] %v14776_v56  ;;  %v7460_v54 = vrot.slane %v7458_v40, 4  ;;  %v15963_v21 = vld [vmem:[#allocation4_spill] sm:$0xff] }
 0x44c   : > { %15958 = vst [vmem:[#allocation13_spill] sm:$0xff] %v14744_v0  ;;  %v7700_v39 = vpop.f32.mrf.mxu1  ;;  %v8008_v0 = vunpack.c.l.b16 %v7947_v52  ;;  %v14781_v41 = vrot.slane %v7454_v43, 5  ;;  %v9275_v8 = vsel %vm11410_vm12, %v9273_v57, %v9274_v9  ;;  %v7608_v1 = vunpack.c.l.b16 %v7433_v16  ;;  %v8519_v16 = vld [vmem:[#allocation3 + $0x78] sm:$0xf] }
 0x44d   : > { %v14755_v42 = vadd.f32 %v7700_v39, %v7125_v11  ;;  %v14771_v11 = vrot.slane %v8721_v13, 5  ;;  %v8009_v39 = vunpack.c.l.b16 %v7950_v62  ;;  %v14783_v13 = vld [vmem:[#allocation3 + $0x94] sm:$0xf]  ;;  %v15962_v62 = vld [vmem:[#allocation8_spill] sm:$0xff]  ;;  %v8718_v52 = vor.u32 %v8717_v6, %v8714_v63 }
 0x44e   : > { %11017 = vmatmul.msk.bf16.gmra.mxu3 %vm6126_vm8, %v11183_v49  ;;  %v7445_v49 = vshrl.u32 %v7186_v50, 16  ;;  %v7126_v58 = vadd.f32 %v15963_v21, %v15962_v62  ;;  %v8731_v50 = vshll.u32 %v14675_v61, 16  ;;  %v9272_v43 = vsel %vm11410_vm12, %v11055_v45, %v9271_v51  ;;  %v14809_v51 = vld [vmem:[#allocation3 + $0x98] sm:$0x1] }
 0x44f   : > { %v8030_v56 = vpack.c.b16 %v8009_v39, %v8008_v0  ;;  %v7631_v57 = vpack.c.b16 %v7609_v27, %v7608_v1  ;;  %v7450_v9 = vrot.slane %v7448_v32, 5  ;;  %v8966_v61 = vpack.c.b16 %v14724_v18, %v14722_v31 }
 0x450   : > { %v7447_v38 = vrot.slane %v7445_v49, 4  ;;  %v7461_v0 = vor.u32 %v7460_v54, %v14781_v41  ;;  %v8728_v63 = vor.u32 %v8727_v3, %v14771_v11  ;;  %v14806_v45 = vrot.slane %v8731_v50, 5  ;;  %v7821_v49 = vld [vmem:[#allocation3 + $0x90] sm:$0xe]  ;;  %v14825_v54 = vld [vmem:[#allocation3 + $0x88] sm:$0xf] }
 0x451   : > { %v6813_v2 = vpop.f32.mrf.mxu3  ;;  %v14774_v60 = vpop.f32.mrf.mxu2  ;;  %v9344_v1 = vunpack.c.l.b16 %v9275_v8  ;;  %v8745_v6 = vshll.u32 %v14739_v30, 16  ;;  %v8749_v32 = vshrl.u32 %v14739_v30, 16  ;;  %v7956_v30 = vrot.slane %v14809_v51, 5 }
 0x452   : > { %v14779_v34 = vadd.f32 %v6813_v2, %v14301_v25  ;;  %v8710_v25 = vsel %vm11429_vm15, %v8705_v53, %v14734_v5  ;;  %v7953_v2 = vrot.slane %v14783_v13, 5  ;;  %v14804_v5 = vrot.slane %v8718_v52, 4  ;;  %v15968_v52 = vld [vmem:[#allocation7_spill] sm:$0xff] }
 0x453   : > { %v7464_v53 = vshll.u32 %v14729_v46, 16  ;;  %v14818_v18 = vunpack.c.l.b16 %v8710_v25  ;;  %v7451_v46 = vor.u32 %v7450_v9, %v7447_v38  ;;  %v7462_v8 = vrot.slane %v7461_v0, 4  ;;  %v15967_v38 = vld [vmem:[#allocation11_spill] sm:$0xff] }
 0x454   : > { %15961 = vst [vmem:[#allocation48_spill] sm:$0xff] %v14779_v34  ;;  %v7703_v7 = vpop.f32.mrf.mxu1  ;;  %v7955_v27 = vrot.slane %v7953_v2, 4  ;;  %v8724_v62 = vsel %vm11429_vm15, %v14804_v5, %v14771_v11  ;;  %v14836_v21 = vrot.slane %v8728_v63, 4  ;;  %v7127_v50 = vadd.f32 %v15968_v52, %v15967_v38  ;;  %v7189_v0 = vld [vmem:[#allocation3 + $0x90] sm:$0xf] }
 0x455   : > { %v14795_v40 = vadd.f32 %v7703_v7, %v7126_v58  ;;  %v9343_v58 = vunpack.c.l.b16 %v9272_v43  ;;  %v11184_v7 = vld [vmem:[#allocation3 + $0x48] sm:$0xff]  ;;  %v8736_v25 = vshrl.u32 %v8519_v16, 16  ;;  %v8739_v43 = vshll.u32 %v8519_v16, 16  ;;  %v9158_v38 = vld [vmem:[#allocation3 + $0x84] sm:$0xe] }
 0x456   : > { %10943 = vmatmul.msk.bf16.gmra.mxu2 %vm6126_vm8, %v8030_v56  ;;  %v15964_v56 = vsel %vm11429_vm15, %v14731_v22, %v14707_v29  ;;  %v7466_v9 = vrot.slane %v7464_v53, 5  ;;  %v9278_v11 = vrot.slane %v14825_v54, 5  ;;  %v7452_v5 = vrot.slane %v7451_v46, 4 }
 0x457   : > { %10909 = vmatmul.msk.bf16.gmra.mxu1 %vm6126_vm8, %v7631_v57  ;;  %v14816_v31 = vunpack.c.l.b16 %v15964_v56  ;;  %v14827_v29 = vpack.c.b16 %v9344_v1, %v9343_v58  ;;  %v14841_v57 = vpop.f32.mrf.mxu0  ;;  %v14843_v58 = vrot.slane %v8745_v6, 5  ;;  %v7957_v1 = vsel %vm11410_vm12, %v7955_v27, %v7956_v30 }
 0x458   : > { %15969 = vst [vmem:[#allocation11_spill] sm:$0xff] %v14841_v57  ;;  %v8751_v56 = vrot.slane %v8749_v32, 4  ;;  %v7467_v53 = vsel %vm11429_vm15, %v7462_v8, %v7466_v9  ;;  %v7478_v6 = vshll.u32 %v14783_v13, 16  ;;  %v7457_v46 = vsel %vm11429_vm15, %v7452_v5, %v14781_v41  ;;  %v15972_v5 = vld [vmem:[#allocation25_spill] sm:$0xff] }
 0x459   : > { %v6815_v3 = vpop.f32.mrf.mxu3  ;;  %v14821_v39 = vpop.f32.mrf.mxu2  ;;  %11036 = vmatmul.msk.bf16.gmra.mxu0 %vm6126_vm8, %v8966_v61  ;;  %15965 = vst [vmem:[#allocation8_spill] sm:$0xff] %v14827_v29  ;;  %v10927_v61 = vrot.slane %v7821_v49, 9  ;;  %v7482_v49 = vshrl.u32 %v14783_v13, 16  ;;  %v7469_v27 = vshrl.u32 %v7189_v0, 16  ;;  %v8738_v32 = vrot.slane %v8736_v25, 4 }
 0x45a   : > { %v14830_v22 = vadd.f32 %v6815_v3, %v14342_v10  ;;  %v14850_v3 = vld [vmem:[#allocation3 + $0x8c] sm:$0x1]  ;;  %v8741_v52 = vrot.slane %v8739_v43, 5  ;;  %v9280_v30 = vrot.slane %v9278_v11, 4  ;;  %v7611_v9 = vunpack.c.l.b16 %v7467_v53  ;;  %v14871_v43 = vld [vmem:[#allocation3 + $0xa0] sm:$0xf] }
 0x45b   : > { %v7954_v16 = vsel %vm11410_vm12, %v10927_v61, %v7953_v2  ;;  %v9281_v8 = vrot.slane %v14850_v3, 5  ;;  %v8752_v13 = vor.u32 %v8751_v56, %v14843_v58  ;;  %v11056_v29 = vrot.slane %v9158_v38, 9 }
 0x45c   : > { %15966 = vst [vmem:[#allocation4_spill] sm:$0xff] %v14830_v22  ;;  %v7705_v10 = vpop.f32.mrf.mxu1  ;;  %v8010_v61 = vunpack.c.l.b16 %v7954_v16  ;;  %v14869_v41 = vrot.slane %v7478_v6, 5  ;;  %v7484_v25 = vrot.slane %v7482_v49, 4  ;;  %v7610_v22 = vunpack.c.l.b16 %v7457_v46 }
 0x45d   : > { %v14846_v63 = vadd.f32 %v7705_v10, %v7127_v50  ;;  %v8011_v50 = vunpack.c.l.b16 %v7957_v1  ;;  %v15973_v1 = vld [vmem:[#allocation5_spill] sm:$0xff]  ;;  %v8742_v34 = vor.u32 %v8741_v52, %v8738_v32  ;;  %v8755_v16 = vshll.u32 %v14759_v15, 16 }
 0x45e   : > { %11018 = vmatmul.msk.bf16.gmra.mxu3 %vm6126_vm8, %v11184_v7  ;;  %v7472_v7 = vshll.u32 %v7189_v0, 16  ;;  %v9282_v0 = vsel %vm11410_vm12, %v9280_v30, %v9281_v8  ;;  %v7128_v53 = vadd.f32 %v15973_v1, %v15972_v5  ;;  %v9279_v6 = vsel %vm11410_vm12, %v11056_v29, %v9278_v11  ;;  %v14956_v1 = vld [vmem:[#allocation3 + $0xac] sm:$0xf] }
 0x45f   : > { %v8031_v38 = vpack.c.b16 %v8011_v50, %v8010_v61  ;;  %v7960_v30 = vrot.slane %v14871_v43, 5  ;;  %v8734_v46 = vsel %vm11429_vm15, %v14836_v21, %v14806_v45  ;;  %v14887_v32 = vpop.f32.mrf.mxu0  ;;  %v8967_v15 = vpack.c.b16 %v14818_v18, %v14816_v31 }
 0x460   : > { %15974 = vst [vmem:[#allocation25_spill] sm:$0xff] %v14887_v32  ;;  %v14893_v29 = vunpack.c.l.b16 %v8724_v62  ;;  %v14895_v11 = vrot.slane %v8752_v13, 4  ;;  %v14900_v52 = vrot.slane %v8742_v34, 4  ;;  %v9345_v21 = vunpack.c.l.b16 %v9279_v6  ;;  %v9159_v62 = vld [vmem:[#allocation3 + $0x90] sm:$0xe]  ;;  %v11185_v6 = vld [vmem:[#allocation3 + $0x54] sm:$0xff] }
 0x461   : > { %v6818_v10 = vpop.f32.mrf.mxu3  ;;  %v14863_v2 = vpop.f32.mrf.mxu2  ;;  %v9346_v50 = vunpack.c.l.b16 %v9282_v0  ;;  %v7488_v8 = vshll.u32 %v14809_v51, 16  ;;  %v14905_v31 = vunpack.c.l.b16 %v8734_v46  ;;  %v14907_v18 = vrot.slane %v8755_v16, 5  ;;  %v7822_v34 = vld [vmem:[#allocation3 + $0x9c] sm:$0xe]  ;;  %v14926_v16 = vld [vmem:[#allocation3 + $0x98] sm:$0x1] }
 0x462   : > { %15970 = vst [vmem:[#allocation7_spill] sm:$0xff] %v14863_v2  ;;  %v14867_v57 = vadd.f32 %v6818_v10, %v14383_v55  ;;  %v7471_v2 = vrot.slane %v7469_v27, 4  ;;  %v7474_v55 = vrot.slane %v7472_v7, 5  ;;  %v8522_v10 = vld [vmem:[#allocation3 + $0x84] sm:$0xf]  ;;  %v7485_v27 = vor.u32 %v7484_v25, %v14869_v41 }
 0x463   : > { %v8760_v45 = vshrl.u32 %v8522_v10, 16  ;;  %v14916_v51 = vpack.c.b16 %v9346_v50, %v9345_v21  ;;  %v11057_v21 = vrot.slane %v9159_v62, 9  ;;  %v7506_v62 = vshrl.u32 %v14871_v43, 16 }
 0x464   : > { %15971 = vst [vmem:[#allocation49_spill] sm:$0xff] %v14867_v57  ;;  %v7708_v56 = vpop.f32.mrf.mxu1  ;;  %v7632_v57 = vpack.c.b16 %v7611_v9, %v7610_v22  ;;  %v14897_v22 = vld [vmem:[#allocation3 + $0x94] sm:$0xf]  ;;  %v7475_v7 = vor.u32 %v7474_v55, %v7471_v2  ;;  %v14903_v9 = vld [vmem:[#allocation3 + $0xa4] sm:$0x1]  ;;  %v7486_v5 = vrot.slane %v7485_v27, 4 }
 0x465   : > { %v14880_v49 = vadd.f32 %v7708_v56, %v7128_v53  ;;  %15976 = vst [vmem:[#allocation50_spill] sm:$0xff] %v14916_v51  ;;  %v9285_v25 = vrot.slane %v14897_v22, 5  ;;  %v8763_v53 = vshll.u32 %v8522_v10, 16  ;;  %v15978_v56 = vld [vmem:[#allocation24_spill] sm:$0xff]  ;;  %v7963_v46 = vrot.slane %v14903_v9, 5 }
 0x466   : > { %10944 = vmatmul.msk.bf16.gmra.mxu2 %vm6126_vm8, %v8031_v38  ;;  %v15979_v38 = vld [vmem:[#allocation23_spill] sm:$0xff]  ;;  %v7476_v50 = vrot.slane %v7475_v7, 4  ;;  %v7490_v27 = vrot.slane %v7488_v8, 5  ;;  %v7192_v2 = vld [vmem:[#allocation3 + $0x9c] sm:$0xf]  ;;  %v7502_v8 = vshll.u32 %v14871_v43, 16 }
 0x467   : > { %10910 = vmatmul.msk.bf16.gmra.mxu1 %vm6126_vm8, %v7632_v57  ;;  %v7962_v57 = vrot.slane %v7960_v30, 4  ;;  %v7129_v55 = vadd.f32 %v15979_v38, %v15978_v56  ;;  %v9287_v51 = vrot.slane %v9285_v25, 4  ;;  %v9286_v56 = vsel %vm11410_vm12, %v11057_v21, %v9285_v25 }
 0x468   : > { %v9288_v38 = vrot.slane %v14926_v16, 5  ;;  %v9347_v21 = vunpack.c.l.b16 %v9286_v56  ;;  %v15984_v56 = vld [vmem:[#allocation17_spill] sm:$0xff] }
 0x469   : > { %v6820_v61 = vpop.f32.mrf.mxu3  ;;  %v14909_v13 = vpop.f32.mrf.mxu2  ;;  %11037 = vmatmul.msk.bf16.gmra.mxu0 %vm6126_vm8, %v8967_v15  ;;  %v14931_v15 = vrot.slane %v8760_v45, 4  ;;  %v7964_v10 = vsel %vm11410_vm12, %v7962_v57, %v7963_v46  ;;  %v7491_v45 = vsel %vm11429_vm15, %v7486_v5, %v7490_v27  ;;  %v8765_v57 = vrot.slane %v8763_v53, 5 }
 0x46a   : > { %15975 = vst [vmem:[#allocation5_spill] sm:$0xff] %v14909_v13  ;;  %v14920_v0 = vadd.f32 %v6820_v61, %v14427_v35  ;;  %v10928_v61 = vrot.slane %v7822_v34, 9  ;;  %v7493_v34 = vshrl.u32 %v7192_v2, 16  ;;  %v9289_v25 = vsel %vm11410_vm12, %v9287_v51, %v9288_v38  ;;  %v14949_v46 = vpop.f32.mrf.mxu0 }
 0x46b   : > { %15981 = vst [vmem:[#allocation23_spill] sm:$0xff] %v14949_v46  ;;  %v8013_v5 = vunpack.c.l.b16 %v7964_v10  ;;  %v7613_v27 = vunpack.c.l.b16 %v7491_v45  ;;  %v8773_v51 = vshrl.u32 %v14825_v54, 16  ;;  %v14963_v38 = vrot.slane %v7502_v8, 5  ;;  %v15985_v45 = vld [vmem:[#allocation10_spill] sm:$0xff] }
 0x46c   : > { %15977 = vst [vmem:[#allocation51_spill] sm:$0xff] %v14920_v0  ;;  %v7710_v35 = vpop.f32.mrf.mxu1  ;;  %v7961_v7 = vsel %vm11410_vm12, %v10928_v61, %v7960_v30 }
 0x46d   : > { %v14933_v0 = vadd.f32 %v7710_v35, %v7129_v55  ;;  %v7496_v55 = vshll.u32 %v7192_v2, 16  ;;  %v9348_v35 = vunpack.c.l.b16 %v9289_v25  ;;  %v8012_v43 = vunpack.c.l.b16 %v7961_v7 }
 0x46e   : > { %11019 = vmatmul.msk.bf16.gmra.mxu3 %vm6126_vm8, %v11185_v6  ;;  %v7481_v6 = vsel %vm11429_vm15, %v7476_v50, %v14869_v41  ;;  %v8769_v2 = vshll.u32 %v14825_v54, 16  ;;  %v7508_v41 = vrot.slane %v7506_v62, 4  ;;  %v8525_v50 = vld [vmem:[#allocation3 + $0x90] sm:$0xf]  ;;  %v7130_v25 = vadd.f32 %v15985_v45, %v15984_v56 }
 0x46f   : > { %15980 = vst [vmem:[#allocation24_spill] sm:$0xff] %v14933_v0  ;;  %v14965_v10 = vpack.c.b16 %v9348_v35, %v9347_v21  ;;  %v7612_v46 = vunpack.c.l.b16 %v7481_v6  ;;  %v7495_v7 = vrot.slane %v7493_v34, 4  ;;  %v7498_v32 = vrot.slane %v7496_v55, 5  ;;  %v14978_v55 = vld [vmem:[#allocation3 + $0xa0] sm:$0xf] }
 0x470   : > { %v8032_v13 = vpack.c.b16 %v8013_v5, %v8012_v43  ;;  %v7967_v0 = vrot.slane %v14956_v1, 5  ;;  %v8766_v54 = vor.u32 %v8765_v57, %v14931_v15  ;;  %v8787_v21 = vshll.u32 %v8525_v50, 16 }
 0x471   : > { %v6823_v30 = vpop.f32.mrf.mxu3  ;;  %v14954_v61 = vpop.f32.mrf.mxu2  ;;  %15983 = vst [vmem:[#allocation53_spill] sm:$0xff] %v14965_v10  ;;  %v7633_v62 = vpack.c.b16 %v7613_v27, %v7612_v46  ;;  %v7509_v35 = vor.u32 %v7508_v41, %v14963_v38  ;;  %v14976_v6 = vrot.slane %v8769_v2, 5  ;;  %v8775_v34 = vrot.slane %v8773_v51, 4  ;;  %v14984_v46 = vld [vmem:[#allocation3 + $0xb0] sm:$0x1] }
 0x472   : > { %15982 = vst [vmem:[#allocation52_spill] sm:$0xff] %v14954_v61  ;;  %v14961_v53 = vadd.f32 %v6823_v30, %v14460_v37  ;;  %v8779_v37 = vshll.u32 %v14850_v3, 16  ;;  %v8784_v30 = vshrl.u32 %v8525_v50, 16  ;;  %v8968_v15 = vpack.c.b16 %v14905_v31, %v14893_v29  ;;  %v9160_v29 = vld [vmem:[#allocation3 + $0x9c] sm:$0xe]  ;;  %v15012_v41 = vpop.f32.mrf.mxu0 }
 0x473   : > { %v7499_v3 = vor.u32 %v7498_v32, %v7495_v7  ;;  %v7512_v57 = vshll.u32 %v14903_v9, 16  ;;  %v7969_v5 = vrot.slane %v7967_v0, 4  ;;  %v15000_v32 = vrot.slane %v8766_v54, 4  ;;  %v7823_v50 = vld [vmem:[#allocation3 + $0xa8] sm:$0xe]  ;;  %v15990_v54 = vld [vmem:[#allocation9_spill] sm:$0xff] }
 0x474   : > { %v7713_v61 = vpop.f32.mrf.mxu1  ;;  %v15005_v2 = vrot.slane %v8779_v37, 5  ;;  %v9292_v51 = vrot.slane %v14978_v55, 5  ;;  %v7970_v56 = vrot.slane %v14984_v46, 5  ;;  %v8776_v45 = vor.u32 %v8775_v34, %v14976_v6  ;;  %v15989_v7 = vld [vmem:[#allocation26_spill] sm:$0xff] }
 0x475   : > { %v14972_v8 = vadd.f32 %v7713_v61, %v7130_v25  ;;  %v15987_v61 = vsel %vm11429_vm15, %v14895_v11, %v14907_v18  ;;  %v7510_v18 = vrot.slane %v7509_v35, 4  ;;  %v15019_v25 = vld [vmem:[#allocation3 + $0xa4] sm:$0x1]  ;;  %v7131_v37 = vadd.f32 %v15990_v54, %v15989_v7 }
 0x476   : > { %10945 = vmatmul.msk.bf16.gmra.mxu2 %vm6126_vm8, %v8032_v13  ;;  %v15986_v13 = vsel %vm11429_vm15, %v14900_v52, %v14843_v58  ;;  %v14998_v43 = vunpack.c.l.b16 %v15987_v61  ;;  %v15007_v58 = vrot.slane %v8784_v30, 4  ;;  %v15009_v52 = vrot.slane %v8787_v21, 5  ;;  %v7195_v61 = vld [vmem:[#allocation3 + $0xa8] sm:$0xf] }
 0x477   : > { %10911 = vmatmul.msk.bf16.gmra.mxu1 %vm6126_vm8, %v7633_v62  ;;  %v14991_v27 = vunpack.c.l.b16 %v15986_v13  ;;  %v7500_v62 = vrot.slane %v7499_v3, 4  ;;  %v7514_v30 = vrot.slane %v7512_v57, 5  ;;  %v11058_v21 = vrot.slane %v9160_v29, 9  ;;  %v11186_v13 = vld [vmem:[#allocation3 + $0x60] sm:$0xff] }
 0x478   : > { %v7526_v35 = vshll.u32 %v14956_v1, 16  ;;  %v10929_v10 = vrot.slane %v7823_v50, 9  ;;  %v9295_v3 = vrot.slane %v15019_v25, 5  ;;  %v8797_v29 = vshrl.u32 %v14897_v22, 16 }
 0x479   : > { %v6825_v9 = vpop.f32.mrf.mxu3  ;;  %v15002_v31 = vpop.f32.mrf.mxu2  ;;  %11038 = vmatmul.msk.bf16.gmra.mxu0 %vm6126_vm8, %v8968_v15  ;;  %v9293_v7 = vsel %vm11410_vm12, %v11058_v21, %v9292_v51  ;;  %v7505_v57 = vsel %vm11429_vm15, %v7500_v62, %v14963_v38 }
 0x47a   : > { %15988 = vst [vmem:[#allocation17_spill] sm:$0xff] %v15002_v31  ;;  %v15015_v11 = vadd.f32 %v6825_v9, %v14501_v26  ;;  %v7971_v26 = vsel %vm11410_vm12, %v7969_v5, %v7970_v56  ;;  %v7530_v9 = vshrl.u32 %v14956_v1, 16  ;;  %v9294_v31 = vrot.slane %v9292_v51, 4 }
 0x47b   : > { %v7515_v5 = vsel %vm11429_vm15, %v7510_v18, %v7514_v30  ;;  %v8793_v1 = vshll.u32 %v14897_v22, 16  ;;  %v7968_v50 = vsel %vm11410_vm12, %v10929_v10, %v7967_v0  ;;  %v8015_v56 = vunpack.c.l.b16 %v7971_v26  ;;  %v15055_v26 = vld [vmem:[#allocation3 + $0xb8] sm:$0xf] }
 0x47c   : > { %v7715_v15 = vpop.f32.mrf.mxu1  ;;  %v7517_v51 = vshrl.u32 %v7195_v61, 16  ;;  %v9296_v54 = vsel %vm11410_vm12, %v9294_v31, %v9295_v3  ;;  %v7532_v21 = vrot.slane %v7530_v9, 4  ;;  %v7520_v30 = vshll.u32 %v7195_v61, 16  ;;  %v15995_v3 = vld [vmem:[#allocation12_spill] sm:$0xff] }
 0x47d   : > { %v15027_v34 = vadd.f32 %v7715_v15, %v7131_v37  ;;  %v15044_v37 = vrot.slane %v7526_v35, 5  ;;  %v9349_v15 = vunpack.c.l.b16 %v9293_v7  ;;  %v9350_v38 = vunpack.c.l.b16 %v9296_v54  ;;  %v15994_v7 = vld [vmem:[#allocation27_spill] sm:$0xff] }
 0x47e   : > { %11020 = vmatmul.msk.bf16.gmra.mxu3 %vm6126_vm8, %v11186_v13  ;;  %v7615_v13 = vunpack.c.l.b16 %v7515_v5  ;;  %v8772_v22 = vsel %vm11429_vm15, %v15000_v32, %v14976_v6  ;;  %v8777_v0 = vrot.slane %v8776_v45, 4  ;;  %v8014_v31 = vunpack.c.l.b16 %v7968_v50  ;;  %v15066_v32 = vpop.f32.mrf.mxu0 }
 0x47f   : > { %v8790_v35 = vor.u32 %v15009_v52, %v15007_v58  ;;  %v15059_v9 = vpack.c.b16 %v9350_v38, %v9349_v15  ;;  %v7132_v61 = vadd.f32 %v15995_v3, %v15994_v7  ;;  %v7614_v5 = vunpack.c.l.b16 %v7505_v57  ;;  %15996 = vst [vmem:[#allocation27_spill] sm:$0xff] %v15066_v32  ;;  %v7198_v3 = vld [vmem:[#allocation3 + $0xb4] sm:$0xf] }
 0x480   : > { %v15063_v54 = vrot.slane %v8793_v1, 5  ;;  %v8803_v6 = vshll.u32 %v14926_v16, 16  ;;  %v8033_v45 = vpack.c.b16 %v8015_v56, %v8014_v31  ;;  %v7519_v50 = vrot.slane %v7517_v51, 4  ;;  %v15082_v51 = vld [vmem:[#allocation3 + $0xbc] sm:$0x1] }
 0x481   : > { %v6828_v62 = vpop.f32.mrf.mxu3  ;;  %v15046_v18 = vpop.f32.mrf.mxu2  ;;  %15993 = vst [vmem:[#allocation9_spill] sm:$0xff] %v15059_v9  ;;  %v7634_v58 = vpack.c.b16 %v7615_v13, %v7614_v5  ;;  %v7522_v52 = vrot.slane %v7520_v30, 5  ;;  %v7974_v15 = vrot.slane %v15055_v26, 5  ;;  %v7536_v57 = vshll.u32 %v14984_v46, 16  ;;  %v15089_v46 = vld [vmem:[#allocation3 + $0xac] sm:$0xf] }
 0x482   : > { %15991 = vst [vmem:[#allocation10_spill] sm:$0xff] %v15046_v18  ;;  %v15053_v10 = vadd.f32 %v6828_v62, %v14545_v33  ;;  %v7533_v62 = vor.u32 %v7532_v21, %v15044_v37  ;;  %v8799_v18 = vrot.slane %v8797_v29, 4  ;;  %v8782_v16 = vsel %vm11429_vm15, %v8777_v0, %v15005_v2 }
 0x483   : > { %v8969_v1 = vpack.c.b16 %v14998_v43, %v14991_v27  ;;  %v15080_v29 = vrot.slane %v8790_v35, 4  ;;  %v15084_v21 = vunpack.c.l.b16 %v8772_v22  ;;  %v15087_v13 = vrot.slane %v8803_v6, 5  ;;  %v7824_v27 = vld [vmem:[#allocation3 + $0xb4] sm:$0xe]  ;;  %v8528_v35 = vld [vmem:[#allocation3 + $0x9c] sm:$0xf] }
 0x484   : > { %15992 = vst [vmem:[#allocation26_spill] sm:$0xff] %v15053_v10  ;;  %v7718_v33 = vpop.f32.mrf.mxu1  ;;  %v7534_v56 = vrot.slane %v7533_v62, 4  ;;  %v8800_v38 = vor.u32 %v8799_v18, %v15063_v54  ;;  %v7523_v0 = vor.u32 %v7522_v52, %v7519_v50  ;;  %v7976_v43 = vrot.slane %v7974_v15, 4  ;;  %v16000_v6 = vld [vmem:[#allocation29_spill] sm:$0xff] }
 0x485   : > { %v15069_v10 = vadd.f32 %v7718_v33, %v7132_v61  ;;  %v15094_v31 = vunpack.c.l.b16 %v8782_v16  ;;  %v8817_v22 = vshll.u32 %v14978_v55, 16  ;;  %v7538_v18 = vrot.slane %v7536_v57, 5  ;;  %v16001_v33 = vld [vmem:[#allocation22_spill] sm:$0xff] }
 0x486   : > { %10946 = vmatmul.msk.bf16.gmra.mxu2 %vm6126_vm8, %v8033_v45  ;;  %v7550_v61 = vshll.u32 %v15055_v26, 16  ;;  %v7554_v5 = vshrl.u32 %v15055_v26, 16  ;;  %v7133_v45 = vadd.f32 %v16001_v33, %v16000_v6  ;;  %v7977_v50 = vrot.slane %v15082_v51, 5  ;;  %v11187_v16 = vld [vmem:[#allocation3 + $0x6c] sm:$0xff] }
 0x487   : > { %15997 = vst [vmem:[#allocation12_spill] sm:$0xff] %v15069_v10  ;;  %10912 = vmatmul.msk.bf16.gmra.mxu1 %vm6126_vm8, %v7634_v58  ;;  %v8821_v62 = vshrl.u32 %v14978_v55, 16  ;;  %v9299_v58 = vrot.slane %v15089_v46, 5  ;;  %v10930_v57 = vrot.slane %v7824_v27, 9  ;;  %v7541_v6 = vshrl.u32 %v7198_v3, 16  ;;  %v15115_v55 = vpop.f32.mrf.mxu0 }
 0x488   : > { %v7978_v26 = vsel %vm11410_vm12, %v7976_v43, %v7977_v50  ;;  %v7544_v33 = vshll.u32 %v7198_v3, 16  ;;  %v15113_v10 = vld [vmem:[#allocation3 + $0xb0] sm:$0x1]  ;;  %16003 = vst [vmem:[#allocation22_spill] sm:$0xff] %v15115_v55  ;;  %v7524_v9 = vrot.slane %v7523_v0, 4  ;;  %v15120_v27 = vrot.slane %v7550_v61, 5 }
 0x489   : > { %v6830_v30 = vpop.f32.mrf.mxu3  ;;  %v15091_v2 = vpop.f32.mrf.mxu2  ;;  %11039 = vmatmul.msk.bf16.gmra.mxu0 %vm6126_vm8, %v8969_v1  ;;  %v8801_v1 = vrot.slane %v8800_v38, 4  ;;  %v7556_v38 = vrot.slane %v7554_v5, 4  ;;  %v15124_v43 = vrot.slane %v8817_v22, 5  ;;  %v8823_v3 = vrot.slane %v8821_v62, 4 }
 0x48a   : > { %15998 = vst [vmem:[#allocation54_spill] sm:$0xff] %v15091_v2  ;;  %v15098_v7 = vadd.f32 %v6830_v30, %v14583_v36  ;;  %v7539_v36 = vsel %vm11429_vm15, %v7534_v56, %v7538_v18  ;;  %v8808_v30 = vshrl.u32 %v8528_v35, 16  ;;  %v7975_v56 = vsel %vm11410_vm12, %v10930_v57, %v7974_v15  ;;  %v9161_v18 = vld [vmem:[#allocation3 + $0xa8] sm:$0xe] }
 0x48b   : > { %v9301_v50 = vrot.slane %v9299_v58, 4  ;;  %v8017_v0 = vunpack.c.l.b16 %v7978_v26  ;;  %v8016_v5 = vunpack.c.l.b16 %v7975_v56  ;;  %v7543_v57 = vrot.slane %v7541_v6, 4 }
 0x48c   : > { %15999 = vst [vmem:[#allocation55_spill] sm:$0xff] %v15098_v7  ;;  %v7720_v52 = vpop.f32.mrf.mxu1  ;;  %v9302_v7 = vrot.slane %v15113_v10, 5  ;;  %v7546_v55 = vrot.slane %v7544_v33, 5  ;;  %v11059_v32 = vrot.slane %v9161_v18, 9  ;;  %v7557_v22 = vor.u32 %v7556_v38, %v15120_v27 }
 0x48d   : > { %v15109_v2 = vadd.f32 %v7720_v52, %v7133_v45  ;;  %v15122_v45 = vld [vmem:[#allocation3 + $0xc4] sm:$0xf]  ;;  %v8811_v52 = vshll.u32 %v8528_v35, 16  ;;  %v8796_v6 = vsel %vm11429_vm15, %v15080_v29, %v15063_v54  ;;  %v15145_v33 = vrot.slane %v8808_v30, 4 }
 0x48e   : > { %11021 = vmatmul.msk.bf16.gmra.mxu3 %vm6126_vm8, %v11187_v16  ;;  %v7617_v16 = vunpack.c.l.b16 %v7539_v36  ;;  %v7981_v62 = vrot.slane %v15122_v45, 5  ;;  %v8034_v56 = vpack.c.b16 %v8017_v0, %v8016_v5  ;;  %v7560_v38 = vshll.u32 %v15082_v51, 16 }
 0x48f   : > { %16002 = vst [vmem:[#allocation29_spill] sm:$0xff] %v15109_v2  ;;  %v7529_v2 = vsel %vm11429_vm15, %v7524_v9, %v15044_v37  ;;  %v9303_v37 = vsel %vm11410_vm12, %v9301_v50, %v9302_v7  ;;  %v16005_v9 = vld [vmem:[#allocation28_spill] sm:$0xff]  ;;  %v15148_v18 = vrot.slane %v8811_v52, 5  ;;  %v9300_v7 = vsel %vm11410_vm12, %v11059_v32, %v9299_v58 }
 0x490   : > { %v7134_v36 = vadd.f32 %v16005_v9, %v14287_v59  ;;  %v7616_v26 = vunpack.c.l.b16 %v7529_v2  ;;  %v15154_v2 = vld [vmem:[#allocation3 + $0xc8] sm:$0x1]  ;;  %v8806_v54 = vsel %vm11429_vm15, %v8801_v1, %v15087_v13  ;;  %v8824_v29 = vor.u32 %v8823_v3, %v15124_v43  ;;  %v7825_v13 = vld [vmem:[#allocation3 + $0xc0] sm:$0xe] }
 0x491   : > { %v6833_v15 = vpop.f32.mrf.mxu3  ;;  %v15130_v61 = vpop.f32.mrf.mxu2  ;;  %v7547_v30 = vor.u32 %v7546_v55, %v7543_v57  ;;  %v7558_v51 = vrot.slane %v7557_v22, 4  ;;  %v7983_v52 = vrot.slane %v7981_v62, 4  ;;  %v8970_v32 = vpack.c.b16 %v15094_v31, %v15084_v21  ;;  %v15173_v57 = vld [vmem:[#allocation3 + $0xb8] sm:$0xf]  ;;  %v16007_v22 = vld [vmem:[#allocation14_spill] sm:$0xff] }
 0x492   : > { %16004 = vst [vmem:[#allocation56_spill] sm:$0xff] %v15130_v61  ;;  %v15133_v35 = vadd.f32 %v6833_v15, %v14625_v24  ;;  %v7635_v59 = vpack.c.b16 %v7617_v16, %v7616_v26  ;;  %v15164_v58 = vunpack.c.l.b16 %v8796_v6  ;;  %v9351_v16 = vunpack.c.l.b16 %v9300_v7  ;;  %v15166_v15 = vpop.f32.mrf.mxu0 }
 0x493   : > { %v9352_v0 = vunpack.c.l.b16 %v9303_v37  ;;  %v7562_v5 = vrot.slane %v7560_v38, 5  ;;  %v7984_v1 = vrot.slane %v15154_v2, 5  ;;  %v15169_v3 = vunpack.c.l.b16 %v8806_v54  ;;  %v7201_v37 = vld [vmem:[#allocation3 + $0xc0] sm:$0xf] }
 0x494   : > { %v7723_v24 = vpop.f32.mrf.mxu1  ;;  %v7135_v21 = vadd.f32 %v16007_v22, %v14332_v48  ;;  %v8827_v26 = vshll.u32 %v15019_v25, 16  ;;  %v10931_v7 = vrot.slane %v7825_v13, 9  ;;  %v7578_v54 = vshrl.u32 %v15122_v45, 16  ;;  %v9548_v22 = vld [vmem:[#allocation2 + $0x10] sm:$0xf] }
 0x495   : > { %v15152_v50 = vadd.f32 %v7723_v24, %v7134_v36  ;;  %v15180_v36 = vrot.slane %v8824_v29, 4  ;;  %v15183_v6 = vpack.c.b16 %v9352_v0, %v9351_v16  ;;  %v7563_v38 = vsel %vm11429_vm15, %v7558_v51, %v7562_v5  ;;  %v9162_v0 = vld [vmem:[#allocation3 + $0xb4] sm:$0xe] }
 0x496   : > { %10947 = vmatmul.msk.bf16.gmra.mxu2 %vm6126_vm8, %v8034_v56  ;;  %v7548_v56 = vrot.slane %v7547_v30, 4  ;;  %v7985_v48 = vsel %vm11410_vm12, %v7983_v52, %v7984_v1  ;;  %v9306_v29 = vrot.slane %v15173_v57, 5  ;;  %v7565_v51 = vshrl.u32 %v7201_v37, 16  ;;  %v9547_v1 = vld [vmem:[#allocation2 + $0xc] sm:$0xf] }
 0x497   : > { %16006 = vst [vmem:[#allocation28_spill] sm:$0xff] %v15152_v50  ;;  %10913 = vmatmul.msk.bf16.gmra.mxu1 %vm6126_vm8, %v7635_v59  ;;  %v7574_v59 = vshll.u32 %v15122_v45, 16  ;;  %v7568_v16 = vshll.u32 %v7201_v37, 16  ;;  %v7619_v5 = vunpack.c.l.b16 %v7563_v38  ;;  %v7982_v45 = vsel %vm11410_vm12, %v10931_v7, %v7981_v62 }
 0x498   : > { %16009 = vst [vmem:[#allocation57_spill] sm:$0xff] %v15183_v6  ;;  %v7553_v30 = vsel %vm11429_vm15, %v7548_v56, %v15120_v27  ;;  %v8019_v13 = vunpack.c.l.b16 %v7985_v48  ;;  %v9609_v55 = vshrl.u32 %v9548_v22, 16  ;;  %v7580_v37 = vrot.slane %v7578_v54, 4 }
 0x499   : > { %v6835_v31 = vpop.f32.mrf.mxu3  ;;  %v15177_v9 = vpop.f32.mrf.mxu2  ;;  %11040 = vmatmul.msk.bf16.gmra.mxu0 %vm6126_vm8, %v8970_v32  ;;  %v11188_v32 = vld [vmem:[#allocation3 + $0x78] sm:$0xff]  ;;  %v15207_v27 = vrot.slane %v7574_v59, 5  ;;  %v11060_v56 = vrot.slane %v9162_v0, 9  ;;  %v9308_v38 = vrot.slane %v9306_v29, 4  ;;  %v8829_v6 = vrot.slane %v8827_v26, 5 }
 0x49a   : > { %16008 = vst [vmem:[#allocation14_spill] sm:$0xff] %v15177_v9  ;;  %v15186_v24 = vadd.f32 %v6835_v31, %v14668_v47  ;;  %v8176_v47 = vadd.f32 %v14645_v14, %v14712_v20  ;;  %v9596_v31 = vshrl.u32 %v9547_v1, 16  ;;  %v9599_v14 = vshll.u32 %v9547_v1, 16  ;;  %v15205_v9 = vld [vmem:[#allocation3 + $0xbc] sm:$0x1]  ;;  %v15216_v50 = vpop.f32.mrf.mxu0 }
 0x49b   : > { %v9605_v20 = vshll.u32 %v9548_v22, 16  ;;  %v9611_v48 = vrot.slane %v9609_v55, 4  ;;  %v8018_v1 = vunpack.c.l.b16 %v7982_v45  ;;  %v9307_v22 = vsel %vm11410_vm12, %v11060_v56, %v9306_v29  ;;  %16013 = vst [vmem:[#allocation61_spill] sm:$0xff] %v15216_v50  ;;  %v16014_v55 = vld [vmem:[#allocation16_spill] sm:$0xff] }
 0x49c   : > { %16010 = vst [vmem:[#allocation58_spill] sm:$0xff] %v15186_v24  ;;  %v7725_v25 = vpop.f32.mrf.mxu1  ;;  %v9601_v61 = vrot.slane %v9599_v14, 5  ;;  %v9309_v59 = vrot.slane %v15205_v9, 5  ;;  %v7570_v24 = vrot.slane %v7568_v16, 5  ;;  %v7581_v50 = vor.u32 %v7580_v37, %v15207_v27 }
 0x49d   : > { %v15200_v52 = vadd.f32 %v7725_v25, %v7135_v21  ;;  %v9549_v21 = vld [vmem:[#allocation2 + $0x14] sm:$0x1]  ;;  %v9598_v25 = vrot.slane %v9596_v31, 4  ;;  %v15209_v62 = vrot.slane %v9605_v20, 5  ;;  %v7136_v20 = vadd.f32 %v16014_v55, %v14369_v12  ;;  %v11189_v55 = vld [vmem:[#allocation3 + $0x84] sm:$0xff] }
 0x49e   : > { %11022 = vmatmul.msk.bf16.gmra.mxu3 %vm6126_vm8, %v11188_v32  ;;  %v9615_v14 = vshll.u32 %v9549_v21, 16  ;;  %v9310_v45 = vsel %vm11410_vm12, %v9308_v38, %v9309_v59  ;;  %v8035_v56 = vpack.c.b16 %v8019_v13, %v8018_v1  ;;  %v8830_v38 = vsel %vm11429_vm15, %v15180_v36, %v8829_v6  ;;  %v15246_v6 = vld [vmem:[#allocation3 + $0xc4] sm:$0xf] }
 0x49f   : > { %16011 = vst [vmem:[#allocation59_spill] sm:$0xff] %v15200_v52  ;;  %v7618_v52 = vunpack.c.l.b16 %v7553_v30  ;;  %v9602_v0 = vor.u32 %v9601_v61, %v9598_v25  ;;  %v9612_v31 = vor.u32 %v9611_v48, %v15209_v62  ;;  %v7567_v30 = vrot.slane %v7565_v51, 4 }
 0x4a0   : > { %v7584_v61 = vshll.u32 %v15154_v2, 16  ;;  %v9353_v25 = vunpack.c.l.b16 %v9307_v22  ;;  %v9354_v21 = vunpack.c.l.b16 %v9310_v45  ;;  %v9617_v26 = vrot.slane %v9615_v14, 5  ;;  %v15274_v45 = vld [vmem:[#allocation3 + $0xc8] sm:$0x1] }
 0x4a1   : > { %v8383_v7 = vpop.f32.mrf.mxu3  ;;  %v15211_v32 = vpop.f32.mrf.mxu2  ;;  %v7636_v29 = vpack.c.b16 %v7619_v5, %v7618_v52  ;;  %v9603_v12 = vrot.slane %v9602_v0, 4  ;;  %v9613_v51 = vrot.slane %v9612_v31, 4  ;;  %v8971_v16 = vpack.c.b16 %v15169_v3, %v15164_v58 }
 0x4a2   : > { %16012 = vst [vmem:[#allocation60_spill] sm:$0xff] %v15211_v32  ;;  %v15218_v54 = vadd.f32 %v8383_v7, %v8176_v47  ;;  %v16015_v52 = vor.u32 %v15148_v18, %v15145_v33  ;;  %v15241_v5 = vpack.c.b16 %v9354_v21, %v9353_v25  ;;  %v8177_v13 = vadd.f32 %v14694_v17, %v14755_v42  ;;  %v8531_v7 = vld [vmem:[#allocation3 + $0xa8] sm:$0xf]  ;;  %v9163_v17 = vld [vmem:[#allocation3 + $0xc0] sm:$0xe]  ;;  %v15268_v31 = vpop.f32.mrf.mxu0 }
 0x4a3   : > { %v7571_v37 = vor.u32 %v7570_v24, %v7567_v30  ;;  %v7582_v48 = vrot.slane %v7581_v50, 4  ;;  %v8841_v36 = vshll.u32 %v15089_v46, 16  ;;  %v7586_v33 = vrot.slane %v7584_v61, 5  ;;  %v9550_v61 = vld [vmem:[#allocation2 + $0x18] sm:$0xf] }
 0x4a4   : > { %v7728_v32 = vpop.f32.mrf.mxu1  ;;  %v15239_v2 = vrot.slane %v16015_v52, 4  ;;  %v15255_v58 = vunpack.c.l.b16 %v8830_v38  ;;  %v9608_v50 = vsel %vm11429_vm15, %v9603_v12, %v15209_v62  ;;  %v9618_v3 = vsel %vm11429_vm15, %v9613_v51, %v9617_v26  ;;  %v9551_v25 = vld [vmem:[#allocation2 + $0x1c] sm:$0xf]  ;;  %v9552_v52 = vld [vmem:[#allocation2 + $0x20] sm:$0x1] }
 0x4a5   : > { %v15226_v47 = vadd.f32 %v7728_v32, %v7136_v20  ;;  %v9313_v24 = vrot.slane %v15246_v6, 5  ;;  %v7137_v22 = vadd.f32 %v14318_v23, %v14413_v44  ;;  %v8832_v59 = vshrl.u32 %v8531_v7, 16 }
 0x4a6   : > { %10948 = vmatmul.msk.bf16.gmra.mxu2 %vm6126_vm8, %v8035_v56  ;;  %v8820_v18 = vsel %vm11429_vm15, %v15239_v2, %v15124_v43  ;;  %v8835_v0 = vshll.u32 %v8531_v7, 16  ;;  %v8845_v43 = vshrl.u32 %v15089_v46, 16  ;;  %v7572_v20 = vrot.slane %v7571_v37, 4 }
 0x4a7   : > { %10914 = vmatmul.msk.bf16.gmra.mxu1 %vm6126_vm8, %v7636_v29  ;;  %v7587_v62 = vsel %vm11429_vm15, %v7582_v48, %v7586_v33  ;;  %v15272_v30 = vrot.slane %v8841_v36, 5  ;;  %v11061_v29 = vrot.slane %v9163_v17, 9  ;;  %v9980_v23 = vunpack.c.l.b16 %v9608_v50 }
 0x4a8   : > { %v9981_v44 = vunpack.c.l.b16 %v9618_v3  ;;  %v9315_v46 = vrot.slane %v9313_v24, 4  ;;  %v9620_v21 = vshrl.u32 %v9550_v61, 16  ;;  %v9623_v12 = vshll.u32 %v9550_v61, 16 }
 0x4a9   : > { %v8385_v32 = vpop.f32.mrf.mxu3  ;;  %v15248_v1 = vpop.f32.mrf.mxu2  ;;  %11041 = vmatmul.msk.bf16.gmra.mxu0 %vm6126_vm8, %v8971_v16  ;;  %v9629_v51 = vshll.u32 %v9551_v25, 16  ;;  %v9633_v26 = vshrl.u32 %v9551_v25, 16  ;;  %v8178_v38 = vadd.f32 %v14736_v4, %v14795_v40  ;;  %v7577_v16 = vsel %vm11429_vm15, %v7572_v20, %v15207_v27  ;;  %v16090_v28 = vld [vmem:[#allocation60_spill] sm:$0xff] }
 0x4aa   : > { %v15257_v42 = vadd.f32 %v8385_v32, %v8177_v13  ;;  %v9314_v2 = vsel %vm11410_vm12, %v11061_v29, %v9313_v24  ;;  %v9316_v13 = vrot.slane %v15274_v45, 5  ;;  %v9622_v37 = vrot.slane %v9620_v21, 4 }
 0x4ab   : > { %v9625_v48 = vrot.slane %v9623_v12, 5  ;;  %v9631_v7 = vrot.slane %v9629_v51, 5  ;;  %v9635_v36 = vrot.slane %v9633_v26, 4  ;;  %v7621_v33 = vunpack.c.l.b16 %v7587_v62 }
 0x4ac   : > { %v7730_v14 = vpop.f32.mrf.mxu1  ;;  %v10012_v50 = vpack.c.b16 %v9981_v44, %v9980_v23  ;;  %v8847_v4 = vrot.slane %v8845_v43, 4  ;;  %v9317_v40 = vsel %vm11410_vm12, %v9315_v46, %v9316_v13  ;;  %v9639_v24 = vshll.u32 %v9552_v52, 16  ;;  %v15299_v46 = vpop.f32.mrf.mxu0 }
 0x4ad   : > { %v15276_v56 = vadd.f32 %v7730_v14, %v7137_v22  ;;  %v9626_v3 = vor.u32 %v9625_v48, %v9622_v37  ;;  %v9636_v22 = vor.u32 %v9635_v36, %v9631_v7  ;;  %v16016_v14 = vld [vmem:[#allocation18_spill] sm:$0xff]  ;;  %v7620_v29 = vunpack.c.l.b16 %v7577_v16  ;;  %v8534_v48 = vld [vmem:[#allocation3 + $0xb4] sm:$0xf] }
 0x4ae   : > { %11023 = vmatmul.msk.bf16.gmra.mxu3 %vm6126_vm8, %v11189_v55  ;;  %v16017_v55 = vld [vmem:[#allocation31_spill] sm:$0xff]  ;;  %v9355_v61 = vunpack.c.l.b16 %v9314_v2  ;;  %v9356_v25 = vunpack.c.l.b16 %v9317_v40  ;;  %v8834_v62 = vrot.slane %v8832_v59, 4  ;;  %v8837_v12 = vrot.slane %v8835_v0, 5 }
 0x4af   : > { %v7138_v20 = vadd.f32 %v16017_v55, %v16016_v14  ;;  %v7637_v43 = vpack.c.b16 %v7621_v33, %v7620_v29  ;;  %v8951_v23 = vunpack.c.l.b16 %v8820_v18  ;;  %v9627_v26 = vrot.slane %v9626_v3, 4  ;;  %v16018_v33 = vld [vmem:[#allocation35_spill] sm:$0xff] }
 0x4b0   : > { %v15297_v44 = vpack.c.b16 %v9356_v25, %v9355_v61  ;;  %v9641_v52 = vrot.slane %v9639_v24, 5  ;;  %v8848_v59 = vor.u32 %v8847_v4, %v15272_v30  ;;  %v8179_v0 = vadd.f32 %v14774_v60, %v14846_v63  ;;  %v9554_v29 = vld [vmem:[#allocation2 + $0x28] sm:$0xf] }
 0x4b1   : > { %v8388_v32 = vpop.f32.mrf.mxu3  ;;  %v15287_v17 = vpop.f32.mrf.mxu2  ;;  %v8972_v16 = vpack.c.b16 %v15255_v58, %v8951_v23  ;;  %v8838_v2 = vor.u32 %v8837_v12, %v8834_v62  ;;  %v8851_v18 = vshll.u32 %v15113_v10, 16  ;;  %v11190_v10 = vld [vmem:[#allocation3 + $0x90] sm:$0xff]  ;;  %v8859_v61 = vshll.u32 %v8534_v48, 16 }
 0x4b2   : > { %v15291_v27 = vadd.f32 %v8388_v32, %v8178_v38  ;;  %v9637_v38 = vrot.slane %v9636_v22, 4  ;;  %v9632_v32 = vsel %vm11429_vm15, %v9627_v26, %v9631_v7  ;;  %v8849_v63 = vrot.slane %v8848_v59, 4  ;;  %v9555_v23 = vld [vmem:[#allocation2 + $0x2c] sm:$0x1] }
 0x4b3   : > { %v8839_v40 = vrot.slane %v8838_v2, 4  ;;  %v8853_v3 = vrot.slane %v8851_v18, 5  ;;  %v8856_v22 = vshrl.u32 %v8534_v48, 16  ;;  %v9982_v14 = vunpack.c.l.b16 %v9632_v32 }
 0x4b4   : > { %v7733_v21 = vpop.f32.mrf.mxu1  ;;  %v9642_v58 = vsel %vm11429_vm15, %v9637_v38, %v9641_v52  ;;  %v9657_v62 = vshrl.u32 %v9554_v29, 16  ;;  %v8180_v12 = vadd.f32 %v14821_v39, %v14880_v49  ;;  %v8865_v26 = vshll.u32 %v15173_v57, 16  ;;  %v15328_v52 = vpop.f32.mrf.mxu0 }
 0x4b5   : > { %v15295_v51 = vadd.f32 %v7733_v21, %v7138_v20  ;;  %v9983_v55 = vunpack.c.l.b16 %v9642_v58  ;;  %v9553_v20 = vld [vmem:[#allocation2 + $0x24] sm:$0xf]  ;;  %v9653_v21 = vshll.u32 %v9554_v29, 16  ;;  %v8869_v38 = vshrl.u32 %v15173_v57, 16  ;;  %v16021_v57 = vld [vmem:[#allocation37_spill] sm:$0xff] }
 0x4b6   : > { %11080 = vmatmul.msk.bf16.vlgmr.msra.gmra.mxu2 %vm1540_vm14, %v10012_v50  ;;  %v16019_v50 = vld [vmem:[#allocation33_spill] sm:$0xff]  ;;  %v9644_v7 = vshrl.u32 %v9553_v20, 16  ;;  %v9647_v25 = vshll.u32 %v9553_v20, 16  ;;  %v9659_v2 = vrot.slane %v9657_v62, 4  ;;  %v8844_v39 = vsel %vm11429_vm15, %v8839_v40, %v15272_v30 }
 0x4b7   : > { %10915 = vmatmul.msk.bf16.gmra.mxu1 %vm6126_vm8, %v7637_v43  ;;  %v7139_v60 = vadd.f32 %v16019_v50, %v16018_v33  ;;  %v8854_v43 = vsel %vm11429_vm15, %v8849_v63, %v8853_v3  ;;  %v10013_v48 = vpack.c.b16 %v9983_v55, %v9982_v14  ;;  %v9663_v33 = vshll.u32 %v9555_v23, 16  ;;  %v16022_v50 = vld [vmem:[#allocation19_spill] sm:$0xff] }
 0x4b8   : > { %v9649_v59 = vrot.slane %v9647_v25, 5  ;;  %v8954_v63 = vunpack.c.l.b16 %v8854_v43  ;;  %v8858_v20 = vrot.slane %v8856_v22, 4  ;;  %v8861_v29 = vrot.slane %v8859_v61, 5  ;;  %v16023_v25 = vld [vmem:[#allocation30_spill] sm:$0xff]  ;;  %v16025_v43 = vld [vmem:[#allocation7_spill] sm:$0xff] }
 0x4b9   : > { %v8390_v13 = vpop.f32.mrf.mxu3  ;;  %v15308_v37 = vpop.f32.mrf.mxu2  ;;  %11042 = vmatmul.msk.bf16.gmra.mxu0 %vm6126_vm8, %v8972_v16  ;;  %v9646_v16 = vrot.slane %v9644_v7, 4  ;;  %v8953_v55 = vunpack.c.l.b16 %v8844_v39  ;;  %v9665_v7 = vrot.slane %v9663_v33, 5  ;;  %v16028_v39 = vld [vmem:[#allocation36_spill] sm:$0xff] }
 0x4ba   : > { %v15311_v36 = vadd.f32 %v8390_v13, %v8179_v0  ;;  %v9655_v0 = vrot.slane %v9653_v21, 5 }
 0x4bb   : > { %v9650_v32 = vor.u32 %v9649_v59, %v9646_v16  ;;  %v8973_v21 = vpack.c.b16 %v8954_v63, %v8953_v55 }
 0x4bc   : > { %v7735_v4 = vpop.f32.mrf.mxu1  ;;  %v9660_v58 = vor.u32 %v9659_v2, %v9655_v0 }
 0x4bd   : > { %v15319_v24 = vadd.f32 %v7735_v4, %v7139_v60  ;;  %v7140_v60 = vadd.f32 %v16022_v50, %v16021_v57  ;;  %v15339_v4 = vrot.slane %v8865_v26, 5  ;;  %v9651_v30 = vrot.slane %v9650_v32, 4  ;;  %v11191_v57 = vld [vmem:[#allocation3 + $0x9c] sm:$0xff] }
 0x4be   : > { %11024 = vmatmul.msk.bf16.gmra.mxu3 %vm6126_vm8, %v11190_v10  ;;  %v8871_v10 = vrot.slane %v8869_v38, 4  ;;  %v9661_v40 = vrot.slane %v9660_v58, 4  ;;  %v8862_v26 = vor.u32 %v8861_v29, %v8858_v20  ;;  %v8875_v38 = vshll.u32 %v15205_v9, 16  ;;  %v9557_v20 = vld [vmem:[#allocation2 + $0x34] sm:$0xf] }
 0x4bf   : > { %v9656_v59 = vsel %vm11429_vm15, %v9651_v30, %v9655_v0  ;;  %v9677_v55 = vshll.u32 %v9557_v20, 16  ;;  %v9681_v30 = vshrl.u32 %v9557_v20, 16 }
 0x4c0   : > { %v8872_v62 = vor.u32 %v8871_v10, %v15339_v4  ;;  %v9666_v2 = vsel %vm11429_vm15, %v9661_v40, %v9665_v7  ;;  %v8863_v50 = vrot.slane %v8862_v26, 4  ;;  %v9984_v9 = vunpack.c.l.b16 %v9656_v59  ;;  %v8537_v40 = vld [vmem:[#allocation3 + $0xc0] sm:$0xf] }
 0x4c1   : > { %v8393_v18 = vpop.f32.mrf.mxu3  ;;  %v15330_v13 = vpop.f32.mrf.mxu2  ;;  %v9985_v63 = vunpack.c.l.b16 %v9666_v2  ;;  %v8877_v10 = vrot.slane %v8875_v38, 5  ;;  %v16029_v7 = vld [vmem:[#allocation5_spill] sm:$0xff]  ;;  %v9683_v38 = vrot.slane %v9681_v30, 4 }
 0x4c2   : > { %16020 = vst [vmem:[#allocation16_spill] sm:$0xff] %v15330_v13  ;;  %v15335_v49 = vadd.f32 %v8393_v18, %v8180_v12  ;;  %v16024_v12 = vld [vmem:[#allocation24_spill] sm:$0xff]  ;;  %v15359_v18 = vpop.f32.mrf.mxu0  ;;  %v8873_v58 = vrot.slane %v8872_v62, 4  ;;  %v9558_v62 = vld [vmem:[#allocation2 + $0x38] sm:$0x1] }
 0x4c3   : > { %v8181_v23 = vadd.f32 %v16025_v43, %v16024_v12  ;;  %v8889_v12 = vshll.u32 %v15246_v6, 16  ;;  %v8893_v43 = vshrl.u32 %v15246_v6, 16  ;;  %v16031_v6 = vld [vmem:[#allocation41_spill] sm:$0xff] }
 0x4c4   : > { %v7738_v3 = vpop.f32.mrf.mxu1 }
 0x4c5   : > { %v15341_v14 = vadd.f32 %v7738_v3, %v7140_v60  ;;  %v9556_v3 = vld [vmem:[#allocation2 + $0x30] sm:$0xf] }
 0x4c6   : > { %11081 = vmatmul.msk.bf16.gmra.mxu2 %vm1540_vm14, %v10013_v48  ;;  %v16027_v48 = vld [vmem:[#allocation40_spill] sm:$0xff]  ;;  %v9668_v0 = vshrl.u32 %v9556_v3, 16  ;;  %v9671_v29 = vshll.u32 %v9556_v3, 16  ;;  %v16032_v3 = vld [vmem:[#allocation39_spill] sm:$0xff] }
 0x4c7   : > { %11064 = vmatmul.msk.bf16.vlgmr.msra.gmra.mxu1 %vm6126_vm8, %v16023_v25  ;;  %v7141_v32 = vadd.f32 %v16028_v39, %v16027_v48  ;;  %v8182_v25 = vadd.f32 %v16029_v7, %v14972_v8  ;;  %v10014_v48 = vpack.c.b16 %v9985_v63, %v9984_v9  ;;  %v8868_v8 = vsel %vm11429_vm15, %v8863_v50, %v15339_v4 }
 0x4c8   : > { %v9673_v26 = vrot.slane %v9671_v29, 5  ;;  %v8880_v39 = vshrl.u32 %v8537_v40, 16  ;;  %v7142_v20 = vadd.f32 %v16032_v3, %v16031_v6  ;;  %v8891_v29 = vrot.slane %v8889_v12, 5  ;;  %v16035_v12 = vld [vmem:[#allocation52_spill] sm:$0xff] }
 0x4c9   : > { %v8395_v22 = vpop.f32.mrf.mxu3  ;;  %v15349_v61 = vpop.f32.mrf.mxu2  ;;  %11043 = vmatmul.msk.bf16.gmra.mxu0 %vm6126_vm8, %v8973_v21  ;;  %v8878_v21 = vsel %vm11429_vm15, %v8873_v58, %v8877_v10  ;;  %v9687_v10 = vshll.u32 %v9558_v62, 16  ;;  %v8955_v63 = vunpack.c.l.b16 %v8868_v8 }
 0x4ca   : > { %16026 = vst [vmem:[#allocation18_spill] sm:$0xff] %v15349_v61  ;;  %v15353_v16 = vadd.f32 %v8395_v22, %v8181_v23  ;;  %v9670_v23 = vrot.slane %v9668_v0, 4  ;;  %v9679_v22 = vrot.slane %v9677_v55, 5  ;;  %v8956_v0 = vunpack.c.l.b16 %v8878_v21  ;;  %v15381_v7 = vpop.f32.mrf.mxu0  ;;  %v16059_v61 = vld [vmem:[#allocation25_spill] sm:$0xff] }
 0x4cb   : > { %v8895_v55 = vrot.slane %v8893_v43, 4  ;;  %v8183_v43 = vadd.f32 %v16035_v12, %v15027_v34 }
 0x4cc   : > { %v7740_v33 = vpop.f32.mrf.mxu1  ;;  %v8974_v62 = vpack.c.b16 %v8956_v0, %v8955_v63  ;;  %v9559_v63 = vld [vmem:[#allocation2 + $0x3c] sm:$0xf] }
 0x4cd   : > { %v15363_v60 = vadd.f32 %v7740_v33, %v7141_v32  ;;  %v8883_v32 = vshll.u32 %v8537_v40, 16  ;;  %v9674_v33 = vor.u32 %v9673_v26, %v9670_v23  ;;  %v9689_v40 = vrot.slane %v9687_v10, 5 }
 0x4ce   : > { %11025 = vmatmul.msk.bf16.gmra.mxu3 %vm6126_vm8, %v11191_v57  ;;  %v9684_v57 = vor.u32 %v9683_v38, %v9679_v22  ;;  %v8882_v23 = vrot.slane %v8880_v39, 4  ;;  %v8896_v21 = vor.u32 %v8895_v55, %v8891_v29 }
 0x4cf   : > { %v9675_v4 = vrot.slane %v9674_v33, 4  ;;  %v8885_v26 = vrot.slane %v8883_v32, 5  ;;  %v16037_v32 = vld [vmem:[#allocation44_spill] sm:$0xff] }
 0x4d0   : > { %v9685_v50 = vrot.slane %v9684_v57, 4  ;;  %v16038_v57 = vld [vmem:[#allocation42_spill] sm:$0xff]  ;;  %v8897_v34 = vrot.slane %v8896_v21, 4 }
 0x4d1   : > { %v8398_v59 = vpop.f32.mrf.mxu3  ;;  %v15372_v2 = vpop.f32.mrf.mxu2  ;;  %v9680_v33 = vsel %vm11429_vm15, %v9675_v4, %v9679_v22  ;;  %v7143_v10 = vadd.f32 %v16038_v57, %v16037_v32  ;;  %v8886_v6 = vor.u32 %v8885_v26, %v8882_v23  ;;  %v9692_v22 = vshrl.u32 %v9559_v63, 16  ;;  %v9561_v26 = vld [vmem:[#allocation2 + $0x44] sm:$0x1] }
 0x4d2   : > { %16030 = vst [vmem:[#allocation31_spill] sm:$0xff] %v15372_v2  ;;  %v15377_v58 = vadd.f32 %v8398_v59, %v8182_v25  ;;  %v16034_v25 = vld [vmem:[#allocation15_spill] sm:$0xff]  ;;  %v9690_v39 = vsel %vm11429_vm15, %v9685_v50, %v9689_v40  ;;  %v9986_v55 = vunpack.c.l.b16 %v9680_v33  ;;  %v9695_v4 = vshll.u32 %v9559_v63, 16  ;;  %v15405_v40 = vpop.f32.mrf.mxu0  ;;  %v16042_v63 = vld [vmem:[#allocation45_spill] sm:$0xff] }
 0x4d3   : > { %v8887_v12 = vrot.slane %v8886_v6, 4  ;;  %v9694_v21 = vrot.slane %v9692_v22, 4 }
 0x4d4   : > { %v7743_v30 = vpop.f32.mrf.mxu1 }
 0x4d5   : > { %v15383_v9 = vadd.f32 %v7743_v30, %v7142_v20  ;;  %v11192_v20 = vld [vmem:[#allocation3 + $0xa8] sm:$0xff]  ;;  %v9987_v30 = vunpack.c.l.b16 %v9690_v39  ;;  %v8892_v39 = vsel %vm11429_vm15, %v8887_v12, %v8891_v29 }
 0x4d6   : > { %11082 = vmatmul.msk.bf16.gmra.mxu2 %vm1540_vm14, %v10014_v48  ;;  %v8899_v48 = vshll.u32 %v15274_v45, 16 }
 0x4d7   : > { %16033 = vst [vmem:[#allocation35_spill] sm:$0xff] %v15383_v9  ;;  %11065 = vmatmul.msk.bf16.gmra.mxu1 %vm6126_vm8, %v16034_v25  ;;  %v9560_v25 = vld [vmem:[#allocation2 + $0x40] sm:$0xf]  ;;  %v10015_v32 = vpack.c.b16 %v9987_v30, %v9986_v55 }
 0x4d8   : > { %v8901_v45 = vrot.slane %v8899_v48, 5  ;;  %v9705_v50 = vshrl.u32 %v9560_v25, 16 }
 0x4d9   : > { %v8400_v38 = vpop.f32.mrf.mxu3  ;;  %v15390_v59 = vpop.f32.mrf.mxu2  ;;  %11044 = vmatmul.msk.bf16.gmra.mxu0 %vm6126_vm8, %v8974_v62  ;;  %v9701_v62 = vshll.u32 %v9560_v25, 16 }
 0x4da   : > { %16036 = vst [vmem:[#allocation33_spill] sm:$0xff] %v15390_v59  ;;  %v15394_v8 = vadd.f32 %v8400_v38, %v8183_v43  ;;  %v8902_v23 = vsel %vm11429_vm15, %v8897_v34, %v8901_v45  ;;  %v9697_v43 = vrot.slane %v9695_v4, 5  ;;  %v9707_v33 = vrot.slane %v9705_v50, 4  ;;  %v16044_v50 = vld [vmem:[#allocation32_spill] sm:$0xff]  ;;  %v15420_v55 = vpop.f32.mrf.mxu0 }
 0x4db   : > { %v9703_v38 = vrot.slane %v9701_v62, 5  ;;  %v8958_v25 = vunpack.c.l.b16 %v8902_v23  ;;  %v8957_v45 = vunpack.c.l.b16 %v8892_v39  ;;  %v16046_v23 = vld [vmem:[#allocation13_spill] sm:$0xff] }
 0x4dc   : > { %v7745_v3 = vpop.f32.mrf.mxu1  ;;  %v9698_v57 = vor.u32 %v9697_v43, %v9694_v21 }
 0x4dd   : > { %v15402_v0 = vadd.f32 %v7745_v3, %v7143_v10  ;;  %v9708_v10 = vor.u32 %v9707_v33, %v9703_v38  ;;  %v9711_v3 = vshll.u32 %v9561_v26, 16  ;;  %v8975_v29 = vpack.c.b16 %v8958_v25, %v8957_v45  ;;  %v16047_v26 = vld [vmem:[#allocation6_spill] sm:$0xff]  ;;  %v11193_v33 = vld [vmem:[#allocation3 + $0xb4] sm:$0xff] }
 0x4de   : > { %11026 = vmatmul.msk.bf16.gmra.mxu3 %vm6126_vm8, %v11192_v20  ;;  %v16041_v20 = vld [vmem:[#allocation46_spill] sm:$0xff]  ;;  %v9699_v22 = vrot.slane %v9698_v57, 4  ;;  %v7145_v21 = vadd.f32 %v16047_v26, %v16046_v23  ;;  %v9564_v25 = vld [vmem:[#allocation2 + $0x50] sm:$0x1] }
 0x4df   : > { %16039 = vst [vmem:[#allocation37_spill] sm:$0xff] %v15402_v0  ;;  %v7144_v6 = vadd.f32 %v16042_v63, %v16041_v20  ;;  %v9709_v4 = vrot.slane %v9708_v10, 4  ;;  %v9713_v62 = vrot.slane %v9711_v3, 5  ;;  %v9562_v10 = vld [vmem:[#allocation2 + $0x48] sm:$0xf] }
 0x4e0   : > { %v9563_v3 = vld [vmem:[#allocation2 + $0x4c] sm:$0xf]  ;;  %v9716_v20 = vshrl.u32 %v9562_v10, 16  ;;  %v9719_v63 = vshll.u32 %v9562_v10, 16  ;;  %v9565_v0 = vld [vmem:[#allocation2 + $0x54] sm:$0xf] }
 0x4e1   : > { %v15409_v48 = vpop.f32.mrf.mxu2  ;;  %v9714_v12 = vsel %vm11429_vm15, %v9709_v4, %v9713_v62 }
 0x4e2   : > { %16040 = vst [vmem:[#allocation19_spill] sm:$0xff] %v15409_v48  ;;  %v9989_v57 = vunpack.c.l.b16 %v9714_v12  ;;  %v9718_v45 = vrot.slane %v9716_v20, 4  ;;  %v16050_v12 = vld [vmem:[#allocation48_spill] sm:$0xff]  ;;  %v11194_v48 = vld [vmem:[#allocation3 + $0xc0] sm:$0xff] }
 0x4e4   : > { %v7748_v59 = vpop.f32.mrf.mxu1 }
 0x4e5   : > { %v15415_v34 = vadd.f32 %v7748_v59, %v7144_v6  ;;  %v9704_v59 = vsel %vm11429_vm15, %v9699_v22, %v9703_v38  ;;  %v9725_v6 = vshll.u32 %v9563_v3, 16  ;;  %v9729_v38 = vshrl.u32 %v9563_v3, 16 }
 0x4e6   : > { %11083 = vmatmul.msk.bf16.gmra.mxu2 %vm1540_vm14, %v10015_v32  ;;  %v9988_v32 = vunpack.c.l.b16 %v9704_v59  ;;  %v9721_v22 = vrot.slane %v9719_v63, 5  ;;  %v9735_v59 = vshll.u32 %v9564_v25, 16  ;;  %v16053_v63 = vld [vmem:[#allocation34_spill] sm:$0xff] }
 0x4e7   : > { %16043 = vst [vmem:[#allocation30_spill] sm:$0xff] %v15415_v34  ;;  %11066 = vmatmul.msk.bf16.gmra.mxu1 %vm6126_vm8, %v16044_v50  ;;  %v9727_v4 = vrot.slane %v9725_v6, 5  ;;  %v9731_v62 = vrot.slane %v9729_v38, 4  ;;  %v8540_v6 = vld [vmem:[#allocation3 + $0xcc] sm:$0xf] }
 0x4e8   : > { %v9722_v23 = vor.u32 %v9721_v22, %v9718_v45  ;;  %v9737_v20 = vrot.slane %v9735_v59, 5  ;;  %v15443_v38 = vld [vmem:[#allocation3 + $0xd0] sm:$0xf]  ;;  %v8907_v25 = vshll.u32 %v8540_v6, 16 }
 0x4e9   : > { %v15422_v30 = vpop.f32.mrf.mxu2  ;;  %11045 = vmatmul.msk.bf16.gmra.mxu0 %vm6126_vm8, %v8975_v29  ;;  %v10016_v29 = vpack.c.b16 %v9989_v57, %v9988_v32  ;;  %v9732_v26 = vor.u32 %v9731_v62, %v9727_v4  ;;  %v15445_v32 = vld [vmem:[#allocation3 + $0xd4] sm:$0x1]  ;;  %v8904_v57 = vshrl.u32 %v8540_v6, 16  ;;  %v8913_v45 = vshll.u32 %v15443_v38, 16 }
 0x4ea   : > { %16045 = vst [vmem:[#allocation24_spill] sm:$0xff] %v15422_v30  ;;  %v9723_v10 = vrot.slane %v9722_v23, 4  ;;  %v8909_v59 = vrot.slane %v8907_v25, 5  ;;  %v9743_v25 = vshll.u32 %v9565_v0, 16 }
 0x4eb   : > { %v9733_v3 = vrot.slane %v9732_v26, 4  ;;  %v8906_v26 = vrot.slane %v8904_v57, 4  ;;  %v9740_v57 = vshrl.u32 %v9565_v0, 16 }
 0x4ec   : > { %v7750_v43 = vpop.f32.mrf.mxu1  ;;  %v9728_v62 = vsel %vm11429_vm15, %v9723_v10, %v9727_v4 }
 0x4ed   : > { %v15431_v39 = vadd.f32 %v7750_v43, %v7145_v21  ;;  %v16051_v21 = vld [vmem:[#allocation21_spill] sm:$0xff]  ;;  %v9738_v23 = vsel %vm11429_vm15, %v9733_v3, %v9737_v20 }
 0x4ee   : > { %11027 = vmatmul.msk.bf16.gmra.mxu3 %vm6126_vm8, %v11193_v33  ;;  %v7146_v43 = vadd.f32 %v16051_v21, %v16050_v12  ;;  %v8915_v12 = vrot.slane %v8913_v45, 5  ;;  %v16055_v21 = vld [vmem:[#allocation4_spill] sm:$0xff]  ;;  %v9991_v4 = vunpack.c.l.b16 %v9738_v23  ;;  %v9566_v3 = vld [vmem:[#allocation2 + $0x58] sm:$0xf] }
 0x4ef   : > { %16048 = vst [vmem:[#allocation7_spill] sm:$0xff] %v15431_v39  ;;  %v8910_v39 = vor.u32 %v8909_v59, %v8906_v26  ;;  %v9749_v45 = vshll.u32 %v9566_v3, 16  ;;  %v9742_v26 = vrot.slane %v9740_v57, 4 }
 0x4f1   : > { %v15434_v50 = vpop.f32.mrf.mxu2  ;;  %v8911_v20 = vrot.slane %v8910_v39, 4  ;;  %v9751_v59 = vrot.slane %v9749_v45, 5 }
 0x4f2   : > { %16049 = vst [vmem:[#allocation40_spill] sm:$0xff] %v15434_v50  ;;  %v15458_v50 = vpop.f32.mrf.mxu0 }
 0x4f4   : > { %v7753_v30 = vpop.f32.mrf.mxu1 }
 0x4f5   : > { %v15438_v33 = vadd.f32 %v7753_v30, %v7146_v43  ;;  %v8917_v30 = vshrl.u32 %v15443_v38, 16  ;;  %v16056_v43 = vld [vmem:[#allocation11_spill] sm:$0xff] }
 0x4f6   : > { %11084 = vmatmul.msk.bf16.gmra.mxu2 %vm1540_vm14, %v10016_v29  ;;  %v8923_v29 = vshll.u32 %v15445_v32, 16 }
 0x4f7   : > { %16052 = vst [vmem:[#allocation36_spill] sm:$0xff] %v15438_v33  ;;  %11067 = vmatmul.msk.bf16.gmra.mxu1 %vm6126_vm8, %v16053_v63  ;;  %v7147_v63 = vadd.f32 %v16056_v43, %v16055_v21  ;;  %v8919_v6 = vrot.slane %v8917_v30, 4  ;;  %v9567_v21 = vld [vmem:[#allocation2 + $0x5c] sm:$0x1]  ;;  %v9753_v43 = vshrl.u32 %v9566_v3, 16 }
 0x4f8   : > { %v8925_v2 = vrot.slane %v8923_v29, 5 }
 0x4f9   : > { %v15449_v22 = vpop.f32.mrf.mxu2  ;;  %v8920_v10 = vor.u32 %v8919_v6, %v8915_v12 }
 0x4fa   : > { %16054 = vst [vmem:[#allocation5_spill] sm:$0xff] %v15449_v22  ;;  %v9990_v22 = vunpack.c.l.b16 %v9728_v62  ;;  %v8916_v62 = vsel %vm11429_vm15, %v8911_v20, %v8915_v12  ;;  %v15473_v57 = vpop.f32.mrf.mxu0 }
 0x4fb   : > { %v8921_v30 = vrot.slane %v8920_v10, 4  ;;  %v16058_v10 = vld [vmem:[#allocation49_spill] sm:$0xff] }
 0x4fc   : > { %v7755_v33 = vpop.f32.mrf.mxu1  ;;  %v10017_v39 = vpack.c.b16 %v9991_v4, %v9990_v22  ;;  %v7148_v3 = vadd.f32 %v16059_v61, %v16058_v10  ;;  %v16060_v4 = vld [vmem:[#allocation20_spill] sm:$0xff]  ;;  %v11195_v61 = vld [vmem:[#allocation3 + $0xcc] sm:$0xff] }
 0x4fd   : > { %v15460_v34 = vadd.f32 %v7755_v33, %v7147_v63  ;;  %v9745_v33 = vrot.slane %v9743_v25, 5  ;;  %v8926_v29 = vsel %vm11429_vm15, %v8921_v30, %v8925_v2  ;;  %v8959_v63 = vunpack.c.l.b16 %v8916_v62 }
 0x4fe   : > { %11028 = vmatmul.msk.bf16.gmra.mxu3 %vm6126_vm8, %v11194_v48  ;;  %v9755_v48 = vrot.slane %v9753_v43, 4  ;;  %v8960_v6 = vunpack.c.l.b16 %v8926_v29  ;;  %v16062_v43 = vld [vmem:[#allocation23_spill] sm:$0xff]  ;;  %v9568_v29 = vld [vmem:[#allocation2 + $0x60] sm:$0xf] }
 0x4ff   : > { %16057 = vst [vmem:[#allocation41_spill] sm:$0xff] %v15460_v34  ;;  %v9746_v0 = vor.u32 %v9745_v33, %v9742_v26  ;;  %v9759_v34 = vshll.u32 %v9567_v21, 16  ;;  %v16061_v21 = vld [vmem:[#allocation51_spill] sm:$0xff] }
 0x500   : > { %v9756_v9 = vor.u32 %v9755_v48, %v9751_v59  ;;  %v8976_v12 = vpack.c.b16 %v8960_v6, %v8959_v63  ;;  %v7149_v62 = vadd.f32 %v16062_v43, %v16061_v21  ;;  %v9569_v63 = vld [vmem:[#allocation2 + $0x64] sm:$0xf]  ;;  %v9764_v48 = vshrl.u32 %v9568_v29, 16 }
 0x501   : > { %v15465_v23 = vpop.f32.mrf.mxu2  ;;  %v9747_v2 = vrot.slane %v9746_v0, 4  ;;  %v9761_v22 = vrot.slane %v9759_v34, 5  ;;  %v9773_v6 = vshll.u32 %v9569_v63, 16  ;;  %v9777_v0 = vshrl.u32 %v9569_v63, 16  ;;  %v16063_v63 = vld [vmem:[#allocation38_spill] sm:$0xff] }
 0x502   : > { %11046 = vmatmul.msk.bf16.gmra.mxu0 %vm6126_vm8, %v8976_v12  ;;  %v9757_v25 = vrot.slane %v9756_v9, 4  ;;  %v9766_v10 = vrot.slane %v9764_v48, 4 }
 0x503   : > { %v9752_v30 = vsel %vm11429_vm15, %v9747_v2, %v9751_v59  ;;  %v9570_v59 = vld [vmem:[#allocation2 + $0x68] sm:$0x1]  ;;  %v9775_v12 = vrot.slane %v9773_v6, 5  ;;  %v9779_v2 = vrot.slane %v9777_v0, 4 }
 0x504   : > { %v7758_v13 = vpop.f32.mrf.mxu1  ;;  %v9992_v9 = vunpack.c.l.b16 %v9752_v30  ;;  %v9783_v30 = vshll.u32 %v9570_v59, 16 }
 0x505   : > { %v15471_v20 = vadd.f32 %v7758_v13, %v7148_v3  ;;  %v9762_v13 = vsel %vm11429_vm15, %v9757_v25, %v9761_v22  ;;  %v9780_v21 = vor.u32 %v9779_v2, %v9775_v12 }
 0x506   : > { %11085 = vmatmul.msk.bf16.gmra.mxu2 %vm1540_vm14, %v10017_v39  ;;  %v9993_v34 = vunpack.c.l.b16 %v9762_v13  ;;  %v9767_v39 = vshll.u32 %v9568_v29, 16  ;;  %v7150_v13 = vadd.f32 %v15012_v41, %v14961_v53  ;;  %v9785_v29 = vrot.slane %v9783_v30, 5  ;;  %v16065_v53 = vld [vmem:[#allocation27_spill] sm:$0xff]  ;;  %v9573_v30 = vld [vmem:[#allocation2 + $0x74] sm:$0x1] }
 0x507   : > { %11068 = vmatmul.msk.bf16.gmra.mxu1 %vm6126_vm8, %v16060_v4  ;;  %v7151_v41 = vadd.f32 %v16065_v53, %v15015_v11  ;;  %v16067_v11 = vld [vmem:[#allocation26_spill] sm:$0xff] }
 0x508   : > { %v9769_v3 = vrot.slane %v9767_v39, 5  ;;  %v10018_v22 = vpack.c.b16 %v9993_v34, %v9992_v9 }
 0x509   : > { %v15479_v45 = vpop.f32.mrf.mxu2 }
 0x50a   : > { %v9770_v4 = vor.u32 %v9769_v3, %v9766_v10  ;;  %v9571_v10 = vld [vmem:[#allocation2 + $0x6c] sm:$0xf]  ;;  %v9572_v3 = vld [vmem:[#allocation2 + $0x70] sm:$0xf] }
 0x50b   : > { %v9788_v2 = vshrl.u32 %v9571_v10, 16 }
 0x50c   : > { %v7760_v26 = vpop.f32.mrf.mxu1 }
 0x50d   : > { %v15487_v33 = vadd.f32 %v7760_v26, %v7149_v62  ;;  %v9771_v62 = vrot.slane %v9770_v4, 4  ;;  %v9781_v26 = vrot.slane %v9780_v21, 4  ;;  %v9797_v4 = vshll.u32 %v9572_v3, 16 }
 0x50e   : > { %11029 = vmatmul.msk.bf16.gmra.mxu3 %vm6126_vm8, %v11195_v61  ;;  %v9801_v21 = vshrl.u32 %v9572_v3, 16 }
 0x50f   : > { %v9776_v9 = vsel %vm11429_vm15, %v9771_v62, %v9775_v12  ;;  %v9786_v34 = vsel %vm11429_vm15, %v9781_v26, %v9785_v29 }
 0x510   : > { %v9994_v0 = vunpack.c.l.b16 %v9776_v9  ;;  %v9995_v59 = vunpack.c.l.b16 %v9786_v34  ;;  %v9803_v62 = vrot.slane %v9801_v21, 4  ;;  %v9807_v34 = vshll.u32 %v9573_v30, 16 }
 0x511   : > { %v15490_v25 = vpop.f32.mrf.mxu2 }
 0x512   : > { %v10019_v29 = vpack.c.b16 %v9995_v59, %v9994_v0  ;;  %v16071_v0 = vld [vmem:[#allocation55_spill] sm:$0xff] }
 0x513   : > { %v7153_v59 = vadd.f32 %v15166_v15, %v16071_v0  ;;  %v9576_v15 = vld [vmem:[#allocation2 + $0x80] sm:$0x1] }
 0x514   : > { %v7763_v43 = vpop.f32.mrf.mxu1 }
 0x515   : > { %v15494_v61 = vadd.f32 %v7763_v43, %v7150_v13  ;;  %v9790_v13 = vrot.slane %v9788_v2, 4  ;;  %v9799_v43 = vrot.slane %v9797_v4, 5 }
 0x516   : > { %11086 = vmatmul.msk.bf16.gmra.mxu2 %vm1540_vm14, %v10018_v22  ;;  %v9791_v22 = vshll.u32 %v9571_v10, 16  ;;  %v16069_v10 = vld [vmem:[#allocation43_spill] sm:$0xff] }
 0x517   : > { %11069 = vmatmul.msk.bf16.gmra.mxu1 %vm6126_vm8, %v16063_v63  ;;  %v16068_v63 = vld [vmem:[#allocation22_spill] sm:$0xff]  ;;  %v9804_v9 = vor.u32 %v9803_v62, %v9799_v43 }
 0x518   : > { %v9793_v12 = vrot.slane %v9791_v22, 5  ;;  %v7152_v53 = vadd.f32 %v16068_v63, %v16067_v11  ;;  %v9809_v22 = vrot.slane %v9807_v34, 5  ;;  %v9575_v34 = vld [vmem:[#allocation2 + $0x7c] sm:$0xf] }
 0x519   : > { %v15499_v48 = vpop.f32.mrf.mxu2  ;;  %v9805_v2 = vrot.slane %v9804_v9, 4  ;;  %v9574_v9 = vld [vmem:[#allocation2 + $0x78] sm:$0xf]  ;;  %v9825_v0 = vshrl.u32 %v9575_v34, 16 }
 0x51a   : > { %16064 = vst [vmem:[#allocation39_spill] sm:$0xff] %v15499_v48 }
 0x51b   : > { %v9810_v30 = vsel %vm11429_vm15, %v9805_v2, %v9809_v22  ;;  %v9831_v22 = vshll.u32 %v9576_v15, 16 }
 0x51c   : > { %v7765_v39 = vpop.f32.mrf.mxu1 }
 0x51d   : > { %v15507_v6 = vadd.f32 %v7765_v39, %v7151_v41  ;;  %v9794_v41 = vor.u32 %v9793_v12, %v9790_v13 }
 0x51f   : > { %v9795_v3 = vrot.slane %v9794_v41, 4 }
 0x521   : > { %v15509_v26 = vpop.f32.mrf.mxu2  ;;  %v9800_v21 = vsel %vm11429_vm15, %v9795_v3, %v9799_v43  ;;  %v9815_v43 = vshll.u32 %v9574_v9, 16  ;;  %v9821_v3 = vshll.u32 %v9575_v34, 16 }
 0x522   : > { %16066 = vst [vmem:[#allocation15_spill] sm:$0xff] %v15509_v26  ;;  %v9996_v62 = vunpack.c.l.b16 %v9800_v21  ;;  %v16075_v26 = vld [vmem:[#allocation58_spill] sm:$0xff] }
 0x523   : > { %v9817_v21 = vrot.slane %v9815_v43, 5 }
 0x524   : > { %v7768_v39 = vpop.f32.mrf.mxu1 }
 0x525   : > { %v15513_v48 = vadd.f32 %v7768_v39, %v7152_v53  ;;  %v16073_v53 = vld [vmem:[#allocation61_spill] sm:$0xff] }
 0x526   : > { %11087 = vmatmul.msk.bf16.gmra.mxu2 %vm1540_vm14, %v10019_v29  ;;  %v9997_v29 = vunpack.c.l.b16 %v9810_v30  ;;  %v7154_v41 = vadd.f32 %v16073_v53, %v15133_v35  ;;  %v9823_v30 = vrot.slane %v9821_v3, 5  ;;  %v9833_v53 = vrot.slane %v9831_v22, 5 }
 0x527   : > { %11070 = vmatmul.msk.bf16.gmra.mxu1 %vm6126_vm8, %v16069_v10  ;;  %v9812_v10 = vshrl.u32 %v9574_v9, 16  ;;  %v9117_v22 = vadd.f32 %v15299_v46, %v15218_v54 }
 0x528   : > { %v10020_v63 = vpack.c.b16 %v9997_v29, %v9996_v62  ;;  %v16074_v62 = vld [vmem:[#allocation47_spill] sm:$0xff] }
 0x529   : > { %v15518_v4 = vpop.f32.mrf.mxu2 }
 0x52a   : > { %16070 = vst [vmem:[#allocation52_spill] sm:$0xff] %v15518_v4 }
 0x52c   : > { %v7770_v13 = vpop.f32.mrf.mxu1 }
 0x52d   : > { %v15526_v12 = vadd.f32 %v7770_v13, %v7153_v59  ;;  %v9814_v59 = vrot.slane %v9812_v10, 4  ;;  %v9827_v13 = vrot.slane %v9825_v0, 4 }
 0x52f   : > { %v9818_v35 = vor.u32 %v9817_v21, %v9814_v59  ;;  %v9828_v29 = vor.u32 %v9827_v13, %v9823_v30  ;;  %v9577_v59 = vld [vmem:[#allocation2 + $0x84] sm:$0xf]  ;;  %v9578_v21 = vld [vmem:[#allocation2 + $0x88] sm:$0xf] }
 0x530   : > { %v9836_v13 = vshrl.u32 %v9577_v59, 16 }
 0x531   : > { %v15528_v11 = vpop.f32.mrf.mxu2  ;;  %v9819_v4 = vrot.slane %v9818_v35, 4  ;;  %v9829_v9 = vrot.slane %v9828_v29, 4 }
 0x532   : > { %16072 = vst [vmem:[#allocation44_spill] sm:$0xff] %v15528_v11 }
 0x533   : > { %v9834_v15 = vsel %vm11429_vm15, %v9829_v9, %v9833_v53  ;;  %v9838_v53 = vrot.slane %v9836_v13, 4  ;;  %v15565_v13 = vpop.f32.mrf.mxu3 }
 0x534   : > { %v7773_v39 = vpop.f32.mrf.mxu1  ;;  %v9999_v43 = vunpack.c.l.b16 %v9834_v15  ;;  %v16076_v15 = vld [vmem:[#allocation8_spill] sm:$0xff] }
 0x535   : > { %v15532_v2 = vadd.f32 %v7773_v39, %v7154_v41  ;;  %v7155_v41 = vadd.f32 %v15268_v31, %v16075_v26  ;;  %v9579_v31 = vld [vmem:[#allocation2 + $0x8c] sm:$0x1] }
 0x536   : > { %11088 = vmatmul.msk.bf16.gmra.mxu2 %vm1540_vm14, %v10020_v63  ;;  %v9824_v63 = vsel %vm11429_vm15, %v9819_v4, %v9823_v30  ;;  %v9845_v4 = vshll.u32 %v9578_v21, 16  ;;  %v9849_v30 = vshrl.u32 %v9578_v21, 16  ;;  %v9855_v29 = vshll.u32 %v9579_v31, 16 }
 0x537   : > { %11071 = vmatmul.msk.bf16.gmra.mxu1 %vm6126_vm8, %v16074_v62  ;;  %v9998_v10 = vunpack.c.l.b16 %v9824_v63  ;;  %v9839_v62 = vshll.u32 %v9577_v59, 16 }
 0x539   : > { %v10088_v11 = vpop.f32.mrf.mxu2  ;;  %v10021_v0 = vpack.c.b16 %v9999_v43, %v9998_v10  ;;  %v9841_v9 = vrot.slane %v9839_v62, 5  ;;  %v9857_v10 = vrot.slane %v9855_v29, 5 }
 0x53b   : > { %v9842_v54 = vor.u32 %v9841_v9, %v9838_v53 }
 0x53c   : > { %v7775_v34 = vpop.f32.mrf.mxu1 }
 0x53d   : > { %v15543_v39 = vadd.f32 %v7775_v34, %v7155_v41  ;;  %v9847_v41 = vrot.slane %v9845_v4, 5  ;;  %v9851_v34 = vrot.slane %v9849_v30, 4 }
 0x53f   : > { %v9852_v46 = vor.u32 %v9851_v34, %v9847_v41  ;;  %v9581_v34 = vld [vmem:[#allocation2 + $0x94] sm:$0xf] }
 0x541   : > { %v10090_v3 = vpop.f32.mrf.mxu2  ;;  %v9853_v59 = vrot.slane %v9852_v46, 4 }
 0x544   : > { %v9435_v26 = vpop.f32.mrf.mxu1 }
 0x545   : > { %v9515_v35 = vadd.f32 %v9435_v26, %v9117_v22  ;;  %v9843_v22 = vrot.slane %v9842_v54, 4  ;;  %v9858_v26 = vsel %vm11429_vm15, %v9853_v59, %v9857_v10  ;;  %v9869_v10 = vshll.u32 %v9581_v34, 16 }
 0x546   : > { %11089 = vmatmul.msk.bf16.gmra.mxu2 %vm1540_vm14, %v10021_v0  ;;  %v10001_v30 = vunpack.c.l.b16 %v9858_v26  ;;  %v16077_v26 = vld [vmem:[#allocation50_spill] sm:$0xff] }
 0x547   : > { %v10089_v63 = vadd.f32 %v10088_v11, %v9515_v35  ;;  %11072 = vmatmul.msk.bf16.gmra.mxu1 %vm6126_vm8, %v16076_v15  ;;  %v9118_v11 = vadd.f32 %v15328_v52, %v15257_v42  ;;  %v9848_v31 = vsel %vm11429_vm15, %v9843_v22, %v9847_v41  ;;  %v9119_v42 = vadd.f32 %v15359_v18, %v15291_v27  ;;  %v9580_v52 = vld [vmem:[#allocation2 + $0x90] sm:$0xf]  ;;  %v15571_v41 = vpop.f32.mrf.mxu0  ;;  %v9582_v15 = vld [vmem:[#allocation2 + $0x98] sm:$0x1]  ;;  %v15574_v27 = vpop.f32.mrf.mxu3 }
 0x548   : > { %v10000_v4 = vunpack.c.l.b16 %v9848_v31  ;;  %v9860_v54 = vshrl.u32 %v9580_v52, 16  ;;  %v9863_v46 = vshll.u32 %v9580_v52, 16 }
 0x549   : > { %v10168_v43 = vpack.c.bf16 %v10089_v63, %v10089_v63  ;;  %v10093_v0 = vpop.f32.mrf.mxu2 }
 0x54a   : > { %v10022_v9 = vpack.c.b16 %v10001_v30, %v10000_v4  ;;  %v9862_v59 = vrot.slane %v9860_v54, 4 }
 0x54b   : > { %10200 = vst.msk [vmem:[%s15555_s19] sm:$0xf] %vm5068_vm7, %v10168_v43  ;;  %v9873_v43 = vshrl.u32 %v9581_v34, 16 }
 0x54c   : > { %v9437_v21 = vpop.f32.mrf.mxu1 }
 0x54d   : > { %v9516_v62 = vadd.f32 %v9437_v21, %v9118_v11  ;;  %v9865_v11 = vrot.slane %v9863_v46, 5  ;;  %v9871_v21 = vrot.slane %v9869_v10, 5  ;;  %v9875_v31 = vrot.slane %v9873_v43, 4 }
 0x54f   : > { %v10091_v35 = vadd.f32 %v10090_v3, %v9516_v62  ;;  %v9879_v3 = vshll.u32 %v9582_v15, 16  ;;  %v9866_v62 = vor.u32 %v9865_v11, %v9862_v59  ;;  %v9876_v4 = vor.u32 %v9875_v31, %v9871_v21  ;;  %v15586_v54 = vpop.f32.mrf.mxu0 }
 0x551   : > { %v10169_v29 = vpack.c.bf16 %v10091_v35, %v10091_v35  ;;  %v10095_v53 = vpop.f32.mrf.mxu2  ;;  %v9881_v30 = vrot.slane %v9879_v3, 5  ;;  %v9877_v52 = vrot.slane %v9876_v4, 4 }
 0x553   : > { %10201 = vst.msk [vmem:[%s15555_s19 + $0x4] sm:$0xf] %vm5068_vm7, %v10169_v29 }
 0x554   : > { %v9440_v63 = vpop.f32.mrf.mxu1 }
 0x555   : > { %v9517_v22 = vadd.f32 %v9440_v63, %v9119_v42  ;;  %v9867_v42 = vrot.slane %v9866_v62, 4  ;;  %v9882_v63 = vsel %vm11429_vm15, %v9877_v52, %v9881_v30 }
 0x556   : > { %11090 = vmatmul.msk.bf16.gmra.mxu2 %vm1540_vm14, %v10022_v9  ;;  %v9120_v9 = vadd.f32 %v15381_v7, %v15311_v36  ;;  %v10003_v10 = vunpack.c.l.b16 %v9882_v63  ;;  %v9121_v36 = vadd.f32 %v15405_v40, %v15335_v49  ;;  %v9583_v7 = vld [vmem:[#allocation2 + $0x9c] sm:$0xf] }
 0x557   : > { %v10094_v18 = vadd.f32 %v10093_v0, %v9517_v22  ;;  %11073 = vmatmul.msk.bf16.gmra.mxu1 %vm6126_vm8, %v16077_v26  ;;  %v9872_v0 = vsel %vm11429_vm15, %v9867_v42, %v9871_v21  ;;  %v15588_v22 = vpop.f32.mrf.mxu3  ;;  %v9584_v21 = vld [vmem:[#allocation2 + $0xa0] sm:$0xf]  ;;  %v9884_v26 = vshrl.u32 %v9583_v7, 16  ;;  %v9887_v62 = vshll.u32 %v9583_v7, 16  ;;  %v16078_v63 = vld [vmem:[#allocation53_spill] sm:$0xff]  ;;  %v15597_v49 = vpop.f32.mrf.mxu0 }
 0x558   : > { %v10002_v46 = vunpack.c.l.b16 %v9872_v0  ;;  %v9893_v4 = vshll.u32 %v9584_v21, 16  ;;  %v9897_v30 = vshrl.u32 %v9584_v21, 16 }
 0x559   : > { %v10170_v35 = vpack.c.bf16 %v10094_v18, %v10094_v18  ;;  %v10098_v29 = vpop.f32.mrf.mxu2  ;;  %v9585_v18 = vld [vmem:[#allocation2 + $0xa4] sm:$0x1]  ;;  %v9886_v42 = vrot.slane %v9884_v26, 4  ;;  %v9889_v52 = vrot.slane %v9887_v62, 5 }
 0x55a   : > { %v10023_v11 = vpack.c.b16 %v10003_v10, %v10002_v46 }
 0x55b   : > { %10202 = vst.msk [vmem:[%s15555_s19 + $0x8] sm:$0xf] %vm5068_vm7, %v10170_v35  ;;  %v9890_v40 = vor.u32 %v9889_v52, %v9886_v42  ;;  %v9587_v52 = vld [vmem:[#allocation2 + $0xac] sm:$0xf] }
 0x55c   : > { %v9442_v34 = vpop.f32.mrf.mxu1 }
 0x55d   : > { %v9518_v15 = vadd.f32 %v9442_v34, %v9120_v9  ;;  %v9895_v9 = vrot.slane %v9893_v4, 5  ;;  %v9899_v34 = vrot.slane %v9897_v30, 4 }
 0x55f   : > { %v10096_v43 = vadd.f32 %v10095_v53, %v9518_v15  ;;  %v9903_v53 = vshll.u32 %v9585_v18, 16  ;;  %v9900_v15 = vor.u32 %v9899_v34, %v9895_v9  ;;  %v9588_v34 = vld [vmem:[#allocation2 + $0xb0] sm:$0x1] }
 0x561   : > { %v10171_v3 = vpack.c.bf16 %v10096_v43, %v10096_v43  ;;  %v10100_v59 = vpop.f32.mrf.mxu2  ;;  %v9905_v46 = vrot.slane %v9903_v53, 5  ;;  %v15609_v53 = vpop.f32.mrf.mxu0 }
 0x563   : > { %10203 = vst.msk [vmem:[%s15555_s19 + $0xc] sm:$0xf] %vm5068_vm7, %v10171_v3  ;;  %v9891_v3 = vrot.slane %v9890_v40, 4  ;;  %v9917_v40 = vshll.u32 %v9587_v52, 16 }
 0x564   : > { %v9445_v31 = vpop.f32.mrf.mxu1 }
 0x565   : > { %v9519_v35 = vadd.f32 %v9445_v31, %v9121_v36  ;;  %v9901_v36 = vrot.slane %v9900_v15, 4  ;;  %v9896_v21 = vsel %vm11429_vm15, %v9891_v3, %v9895_v9  ;;  %v9921_v15 = vshrl.u32 %v9587_v52, 16 }
 0x566   : > { %11091 = vmatmul.msk.bf16.gmra.mxu2 %vm1540_vm14, %v10023_v11  ;;  %v15599_v11 = vpop.f32.mrf.mxu3  ;;  %v10004_v26 = vunpack.c.l.b16 %v9896_v21 }
 0x567   : > { %v10099_v0 = vadd.f32 %v10098_v29, %v9519_v35  ;;  %11074 = vmatmul.msk.bf16.gmra.mxu1 %vm6126_vm8, %v16078_v63  ;;  %v9122_v29 = vadd.f32 %v15420_v55, %v15353_v16  ;;  %v9906_v31 = vsel %vm11429_vm15, %v9901_v36, %v9905_v46  ;;  %v9123_v16 = vadd.f32 %v15458_v50, %v15377_v58  ;;  %v9586_v55 = vld [vmem:[#allocation2 + $0xa8] sm:$0xf]  ;;  %v16079_v50 = vld [vmem:[#allocation9_spill] sm:$0xff] }
 0x568   : > { %v10005_v62 = vunpack.c.l.b16 %v9906_v31  ;;  %v9911_v63 = vshll.u32 %v9586_v55, 16 }
 0x569   : > { %v10172_v10 = vpack.c.bf16 %v10099_v0, %v10099_v0  ;;  %v10103_v43 = vpop.f32.mrf.mxu2  ;;  %v9908_v0 = vshrl.u32 %v9586_v55, 16 }
 0x56a   : > { %v10024_v42 = vpack.c.b16 %v10005_v62, %v10004_v26  ;;  %v9913_v36 = vrot.slane %v9911_v63, 5 }
 0x56b   : > { %10204 = vst.msk [vmem:[%s15555_s19 + $0x10] sm:$0xf] %vm5068_vm7, %v10172_v10  ;;  %v9927_v10 = vshll.u32 %v9588_v34, 16  ;;  %v9910_v3 = vrot.slane %v9908_v0, 4  ;;  %v16081_v34 = vld [vmem:[#allocation17_spill] sm:$0xff] }
 0x56c   : > { %v9447_v7 = vpop.f32.mrf.mxu1 }
 0x56d   : > { %v9520_v18 = vadd.f32 %v9447_v7, %v9122_v29  ;;  %v9919_v29 = vrot.slane %v9917_v40, 5  ;;  %v9923_v7 = vrot.slane %v9921_v15, 4  ;;  %v9914_v21 = vor.u32 %v9913_v36, %v9910_v3 }
 0x56e   : > { %v15615_v46 = vpop.f32.mrf.mxu3 }
 0x56f   : > { %v10101_v4 = vadd.f32 %v10100_v59, %v9520_v18  ;;  %v9924_v31 = vor.u32 %v9923_v7, %v9919_v29  ;;  %v9929_v18 = vrot.slane %v9927_v10, 5  ;;  %v9589_v7 = vld [vmem:[#allocation2 + $0xb4] sm:$0xf] }
 0x571   : > { %v10173_v30 = vpack.c.bf16 %v10101_v4, %v10101_v4  ;;  %v10105_v35 = vpop.f32.mrf.mxu2  ;;  %v9915_v4 = vrot.slane %v9914_v21, 4  ;;  %v9591_v21 = vld [vmem:[#allocation2 + $0xbc] sm:$0x1] }
 0x573   : > { %10205 = vst.msk [vmem:[%s15555_s19 + $0x14] sm:$0xf] %vm5068_vm7, %v10173_v30  ;;  %v9925_v30 = vrot.slane %v9924_v31, 4  ;;  %v9932_v31 = vshrl.u32 %v9589_v7, 16 }
 0x574   : > { %v9450_v9 = vpop.f32.mrf.mxu1 }
 0x575   : > { %v9521_v59 = vadd.f32 %v9450_v9, %v9123_v16  ;;  %v15624_v16 = vpop.f32.mrf.mxu0  ;;  %v9930_v52 = vsel %vm11429_vm15, %v9925_v30, %v9929_v18  ;;  %v16080_v9 = vld [vmem:[#allocation12_spill] sm:$0xff]  ;;  %v9935_v18 = vshll.u32 %v9589_v7, 16  ;;  %v16082_v30 = vld [vmem:[#allocation29_spill] sm:$0xff] }
 0x576   : > { %11092 = vmatmul.msk.bf16.gmra.mxu2 %vm1540_vm14, %v10024_v42  ;;  %v9124_v42 = vadd.f32 %v15473_v57, %v15394_v8  ;;  %v8184_v0 = vadd.f32 %v16081_v34, %v16080_v9  ;;  %v10007_v15 = vunpack.c.l.b16 %v9930_v52  ;;  %v15633_v10 = vpop.f32.mrf.mxu3  ;;  %v9934_v52 = vrot.slane %v9932_v31, 4  ;;  %v16085_v31 = vld [vmem:[#allocation28_spill] sm:$0xff] }
 0x577   : > { %v10104_v58 = vadd.f32 %v10103_v43, %v9521_v59  ;;  %11075 = vmatmul.msk.bf16.gmra.mxu1 %vm6126_vm8, %v16079_v50  ;;  %v9920_v43 = vsel %vm11429_vm15, %v9915_v4, %v9919_v29 }
 0x578   : > { %v10006_v40 = vunpack.c.l.b16 %v9920_v43  ;;  %v8471_v59 = vadd.f32 %v15565_v13, %v8184_v0  ;;  %v16083_v13 = vld [vmem:[#allocation10_spill] sm:$0xff] }
 0x579   : > { %v10174_v26 = vpack.c.bf16 %v10104_v58, %v10104_v58  ;;  %v10108_v62 = vpop.f32.mrf.mxu2  ;;  %v9590_v58 = vld [vmem:[#allocation2 + $0xb8] sm:$0xf] }
 0x57a   : > { %v10025_v36 = vpack.c.b16 %v10007_v15, %v10006_v40  ;;  %v9125_v29 = vadd.f32 %v15571_v41, %v8471_v59  ;;  %v9945_v4 = vshrl.u32 %v9590_v58, 16  ;;  %v9937_v41 = vrot.slane %v9935_v18, 5  ;;  %v16084_v40 = vld [vmem:[#allocation57_spill] sm:$0xff]  ;;  %v16086_v18 = vld [vmem:[#allocation54_spill] sm:$0xff] }
 0x57b   : > { %10206 = vst.msk [vmem:[%s15555_s19 + $0x18] sm:$0xf] %vm5068_vm7, %v10174_v26  ;;  %v9941_v26 = vshll.u32 %v9590_v58, 16 }
 0x57c   : > { %v9452_v55 = vpop.f32.mrf.mxu1  ;;  %v9947_v34 = vrot.slane %v9945_v4, 4  ;;  %v9938_v15 = vor.u32 %v9937_v41, %v9934_v52 }
 0x57d   : > { %v9522_v63 = vadd.f32 %v9452_v55, %v9124_v42  ;;  %v8185_v42 = vadd.f32 %v16083_v13, %v16082_v30  ;;  %v15640_v43 = vpop.f32.mrf.mxu0  ;;  %v9943_v9 = vrot.slane %v9941_v26, 5  ;;  %v8186_v26 = vadd.f32 %v16086_v18, %v16085_v31 }
 0x57e   : > { %v9939_v58 = vrot.slane %v9938_v15, 4  ;;  %v9594_v15 = vld [vmem:[#allocation2 + $0xc8] sm:$0x1] }
 0x57f   : > { %v10106_v8 = vadd.f32 %v10105_v35, %v9522_v63  ;;  %v9951_v35 = vshll.u32 %v9591_v21, 16  ;;  %v8472_v0 = vadd.f32 %v15574_v27, %v8185_v42  ;;  %v9948_v59 = vor.u32 %v9947_v34, %v9943_v9 }
 0x580   : > { %v9944_v27 = vsel %vm11429_vm15, %v9939_v58, %v9943_v9  ;;  %v8473_v42 = vadd.f32 %v15588_v22, %v8186_v26  ;;  %v16087_v22 = vld [vmem:[#allocation59_spill] sm:$0xff] }
 0x581   : > { %v10175_v57 = vpack.c.bf16 %v10106_v8, %v10106_v8  ;;  %v10110_v3 = vpop.f32.mrf.mxu2  ;;  %v9953_v8 = vrot.slane %v9951_v35, 5  ;;  %v10008_v30 = vunpack.c.l.b16 %v9944_v27 }
 0x582   : > { %v9127_v9 = vadd.f32 %v15597_v49, %v8473_v42 }
 0x583   : > { %10207 = vst.msk [vmem:[%s15555_s19 + $0x1c] sm:$0xf] %vm5068_vm7, %v10175_v57  ;;  %v15646_v57 = vpop.f32.mrf.mxu3 }
 0x584   : > { %v9455_v50 = vpop.f32.mrf.mxu1 }
 0x585   : > { %v9523_v55 = vadd.f32 %v9455_v50, %v9125_v29  ;;  %v9126_v50 = vadd.f32 %v15586_v54, %v8472_v0  ;;  %v15658_v35 = vpop.f32.mrf.mxu0  ;;  %v9592_v0 = vld [vmem:[#allocation2 + $0xc0] sm:$0xf] }
 0x586   : > { %11093 = vmatmul.msk.bf16.gmra.mxu2 %vm1540_vm14, %v10025_v36  ;;  %v9949_v36 = vrot.slane %v9948_v59, 4  ;;  %v9956_v59 = vshrl.u32 %v9592_v0, 16 }
 0x587   : > { %v10109_v63 = vadd.f32 %v10108_v62, %v9523_v55  ;;  %11076 = vmatmul.msk.bf16.gmra.mxu1 %vm6126_vm8, %v16084_v40 }
 0x588   : > { %v9954_v62 = vsel %vm11429_vm15, %v9949_v36, %v9953_v8  ;;  %v9959_v8 = vshll.u32 %v9592_v0, 16  ;;  %v9958_v27 = vrot.slane %v9956_v59, 4 }
 0x589   : > { %v10176_v29 = vpack.c.bf16 %v10109_v63, %v10109_v63  ;;  %v10113_v7 = vpop.f32.mrf.mxu2  ;;  %v10009_v13 = vunpack.c.l.b16 %v9954_v62  ;;  %v9593_v63 = vld [vmem:[#allocation2 + $0xc4] sm:$0xf] }
 0x58a   : > { %v9961_v62 = vrot.slane %v9959_v8, 5 }
 0x58b   : > { %10208 = vst.msk [vmem:[%s15555_s19 + $0x20] sm:$0xf] %vm5068_vm7, %v10176_v29  ;;  %v10026_v41 = vpack.c.b16 %v10009_v13, %v10008_v30  ;;  %v15660_v34 = vpop.f32.mrf.mxu3  ;;  %v9965_v29 = vshll.u32 %v9593_v63, 16 }
 0x58c   : > { %v9457_v21 = vpop.f32.mrf.mxu1 }
 0x58d   : > { %v9524_v4 = vadd.f32 %v9457_v21, %v9126_v50  ;;  %v9969_v50 = vshrl.u32 %v9593_v63, 16  ;;  %v9975_v21 = vshll.u32 %v9594_v15, 16  ;;  %v9967_v31 = vrot.slane %v9965_v29, 5 }
 0x58f   : > { %v10111_v55 = vadd.f32 %v10110_v3, %v9524_v4  ;;  %v16088_v3 = vld [vmem:[#allocation56_spill] sm:$0xff]  ;;  %v9971_v26 = vrot.slane %v9969_v50, 4  ;;  %v9962_v4 = vor.u32 %v9961_v62, %v9958_v27  ;;  %v9320_v27 = vrot.slane %v15443_v38, 5 }
 0x590   : > { %v8187_v58 = vadd.f32 %v16088_v3, %v16087_v22  ;;  %v8189_v62 = vadd.f32 %v16090_v28, %v15276_v56 }
 0x591   : > { %v10177_v52 = vpack.c.bf16 %v10111_v55, %v10111_v55  ;;  %v10115_v54 = vpop.f32.mrf.mxu2  ;;  %v9972_v42 = vor.u32 %v9971_v26, %v9967_v31  ;;  %v9977_v55 = vrot.slane %v9975_v21, 5  ;;  %v9322_v26 = vrot.slane %v9320_v27, 4 }
 0x592   : > { %v8474_v49 = vadd.f32 %v15599_v11, %v8187_v58 }
 0x593   : > { %10209 = vst.msk [vmem:[%s15555_s19 + $0x24] sm:$0xf] %vm5068_vm7, %v10177_v52  ;;  %v15671_v52 = vpop.f32.mrf.mxu0  ;;  %v9973_v0 = vrot.slane %v9972_v42, 4 }
 0x594   : > { %v9460_v40 = vpop.f32.mrf.mxu1 }
 0x595   : > { %v9525_v36 = vadd.f32 %v9460_v40, %v9127_v9  ;;  %v9963_v9 = vrot.slane %v9962_v4, 4  ;;  %v8423_v40 = vpop.f32.mrf.mxu3  ;;  %v9978_v59 = vsel %vm11429_vm15, %v9973_v0, %v9977_v55  ;;  %v9323_v4 = vrot.slane %v15445_v32, 5 }
 0x596   : > { %11094 = vmatmul.msk.bf16.gmra.mxu2 %vm1540_vm14, %v10026_v41  ;;  %v9128_v41 = vadd.f32 %v15609_v53, %v8474_v49  ;;  %v10011_v29 = vunpack.c.l.b16 %v9978_v59  ;;  %v9164_v49 = vld [vmem:[#allocation3 + $0xcc] sm:$0xe] }
 0x597   : > { %v10114_v18 = vadd.f32 %v10113_v7, %v9525_v36  ;;  %11077 = vmatmul.msk.bf16.gmra.mxu1 %vm6126_vm8, %v15241_v5  ;;  %v9968_v7 = vsel %vm11429_vm15, %v9963_v9, %v9967_v31  ;;  %v16089_v5 = vld [vmem:[#allocation14_spill] sm:$0xff] }
 0x598   : > { %v8188_v63 = vadd.f32 %v16089_v5, %v15226_v47  ;;  %v10010_v8 = vunpack.c.l.b16 %v9968_v7 }
 0x599   : > { %v10178_v30 = vpack.c.bf16 %v10114_v18, %v10114_v18  ;;  %v10118_v13 = vpop.f32.mrf.mxu2 }
 0x59a   : > { %v8475_v22 = vadd.f32 %v15615_v46, %v8188_v63  ;;  %v10027_v36 = vpack.c.b16 %v10011_v29, %v10010_v8  ;;  %v8476_v46 = vadd.f32 %v15633_v10, %v8189_v62  ;;  %v16091_v62 = vld [vmem:[#allocation16_spill] sm:$0xff] }
 0x59b   : > { %10210 = vst.msk [vmem:[%s15555_s19 + $0x28] sm:$0xf] %vm5068_vm7, %v10178_v30  ;;  %v9077_v21 = vpop.f32.mrf.mxu0 }
 0x59c   : > { %v9462_v11 = vpop.f32.mrf.mxu1  ;;  %v9129_v50 = vadd.f32 %v15624_v16, %v8475_v22  ;;  %v11062_v16 = vrot.slane %v9164_v49, 9  ;;  %v9130_v56 = vadd.f32 %v15640_v43, %v8476_v46 }
 0x59d   : > { %v9526_v15 = vadd.f32 %v9462_v11, %v9128_v41 }
 0x59e   : > { %v9321_v10 = vsel %vm11410_vm12, %v11062_v16, %v9320_v27 }
 0x59f   : > { %v10116_v3 = vadd.f32 %v10115_v54, %v9526_v15  ;;  %v8425_v54 = vpop.f32.mrf.mxu3  ;;  %v9357_v0 = vunpack.c.l.b16 %v9321_v10 }
 0x5a1   : > { %v10179_v58 = vpack.c.bf16 %v10116_v3, %v10116_v3  ;;  %v10120_v53 = vpop.f32.mrf.mxu2 }
 0x5a3   : > { %10211 = vst.msk [vmem:[%s15555_s19 + $0x2c] sm:$0xf] %vm5068_vm7, %v10179_v58  ;;  %v9079_v9 = vpop.f32.mrf.mxu0 }
 0x5a4   : > { %v9465_v47 = vpop.f32.mrf.mxu1 }
 0x5a5   : > { %v9527_v31 = vadd.f32 %v9465_v47, %v9129_v50 }
 0x5a6   : > { %11095 = vmatmul.msk.bf16.gmra.mxu2 %vm1540_vm14, %v10027_v36 }
 0x5a7   : > { %v10119_v18 = vadd.f32 %v10118_v13, %v9527_v31  ;;  %11078 = vmatmul.msk.bf16.gmra.mxu1 %vm6126_vm8, %v15297_v44  ;;  %v9324_v13 = vsel %vm11410_vm12, %v9322_v26, %v9323_v4  ;;  %v8190_v44 = vadd.f32 %v15248_v1, %v15295_v51  ;;  %v8428_v7 = vpop.f32.mrf.mxu3  ;;  %v8191_v1 = vadd.f32 %v15287_v17, %v15319_v24  ;;  %v16092_v4 = vld [vmem:[#allocation35_spill] sm:$0xff] }
 0x5a8   : > { %v9358_v11 = vunpack.c.l.b16 %v9324_v13  ;;  %v8193_v31 = vadd.f32 %v16091_v62, %v15363_v60 }
 0x5a9   : > { %v10180_v30 = vpack.c.bf16 %v10119_v18, %v10119_v18  ;;  %v10123_v38 = vpop.f32.mrf.mxu2  ;;  %v8477_v32 = vadd.f32 %v15646_v57, %v8190_v44  ;;  %v8478_v59 = vadd.f32 %v15660_v34, %v8191_v1  ;;  %v16096_v1 = vld [vmem:[#allocation30_spill] sm:$0xff] }
 0x5aa   : > { %v9374_v19 = vpack.c.b16 %v9358_v11, %v9357_v0  ;;  %v8480_v46 = vadd.f32 %v8425_v54, %v8193_v31 }
 0x5ab   : > { %10212 = vst.msk [vmem:[%s15555_s19 + $0x30] sm:$0xf] %vm5068_vm7, %v10180_v30  ;;  %v9131_v63 = vadd.f32 %v15658_v35, %v8477_v32  ;;  %v9082_v8 = vpop.f32.mrf.mxu0  ;;  %v9132_v35 = vadd.f32 %v15671_v52, %v8478_v59  ;;  %v16093_v30 = vld [vmem:[#allocation18_spill] sm:$0xff]  ;;  %v16095_v32 = vld [vmem:[#allocation31_spill] sm:$0xff] }
 0x5ac   : > { %v9467_v42 = vpop.f32.mrf.mxu1 }
 0x5ad   : > { %v9528_v55 = vadd.f32 %v9467_v42, %v9130_v56 }
 0x5af   : > { %v10121_v41 = vadd.f32 %v10120_v53, %v9528_v55  ;;  %v8430_v3 = vpop.f32.mrf.mxu3  ;;  %v8192_v53 = vadd.f32 %v15308_v37, %v15341_v14  ;;  %v16094_v55 = vld [vmem:[#allocation37_spill] sm:$0xff] }
 0x5b1   : > { %v10181_v43 = vpack.c.bf16 %v10121_v41, %v10121_v41  ;;  %v10125_v5 = vpop.f32.mrf.mxu2  ;;  %v8479_v24 = vadd.f32 %v8423_v40, %v8192_v53  ;;  %v9134_v40 = vadd.f32 %v9079_v9, %v8480_v46  ;;  %v8195_v41 = vadd.f32 %v16095_v32, %v16094_v55  ;;  %v16100_v46 = vld [vmem:[#allocation36_spill] sm:$0xff] }
 0x5b3   : > { %10213 = vst.msk [vmem:[%s15555_s19 + $0x34] sm:$0xf] %vm5068_vm7, %v10181_v43  ;;  %v9084_v47 = vpop.f32.mrf.mxu0  ;;  %v9133_v27 = vadd.f32 %v9077_v21, %v8479_v24  ;;  %v8482_v11 = vadd.f32 %v8430_v3, %v8195_v41  ;;  %v16098_v24 = vld [vmem:[#allocation7_spill] sm:$0xff] }
 0x5b4   : > { %v9470_v15 = vpop.f32.mrf.mxu1 }
 0x5b5   : > { %v9529_v51 = vadd.f32 %v9470_v15, %v9131_v63 }
 0x5b7   : > { %v10124_v57 = vadd.f32 %v10123_v38, %v9529_v51  ;;  %11079 = vmatmul.msk.bf16.gmra.mxu1 %vm6126_vm8, %v9374_v19  ;;  %v8433_v49 = vpop.f32.mrf.mxu3  ;;  %v8194_v38 = vadd.f32 %v16093_v30, %v16092_v4  ;;  %v9136_v19 = vadd.f32 %v9084_v47, %v8482_v11  ;;  %v16097_v51 = vld [vmem:[#allocation33_spill] sm:$0xff] }
 0x5b8   : > { %v8196_v59 = vadd.f32 %v16097_v51, %v16096_v1  ;;  %v16104_v11 = vld [vmem:[#allocation5_spill] sm:$0xff] }
 0x5b9   : > { %v10182_v29 = vpack.c.bf16 %v10124_v57, %v10124_v57  ;;  %v10128_v22 = vpop.f32.mrf.mxu2  ;;  %v8481_v56 = vadd.f32 %v8428_v7, %v8194_v38 }
 0x5bb   : > { %10214 = vst.msk [vmem:[%s15555_s19 + $0x38] sm:$0xf] %vm5068_vm7, %v10182_v29  ;;  %v9087_v16 = vpop.f32.mrf.mxu0  ;;  %v9135_v54 = vadd.f32 %v9082_v8, %v8481_v56  ;;  %v8483_v8 = vadd.f32 %v8433_v49, %v8196_v59 }
 0x5bc   : > { %v9472_v58 = vpop.f32.mrf.mxu1 }
 0x5bd   : > { %v9530_v17 = vadd.f32 %v9472_v58, %v9132_v35  ;;  %v9137_v53 = vadd.f32 %v9087_v16, %v8483_v8  ;;  %v8201_v8 = vadd.f32 %v15465_v23, %v15487_v33 }
 0x5bf   : > { %v10126_v34 = vadd.f32 %v10125_v5, %v9530_v17  ;;  %v8435_v42 = vpop.f32.mrf.mxu3 }
 0x5c1   : > { %v10183_v36 = vpack.c.bf16 %v10126_v34, %v10126_v34  ;;  %v10130_v50 = vpop.f32.mrf.mxu2  ;;  %v16099_v34 = vld [vmem:[#allocation19_spill] sm:$0xff] }
 0x5c3   : > { %10215 = vst.msk [vmem:[%s15555_s19 + $0x3c] sm:$0xf] %vm5068_vm7, %v10183_v36  ;;  %v9089_v0 = vpop.f32.mrf.mxu0  ;;  %v8197_v36 = vadd.f32 %v16099_v34, %v16098_v24  ;;  %v8202_v34 = vadd.f32 %v15479_v45, %v15494_v61 }
 0x5c4   : > { %v9475_v28 = vpop.f32.mrf.mxu1 }
 0x5c5   : > { %v9531_v52 = vadd.f32 %v9475_v28, %v9133_v27  ;;  %v8484_v47 = vadd.f32 %v8435_v42, %v8197_v36  ;;  %v16102_v42 = vld [vmem:[#allocation41_spill] sm:$0xff] }
 0x5c7   : > { %v10129_v18 = vadd.f32 %v10128_v22, %v9531_v52  ;;  %v8438_v5 = vpop.f32.mrf.mxu3  ;;  %v9138_v49 = vadd.f32 %v9089_v0, %v8484_v47 }
 0x5c9   : > { %v10184_v37 = vpack.c.bf16 %v10129_v18, %v10129_v18  ;;  %v10133_v14 = vpop.f32.mrf.mxu2  ;;  %v16101_v18 = vld [vmem:[#allocation24_spill] sm:$0xff] }
 0x5cb   : > { %10216 = vst.msk [vmem:[%s15555_s19 + $0x40] sm:$0xf] %vm5068_vm7, %v10184_v37  ;;  %v9092_v22 = vpop.f32.mrf.mxu0  ;;  %v8198_v37 = vadd.f32 %v16101_v18, %v16100_v46 }
 0x5cc   : > { %v9477_v26 = vpop.f32.mrf.mxu1 }
 0x5cd   : > { %v9532_v21 = vadd.f32 %v9477_v26, %v9134_v40  ;;  %v8485_v16 = vadd.f32 %v8438_v5, %v8198_v37 }
 0x5cf   : > { %v10131_v60 = vadd.f32 %v10130_v50, %v9532_v21  ;;  %v8440_v3 = vpop.f32.mrf.mxu3  ;;  %v9139_v38 = vadd.f32 %v9092_v22, %v8485_v16 }
 0x5d1   : > { %v10185_v10 = vpack.c.bf16 %v10131_v60, %v10131_v60  ;;  %v10135_v13 = vpop.f32.mrf.mxu2  ;;  %v16103_v60 = vld [vmem:[#allocation40_spill] sm:$0xff] }
 0x5d3   : > { %10217 = vst.msk [vmem:[%s15555_s19 + $0x44] sm:$0xf] %vm5068_vm7, %v10185_v10  ;;  %v9094_v31 = vpop.f32.mrf.mxu0  ;;  %v8199_v10 = vadd.f32 %v16103_v60, %v16102_v42  ;;  %v16106_v42 = vld [vmem:[#allocation15_spill] sm:$0xff] }
 0x5d4   : > { %v9480_v44 = vpop.f32.mrf.mxu1  ;;  %v8205_v60 = vadd.f32 %v16106_v42, %v15526_v12 }
 0x5d5   : > { %v9533_v9 = vadd.f32 %v9480_v44, %v9135_v54  ;;  %v8486_v54 = vadd.f32 %v8440_v3, %v8199_v10 }
 0x5d7   : > { %v10134_v43 = vadd.f32 %v10133_v14, %v9533_v9  ;;  %v8443_v14 = vpop.f32.mrf.mxu3  ;;  %v9140_v9 = vadd.f32 %v9094_v31, %v8486_v54 }
 0x5d9   : > { %v10186_v63 = vpack.c.bf16 %v10134_v43, %v10134_v43  ;;  %v10138_v7 = vpop.f32.mrf.mxu2  ;;  %v8200_v43 = vadd.f32 %v16104_v11, %v15471_v20 }
 0x5db   : > { %10218 = vst.msk [vmem:[%s15555_s19 + $0x48] sm:$0xf] %vm5068_vm7, %v10186_v63  ;;  %v9097_v21 = vpop.f32.mrf.mxu0 }
 0x5dc   : > { %v9482_v15 = vpop.f32.mrf.mxu1 }
 0x5dd   : > { %v9534_v57 = vadd.f32 %v9482_v15, %v9136_v19 }
 0x5df   : > { %v10136_v29 = vadd.f32 %v10135_v13, %v9534_v57  ;;  %v8445_v44 = vpop.f32.mrf.mxu3 }
 0x5e0   : > { %v8488_v22 = vadd.f32 %v8445_v44, %v8201_v8 }
 0x5e1   : > { %v10187_v35 = vpack.c.bf16 %v10136_v29, %v10136_v29  ;;  %v10140_v58 = vpop.f32.mrf.mxu2 }
 0x5e3   : > { %10219 = vst.msk [vmem:[%s15555_s19 + $0x4c] sm:$0xf] %vm5068_vm7, %v10187_v35  ;;  %v9099_v63 = vpop.f32.mrf.mxu0 }
 0x5e4   : > { %v9485_v17 = vpop.f32.mrf.mxu1 }
 0x5e5   : > { %v9535_v50 = vadd.f32 %v9485_v17, %v9137_v53  ;;  %v9142_v53 = vadd.f32 %v9099_v63, %v8488_v22 }
 0x5e7   : > { %v10139_v27 = vadd.f32 %v10138_v7, %v9535_v50  ;;  %v8487_v7 = vadd.f32 %v8443_v14, %v8200_v43  ;;  %v8448_v15 = vpop.f32.mrf.mxu3 }
 0x5e8   : > { %v8489_v50 = vadd.f32 %v8448_v15, %v8202_v34 }
 0x5e9   : > { %v10188_v28 = vpack.c.bf16 %v10139_v27, %v10139_v27  ;;  %v10143_v62 = vpop.f32.mrf.mxu2  ;;  %v9141_v59 = vadd.f32 %v9097_v21, %v8487_v7 }
 0x5eb   : > { %10220 = vst.msk [vmem:[%s15555_s19 + $0x50] sm:$0xf] %vm5068_vm7, %v10188_v28  ;;  %v9102_v20 = vpop.f32.mrf.mxu0 }
 0x5ec   : > { %v9487_v52 = vpop.f32.mrf.mxu1  ;;  %v9143_v27 = vadd.f32 %v9102_v20, %v8489_v50 }
 0x5ed   : > { %v9536_v40 = vadd.f32 %v9487_v52, %v9138_v49 }
 0x5ef   : > { %v10141_v26 = vadd.f32 %v10140_v58, %v9536_v40  ;;  %v8450_v3 = vpop.f32.mrf.mxu3  ;;  %v16105_v40 = vld [vmem:[#allocation39_spill] sm:$0xff] }
 0x5f0   : > { %v8204_v16 = vadd.f32 %v16105_v40, %v15513_v48 }
 0x5f1   : > { %v10189_v4 = vpack.c.bf16 %v10141_v26, %v10141_v26  ;;  %v10145_v30 = vpop.f32.mrf.mxu2 }
 0x5f3   : > { %10221 = vst.msk [vmem:[%s15555_s19 + $0x54] sm:$0xf] %vm5068_vm7, %v10189_v4  ;;  %v9104_v33 = vpop.f32.mrf.mxu0 }
 0x5f4   : > { %v9490_v56 = vpop.f32.mrf.mxu1 }
 0x5f5   : > { %v9537_v13 = vadd.f32 %v9490_v56, %v9139_v38 }
 0x5f7   : > { %v10144_v55 = vadd.f32 %v10143_v62, %v9537_v13  ;;  %v8203_v62 = vadd.f32 %v15490_v25, %v15507_v6  ;;  %v8453_v31 = vpop.f32.mrf.mxu3 }
 0x5f8   : > { %v8491_v4 = vadd.f32 %v8453_v31, %v8204_v16 }
 0x5f9   : > { %v10190_v32 = vpack.c.bf16 %v10144_v55, %v10144_v55  ;;  %v10148_v41 = vpop.f32.mrf.mxu2  ;;  %v8490_v46 = vadd.f32 %v8450_v3, %v8203_v62 }
 0x5fb   : > { %10222 = vst.msk [vmem:[%s15555_s19 + $0x58] sm:$0xf] %vm5068_vm7, %v10190_v32  ;;  %v9144_v61 = vadd.f32 %v9104_v33, %v8490_v46  ;;  %v9107_v37 = vpop.f32.mrf.mxu0 }
 0x5fc   : > { %v9492_v0 = vpop.f32.mrf.mxu1  ;;  %v9145_v21 = vadd.f32 %v9107_v37, %v8491_v4 }
 0x5fd   : > { %v9538_v5 = vadd.f32 %v9492_v0, %v9140_v9  ;;  %v16107_v0 = vld [vmem:[#allocation52_spill] sm:$0xff] }
 0x5fe   : > { %v8206_v11 = vadd.f32 %v16107_v0, %v15532_v2 }
 0x5ff   : > { %v10146_v19 = vadd.f32 %v10145_v30, %v9538_v5  ;;  %v8455_v30 = vpop.f32.mrf.mxu3 }
 0x600   : > { %v8492_v54 = vadd.f32 %v8455_v30, %v8205_v60 }
 0x601   : > { %v10191_v1 = vpack.c.bf16 %v10146_v19, %v10146_v19  ;;  %v10150_v51 = vpop.f32.mrf.mxu2 }
 0x603   : > { %10223 = vst.msk [vmem:[%s15555_s19 + $0x5c] sm:$0xf] %vm5068_vm7, %v10191_v1  ;;  %v9109_v13 = vpop.f32.mrf.mxu0 }
 0x604   : > { %v9495_v57 = vpop.f32.mrf.mxu1 }
 0x605   : > { %v9539_v29 = vadd.f32 %v9495_v57, %v9141_v59  ;;  %v16108_v59 = vld [vmem:[#allocation44_spill] sm:$0xff] }
 0x606   : > { %v8207_v57 = vadd.f32 %v16108_v59, %v15543_v39 }
 0x607   : > { %v10149_v35 = vadd.f32 %v10148_v41, %v9539_v29  ;;  %v8458_v48 = vpop.f32.mrf.mxu3  ;;  %v9146_v41 = vadd.f32 %v9109_v13, %v8492_v54 }
 0x608   : > { %v8493_v63 = vadd.f32 %v8458_v48, %v8206_v11 }
 0x609   : > { %v10192_v58 = vpack.c.bf16 %v10149_v35, %v10149_v35  ;;  %v10153_v24 = vpop.f32.mrf.mxu2 }
 0x60b   : > { %10224 = vst.msk [vmem:[%s15555_s19 + $0x60] sm:$0xf] %vm5068_vm7, %v10192_v58  ;;  %v9112_v5 = vpop.f32.mrf.mxu0 }
 0x60c   : > { %v9497_v17 = vpop.f32.mrf.mxu1  ;;  %v9147_v19 = vadd.f32 %v9112_v5, %v8493_v63 }
 0x60d   : > { %v9540_v36 = vadd.f32 %v9497_v17, %v9142_v53 }
 0x60f   : > { %v10151_v47 = vadd.f32 %v10150_v51, %v9540_v36  ;;  %v8460_v15 = vpop.f32.mrf.mxu3 }
 0x610   : > { %v8494_v29 = vadd.f32 %v8460_v15, %v8207_v57 }
 0x611   : > { %v10193_v23 = vpack.c.bf16 %v10151_v47, %v10151_v47  ;;  %v10155_v52 = vpop.f32.mrf.mxu2 }
 0x613   : > { %10225 = vst.msk [vmem:[%s15555_s19 + $0x64] sm:$0xf] %vm5068_vm7, %v10193_v23  ;;  %v9114_v2 = vpop.f32.mrf.mxu0 }
 0x614   : > { %v9500_v28 = vpop.f32.mrf.mxu1  ;;  %v9148_v20 = vadd.f32 %v9114_v2, %v8494_v29 }
 0x615   : > { %v9541_v49 = vadd.f32 %v9500_v28, %v9143_v27 }
 0x617   : > { %v10154_v18 = vadd.f32 %v10153_v24, %v9541_v49 }
 0x619   : > { %v10194_v45 = vpack.c.bf16 %v10154_v18, %v10154_v18  ;;  %v10158_v6 = vpop.f32.mrf.mxu2 }
 0x61b   : > { %10226 = vst.msk [vmem:[%s15555_s19 + $0x68] sm:$0xf] %vm5068_vm7, %v10194_v45 }
 0x61c   : > { %v9502_v14 = vpop.f32.mrf.mxu1 }
 0x61d   : > { %v9542_v26 = vadd.f32 %v9502_v14, %v9144_v61 }
 0x61f   : > { %v10156_v25 = vadd.f32 %v10155_v52, %v9542_v26 }
 0x621   : > { %v10195_v38 = vpack.c.bf16 %v10156_v25, %v10156_v25  ;;  %v10160_v32 = vpop.f32.mrf.mxu2 }
 0x623   : > { %10227 = vst.msk [vmem:[%s15555_s19 + $0x6c] sm:$0xf] %vm5068_vm7, %v10195_v38 }
 0x624   : > { %v9505_v56 = vpop.f32.mrf.mxu1 }
 0x625   : > { %v9543_v10 = vadd.f32 %v9505_v56, %v9145_v21 }
 0x627   : > { %v10159_v44 = vadd.f32 %v10158_v6, %v9543_v10 }
 0x629   : > { %v10196_v55 = vpack.c.bf16 %v10159_v44, %v10159_v44  ;;  %v10163_v1 = vpop.f32.mrf.mxu2 }
 0x62b   : > { %10228 = vst.msk [vmem:[%s15555_s19 + $0x70] sm:$0xf] %vm5068_vm7, %v10196_v55 }
 0x62c   : > { %v9507_v9 = vpop.f32.mrf.mxu1 }
 0x62d   : > { %v9544_v43 = vadd.f32 %v9507_v9, %v9146_v41 }
 0x62f   : > { %v10161_v12 = vadd.f32 %v10160_v32, %v9544_v43 }
 0x631   : > { %v10197_v7 = vpack.c.bf16 %v10161_v12, %v10161_v12  ;;  %v10165_v53 = vpop.f32.mrf.mxu2 }
 0x633   : > { %10229 = vst.msk [vmem:[%s15555_s19 + $0x74] sm:$0xf] %vm5068_vm7, %v10197_v7 }
 0x634   : > { %v9510_v51 = vpop.f32.mrf.mxu1 }
 0x635   : > { %v9545_v8 = vadd.f32 %v9510_v51, %v9147_v19 }
 0x637   : > { %v10164_v22 = vadd.f32 %v10163_v1, %v9545_v8 }
 0x639   : > { %v10198_v35 = vpack.c.bf16 %v10164_v22, %v10164_v22 }
 0x63b   : > { %10230 = vst.msk [vmem:[%s15555_s19 + $0x78] sm:$0xf] %vm5068_vm7, %v10198_v35 }
 0x63c   : > { %v9512_v58 = vpop.f32.mrf.mxu1 }
 0x63d   : > { %v9546_v3 = vadd.f32 %v9512_v58, %v9148_v20 }
 0x63f   : > { %v10166_v17 = vadd.f32 %v10165_v53, %v9546_v3 }
 0x641   : > { %v10199_v24 = vpack.c.bf16 %v10166_v17, %v10166_v17 }
 0x643   : > { %10231 = vst.msk [vmem:[%s15555_s19 + $0x7c] sm:$0xf] %vm5068_vm7, %v10199_v24 }
 0x644 PF: > { %s18_s27 = sadd.s32 1, %s11314_s27  }
 0x645   : > { %p15_p4 = scmp.ge.s32.totalorder %s18_s27, 4  }
 0x647   :  { %17 = sbr.rel (!%p15_p4) target bundleno = 1 (0x1), region = 104 }

</bundles_post_ra>
